<compile_context>
chip_gen: v5e
topology: v5e:2x2
jax: 0.10.0
libtpu: 0.0.40
codegen_flags: <defaults>
</compile_context>

<pallas_src>
import functools

import jax
import jax.numpy as jnp
from jax import lax
from jax.experimental import pallas as pl
from jax.experimental.pallas import tpu as pltpu


def _round_up(a, m):
    return (a + m - 1) // m * m


# --------------------------------------------------------------------------
# Kernel 1: 3x3 Conv + folded BN + ReLU on a zero-padded flattened image.
#   xp_ref  : (NP_pad, Cin)  bf16   flattened (H+2, W+2, Cin), zero halo/tail
#   w_ref   : (9, Cin, Cout) bf16   tap t = ky*3 + kx
#   b_ref   : (1, Cout)      f32
#   mask_ref: (NP_pad, 1)    f32    1.0 on interior pixels, 0.0 on halo/tail
#   out_ref : (NP_pad, Cout) bf16   same padded layout (ready for next conv)
# --------------------------------------------------------------------------
def _conv3x3_kernel(xp_ref, w_ref, b_ref, mask_ref, out_ref, *, shifts):
    x = xp_ref[...]                                           # (NP_pad, Cin) bf16
    acc = None
    for t, d in enumerate(shifts):
        m = jnp.dot(x, w_ref[t], preferred_element_type=jnp.float32)
        if d != 0:
            # out[i] needs M[i + d]; wrap-around only lands on masked halo rows.
            m = jnp.roll(m, -d, axis=0)
        acc = m if acc is None else acc + m
    y = jnp.maximum(acc + b_ref[...], 0.0) * mask_ref[...]    # ReLU, re-zero halo
    out_ref[...] = y.astype(out_ref.dtype)


def _conv3x3_call(xf, w9, b, mask, shifts):
    bs, np_pad, cin = xf.shape
    cout = w9.shape[2]
    kern = functools.partial(_conv3x3_kernel, shifts=shifts)
    return pl.pallas_call(
        kern,
        out_shape=jax.ShapeDtypeStruct((bs, np_pad, cout), jnp.bfloat16),
        grid=(bs,),
        in_specs=[
            pl.BlockSpec((None, np_pad, cin), lambda b_: (b_, 0, 0)),
            pl.BlockSpec((9, cin, cout), lambda b_: (0, 0, 0)),
            pl.BlockSpec((1, cout), lambda b_: (0, 0)),
            pl.BlockSpec((np_pad, 1), lambda b_: (0, 0)),
        ],
        out_specs=pl.BlockSpec((None, np_pad, cout), lambda b_: (b_, 0, 0)),
        compiler_params=pltpu.CompilerParams(dimension_semantics=("parallel",)),
    )(xf, w9, b, mask)


# --------------------------------------------------------------------------
# Kernel 2: fused sc(1x1)+BN+ReLU -> ec(1x1)+BN+ReLU -> optional shortcut add.
# Reads x and the n branch tensors directly; the channel concat never exists.
# Grid is (batch, spatial_tiles), both parallel.
# --------------------------------------------------------------------------
def _head_kernel(*refs, n, add):
    x_ref = refs[0]
    y_refs = refs[1:1 + n]
    wscx_ref, wscy_ref, bsc_ref, wec_ref, bec_ref, out_ref = refs[1 + n:]

    x = x_ref[...]                                            # (TQ, c1) bf16
    s = jnp.dot(x, wscx_ref[...], preferred_element_type=jnp.float32)
    for i in range(n):
        s = s + jnp.dot(y_refs[i][...], wscy_ref[i],
                        preferred_element_type=jnp.float32)
    s = jnp.maximum(s + bsc_ref[...], 0.0)                    # sc ReLU

    e = jnp.dot(s.astype(wec_ref.dtype), wec_ref[...],
                preferred_element_type=jnp.float32)
    e = jnp.maximum(e + bec_ref[...], 0.0)                    # ec ReLU
    if add:                                                   # shortcut (c1==c2)
        e = e + x.astype(jnp.float32)
    out_ref[...] = e.astype(out_ref.dtype)


def _head_call(xf, ys, wscx, wscy, bsc, wec, bec, add, tq):
    bs, np_pad, c1 = xf.shape
    n = len(ys)
    cm = ys[0].shape[-1]
    c_half = wscx.shape[-1]
    c2 = wec.shape[-1]
    kern = functools.partial(_head_kernel, n=n, add=add)

    def act_spec(c):
        return pl.BlockSpec((None, tq, c), lambda b_, q: (b_, q, 0))

    def const_spec(shape):
        return pl.BlockSpec(shape, lambda b_, q, _s=len(shape): (0,) * _s)

    in_specs = ([act_spec(c1)] + [act_spec(cm) for _ in range(n)] +
                [const_spec((c1, c_half)), const_spec((n, cm, c_half)),
                 const_spec((1, c_half)), const_spec((c_half, c2)),
                 const_spec((1, c2))])

    return pl.pallas_call(
        kern,
        out_shape=jax.ShapeDtypeStruct((bs, np_pad, c2), jnp.float32),
        grid=(bs, np_pad // tq),
        in_specs=in_specs,
        out_specs=pl.BlockSpec((None, tq, c2), lambda b_, q: (b_, q, 0)),
        compiler_params=pltpu.CompilerParams(
            dimension_semantics=("parallel", "parallel")),
    )(xf, *ys, wscx, wscy, bsc, wec, bec)


# --------------------------------------------------------------------------
# Host wrapper: layout prep (pad + flatten NHWC), chained convs, fused head.
# conv_ws[i]: (cout_i, cin_i, 3, 3) BN-folded f32; conv_bs[i]: (cout_i,)
# wsc: (c2//2, c1 + n*cm) BN-folded; wec: (c2, c2//2) BN-folded.
# --------------------------------------------------------------------------
def hg_block(x, conv_ws, conv_bs, wsc, bsc, wec, bec, *, shortcut,
             tq_target=512):
    bs, c1, H, W = x.shape
    n = len(conv_ws)
    cm = conv_ws[0].shape[0]
    c_half = wsc.shape[0]
    c2 = wec.shape[0]
    add = bool(shortcut) and (c1 == c2)

    NP = (H + 2) * (W + 2)
    tq = tq_target if NP > tq_target else _round_up(NP, 64)
    np_pad = _round_up(NP, tq)
    shifts = tuple((ky - 1) * (W + 2) + (kx - 1)
                   for ky in range(3) for kx in range(3))

    # interior-pixel mask on the padded flattened grid
    hh = jnp.arange(H + 2)[:, None]
    ww = jnp.arange(W + 2)[None, :]
    m2d = ((hh >= 1) & (hh <= H) & (ww >= 1) & (ww <= W)).astype(jnp.float32)
    mask = jnp.pad(m2d.reshape(NP, 1), ((0, np_pad - NP), (0, 0)))

    # x: NCHW -> zero-padded NHWC -> flattened (bs, NP_pad, c1), bf16
    xt = jnp.transpose(x, (0, 2, 3, 1))
    xp = jnp.pad(xt, ((0, 0), (1, 1), (1, 1), (0, 0))).reshape(bs, NP, c1)
    xf = jnp.pad(xp, ((0, 0), (0, np_pad - NP), (0, 0))).astype(jnp.bfloat16)

    # chained 3x3 Conv+BN+ReLU blocks (self.m)
    ys = []
    h = xf
    for w4, b in zip(conv_ws, conv_bs):
        cin, cout = w4.shape[1], w4.shape[0]
        w9 = jnp.transpose(w4, (2, 3, 1, 0)).reshape(9, cin, cout)
        h = _conv3x3_call(h, w9.astype(jnp.bfloat16),
                          b.reshape(1, -1).astype(jnp.float32), mask, shifts)
        ys.append(h)

    # fused sc + ec (+ shortcut); split sc weight per source branch
    wscx = wsc[:, :c1].T.astype(jnp.bfloat16)                       # (c1, c_half)
    wscy = jnp.stack([wsc[:, c1 + i * cm: c1 + (i + 1) * cm].T
                      for i in range(n)]).astype(jnp.bfloat16)      # (n, cm, c_half)
    out_f = _head_call(xf, ys, wscx, wscy,
                       bsc.reshape(1, -1).astype(jnp.float32),
                       wec.T.astype(jnp.bfloat16),
                       bec.reshape(1, -1).astype(jnp.float32), add, tq)

    # strip halo / tail, back to NCHW
    out = out_f[:, :NP, :].reshape(bs, H + 2, W + 2, c2)[:, 1:H + 1, 1:W + 1, :]
    return jnp.transpose(out, (0, 3, 1, 2))

# TODO(synk): lightconv=True (1x1 Conv + depthwise k x k) and k != 3 paths are
# not implemented; this covers the default HGBlock(Conv, k=3) configuration.
# TODO(synk): for very large H*W the 3x3 kernel keeps a whole image per grid
# step; a row-tiled variant would need +/-1-row halos in the DMA.


# --------------------------------------------------------------------------
# BN folding + pure-JAX f32 reference (matches the PyTorch forward)
# --------------------------------------------------------------------------
def fold_bn4(w, gamma, beta, mean, var, eps=1e-5):
    s = gamma / jnp.sqrt(var + eps)
    return w * s[:, None, None, None], beta - mean * s


def fold_bn2(w, gamma, beta, mean, var, eps=1e-5):
    s = gamma / jnp.sqrt(var + eps)
    return w * s[:, None], beta - mean * s


def _reference(x, conv_ws, conv_bs, wsc, bsc, wec, bec, add):
    y = [x]
    h = x
    for w, b in zip(conv_ws, conv_bs):
        h = lax.conv_general_dilated(h, w, (1, 1), 'SAME',
                                     dimension_numbers=('NCHW', 'OIHW', 'NCHW'))
        h = jax.nn.relu(h + b[None, :, None, None])
        y.append(h)
    cat = jnp.concatenate(y, axis=1)
    s = jax.nn.relu(jnp.einsum('bchw,oc->bohw', cat, wsc)
                    + bsc[None, :, None, None])
    e = jax.nn.relu(jnp.einsum('bchw,oc->bohw', s, wec)
                    + bec[None, :, None, None])
    return e + x if add else e


if __name__ == "__main__":
    # small shapes consistent with the module; shortcut path exercised (c1==c2)
    bs, c1, cm, c2, n = 2, 16, 8, 16, 6
    H = W = 16
    shortcut = True
    c_half = c2 // 2
    ctot = c1 + n * cm

    key = jax.random.PRNGKey(0)
    keys = iter(jax.random.split(key, 64))
    x = jax.random.normal(next(keys), (bs, c1, H, W), jnp.float32)

    def rand_bn(c):
        g = 0.9 + 0.2 * jax.random.uniform(next(keys), (c,), jnp.float32)
        b = 0.1 * jax.random.normal(next(keys), (c,), jnp.float32)
        m = 0.1 * jax.random.normal(next(keys), (c,), jnp.float32)
        v = 0.9 + 0.2 * jax.random.uniform(next(keys), (c,), jnp.float32)
        return g, b, m, v

    # conv chain weights (BN folded, then bf16-quantized once so the kernel and
    # the reference use numerically identical weights)
    conv_ws, conv_bs = [], []
    for i in range(n):
        cin = c1 if i == 0 else cm
        w = jax.random.normal(next(keys), (cm, cin, 3, 3),
                              jnp.float32) / (3.0 * (cin ** 0.5))
        g, bb, mu, var = rand_bn(cm)
        wf, bf = fold_bn4(w, g, bb, mu, var)
        conv_ws.append(wf.astype(jnp.bfloat16).astype(jnp.float32))
        conv_bs.append(bf)

    wsc0 = jax.random.normal(next(keys), (c_half, ctot), jnp.float32) / (ctot ** 0.5)
    g, bb, mu, var = rand_bn(c_half)
    wsc, bsc = fold_bn2(wsc0, g, bb, mu, var)
    wsc = wsc.astype(jnp.bfloat16).astype(jnp.float32)

    wec0 = jax.random.normal(next(keys), (c2, c_half), jnp.float32) / (c_half ** 0.5)
    g, bb, mu, var = rand_bn(c2)
    wec, bec = fold_bn2(wec0, g, bb, mu, var)
    wec = wec.astype(jnp.bfloat16).astype(jnp.float32)

    fwd = jax.jit(functools.partial(hg_block, shortcut=shortcut))
    out = fwd(x, conv_ws, conv_bs, wsc, bsc, wec, bec)
    out = jax.block_until_ready(out)

    ref = _reference(x, conv_ws, conv_bs, wsc, bsc, wec, bec,
                     add=shortcut and c1 == c2)
    assert out.shape == (bs, c2, H, W)
    err = float(jnp.max(jnp.abs(out - ref)))
    tol = 3e-2 * max(1.0, float(jnp.max(jnp.abs(ref))))   # bf16 activation noise
    assert err < tol, (err, tol)

    print("KERNEL_OK")
</pallas_src>

<mosaic_0001>
module attributes {stable_mosaic.version = 11 : i64} {
  func.func @_conv3x3_kernel(%arg0: i32, %arg1: memref<1x384x16xbf16, #tpu.memory_space<vmem>>, %arg2: memref<9x16x8xbf16, #tpu.memory_space<vmem>>, %arg3: memref<1x8xf32, #tpu.memory_space<vmem>>, %arg4: memref<384x1xf32, #tpu.memory_space<vmem>>, %arg5: memref<1x384x8xbf16, #tpu.memory_space<vmem>>) attributes {dimension_semantics = [#tpu.dimension_semantics<parallel>], iteration_bounds = array<i64: 2>, scalar_prefetch = 0 : i64, scratch_operands = 0 : i64, tpu.core_type = #tpu.core_type<tc>, window_params = [{transform_indices = @transform_0, window_bounds = array<i64: 1, 384, 16>}, {pipeline_mode = #tpu.pipeline_mode<synchronous>, transform_indices = @transform_1, window_bounds = array<i64: 9, 16, 8>}, {pipeline_mode = #tpu.pipeline_mode<synchronous>, transform_indices = @transform_2, window_bounds = array<i64: 1, 8>}, {pipeline_mode = #tpu.pipeline_mode<synchronous>, transform_indices = @transform_3, window_bounds = array<i64: 384, 1>}, {transform_indices = @transform_4, window_bounds = array<i64: 1, 384, 8>}]} {
    %c0 = arith.constant 0 : index
    %c0_0 = arith.constant 0 : index
    %c0_1 = arith.constant 0 : index
    %0 = vector.load %arg1[%c0, %c0_0, %c0_1] : memref<1x384x16xbf16, #tpu.memory_space<vmem>>, vector<1x384x16xbf16>
    %1 = vector.shape_cast %0 : vector<1x384x16xbf16> to vector<384x16xbf16>
    %c0_2 = arith.constant 0 : index
    %c0_3 = arith.constant 0 : index
    %c0_4 = arith.constant 0 : index
    %2 = vector.load %arg2[%c0_2, %c0_3, %c0_4] : memref<9x16x8xbf16, #tpu.memory_space<vmem>>, vector<1x16x8xbf16>
    %3 = vector.shape_cast %2 : vector<1x16x8xbf16> to vector<16x8xbf16>
    %cst = arith.constant dense<0.000000e+00> : vector<384x8xf32>
    %4 = tpu.matmul %1, %3, %cst {dimension_numbers = #tpu.dot_dimension_numbers<[1], [0], [0], [1], [0, 0, 1, 1], [], []>} : vector<384x16xbf16>, vector<16x8xbf16>, vector<384x8xf32> -> vector<384x8xf32>
    %5 = vector.extract_strided_slice %4 {offsets = [365, 0], sizes = [19, 8], strides = [1, 1]} : vector<384x8xf32> to vector<19x8xf32>
    %6 = vector.extract_strided_slice %4 {offsets = [0, 0], sizes = [365, 8], strides = [1, 1]} : vector<384x8xf32> to vector<365x8xf32>
    %7 = tpu.concatenate %5, %6 in 0 : vector<19x8xf32>, vector<365x8xf32> -> vector<384x8xf32>
    %c1 = arith.constant 1 : index
    %c0_5 = arith.constant 0 : index
    %c0_6 = arith.constant 0 : index
    %8 = vector.load %arg2[%c1, %c0_5, %c0_6] : memref<9x16x8xbf16, #tpu.memory_space<vmem>>, vector<1x16x8xbf16>
    %9 = vector.shape_cast %8 : vector<1x16x8xbf16> to vector<16x8xbf16>
    %cst_7 = arith.constant dense<0.000000e+00> : vector<384x8xf32>
    %10 = tpu.matmul %1, %9, %cst_7 {dimension_numbers = #tpu.dot_dimension_numbers<[1], [0], [0], [1], [0, 0, 1, 1], [], []>} : vector<384x16xbf16>, vector<16x8xbf16>, vector<384x8xf32> -> vector<384x8xf32>
    %11 = vector.extract_strided_slice %10 {offsets = [366, 0], sizes = [18, 8], strides = [1, 1]} : vector<384x8xf32> to vector<18x8xf32>
    %12 = vector.extract_strided_slice %10 {offsets = [0, 0], sizes = [366, 8], strides = [1, 1]} : vector<384x8xf32> to vector<366x8xf32>
    %13 = tpu.concatenate %11, %12 in 0 : vector<18x8xf32>, vector<366x8xf32> -> vector<384x8xf32>
    %14 = arith.addf %7, %13 : vector<384x8xf32>
    %c2 = arith.constant 2 : index
    %c0_8 = arith.constant 0 : index
    %c0_9 = arith.constant 0 : index
    %15 = vector.load %arg2[%c2, %c0_8, %c0_9] : memref<9x16x8xbf16, #tpu.memory_space<vmem>>, vector<1x16x8xbf16>
    %16 = vector.shape_cast %15 : vector<1x16x8xbf16> to vector<16x8xbf16>
    %cst_10 = arith.constant dense<0.000000e+00> : vector<384x8xf32>
    %17 = tpu.matmul %1, %16, %cst_10 {dimension_numbers = #tpu.dot_dimension_numbers<[1], [0], [0], [1], [0, 0, 1, 1], [], []>} : vector<384x16xbf16>, vector<16x8xbf16>, vector<384x8xf32> -> vector<384x8xf32>
    %18 = vector.extract_strided_slice %17 {offsets = [367, 0], sizes = [17, 8], strides = [1, 1]} : vector<384x8xf32> to vector<17x8xf32>
    %19 = vector.extract_strided_slice %17 {offsets = [0, 0], sizes = [367, 8], strides = [1, 1]} : vector<384x8xf32> to vector<367x8xf32>
    %20 = tpu.concatenate %18, %19 in 0 : vector<17x8xf32>, vector<367x8xf32> -> vector<384x8xf32>
    %21 = arith.addf %14, %20 : vector<384x8xf32>
    %c3 = arith.constant 3 : index
    %c0_11 = arith.constant 0 : index
    %c0_12 = arith.constant 0 : index
    %22 = vector.load %arg2[%c3, %c0_11, %c0_12] : memref<9x16x8xbf16, #tpu.memory_space<vmem>>, vector<1x16x8xbf16>
    %23 = vector.shape_cast %22 : vector<1x16x8xbf16> to vector<16x8xbf16>
    %cst_13 = arith.constant dense<0.000000e+00> : vector<384x8xf32>
    %24 = tpu.matmul %1, %23, %cst_13 {dimension_numbers = #tpu.dot_dimension_numbers<[1], [0], [0], [1], [0, 0, 1, 1], [], []>} : vector<384x16xbf16>, vector<16x8xbf16>, vector<384x8xf32> -> vector<384x8xf32>
    %25 = vector.extract_strided_slice %24 {offsets = [383, 0], sizes = [1, 8], strides = [1, 1]} : vector<384x8xf32> to vector<1x8xf32>
    %26 = vector.extract_strided_slice %24 {offsets = [0, 0], sizes = [383, 8], strides = [1, 1]} : vector<384x8xf32> to vector<383x8xf32>
    %27 = tpu.concatenate %25, %26 in 0 : vector<1x8xf32>, vector<383x8xf32> -> vector<384x8xf32>
    %28 = arith.addf %21, %27 : vector<384x8xf32>
    %c4 = arith.constant 4 : index
    %c0_14 = arith.constant 0 : index
    %c0_15 = arith.constant 0 : index
    %29 = vector.load %arg2[%c4, %c0_14, %c0_15] : memref<9x16x8xbf16, #tpu.memory_space<vmem>>, vector<1x16x8xbf16>
    %30 = vector.shape_cast %29 : vector<1x16x8xbf16> to vector<16x8xbf16>
    %cst_16 = arith.constant dense<0.000000e+00> : vector<384x8xf32>
    %31 = tpu.matmul %1, %30, %cst_16 {dimension_numbers = #tpu.dot_dimension_numbers<[1], [0], [0], [1], [0, 0, 1, 1], [], []>} : vector<384x16xbf16>, vector<16x8xbf16>, vector<384x8xf32> -> vector<384x8xf32>
    %32 = arith.addf %28, %31 : vector<384x8xf32>
    %c5 = arith.constant 5 : index
    %c0_17 = arith.constant 0 : index
    %c0_18 = arith.constant 0 : index
    %33 = vector.load %arg2[%c5, %c0_17, %c0_18] : memref<9x16x8xbf16, #tpu.memory_space<vmem>>, vector<1x16x8xbf16>
    %34 = vector.shape_cast %33 : vector<1x16x8xbf16> to vector<16x8xbf16>
    %cst_19 = arith.constant dense<0.000000e+00> : vector<384x8xf32>
    %35 = tpu.matmul %1, %34, %cst_19 {dimension_numbers = #tpu.dot_dimension_numbers<[1], [0], [0], [1], [0, 0, 1, 1], [], []>} : vector<384x16xbf16>, vector<16x8xbf16>, vector<384x8xf32> -> vector<384x8xf32>
    %36 = vector.extract_strided_slice %35 {offsets = [1, 0], sizes = [383, 8], strides = [1, 1]} : vector<384x8xf32> to vector<383x8xf32>
    %37 = vector.extract_strided_slice %35 {offsets = [0, 0], sizes = [1, 8], strides = [1, 1]} : vector<384x8xf32> to vector<1x8xf32>
    %38 = tpu.concatenate %36, %37 in 0 : vector<383x8xf32>, vector<1x8xf32> -> vector<384x8xf32>
    %39 = arith.addf %32, %38 : vector<384x8xf32>
    %c6 = arith.constant 6 : index
    %c0_20 = arith.constant 0 : index
    %c0_21 = arith.constant 0 : index
    %40 = vector.load %arg2[%c6, %c0_20, %c0_21] : memref<9x16x8xbf16, #tpu.memory_space<vmem>>, vector<1x16x8xbf16>
    %41 = vector.shape_cast %40 : vector<1x16x8xbf16> to vector<16x8xbf16>
    %cst_22 = arith.constant dense<0.000000e+00> : vector<384x8xf32>
    %42 = tpu.matmul %1, %41, %cst_22 {dimension_numbers = #tpu.dot_dimension_numbers<[1], [0], [0], [1], [0, 0, 1, 1], [], []>} : vector<384x16xbf16>, vector<16x8xbf16>, vector<384x8xf32> -> vector<384x8xf32>
    %43 = vector.extract_strided_slice %42 {offsets = [17, 0], sizes = [367, 8], strides = [1, 1]} : vector<384x8xf32> to vector<367x8xf32>
    %44 = vector.extract_strided_slice %42 {offsets = [0, 0], sizes = [17, 8], strides = [1, 1]} : vector<384x8xf32> to vector<17x8xf32>
    %45 = tpu.concatenate %43, %44 in 0 : vector<367x8xf32>, vector<17x8xf32> -> vector<384x8xf32>
    %46 = arith.addf %39, %45 : vector<384x8xf32>
    %c7 = arith.constant 7 : index
    %c0_23 = arith.constant 0 : index
    %c0_24 = arith.constant 0 : index
    %47 = vector.load %arg2[%c7, %c0_23, %c0_24] : memref<9x16x8xbf16, #tpu.memory_space<vmem>>, vector<1x16x8xbf16>
    %48 = vector.shape_cast %47 : vector<1x16x8xbf16> to vector<16x8xbf16>
    %cst_25 = arith.constant dense<0.000000e+00> : vector<384x8xf32>
    %49 = tpu.matmul %1, %48, %cst_25 {dimension_numbers = #tpu.dot_dimension_numbers<[1], [0], [0], [1], [0, 0, 1, 1], [], []>} : vector<384x16xbf16>, vector<16x8xbf16>, vector<384x8xf32> -> vector<384x8xf32>
    %50 = vector.extract_strided_slice %49 {offsets = [18, 0], sizes = [366, 8], strides = [1, 1]} : vector<384x8xf32> to vector<366x8xf32>
    %51 = vector.extract_strided_slice %49 {offsets = [0, 0], sizes = [18, 8], strides = [1, 1]} : vector<384x8xf32> to vector<18x8xf32>
    %52 = tpu.concatenate %50, %51 in 0 : vector<366x8xf32>, vector<18x8xf32> -> vector<384x8xf32>
    %53 = arith.addf %46, %52 : vector<384x8xf32>
    %c8 = arith.constant 8 : index
    %c0_26 = arith.constant 0 : index
    %c0_27 = arith.constant 0 : index
    %54 = vector.load %arg2[%c8, %c0_26, %c0_27] : memref<9x16x8xbf16, #tpu.memory_space<vmem>>, vector<1x16x8xbf16>
    %55 = vector.shape_cast %54 : vector<1x16x8xbf16> to vector<16x8xbf16>
    %cst_28 = arith.constant dense<0.000000e+00> : vector<384x8xf32>
    %56 = tpu.matmul %1, %55, %cst_28 {dimension_numbers = #tpu.dot_dimension_numbers<[1], [0], [0], [1], [0, 0, 1, 1], [], []>} : vector<384x16xbf16>, vector<16x8xbf16>, vector<384x8xf32> -> vector<384x8xf32>
    %57 = vector.extract_strided_slice %56 {offsets = [19, 0], sizes = [365, 8], strides = [1, 1]} : vector<384x8xf32> to vector<365x8xf32>
    %58 = vector.extract_strided_slice %56 {offsets = [0, 0], sizes = [19, 8], strides = [1, 1]} : vector<384x8xf32> to vector<19x8xf32>
    %59 = tpu.concatenate %57, %58 in 0 : vector<365x8xf32>, vector<19x8xf32> -> vector<384x8xf32>
    %60 = arith.addf %53, %59 : vector<384x8xf32>
    %c0_29 = arith.constant 0 : index
    %c0_30 = arith.constant 0 : index
    %61 = vector.load %arg3[%c0_29, %c0_30] : memref<1x8xf32, #tpu.memory_space<vmem>>, vector<1x8xf32>
    %62 = vector.broadcast %61 : vector<1x8xf32> to vector<384x8xf32>
    %63 = arith.addf %60, %62 : vector<384x8xf32>
    %cst_31 = arith.constant 0.000000e+00 : f32
    %64 = vector.broadcast %cst_31 : f32 to vector<384x8xf32>
    %65 = arith.maximumf %63, %64 : vector<384x8xf32>
    %c0_32 = arith.constant 0 : index
    %c0_33 = arith.constant 0 : index
    %66 = vector.load %arg4[%c0_32, %c0_33] : memref<384x1xf32, #tpu.memory_space<vmem>>, vector<384x1xf32>
    %67 = vector.broadcast %66 : vector<384x1xf32> to vector<384x8xf32>
    %68 = arith.mulf %65, %67 : vector<384x8xf32>
    %69 = arith.truncf %68 : vector<384x8xf32> to vector<384x8xbf16>
    %c0_34 = arith.constant 0 : index
    %c0_35 = arith.constant 0 : index
    %c0_36 = arith.constant 0 : index
    %70 = vector.load %arg5[%c0_34, %c0_35, %c0_36] : memref<1x384x8xbf16, #tpu.memory_space<vmem>>, vector<1x384x8xbf16>
    %71 = vector.shape_cast %70 : vector<1x384x8xbf16> to vector<384x8xbf16>
    %72 = vector.shape_cast %69 : vector<384x8xbf16> to vector<1x384x8xbf16>
    tpu.vector_store %arg5[%c0_34, %c0_35, %c0_36], %72 {strides = array<i32>} : memref<1x384x8xbf16, #tpu.memory_space<vmem>>, vector<1x384x8xbf16>,
    return
  }
  func.func @transform_0(%arg0: i32) -> (i32, i32, i32) {
    %c0_i32 = arith.constant 0 : i32
    %c0_i32_0 = arith.constant 0 : i32
    %c0_i32_1 = arith.constant 0 : i32
    return %arg0, %c0_i32, %c0_i32_0 : i32, i32, i32
  }
  func.func @transform_1(%arg0: i32) -> (i32, i32, i32) {
    %c0_i32 = arith.constant 0 : i32
    %c0_i32_0 = arith.constant 0 : i32
    %c0_i32_1 = arith.constant 0 : i32
    %c0_i32_2 = arith.constant 0 : i32
    return %c0_i32, %c0_i32_0, %c0_i32_1 : i32, i32, i32
  }
  func.func @transform_2(%arg0: i32) -> (i32, i32) {
    %c0_i32 = arith.constant 0 : i32
    %c0_i32_0 = arith.constant 0 : i32
    %c0_i32_1 = arith.constant 0 : i32
    return %c0_i32, %c0_i32_0 : i32, i32
  }
  func.func @transform_3(%arg0: i32) -> (i32, i32) {
    %c0_i32 = arith.constant 0 : i32
    %c0_i32_0 = arith.constant 0 : i32
    %c0_i32_1 = arith.constant 0 : i32
    return %c0_i32, %c0_i32_0 : i32, i32
  }
  func.func @transform_4(%arg0: i32) -> (i32, i32, i32) {
    %c0_i32 = arith.constant 0 : i32
    %c0_i32_0 = arith.constant 0 : i32
    %c0_i32_1 = arith.constant 0 : i32
    return %arg0, %c0_i32, %c0_i32_0 : i32, i32, i32
  }
}

module attributes {stable_mosaic.version = 11 : i64} {
  func.func @_conv3x3_kernel(%arg0: i32, %arg1: memref<1x384x8xbf16, #tpu.memory_space<vmem>>, %arg2: memref<9x8x8xbf16, #tpu.memory_space<vmem>>, %arg3: memref<1x8xf32, #tpu.memory_space<vmem>>, %arg4: memref<384x1xf32, #tpu.memory_space<vmem>>, %arg5: memref<1x384x8xbf16, #tpu.memory_space<vmem>>) attributes {dimension_semantics = [#tpu.dimension_semantics<parallel>], iteration_bounds = array<i64: 2>, scalar_prefetch = 0 : i64, scratch_operands = 0 : i64, tpu.core_type = #tpu.core_type<tc>, window_params = [{transform_indices = @transform_0, window_bounds = array<i64: 1, 384, 8>}, {pipeline_mode = #tpu.pipeline_mode<synchronous>, transform_indices = @transform_1, window_bounds = array<i64: 9, 8, 8>}, {pipeline_mode = #tpu.pipeline_mode<synchronous>, transform_indices = @transform_2, window_bounds = array<i64: 1, 8>}, {pipeline_mode = #tpu.pipeline_mode<synchronous>, transform_indices = @transform_3, window_bounds = array<i64: 384, 1>}, {transform_indices = @transform_4, window_bounds = array<i64: 1, 384, 8>}]} {
    %c0 = arith.constant 0 : index
    %c0_0 = arith.constant 0 : index
    %c0_1 = arith.constant 0 : index
    %0 = vector.load %arg1[%c0, %c0_0, %c0_1] : memref<1x384x8xbf16, #tpu.memory_space<vmem>>, vector<1x384x8xbf16>
    %1 = vector.shape_cast %0 : vector<1x384x8xbf16> to vector<384x8xbf16>
    %c0_2 = arith.constant 0 : index
    %c0_3 = arith.constant 0 : index
    %c0_4 = arith.constant 0 : index
    %2 = vector.load %arg2[%c0_2, %c0_3, %c0_4] : memref<9x8x8xbf16, #tpu.memory_space<vmem>>, vector<1x8x8xbf16>
    %3 = vector.shape_cast %2 : vector<1x8x8xbf16> to vector<8x8xbf16>
    %cst = arith.constant dense<0.000000e+00> : vector<384x8xf32>
    %4 = tpu.matmul %1, %3, %cst {dimension_numbers = #tpu.dot_dimension_numbers<[1], [0], [0], [1], [0, 0, 1, 1], [], []>} : vector<384x8xbf16>, vector<8x8xbf16>, vector<384x8xf32> -> vector<384x8xf32>
    %5 = vector.extract_strided_slice %4 {offsets = [365, 0], sizes = [19, 8], strides = [1, 1]} : vector<384x8xf32> to vector<19x8xf32>
    %6 = vector.extract_strided_slice %4 {offsets = [0, 0], sizes = [365, 8], strides = [1, 1]} : vector<384x8xf32> to vector<365x8xf32>
    %7 = tpu.concatenate %5, %6 in 0 : vector<19x8xf32>, vector<365x8xf32> -> vector<384x8xf32>
    %c1 = arith.constant 1 : index
    %c0_5 = arith.constant 0 : index
    %c0_6 = arith.constant 0 : index
    %8 = vector.load %arg2[%c1, %c0_5, %c0_6] : memref<9x8x8xbf16, #tpu.memory_space<vmem>>, vector<1x8x8xbf16>
    %9 = vector.shape_cast %8 : vector<1x8x8xbf16> to vector<8x8xbf16>
    %cst_7 = arith.constant dense<0.000000e+00> : vector<384x8xf32>
    %10 = tpu.matmul %1, %9, %cst_7 {dimension_numbers = #tpu.dot_dimension_numbers<[1], [0], [0], [1], [0, 0, 1, 1], [], []>} : vector<384x8xbf16>, vector<8x8xbf16>, vector<384x8xf32> -> vector<384x8xf32>
    %11 = vector.extract_strided_slice %10 {offsets = [366, 0], sizes = [18, 8], strides = [1, 1]} : vector<384x8xf32> to vector<18x8xf32>
    %12 = vector.extract_strided_slice %10 {offsets = [0, 0], sizes = [366, 8], strides = [1, 1]} : vector<384x8xf32> to vector<366x8xf32>
    %13 = tpu.concatenate %11, %12 in 0 : vector<18x8xf32>, vector<366x8xf32> -> vector<384x8xf32>
    %14 = arith.addf %7, %13 : vector<384x8xf32>
    %c2 = arith.constant 2 : index
    %c0_8 = arith.constant 0 : index
    %c0_9 = arith.constant 0 : index
    %15 = vector.load %arg2[%c2, %c0_8, %c0_9] : memref<9x8x8xbf16, #tpu.memory_space<vmem>>, vector<1x8x8xbf16>
    %16 = vector.shape_cast %15 : vector<1x8x8xbf16> to vector<8x8xbf16>
    %cst_10 = arith.constant dense<0.000000e+00> : vector<384x8xf32>
    %17 = tpu.matmul %1, %16, %cst_10 {dimension_numbers = #tpu.dot_dimension_numbers<[1], [0], [0], [1], [0, 0, 1, 1], [], []>} : vector<384x8xbf16>, vector<8x8xbf16>, vector<384x8xf32> -> vector<384x8xf32>
    %18 = vector.extract_strided_slice %17 {offsets = [367, 0], sizes = [17, 8], strides = [1, 1]} : vector<384x8xf32> to vector<17x8xf32>
    %19 = vector.extract_strided_slice %17 {offsets = [0, 0], sizes = [367, 8], strides = [1, 1]} : vector<384x8xf32> to vector<367x8xf32>
    %20 = tpu.concatenate %18, %19 in 0 : vector<17x8xf32>, vector<367x8xf32> -> vector<384x8xf32>
    %21 = arith.addf %14, %20 : vector<384x8xf32>
    %c3 = arith.constant 3 : index
    %c0_11 = arith.constant 0 : index
    %c0_12 = arith.constant 0 : index
    %22 = vector.load %arg2[%c3, %c0_11, %c0_12] : memref<9x8x8xbf16, #tpu.memory_space<vmem>>, vector<1x8x8xbf16>
    %23 = vector.shape_cast %22 : vector<1x8x8xbf16> to vector<8x8xbf16>
    %cst_13 = arith.constant dense<0.000000e+00> : vector<384x8xf32>
    %24 = tpu.matmul %1, %23, %cst_13 {dimension_numbers = #tpu.dot_dimension_numbers<[1], [0], [0], [1], [0, 0, 1, 1], [], []>} : vector<384x8xbf16>, vector<8x8xbf16>, vector<384x8xf32> -> vector<384x8xf32>
    %25 = vector.extract_strided_slice %24 {offsets = [383, 0], sizes = [1, 8], strides = [1, 1]} : vector<384x8xf32> to vector<1x8xf32>
    %26 = vector.extract_strided_slice %24 {offsets = [0, 0], sizes = [383, 8], strides = [1, 1]} : vector<384x8xf32> to vector<383x8xf32>
    %27 = tpu.concatenate %25, %26 in 0 : vector<1x8xf32>, vector<383x8xf32> -> vector<384x8xf32>
    %28 = arith.addf %21, %27 : vector<384x8xf32>
    %c4 = arith.constant 4 : index
    %c0_14 = arith.constant 0 : index
    %c0_15 = arith.constant 0 : index
    %29 = vector.load %arg2[%c4, %c0_14, %c0_15] : memref<9x8x8xbf16, #tpu.memory_space<vmem>>, vector<1x8x8xbf16>
    %30 = vector.shape_cast %29 : vector<1x8x8xbf16> to vector<8x8xbf16>
    %cst_16 = arith.constant dense<0.000000e+00> : vector<384x8xf32>
    %31 = tpu.matmul %1, %30, %cst_16 {dimension_numbers = #tpu.dot_dimension_numbers<[1], [0], [0], [1], [0, 0, 1, 1], [], []>} : vector<384x8xbf16>, vector<8x8xbf16>, vector<384x8xf32> -> vector<384x8xf32>
    %32 = arith.addf %28, %31 : vector<384x8xf32>
    %c5 = arith.constant 5 : index
    %c0_17 = arith.constant 0 : index
    %c0_18 = arith.constant 0 : index
    %33 = vector.load %arg2[%c5, %c0_17, %c0_18] : memref<9x8x8xbf16, #tpu.memory_space<vmem>>, vector<1x8x8xbf16>
    %34 = vector.shape_cast %33 : vector<1x8x8xbf16> to vector<8x8xbf16>
    %cst_19 = arith.constant dense<0.000000e+00> : vector<384x8xf32>
    %35 = tpu.matmul %1, %34, %cst_19 {dimension_numbers = #tpu.dot_dimension_numbers<[1], [0], [0], [1], [0, 0, 1, 1], [], []>} : vector<384x8xbf16>, vector<8x8xbf16>, vector<384x8xf32> -> vector<384x8xf32>
    %36 = vector.extract_strided_slice %35 {offsets = [1, 0], sizes = [383, 8], strides = [1, 1]} : vector<384x8xf32> to vector<383x8xf32>
    %37 = vector.extract_strided_slice %35 {offsets = [0, 0], sizes = [1, 8], strides = [1, 1]} : vector<384x8xf32> to vector<1x8xf32>
    %38 = tpu.concatenate %36, %37 in 0 : vector<383x8xf32>, vector<1x8xf32> -> vector<384x8xf32>
    %39 = arith.addf %32, %38 : vector<384x8xf32>
    %c6 = arith.constant 6 : index
    %c0_20 = arith.constant 0 : index
    %c0_21 = arith.constant 0 : index
    %40 = vector.load %arg2[%c6, %c0_20, %c0_21] : memref<9x8x8xbf16, #tpu.memory_space<vmem>>, vector<1x8x8xbf16>
    %41 = vector.shape_cast %40 : vector<1x8x8xbf16> to vector<8x8xbf16>
    %cst_22 = arith.constant dense<0.000000e+00> : vector<384x8xf32>
    %42 = tpu.matmul %1, %41, %cst_22 {dimension_numbers = #tpu.dot_dimension_numbers<[1], [0], [0], [1], [0, 0, 1, 1], [], []>} : vector<384x8xbf16>, vector<8x8xbf16>, vector<384x8xf32> -> vector<384x8xf32>
    %43 = vector.extract_strided_slice %42 {offsets = [17, 0], sizes = [367, 8], strides = [1, 1]} : vector<384x8xf32> to vector<367x8xf32>
    %44 = vector.extract_strided_slice %42 {offsets = [0, 0], sizes = [17, 8], strides = [1, 1]} : vector<384x8xf32> to vector<17x8xf32>
    %45 = tpu.concatenate %43, %44 in 0 : vector<367x8xf32>, vector<17x8xf32> -> vector<384x8xf32>
    %46 = arith.addf %39, %45 : vector<384x8xf32>
    %c7 = arith.constant 7 : index
    %c0_23 = arith.constant 0 : index
    %c0_24 = arith.constant 0 : index
    %47 = vector.load %arg2[%c7, %c0_23, %c0_24] : memref<9x8x8xbf16, #tpu.memory_space<vmem>>, vector<1x8x8xbf16>
    %48 = vector.shape_cast %47 : vector<1x8x8xbf16> to vector<8x8xbf16>
    %cst_25 = arith.constant dense<0.000000e+00> : vector<384x8xf32>
    %49 = tpu.matmul %1, %48, %cst_25 {dimension_numbers = #tpu.dot_dimension_numbers<[1], [0], [0], [1], [0, 0, 1, 1], [], []>} : vector<384x8xbf16>, vector<8x8xbf16>, vector<384x8xf32> -> vector<384x8xf32>
    %50 = vector.extract_strided_slice %49 {offsets = [18, 0], sizes = [366, 8], strides = [1, 1]} : vector<384x8xf32> to vector<366x8xf32>
    %51 = vector.extract_strided_slice %49 {offsets = [0, 0], sizes = [18, 8], strides = [1, 1]} : vector<384x8xf32> to vector<18x8xf32>
    %52 = tpu.concatenate %50, %51 in 0 : vector<366x8xf32>, vector<18x8xf32> -> vector<384x8xf32>
    %53 = arith.addf %46, %52 : vector<384x8xf32>
    %c8 = arith.constant 8 : index
    %c0_26 = arith.constant 0 : index
    %c0_27 = arith.constant 0 : index
    %54 = vector.load %arg2[%c8, %c0_26, %c0_27] : memref<9x8x8xbf16, #tpu.memory_space<vmem>>, vector<1x8x8xbf16>
    %55 = vector.shape_cast %54 : vector<1x8x8xbf16> to vector<8x8xbf16>
    %cst_28 = arith.constant dense<0.000000e+00> : vector<384x8xf32>
    %56 = tpu.matmul %1, %55, %cst_28 {dimension_numbers = #tpu.dot_dimension_numbers<[1], [0], [0], [1], [0, 0, 1, 1], [], []>} : vector<384x8xbf16>, vector<8x8xbf16>, vector<384x8xf32> -> vector<384x8xf32>
    %57 = vector.extract_strided_slice %56 {offsets = [19, 0], sizes = [365, 8], strides = [1, 1]} : vector<384x8xf32> to vector<365x8xf32>
    %58 = vector.extract_strided_slice %56 {offsets = [0, 0], sizes = [19, 8], strides = [1, 1]} : vector<384x8xf32> to vector<19x8xf32>
    %59 = tpu.concatenate %57, %58 in 0 : vector<365x8xf32>, vector<19x8xf32> -> vector<384x8xf32>
    %60 = arith.addf %53, %59 : vector<384x8xf32>
    %c0_29 = arith.constant 0 : index
    %c0_30 = arith.constant 0 : index
    %61 = vector.load %arg3[%c0_29, %c0_30] : memref<1x8xf32, #tpu.memory_space<vmem>>, vector<1x8xf32>
    %62 = vector.broadcast %61 : vector<1x8xf32> to vector<384x8xf32>
    %63 = arith.addf %60, %62 : vector<384x8xf32>
    %cst_31 = arith.constant 0.000000e+00 : f32
    %64 = vector.broadcast %cst_31 : f32 to vector<384x8xf32>
    %65 = arith.maximumf %63, %64 : vector<384x8xf32>
    %c0_32 = arith.constant 0 : index
    %c0_33 = arith.constant 0 : index
    %66 = vector.load %arg4[%c0_32, %c0_33] : memref<384x1xf32, #tpu.memory_space<vmem>>, vector<384x1xf32>
    %67 = vector.broadcast %66 : vector<384x1xf32> to vector<384x8xf32>
    %68 = arith.mulf %65, %67 : vector<384x8xf32>
    %69 = arith.truncf %68 : vector<384x8xf32> to vector<384x8xbf16>
    %c0_34 = arith.constant 0 : index
    %c0_35 = arith.constant 0 : index
    %c0_36 = arith.constant 0 : index
    %70 = vector.load %arg5[%c0_34, %c0_35, %c0_36] : memref<1x384x8xbf16, #tpu.memory_space<vmem>>, vector<1x384x8xbf16>
    %71 = vector.shape_cast %70 : vector<1x384x8xbf16> to vector<384x8xbf16>
    %72 = vector.shape_cast %69 : vector<384x8xbf16> to vector<1x384x8xbf16>
    tpu.vector_store %arg5[%c0_34, %c0_35, %c0_36], %72 {strides = array<i32>} : memref<1x384x8xbf16, #tpu.memory_space<vmem>>, vector<1x384x8xbf16>,
    return
  }
  func.func @transform_0(%arg0: i32) -> (i32, i32, i32) {
    %c0_i32 = arith.constant 0 : i32
    %c0_i32_0 = arith.constant 0 : i32
    %c0_i32_1 = arith.constant 0 : i32
    return %arg0, %c0_i32, %c0_i32_0 : i32, i32, i32
  }
  func.func @transform_1(%arg0: i32) -> (i32, i32, i32) {
    %c0_i32 = arith.constant 0 : i32
    %c0_i32_0 = arith.constant 0 : i32
    %c0_i32_1 = arith.constant 0 : i32
    %c0_i32_2 = arith.constant 0 : i32
    return %c0_i32, %c0_i32_0, %c0_i32_1 : i32, i32, i32
  }
  func.func @transform_2(%arg0: i32) -> (i32, i32) {
    %c0_i32 = arith.constant 0 : i32
    %c0_i32_0 = arith.constant 0 : i32
    %c0_i32_1 = arith.constant 0 : i32
    return %c0_i32, %c0_i32_0 : i32, i32
  }
  func.func @transform_3(%arg0: i32) -> (i32, i32) {
    %c0_i32 = arith.constant 0 : i32
    %c0_i32_0 = arith.constant 0 : i32
    %c0_i32_1 = arith.constant 0 : i32
    return %c0_i32, %c0_i32_0 : i32, i32
  }
  func.func @transform_4(%arg0: i32) -> (i32, i32, i32) {
    %c0_i32 = arith.constant 0 : i32
    %c0_i32_0 = arith.constant 0 : i32
    %c0_i32_1 = arith.constant 0 : i32
    return %arg0, %c0_i32, %c0_i32_0 : i32, i32, i32
  }
}

module attributes {stable_mosaic.version = 11 : i64} {
  func.func @_head_kernel(%arg0: i32, %arg1: i32, %arg2: memref<1x384x16xbf16, #tpu.memory_space<vmem>>, %arg3: memref<1x384x8xbf16, #tpu.memory_space<vmem>>, %arg4: memref<1x384x8xbf16, #tpu.memory_space<vmem>>, %arg5: memref<1x384x8xbf16, #tpu.memory_space<vmem>>, %arg6: memref<1x384x8xbf16, #tpu.memory_space<vmem>>, %arg7: memref<1x384x8xbf16, #tpu.memory_space<vmem>>, %arg8: memref<1x384x8xbf16, #tpu.memory_space<vmem>>, %arg9: memref<16x8xbf16, #tpu.memory_space<vmem>>, %arg10: memref<6x8x8xbf16, #tpu.memory_space<vmem>>, %arg11: memref<1x8xf32, #tpu.memory_space<vmem>>, %arg12: memref<8x16xbf16, #tpu.memory_space<vmem>>, %arg13: memref<1x16xf32, #tpu.memory_space<vmem>>, %arg14: memref<1x384x16xf32, #tpu.memory_space<vmem>>) attributes {dimension_semantics = [#tpu.dimension_semantics<parallel>, #tpu.dimension_semantics<parallel>], iteration_bounds = array<i64: 2, 1>, scalar_prefetch = 0 : i64, scratch_operands = 0 : i64, tpu.core_type = #tpu.core_type<tc>, window_params = [{transform_indices = @transform_0, window_bounds = array<i64: 1, 384, 16>}, {transform_indices = @transform_1, window_bounds = array<i64: 1, 384, 8>}, {transform_indices = @transform_2, window_bounds = array<i64: 1, 384, 8>}, {transform_indices = @transform_3, window_bounds = array<i64: 1, 384, 8>}, {transform_indices = @transform_4, window_bounds = array<i64: 1, 384, 8>}, {transform_indices = @transform_5, window_bounds = array<i64: 1, 384, 8>}, {transform_indices = @transform_6, window_bounds = array<i64: 1, 384, 8>}, {pipeline_mode = #tpu.pipeline_mode<synchronous>, transform_indices = @transform_7, window_bounds = array<i64: 16, 8>}, {pipeline_mode = #tpu.pipeline_mode<synchronous>, transform_indices = @transform_8, window_bounds = array<i64: 6, 8, 8>}, {pipeline_mode = #tpu.pipeline_mode<synchronous>, transform_indices = @transform_9, window_bounds = array<i64: 1, 8>}, {pipeline_mode = #tpu.pipeline_mode<synchronous>, transform_indices = @transform_10, window_bounds = array<i64: 8, 16>}, {pipeline_mode = #tpu.pipeline_mode<synchronous>, transform_indices = @transform_11, window_bounds = array<i64: 1, 16>}, {transform_indices = @transform_12, window_bounds = array<i64: 1, 384, 16>}]} {
    %c0 = arith.constant 0 : index
    %c0_0 = arith.constant 0 : index
    %c0_1 = arith.constant 0 : index
    %0 = vector.load %arg2[%c0, %c0_0, %c0_1] : memref<1x384x16xbf16, #tpu.memory_space<vmem>>, vector<1x384x16xbf16>
    %1 = vector.shape_cast %0 : vector<1x384x16xbf16> to vector<384x16xbf16>
    %c0_2 = arith.constant 0 : index
    %c0_3 = arith.constant 0 : index
    %2 = vector.load %arg9[%c0_2, %c0_3] : memref<16x8xbf16, #tpu.memory_space<vmem>>, vector<16x8xbf16>
    %cst = arith.constant dense<0.000000e+00> : vector<384x8xf32>
    %3 = tpu.matmul %1, %2, %cst {dimension_numbers = #tpu.dot_dimension_numbers<[1], [0], [0], [1], [0, 0, 1, 1], [], []>} : vector<384x16xbf16>, vector<16x8xbf16>, vector<384x8xf32> -> vector<384x8xf32>
    %c0_4 = arith.constant 0 : index
    %c0_5 = arith.constant 0 : index
    %c0_6 = arith.constant 0 : index
    %4 = vector.load %arg3[%c0_4, %c0_5, %c0_6] : memref<1x384x8xbf16, #tpu.memory_space<vmem>>, vector<1x384x8xbf16>
    %5 = vector.shape_cast %4 : vector<1x384x8xbf16> to vector<384x8xbf16>
    %c0_7 = arith.constant 0 : index
    %c0_8 = arith.constant 0 : index
    %c0_9 = arith.constant 0 : index
    %6 = vector.load %arg10[%c0_7, %c0_8, %c0_9] : memref<6x8x8xbf16, #tpu.memory_space<vmem>>, vector<1x8x8xbf16>
    %7 = vector.shape_cast %6 : vector<1x8x8xbf16> to vector<8x8xbf16>
    %cst_10 = arith.constant dense<0.000000e+00> : vector<384x8xf32>
    %8 = tpu.matmul %5, %7, %cst_10 {dimension_numbers = #tpu.dot_dimension_numbers<[1], [0], [0], [1], [0, 0, 1, 1], [], []>} : vector<384x8xbf16>, vector<8x8xbf16>, vector<384x8xf32> -> vector<384x8xf32>
    %9 = arith.addf %3, %8 : vector<384x8xf32>
    %c0_11 = arith.constant 0 : index
    %c0_12 = arith.constant 0 : index
    %c0_13 = arith.constant 0 : index
    %10 = vector.load %arg4[%c0_11, %c0_12, %c0_13] : memref<1x384x8xbf16, #tpu.memory_space<vmem>>, vector<1x384x8xbf16>
    %11 = vector.shape_cast %10 : vector<1x384x8xbf16> to vector<384x8xbf16>
    %c1 = arith.constant 1 : index
    %c0_14 = arith.constant 0 : index
    %c0_15 = arith.constant 0 : index
    %12 = vector.load %arg10[%c1, %c0_14, %c0_15] : memref<6x8x8xbf16, #tpu.memory_space<vmem>>, vector<1x8x8xbf16>
    %13 = vector.shape_cast %12 : vector<1x8x8xbf16> to vector<8x8xbf16>
    %cst_16 = arith.constant dense<0.000000e+00> : vector<384x8xf32>
    %14 = tpu.matmul %11, %13, %cst_16 {dimension_numbers = #tpu.dot_dimension_numbers<[1], [0], [0], [1], [0, 0, 1, 1], [], []>} : vector<384x8xbf16>, vector<8x8xbf16>, vector<384x8xf32> -> vector<384x8xf32>
    %15 = arith.addf %9, %14 : vector<384x8xf32>
    %c0_17 = arith.constant 0 : index
    %c0_18 = arith.constant 0 : index
    %c0_19 = arith.constant 0 : index
    %16 = vector.load %arg5[%c0_17, %c0_18, %c0_19] : memref<1x384x8xbf16, #tpu.memory_space<vmem>>, vector<1x384x8xbf16>
    %17 = vector.shape_cast %16 : vector<1x384x8xbf16> to vector<384x8xbf16>
    %c2 = arith.constant 2 : index
    %c0_20 = arith.constant 0 : index
    %c0_21 = arith.constant 0 : index
    %18 = vector.load %arg10[%c2, %c0_20, %c0_21] : memref<6x8x8xbf16, #tpu.memory_space<vmem>>, vector<1x8x8xbf16>
    %19 = vector.shape_cast %18 : vector<1x8x8xbf16> to vector<8x8xbf16>
    %cst_22 = arith.constant dense<0.000000e+00> : vector<384x8xf32>
    %20 = tpu.matmul %17, %19, %cst_22 {dimension_numbers = #tpu.dot_dimension_numbers<[1], [0], [0], [1], [0, 0, 1, 1], [], []>} : vector<384x8xbf16>, vector<8x8xbf16>, vector<384x8xf32> -> vector<384x8xf32>
    %21 = arith.addf %15, %20 : vector<384x8xf32>
    %c0_23 = arith.constant 0 : index
    %c0_24 = arith.constant 0 : index
    %c0_25 = arith.constant 0 : index
    %22 = vector.load %arg6[%c0_23, %c0_24, %c0_25] : memref<1x384x8xbf16, #tpu.memory_space<vmem>>, vector<1x384x8xbf16>
    %23 = vector.shape_cast %22 : vector<1x384x8xbf16> to vector<384x8xbf16>
    %c3 = arith.constant 3 : index
    %c0_26 = arith.constant 0 : index
    %c0_27 = arith.constant 0 : index
    %24 = vector.load %arg10[%c3, %c0_26, %c0_27] : memref<6x8x8xbf16, #tpu.memory_space<vmem>>, vector<1x8x8xbf16>
    %25 = vector.shape_cast %24 : vector<1x8x8xbf16> to vector<8x8xbf16>
    %cst_28 = arith.constant dense<0.000000e+00> : vector<384x8xf32>
    %26 = tpu.matmul %23, %25, %cst_28 {dimension_numbers = #tpu.dot_dimension_numbers<[1], [0], [0], [1], [0, 0, 1, 1], [], []>} : vector<384x8xbf16>, vector<8x8xbf16>, vector<384x8xf32> -> vector<384x8xf32>
    %27 = arith.addf %21, %26 : vector<384x8xf32>
    %c0_29 = arith.constant 0 : index
    %c0_30 = arith.constant 0 : index
    %c0_31 = arith.constant 0 : index
    %28 = vector.load %arg7[%c0_29, %c0_30, %c0_31] : memref<1x384x8xbf16, #tpu.memory_space<vmem>>, vector<1x384x8xbf16>
    %29 = vector.shape_cast %28 : vector<1x384x8xbf16> to vector<384x8xbf16>
    %c4 = arith.constant 4 : index
    %c0_32 = arith.constant 0 : index
    %c0_33 = arith.constant 0 : index
    %30 = vector.load %arg10[%c4, %c0_32, %c0_33] : memref<6x8x8xbf16, #tpu.memory_space<vmem>>, vector<1x8x8xbf16>
    %31 = vector.shape_cast %30 : vector<1x8x8xbf16> to vector<8x8xbf16>
    %cst_34 = arith.constant dense<0.000000e+00> : vector<384x8xf32>
    %32 = tpu.matmul %29, %31, %cst_34 {dimension_numbers = #tpu.dot_dimension_numbers<[1], [0], [0], [1], [0, 0, 1, 1], [], []>} : vector<384x8xbf16>, vector<8x8xbf16>, vector<384x8xf32> -> vector<384x8xf32>
    %33 = arith.addf %27, %32 : vector<384x8xf32>
    %c0_35 = arith.constant 0 : index
    %c0_36 = arith.constant 0 : index
    %c0_37 = arith.constant 0 : index
    %34 = vector.load %arg8[%c0_35, %c0_36, %c0_37] : memref<1x384x8xbf16, #tpu.memory_space<vmem>>, vector<1x384x8xbf16>
    %35 = vector.shape_cast %34 : vector<1x384x8xbf16> to vector<384x8xbf16>
    %c5 = arith.constant 5 : index
    %c0_38 = arith.constant 0 : index
    %c0_39 = arith.constant 0 : index
    %36 = vector.load %arg10[%c5, %c0_38, %c0_39] : memref<6x8x8xbf16, #tpu.memory_space<vmem>>, vector<1x8x8xbf16>
    %37 = vector.shape_cast %36 : vector<1x8x8xbf16> to vector<8x8xbf16>
    %cst_40 = arith.constant dense<0.000000e+00> : vector<384x8xf32>
    %38 = tpu.matmul %35, %37, %cst_40 {dimension_numbers = #tpu.dot_dimension_numbers<[1], [0], [0], [1], [0, 0, 1, 1], [], []>} : vector<384x8xbf16>, vector<8x8xbf16>, vector<384x8xf32> -> vector<384x8xf32>
    %39 = arith.addf %33, %38 : vector<384x8xf32>
    %c0_41 = arith.constant 0 : index
    %c0_42 = arith.constant 0 : index
    %40 = vector.load %arg11[%c0_41, %c0_42] : memref<1x8xf32, #tpu.memory_space<vmem>>, vector<1x8xf32>
    %41 = vector.broadcast %40 : vector<1x8xf32> to vector<384x8xf32>
    %42 = arith.addf %39, %41 : vector<384x8xf32>
    %cst_43 = arith.constant 0.000000e+00 : f32
    %43 = vector.broadcast %cst_43 : f32 to vector<384x8xf32>
    %44 = arith.maximumf %42, %43 : vector<384x8xf32>
    %45 = arith.truncf %44 : vector<384x8xf32> to vector<384x8xbf16>
    %c0_44 = arith.constant 0 : index
    %c0_45 = arith.constant 0 : index
    %46 = vector.load %arg12[%c0_44, %c0_45] : memref<8x16xbf16, #tpu.memory_space<vmem>>, vector<8x16xbf16>
    %cst_46 = arith.constant dense<0.000000e+00> : vector<384x16xf32>
    %47 = tpu.matmul %45, %46, %cst_46 {dimension_numbers = #tpu.dot_dimension_numbers<[1], [0], [0], [1], [0, 0, 1, 1], [], []>} : vector<384x8xbf16>, vector<8x16xbf16>, vector<384x16xf32> -> vector<384x16xf32>
    %c0_47 = arith.constant 0 : index
    %c0_48 = arith.constant 0 : index
    %48 = vector.load %arg13[%c0_47, %c0_48] : memref<1x16xf32, #tpu.memory_space<vmem>>, vector<1x16xf32>
    %49 = vector.broadcast %48 : vector<1x16xf32> to vector<384x16xf32>
    %50 = arith.addf %47, %49 : vector<384x16xf32>
    %cst_49 = arith.constant 0.000000e+00 : f32
    %51 = vector.broadcast %cst_49 : f32 to vector<384x16xf32>
    %52 = arith.maximumf %50, %51 : vector<384x16xf32>
    %53 = arith.extf %1 : vector<384x16xbf16> to vector<384x16xf32>
    %54 = arith.addf %52, %53 : vector<384x16xf32>
    %c0_50 = arith.constant 0 : index
    %c0_51 = arith.constant 0 : index
    %c0_52 = arith.constant 0 : index
    %55 = vector.load %arg14[%c0_50, %c0_51, %c0_52] : memref<1x384x16xf32, #tpu.memory_space<vmem>>, vector<1x384x16xf32>
    %56 = vector.shape_cast %55 : vector<1x384x16xf32> to vector<384x16xf32>
    %57 = vector.shape_cast %54 : vector<384x16xf32> to vector<1x384x16xf32>
    tpu.vector_store %arg14[%c0_50, %c0_51, %c0_52], %57 {strides = array<i32>} : memref<1x384x16xf32, #tpu.memory_space<vmem>>, vector<1x384x16xf32>,
    return
  }
  func.func @transform_0(%arg0: i32, %arg1: i32) -> (i32, i32, i32) {
    %c0_i32 = arith.constant 0 : i32
    %c0_i32_0 = arith.constant 0 : i32
    return %arg0, %arg1, %c0_i32 : i32, i32, i32
  }
  func.func @transform_1(%arg0: i32, %arg1: i32) -> (i32, i32, i32) {
    %c0_i32 = arith.constant 0 : i32
    %c0_i32_0 = arith.constant 0 : i32
    return %arg0, %arg1, %c0_i32 : i32, i32, i32
  }
  func.func @transform_2(%arg0: i32, %arg1: i32) -> (i32, i32, i32) {
    %c0_i32 = arith.constant 0 : i32
    %c0_i32_0 = arith.constant 0 : i32
    return %arg0, %arg1, %c0_i32 : i32, i32, i32
  }
  func.func @transform_3(%arg0: i32, %arg1: i32) -> (i32, i32, i32) {
    %c0_i32 = arith.constant 0 : i32
    %c0_i32_0 = arith.constant 0 : i32
    return %arg0, %arg1, %c0_i32 : i32, i32, i32
  }
  func.func @transform_4(%arg0: i32, %arg1: i32) -> (i32, i32, i32) {
    %c0_i32 = arith.constant 0 : i32
    %c0_i32_0 = arith.constant 0 : i32
    return %arg0, %arg1, %c0_i32 : i32, i32, i32
  }
  func.func @transform_5(%arg0: i32, %arg1: i32) -> (i32, i32, i32) {
    %c0_i32 = arith.constant 0 : i32
    %c0_i32_0 = arith.constant 0 : i32
    return %arg0, %arg1, %c0_i32 : i32, i32, i32
  }
  func.func @transform_6(%arg0: i32, %arg1: i32) -> (i32, i32, i32) {
    %c0_i32 = arith.constant 0 : i32
    %c0_i32_0 = arith.constant 0 : i32
    return %arg0, %arg1, %c0_i32 : i32, i32, i32
  }
  func.func @transform_7(%arg0: i32, %arg1: i32) -> (i32, i32) {
    %c0_i32 = arith.constant 0 : i32
    %c0_i32_0 = arith.constant 0 : i32
    %c0_i32_1 = arith.constant 0 : i32
    return %c0_i32, %c0_i32_0 : i32, i32
  }
  func.func @transform_8(%arg0: i32, %arg1: i32) -> (i32, i32, i32) {
    %c0_i32 = arith.constant 0 : i32
    %c0_i32_0 = arith.constant 0 : i32
    %c0_i32_1 = arith.constant 0 : i32
    %c0_i32_2 = arith.constant 0 : i32
    return %c0_i32, %c0_i32_0, %c0_i32_1 : i32, i32, i32
  }
  func.func @transform_9(%arg0: i32, %arg1: i32) -> (i32, i32) {
    %c0_i32 = arith.constant 0 : i32
    %c0_i32_0 = arith.constant 0 : i32
    %c0_i32_1 = arith.constant 0 : i32
    return %c0_i32, %c0_i32_0 : i32, i32
  }
  func.func @transform_10(%arg0: i32, %arg1: i32) -> (i32, i32) {
    %c0_i32 = arith.constant 0 : i32
    %c0_i32_0 = arith.constant 0 : i32
    %c0_i32_1 = arith.constant 0 : i32
    return %c0_i32, %c0_i32_0 : i32, i32
  }
  func.func @transform_11(%arg0: i32, %arg1: i32) -> (i32, i32) {
    %c0_i32 = arith.constant 0 : i32
    %c0_i32_0 = arith.constant 0 : i32
    %c0_i32_1 = arith.constant 0 : i32
    return %c0_i32, %c0_i32_0 : i32, i32
  }
  func.func @transform_12(%arg0: i32, %arg1: i32) -> (i32, i32, i32) {
    %c0_i32 = arith.constant 0 : i32
    %c0_i32_0 = arith.constant 0 : i32
    return %arg0, %arg1, %c0_i32 : i32, i32, i32
  }
}

</mosaic_0001>

<bundles_post_ra>
// kernel: hg_block.7
= control target key start
LH: loop header
LB: loop body
LE: loop exit
PB: predicated region body
PF: predicated region fallthrough
CT: control target
= control target key end

     0   :  { %s4692_s15 = smov 0   ;;  %s6405_s0 = inlined_call_operand.vmem [shape: bf16[2,384,16], index: 0, kind: input, shape index: {}]   ;;  %s6406_s1 = inlined_call_operand.vmem [shape: bf16[9,16,8], index: 1, kind: input, shape index: {}]   ;;  %s6407_s2 = inlined_call_operand.vmem [shape: f32[1,8], index: 2, kind: input, shape index: {}]   ;;  %s6408_s3 = inlined_call_operand.vmem [shape: f32[384,1], index: 3, kind: input, shape index: {}]   ;;  %s6409_s4 = inlined_call_operand.vmem [shape: bf16[2,384,8], index: 4, kind: output, shape index: {}]  }
   0x1 LB: > { %s4203_s16 = sadd.s32 4294967295, %s4664_s15   ;;  %p4207_p0 = scmp.ge.s32.totalorder %s4664_s15, 1  ;;  %s4664_s15 = sphi %s4692_s15, %s14_s15  }
   0x2   : > { %p162_p1 = scmp.lt.s32.totalorder %s4664_s15, 3 }
   0x4   : > { %p163_p2 = pnand %p4207_p0, %p162_p1 }
   0x6   : > { %166 = sbr.rel (%p163_p2) target bundleno = 1026 (0x402), region = 36 }
   0xb   : > { %v4600_v0 = vld [vmem:[%s6406_s1] sm:$0xff]  ;;  %p188_p3 = scmp.lt.s32.totalorder %s4203_s16, 1  ;;  %v4602_v1 = vld [vmem:[%s6406_s1 + $0x10] sm:$0xff]  ;;  %v4603_v2 = vld [vmem:[%s6406_s1 + $0x18] sm:$0xff]  ;;  %vm375_vm0 = vcmask 130048   ;;  %vm580_vm1 = vcmask 1042432  }
   0xc   : > { %v4601_v3 = vld [vmem:[%s6406_s1 + $0x8] sm:$0xff]  ;;  %v4604_v4 = vld [vmem:[%s6406_s1 + $0x20] sm:$0xff]  ;;  %455 = vmatpush.bf16.msra.mxu0 %v4600_v0  ;;  %4609 = vmatpush.bf16.msra.mxu1 %v4600_v0  ;;  %v4606_v25 = vld [vmem:[%s6406_s1 + $0x30] sm:$0xff]  ;;  %vm912_vm2 = vcmask 1041408   ;;  %vm1292_vm3 = vcmask 1040384   ;;  %vm3419_vm4 = vcmask 1044480  }
   0xd   : > { %s6524_s16 = smov (!%p188_p3, %s4203_s16), 1  ;;  %4610 = vmatpush.bf16.msra.mxu2 %v4600_v0  ;;  %4611 = vmatpush.bf16.msra.mxu3 %v4600_v0  ;;  %v4607_v26 = vld [vmem:[%s6406_s1 + $0x38] sm:$0xff]  ;;  %v4605_v27 = vld [vmem:[%s6406_s1 + $0x28] sm:$0xff]  ;;  %v4608_v28 = vld [vmem:[%s6406_s1 + $0x40] sm:$0xff]  ;;  %vm3039_vm5 = vcmask 1045504   ;;  %vm2282_vm6 = vcmask 1046528  }
   0xe   : > { %s4612_s27 = smul.u32 192, %s6524_s16  ;;  %vm4099_vm7 = vcmask 60416  }
  0x10   : > { %787 = vmatpush.bf16.msrb.mxu1 %v4601_v3  ;;  %1926 = vmatpush.bf16.msrb.mxu0 %v4604_v4  ;;  %s4723_s30 = scalar_lea.vmem %s6405_s0, %s4612_s27  ;;  %s5671_s9 = scalar_lea.vmem %s6409_s4, %s4612_s27 }
  0x11   : > { %1167 = vmatpush.bf16.msrb.mxu2 %v4602_v1  ;;  %1547 = vmatpush.bf16.msrb.mxu3 %v4603_v2  ;;  %v4576_v5 = vld [vmem:[%s4723_s30] sm:$0xff]  ;;  %v4727_v6 = vld [vmem:[%s4723_s30 + $0x30] sm:$0xff]  ;;  %v4577_v9 = vld [vmem:[%s4723_s30 + $0x8] sm:$0xff] }
  0x12   : > { %v4730_v7 = vld [vmem:[%s4723_s30 + $0x60] sm:$0xff]  ;;  %v4594_v8 = vld [vmem:[%s4723_s30 + $0x90] sm:$0xff]  ;;  %4310 = vmatmul.msk.bf16.vlgmr.msra.gmra.mxu0 %vm375_vm0, %v4576_v5  ;;  %4316 = vmatmul.msk.bf16.vlgmr.msra.gmra.mxu1 %vm375_vm0, %v4727_v6  ;;  %v4741_v10 = vld [vmem:[%s4723_s30 + $0x38] sm:$0xff] }
  0x13   : > { %4322 = vmatmul.msk.bf16.vlgmr.msra.gmra.mxu2 %vm375_vm0, %v4730_v7  ;;  %4328 = vmatmul.msk.bf16.vlgmr.msra.gmra.mxu3 %vm375_vm0, %v4594_v8  ;;  %v4744_v11 = vld [vmem:[%s4723_s30 + $0x68] sm:$0xff]  ;;  %v4595_v12 = vld [vmem:[%s4723_s30 + $0x98] sm:$0xff]  ;;  %v4578_v13 = vld [vmem:[%s4723_s30 + $0x10] sm:$0xff] }
  0x14   : > { %v4755_v14 = vld [vmem:[%s4723_s30 + $0x40] sm:$0xff]  ;;  %v4758_v15 = vld [vmem:[%s4723_s30 + $0x70] sm:$0xff]  ;;  %v4768_v17 = vld [vmem:[%s4723_s30 + $0x18] sm:$0xff]  ;;  %2112 = vmatpush.bf16.msra.mxu1 %v4605_v27  ;;  %3251 = vmatpush.bf16.msra.mxu0 %v4608_v28 }
  0x15   : > { %v4596_v16 = vld [vmem:[%s4723_s30 + $0xa0] sm:$0xff]  ;;  %v4771_v18 = vld [vmem:[%s4723_s30 + $0x48] sm:$0xff]  ;;  %v4774_v19 = vld [vmem:[%s4723_s30 + $0x78] sm:$0xff]  ;;  %2492 = vmatpush.bf16.msra.mxu2 %v4606_v25  ;;  %2871 = vmatpush.bf16.msra.mxu3 %v4607_v26 }
  0x16   : > { %v4597_v20 = vld [vmem:[%s4723_s30 + $0xa8] sm:$0xff]  ;;  %v4785_v21 = vld [vmem:[%s4723_s30 + $0x20] sm:$0xff]  ;;  %v4788_v22 = vld [vmem:[%s4723_s30 + $0x50] sm:$0xff] }
  0x17   : > { %v4791_v23 = vld [vmem:[%s4723_s30 + $0x80] sm:$0xff]  ;;  %v4598_v24 = vld [vmem:[%s4723_s30 + $0xb0] sm:$0xff]  ;;  %v4814_v29 = vld [vmem:[%s4723_s30 + $0x28] sm:$0xff] }
  0x18   : > { %v4817_v30 = vld [vmem:[%s4723_s30 + $0x58] sm:$0xff]  ;;  %v4820_v31 = vld [vmem:[%s4723_s30 + $0x88] sm:$0xff] }
  0x19   : > { %v4599_v32 = vld [vmem:[%s4723_s30 + $0xb8] sm:$0xff] }
  0x22   : > { %4311 = vmatmul.msk.bf16.gmra.mxu0 %vm375_vm0, %v4577_v9  ;;  %4317 = vmatmul.msk.bf16.gmra.mxu1 %vm375_vm0, %v4741_v10 }
  0x23   : > { %4323 = vmatmul.msk.bf16.gmra.mxu2 %vm375_vm0, %v4744_v11  ;;  %4329 = vmatmul.msk.bf16.gmra.mxu3 %vm375_vm0, %v4595_v12 }
  0x32   : > { %4312 = vmatmul.msk.bf16.gmra.mxu0 %vm375_vm0, %v4578_v13  ;;  %4318 = vmatmul.msk.bf16.gmra.mxu1 %vm375_vm0, %v4755_v14 }
  0x33   : > { %4324 = vmatmul.msk.bf16.gmra.mxu2 %vm375_vm0, %v4758_v15  ;;  %4330 = vmatmul.msk.bf16.gmra.mxu3 %vm375_vm0, %v4596_v16 }
  0x42   : > { %4313 = vmatmul.msk.bf16.gmra.mxu0 %vm375_vm0, %v4768_v17  ;;  %4319 = vmatmul.msk.bf16.gmra.mxu1 %vm375_vm0, %v4771_v18 }
  0x43   : > { %4325 = vmatmul.msk.bf16.gmra.mxu2 %vm375_vm0, %v4774_v19  ;;  %4331 = vmatmul.msk.bf16.gmra.mxu3 %vm375_vm0, %v4597_v20 }
  0x52   : > { %4314 = vmatmul.msk.bf16.gmra.mxu0 %vm375_vm0, %v4785_v21  ;;  %4320 = vmatmul.msk.bf16.gmra.mxu1 %vm375_vm0, %v4788_v22 }
  0x53   : > { %4326 = vmatmul.msk.bf16.gmra.mxu2 %vm375_vm0, %v4791_v23  ;;  %4332 = vmatmul.msk.bf16.gmra.mxu3 %vm375_vm0, %v4598_v24 }
  0x62   : > { %4315 = vmatmul.msk.bf16.gmra.mxu0 %vm375_vm0, %v4814_v29  ;;  %4321 = vmatmul.msk.bf16.gmra.mxu1 %vm375_vm0, %v4817_v30 }
  0x63   : > { %4327 = vmatmul.msk.bf16.gmra.mxu2 %vm375_vm0, %v4820_v31  ;;  %4333 = vmatmul.msk.bf16.gmra.mxu3 %vm375_vm0, %v4599_v32 }
  0x72   : > { %4340 = vmatmul.msk.bf16.vlgmr.msrb.gmra.mxu1 %vm375_vm0, %v4576_v5  ;;  %4430 = vmatmul.msk.bf16.vlgmr.msrb.gmra.mxu0 %vm375_vm0, %v4576_v5 }
  0x73   : > { %4370 = vmatmul.msk.bf16.vlgmr.msrb.gmra.mxu2 %vm375_vm0, %v4576_v5  ;;  %4400 = vmatmul.msk.bf16.vlgmr.msrb.gmra.mxu3 %vm375_vm0, %v4576_v5 }
  0x82   : > { %4341 = vmatmul.msk.bf16.gmra.mxu1 %vm375_vm0, %v4577_v9  ;;  %4431 = vmatmul.msk.bf16.gmra.mxu0 %vm375_vm0, %v4577_v9 }
  0x83   : > { %4371 = vmatmul.msk.bf16.gmra.mxu2 %vm375_vm0, %v4577_v9  ;;  %4401 = vmatmul.msk.bf16.gmra.mxu3 %vm375_vm0, %v4577_v9 }
  0x8f   : > { %v4838_v33 = vpop.f32.mrf.mxu0  ;;  %v4840_v34 = vpop.f32.mrf.mxu1 }
  0x90   : > { %v6410_v35 = vrot.slane %v4838_v33, 5  ;;  %v6413_v40 = vrot.slane %v4840_v34, 5 }
  0x92   : > { %4342 = vmatmul.msk.bf16.gmra.mxu1 %vm375_vm0, %v4578_v13  ;;  %4432 = vmatmul.msk.bf16.gmra.mxu0 %vm375_vm0, %v4578_v13 }
  0x93   : > { %4372 = vmatmul.msk.bf16.gmra.mxu2 %vm375_vm0, %v4578_v13  ;;  %4402 = vmatmul.msk.bf16.gmra.mxu3 %vm375_vm0, %v4578_v13 }
  0x96   : > { %v4847_v36 = vpop.f32.mrf.mxu2  ;;  %v4849_v37 = vpop.f32.mrf.mxu3 }
  0x97   : > { %v459_v38 = vpop.f32.mrf.mxu0  ;;  %v489_v39 = vpop.f32.mrf.mxu1  ;;  %v6412_v47 = vrot.slane %v4847_v36, 5  ;;  %v6411_v48 = vrot.slane %v4849_v37, 5 }
  0x98   : > { %v635_v41 = vrot.slane %v459_v38, 5  ;;  %v659_v42 = vrot.slane %v489_v39, 5 }
  0x9a   : > { %v4855_v43 = vsel %vm580_vm1, %v6410_v35, %v635_v41  ;;  %v4860_v44 = vsel %vm580_vm1, %v6413_v40, %v659_v42 }
  0x9e   : > { %v519_v45 = vpop.f32.mrf.mxu2  ;;  %v549_v46 = vpop.f32.mrf.mxu3 }
  0x9f   : > { %v683_v49 = vrot.slane %v519_v45, 5  ;;  %v707_v50 = vrot.slane %v549_v46, 5  ;;  %v462_v51 = vpop.f32.mrf.mxu0  ;;  %v492_v52 = vpop.f32.mrf.mxu1 }
  0xa0   : > { %v637_v53 = vrot.slane %v462_v51, 5  ;;  %v661_v54 = vrot.slane %v492_v52, 5 }
  0xa1   : > { %v4867_v55 = vsel %vm580_vm1, %v6412_v47, %v683_v49  ;;  %v4872_v56 = vsel %vm580_vm1, %v6411_v48, %v707_v50 }
  0xa2   : > { %6428 = vst [vmem:[#allocation2_spill] sm:$0xff] %v4872_v56  ;;  %v4875_v57 = vsel %vm580_vm1, %v635_v41, %v637_v53  ;;  %v4878_v58 = vsel %vm580_vm1, %v659_v42, %v661_v54  ;;  %4343 = vmatmul.msk.bf16.gmra.mxu1 %vm375_vm0, %v4768_v17  ;;  %4433 = vmatmul.msk.bf16.gmra.mxu0 %vm375_vm0, %v4768_v17 }
  0xa3   : > { %4373 = vmatmul.msk.bf16.gmra.mxu2 %vm375_vm0, %v4768_v17  ;;  %4403 = vmatmul.msk.bf16.gmra.mxu3 %vm375_vm0, %v4768_v17 }
  0xa6   : > { %v522_v59 = vpop.f32.mrf.mxu2  ;;  %v552_v60 = vpop.f32.mrf.mxu3 }
  0xa7   : > { %v685_v61 = vrot.slane %v522_v59, 5  ;;  %v709_v62 = vrot.slane %v552_v60, 5  ;;  %v464_v63 = vpop.f32.mrf.mxu0  ;;  %v494_v0 = vpop.f32.mrf.mxu1 }
  0xa8   : > { %v639_v1 = vrot.slane %v464_v63, 5  ;;  %v663_v2 = vrot.slane %v494_v0, 5 }
  0xa9   : > { %v4889_v3 = vsel %vm580_vm1, %v683_v49, %v685_v61  ;;  %v4892_v4 = vsel %vm580_vm1, %v707_v50, %v709_v62 }
  0xaa   : > { %6429 = vst [vmem:[#allocation3_spill] sm:$0xff] %v4892_v4  ;;  %v4895_v5 = vsel %vm580_vm1, %v637_v53, %v639_v1  ;;  %v4898_v8 = vsel %vm580_vm1, %v661_v54, %v663_v2 }
  0xae   : > { %v524_v9 = vpop.f32.mrf.mxu2  ;;  %v554_v12 = vpop.f32.mrf.mxu3 }
  0xaf   : > { %v687_v13 = vrot.slane %v524_v9, 5  ;;  %v711_v16 = vrot.slane %v554_v12, 5  ;;  %v467_v17 = vpop.f32.mrf.mxu0  ;;  %v497_v20 = vpop.f32.mrf.mxu1 }
  0xb0   : > { %v641_v24 = vrot.slane %v467_v17, 5  ;;  %v665_v25 = vrot.slane %v497_v20, 5 }
  0xb1   : > { %v4901_v26 = vsel %vm580_vm1, %v685_v61, %v687_v13  ;;  %v4904_v27 = vsel %vm580_vm1, %v709_v62, %v711_v16 }
  0xb2   : > { %6430 = vst [vmem:[#allocation4_spill] sm:$0xff] %v4904_v27  ;;  %v4907_v28 = vsel %vm580_vm1, %v639_v1, %v641_v24  ;;  %v4910_v32 = vsel %vm580_vm1, %v663_v2, %v665_v25  ;;  %4344 = vmatmul.msk.bf16.gmra.mxu1 %vm375_vm0, %v4785_v21  ;;  %4434 = vmatmul.msk.bf16.gmra.mxu0 %vm375_vm0, %v4785_v21 }
  0xb3   : > { %4374 = vmatmul.msk.bf16.gmra.mxu2 %vm375_vm0, %v4785_v21  ;;  %4404 = vmatmul.msk.bf16.gmra.mxu3 %vm375_vm0, %v4785_v21 }
  0xb6   : > { %v527_v38 = vpop.f32.mrf.mxu2  ;;  %v557_v39 = vpop.f32.mrf.mxu3 }
  0xb7   : > { %v689_v41 = vrot.slane %v527_v38, 5  ;;  %v713_v42 = vrot.slane %v557_v39, 5  ;;  %v469_v45 = vpop.f32.mrf.mxu0  ;;  %v499_v46 = vpop.f32.mrf.mxu1 }
  0xb8   : > { %v643_v49 = vrot.slane %v469_v45, 5  ;;  %v667_v50 = vrot.slane %v499_v46, 5 }
  0xb9   : > { %v4921_v51 = vsel %vm580_vm1, %v687_v13, %v689_v41  ;;  %v4924_v52 = vsel %vm580_vm1, %v711_v16, %v713_v42 }
  0xba   : > { %6431 = vst [vmem:[#allocation5_spill] sm:$0xff] %v4924_v52  ;;  %v4927_v53 = vsel %vm580_vm1, %v641_v24, %v643_v49  ;;  %v4930_v54 = vsel %vm580_vm1, %v665_v25, %v667_v50 }
  0xbe   : > { %v529_v21 = vpop.f32.mrf.mxu2  ;;  %v559_v59 = vpop.f32.mrf.mxu3 }
  0xbf   : > { %v691_v60 = vrot.slane %v529_v21, 5  ;;  %v715_v61 = vrot.slane %v559_v59, 5  ;;  %v472_v62 = vpop.f32.mrf.mxu0  ;;  %v502_v63 = vpop.f32.mrf.mxu1 }
  0xc0   : > { %v645_v0 = vrot.slane %v472_v62, 5  ;;  %v669_v1 = vrot.slane %v502_v63, 5 }
  0xc1   : > { %v4933_v2 = vsel %vm580_vm1, %v689_v41, %v691_v60  ;;  %v4936_v9 = vsel %vm580_vm1, %v713_v42, %v715_v61 }
  0xc2   : > { %6432 = vst [vmem:[#allocation6_spill] sm:$0xff] %v4936_v9  ;;  %v4939_v12 = vsel %vm580_vm1, %v643_v49, %v645_v0  ;;  %v4942_v13 = vsel %vm580_vm1, %v667_v50, %v669_v1  ;;  %4345 = vmatmul.msk.bf16.gmra.mxu1 %vm375_vm0, %v4814_v29  ;;  %4435 = vmatmul.msk.bf16.gmra.mxu0 %vm375_vm0, %v4814_v29  ;;  %v6438_v9 = vrot.slane %v4840_v34, 5 }
  0xc3   : > { %4375 = vmatmul.msk.bf16.gmra.mxu2 %vm375_vm0, %v4814_v29  ;;  %4405 = vmatmul.msk.bf16.gmra.mxu3 %vm375_vm0, %v4814_v29 }
  0xc6   : > { %v532_v16 = vpop.f32.mrf.mxu2  ;;  %v562_v17 = vpop.f32.mrf.mxu3 }
  0xc7   : > { %v693_v20 = vrot.slane %v532_v16, 5  ;;  %v717_v24 = vrot.slane %v562_v17, 5  ;;  %v474_v25 = vpop.f32.mrf.mxu0  ;;  %v504_v38 = vpop.f32.mrf.mxu1 }
  0xc8   : > { %v647_v39 = vrot.slane %v474_v25, 5  ;;  %v671_v41 = vrot.slane %v504_v38, 5 }
  0xc9   : > { %v4953_v42 = vsel %vm580_vm1, %v691_v60, %v693_v20  ;;  %v4956_v45 = vsel %vm580_vm1, %v715_v61, %v717_v24 }
  0xca   : > { %6433 = vst [vmem:[#allocation7_spill] sm:$0xff] %v4956_v45  ;;  %v4959_v46 = vsel %vm580_vm1, %v645_v0, %v647_v39  ;;  %v4962_v49 = vsel %vm580_vm1, %v669_v1, %v671_v41 }
  0xce   : > { %v534_v29 = vpop.f32.mrf.mxu2  ;;  %v564_v50 = vpop.f32.mrf.mxu3 }
  0xcf   : > { %v695_v21 = vrot.slane %v534_v29, 5  ;;  %v719_v59 = vrot.slane %v564_v50, 5  ;;  %v477_v62 = vpop.f32.mrf.mxu0  ;;  %v507_v63 = vpop.f32.mrf.mxu1 }
  0xd0   : > { %v649_v16 = vrot.slane %v477_v62, 5  ;;  %v673_v17 = vrot.slane %v507_v63, 5 }
  0xd1   : > { %v4965_v60 = vsel %vm580_vm1, %v693_v20, %v695_v21  ;;  %v4968_v61 = vsel %vm580_vm1, %v717_v24, %v719_v59 }
  0xd2   : > { %6434 = vst [vmem:[#allocation8_spill] sm:$0xff] %v4968_v61  ;;  %v4971_v0 = vsel %vm580_vm1, %v647_v39, %v649_v16  ;;  %v4974_v1 = vsel %vm580_vm1, %v671_v41, %v673_v17  ;;  %4346 = vmatmul.msk.bf16.gmra.mxu1 %vm375_vm0, %v4727_v6  ;;  %4436 = vmatmul.msk.bf16.gmra.mxu0 %vm375_vm0, %v4727_v6 }
  0xd3   : > { %4376 = vmatmul.msk.bf16.gmra.mxu2 %vm375_vm0, %v4727_v6  ;;  %4406 = vmatmul.msk.bf16.gmra.mxu3 %vm375_vm0, %v4727_v6 }
  0xd6   : > { %v537_v20 = vpop.f32.mrf.mxu2  ;;  %v567_v24 = vpop.f32.mrf.mxu3 }
  0xd7   : > { %v697_v25 = vrot.slane %v537_v20, 5  ;;  %v721_v38 = vrot.slane %v567_v24, 5  ;;  %v479_v39 = vpop.f32.mrf.mxu0  ;;  %v509_v29 = vpop.f32.mrf.mxu1 }
  0xd8   : > { %v651_v41 = vrot.slane %v479_v39, 5  ;;  %v675_v50 = vrot.slane %v509_v29, 5 }
  0xd9   : > { %v4985_v62 = vsel %vm580_vm1, %v695_v21, %v697_v25  ;;  %v4988_v63 = vsel %vm580_vm1, %v719_v59, %v721_v38 }
  0xda   : > { %6435 = vst [vmem:[#allocation9_spill] sm:$0xff] %v4988_v63  ;;  %v4991_v35 = vsel %vm580_vm1, %v649_v16, %v651_v41  ;;  %v4994_v48 = vsel %vm580_vm1, %v673_v17, %v675_v50 }
  0xde   : > { %v539_v6 = vpop.f32.mrf.mxu2  ;;  %v569_v47 = vpop.f32.mrf.mxu3 }
  0xdf   : > { %v699_v20 = vrot.slane %v539_v6, 5  ;;  %v581_v24 = vrot.slane %v569_v47, 5  ;;  %v482_v40 = vpop.f32.mrf.mxu0  ;;  %v512_v61 = vpop.f32.mrf.mxu1 }
  0xe0   : > { %v653_v39 = vrot.slane %v482_v40, 5  ;;  %v677_v29 = vrot.slane %v512_v61, 5 }
  0xe1   : > { %v4997_v21 = vsel %vm580_vm1, %v697_v25, %v699_v20  ;;  %v5000_v59 = vsel %vm580_vm1, %v721_v38, %v581_v24 }
  0xe2   : > { %6436 = vst [vmem:[#allocation10_spill] sm:$0xff] %v5000_v59  ;;  %v5003_v16 = vsel %vm580_vm1, %v651_v41, %v653_v39  ;;  %v5006_v17 = vsel %vm580_vm1, %v675_v50, %v677_v29  ;;  %4347 = vmatmul.msk.bf16.gmra.mxu1 %vm375_vm0, %v4741_v10  ;;  %4437 = vmatmul.msk.bf16.gmra.mxu0 %vm375_vm0, %v4741_v10 }
  0xe3   : > { %4377 = vmatmul.msk.bf16.gmra.mxu2 %vm375_vm0, %v4741_v10  ;;  %4407 = vmatmul.msk.bf16.gmra.mxu3 %vm375_vm0, %v4741_v10 }
  0xe6   : > { %v542_v40 = vpop.f32.mrf.mxu2  ;;  %v572_v47 = vpop.f32.mrf.mxu3 }
  0xe7   : > { %v701_v61 = vrot.slane %v542_v40, 5  ;;  %v582_v25 = vrot.slane %v572_v47, 5  ;;  %v484_v38 = vpop.f32.mrf.mxu0  ;;  %v514_v41 = vpop.f32.mrf.mxu1  ;;  %v6439_v47 = vrot.slane %v4847_v36, 5 }
  0xe8   : > { %v655_v50 = vrot.slane %v484_v38, 5  ;;  %v679_v6 = vrot.slane %v514_v41, 5 }
  0xe9   : > { %v5017_v59 = vsel %vm580_vm1, %v699_v20, %v701_v61  ;;  %v5020_v63 = vsel %vm580_vm1, %v581_v24, %v582_v25 }
  0xea   : > { %6437 = vst [vmem:[#allocation11_spill] sm:$0xff] %v5020_v63  ;;  %v5023_v45 = vsel %vm580_vm1, %v653_v39, %v655_v50  ;;  %v5028_v10 = vsel %vm580_vm1, %v655_v50, %v6438_v9  ;;  %v5031_v40 = vsel %vm580_vm1, %v677_v29, %v679_v6  ;;  %v5036_v38 = vsel %vm580_vm1, %v679_v6, %v6439_v47 }
  0xeb   : > { %v6443_v9 = vrot.slane %v4849_v37, 5  ;;  %v6446_v50 = vrot.slane %v4838_v33, 5 }
  0xee   : > { %v544_v20 = vpop.f32.mrf.mxu2  ;;  %v574_v41 = vpop.f32.mrf.mxu3 }
  0xef   : > { %v703_v24 = vrot.slane %v544_v20, 5  ;;  %v584_v63 = vrot.slane %v574_v41, 5  ;;  %v5038_v52 = vpop.f32.mrf.mxu1  ;;  %v5040_v39 = vpop.f32.mrf.mxu0 }
  0xf0   : > { %6440 = vst [vmem:[#allocation12_spill] sm:$0xff] %v5038_v52 }
  0xf1   : > { %6441 = vst [vmem:[#allocation13_spill] sm:$0xff] %v5040_v39  ;;  %v5043_v34 = vsel %vm580_vm1, %v701_v61, %v703_v24  ;;  %v5048_v29 = vsel %vm580_vm1, %v703_v24, %v6443_v9  ;;  %v5051_v36 = vsel %vm580_vm1, %v582_v25, %v584_v63  ;;  %v5056_v6 = vsel %vm580_vm1, %v584_v63, %v6446_v50 }
  0xf2   : > { %6442 = vst [vmem:[#allocation14_spill] sm:$0xff] %v5043_v34  ;;  %4348 = vmatmul.msk.bf16.gmra.mxu1 %vm375_vm0, %v4755_v14  ;;  %4438 = vmatmul.msk.bf16.gmra.mxu0 %vm375_vm0, %v4755_v14  ;;  %v6414_v25 = vrot.slane %v5038_v52, 6 }
  0xf3   : > { %6444 = vst [vmem:[#allocation15_spill] sm:$0xff] %v5048_v29  ;;  %4378 = vmatmul.msk.bf16.gmra.mxu2 %vm375_vm0, %v4755_v14  ;;  %4408 = vmatmul.msk.bf16.gmra.mxu3 %vm375_vm0, %v4755_v14 }
  0xf4   : > { %6445 = vst [vmem:[#allocation16_spill] sm:$0xff] %v5051_v36 }
  0xf5   : > { %6447 = vst [vmem:[#allocation17_spill] sm:$0xff] %v5056_v6 }
  0xf6   : > { %v5066_v37 = vpop.f32.mrf.mxu2  ;;  %v5068_v61 = vpop.f32.mrf.mxu3 }
  0xf7   : > { %6448 = vst [vmem:[#allocation18_spill] sm:$0xff] %v5066_v37  ;;  %v791_v33 = vpop.f32.mrf.mxu1  ;;  %v5070_v63 = vpop.f32.mrf.mxu0  ;;  %v6416_v9 = vrot.slane %v5066_v37, 7  ;;  %v6415_v50 = vrot.slane %v5068_v61, 7 }
  0xf8   : > { %6449 = vst [vmem:[#allocation19_spill] sm:$0xff] %v5068_v61  ;;  %v967_v47 = vrot.slane %v791_v33, 6 }
  0xf9   : > { %6450 = vst [vmem:[#allocation20_spill] sm:$0xff] %v5070_v63 }
  0xfa   : > { %v968_v20 = vsel %vm912_vm2, %v6414_v25, %v967_v47 }
  0xfb   : > { %v1106_v41 = vadd.f32 %v968_v20, %v4855_v43 }
  0xfe   : > { %v1171_v24 = vpop.f32.mrf.mxu2  ;;  %v1551_v14 = vpop.f32.mrf.mxu3 }
  0xff   : > { %v1347_v39 = vrot.slane %v1171_v24, 7  ;;  %v1720_v36 = vrot.slane %v1551_v14, 7  ;;  %v794_v6 = vpop.f32.mrf.mxu1  ;;  %v5079_v63 = vpop.f32.mrf.mxu0 }
 0x100   : > { %6451 = vst [vmem:[#allocation21_spill] sm:$0xff] %v5079_v63  ;;  %v969_v27 = vrot.slane %v794_v6, 6 }
 0x101   : > { %v1348_v33 = vsel %vm1292_vm3, %v6416_v9, %v1347_v39  ;;  %v5087_v43 = vsel %vm1292_vm3, %v6415_v50, %v1720_v36 }
 0x102   : > { %6452 = vst [vmem:[#allocation22_spill] sm:$0xff] %v5087_v43  ;;  %v1486_v20 = vadd.f32 %v1348_v33, %v1106_v41  ;;  %v970_v25 = vsel %vm912_vm2, %v967_v47, %v969_v27  ;;  %4349 = vmatmul.msk.bf16.gmra.mxu1 %vm375_vm0, %v4771_v18  ;;  %4439 = vmatmul.msk.bf16.gmra.mxu0 %vm375_vm0, %v4771_v18 }
 0x103   : > { %v1107_v6 = vadd.f32 %v970_v25, %v4875_v57  ;;  %4379 = vmatmul.msk.bf16.gmra.mxu2 %vm375_vm0, %v4771_v18  ;;  %4409 = vmatmul.msk.bf16.gmra.mxu3 %vm375_vm0, %v4771_v18 }
 0x106   : > { %v1174_v24 = vpop.f32.mrf.mxu2  ;;  %v1554_v14 = vpop.f32.mrf.mxu3 }
 0x107   : > { %v1349_v50 = vrot.slane %v1174_v24, 7  ;;  %v1722_v41 = vrot.slane %v1554_v14, 7  ;;  %v796_v33 = vpop.f32.mrf.mxu1  ;;  %v1935_v47 = vpop.f32.mrf.mxu0 }
 0x108   : > { %v971_v9 = vrot.slane %v796_v33, 6 }
 0x109   : > { %v1350_v63 = vsel %vm1292_vm3, %v1347_v39, %v1349_v50  ;;  %v5101_v43 = vsel %vm1292_vm3, %v1720_v36, %v1722_v41 }
 0x10a   : > { %v1487_v61 = vadd.f32 %v1350_v63, %v1107_v6  ;;  %v972_v57 = vsel %vm912_vm2, %v969_v27, %v971_v9 }
 0x10b   : > { %v1108_v25 = vadd.f32 %v972_v57, %v4895_v5 }
 0x10e   : > { %v1176_v37 = vpop.f32.mrf.mxu2  ;;  %v1556_v52 = vpop.f32.mrf.mxu3 }
 0x10f   : > { %v1351_v18 = vrot.slane %v1176_v37, 7  ;;  %v1724_v4 = vrot.slane %v1556_v52, 7  ;;  %v799_v56 = vpop.f32.mrf.mxu1  ;;  %v1938_v24 = vpop.f32.mrf.mxu0 }
 0x110   : > { %v973_v14 = vrot.slane %v799_v56, 6 }
 0x111   : > { %v1352_v29 = vsel %vm1292_vm3, %v1349_v50, %v1351_v18  ;;  %v1725_v33 = vsel %vm1292_vm3, %v1722_v41, %v1724_v4 }
 0x112   : > { %v1488_v39 = vadd.f32 %v1352_v29, %v1108_v25  ;;  %v1865_v34 = vadd.f32 %v1725_v33, %v1486_v20  ;;  %v974_v36 = vsel %vm912_vm2, %v971_v9, %v973_v14  ;;  %4350 = vmatmul.msk.bf16.gmra.mxu1 %vm375_vm0, %v4788_v22  ;;  %4440 = vmatmul.msk.bf16.gmra.mxu0 %vm375_vm0, %v4788_v22 }
 0x113   : > { %v1109_v5 = vadd.f32 %v974_v36, %v4907_v28  ;;  %4380 = vmatmul.msk.bf16.gmra.mxu2 %vm375_vm0, %v4788_v22  ;;  %4410 = vmatmul.msk.bf16.gmra.mxu3 %vm375_vm0, %v4788_v22 }
 0x114   : > { %v5117_v56 = vadd.f32 %v1935_v47, %v1865_v34 }
 0x116   : > { %6453 = vst [vmem:[#allocation23_spill] sm:$0xff] %v5117_v56  ;;  %v1179_v27 = vpop.f32.mrf.mxu2  ;;  %v1559_v52 = vpop.f32.mrf.mxu3 }
 0x117   : > { %v1353_v29 = vrot.slane %v1179_v27, 7  ;;  %v1726_v37 = vrot.slane %v1559_v52, 7  ;;  %v801_v63 = vpop.f32.mrf.mxu1  ;;  %v1940_v9 = vpop.f32.mrf.mxu0 }
 0x118   : > { %v975_v50 = vrot.slane %v801_v63, 6 }
 0x119   : > { %v1354_v20 = vsel %vm1292_vm3, %v1351_v18, %v1353_v29  ;;  %v1727_v6 = vsel %vm1292_vm3, %v1724_v4, %v1726_v37 }
 0x11a   : > { %v1489_v28 = vadd.f32 %v1354_v20, %v1109_v5  ;;  %v1866_v41 = vadd.f32 %v1727_v6, %v1487_v61  ;;  %v976_v57 = vsel %vm912_vm2, %v973_v14, %v975_v50 }
 0x11b   : > { %v1110_v25 = vadd.f32 %v976_v57, %v4927_v53 }
 0x11c   : > { %v5123_v22 = vadd.f32 %v1938_v24, %v1866_v41 }
 0x11e   : > { %v1181_v34 = vpop.f32.mrf.mxu2  ;;  %v1561_v47 = vpop.f32.mrf.mxu3 }
 0x11f   : > { %v1355_v33 = vrot.slane %v1181_v34, 7  ;;  %v1728_v36 = vrot.slane %v1561_v47, 7  ;;  %v804_v27 = vpop.f32.mrf.mxu1  ;;  %v1943_v52 = vpop.f32.mrf.mxu0 }
 0x120   : > { %v977_v56 = vrot.slane %v804_v27, 6 }
 0x121   : > { %v1356_v63 = vsel %vm1292_vm3, %v1353_v29, %v1355_v33  ;;  %v1729_v18 = vsel %vm1292_vm3, %v1726_v37, %v1728_v36 }
 0x122   : > { %v1490_v4 = vadd.f32 %v1356_v63, %v1110_v25  ;;  %v1867_v5 = vadd.f32 %v1729_v18, %v1488_v39  ;;  %v978_v61 = vsel %vm912_vm2, %v975_v50, %v977_v56  ;;  %4351 = vmatmul.msk.bf16.gmra.mxu1 %vm375_vm0, %v4817_v30  ;;  %4441 = vmatmul.msk.bf16.gmra.mxu0 %vm375_vm0, %v4817_v30 }
 0x123   : > { %v1111_v53 = vadd.f32 %v978_v61, %v4939_v12  ;;  %4381 = vmatmul.msk.bf16.gmra.mxu2 %vm375_vm0, %v4817_v30  ;;  %4411 = vmatmul.msk.bf16.gmra.mxu3 %vm375_vm0, %v4817_v30 }
 0x124   : > { %v5137_v24 = vadd.f32 %v1940_v9, %v1867_v5 }
 0x126   : > { %v1184_v14 = vpop.f32.mrf.mxu2  ;;  %v1564_v39 = vpop.f32.mrf.mxu3 }
 0x127   : > { %v1357_v29 = vrot.slane %v1184_v14, 7  ;;  %v1730_v37 = vrot.slane %v1564_v39, 7  ;;  %v806_v50 = vpop.f32.mrf.mxu1  ;;  %v1945_v20 = vpop.f32.mrf.mxu0 }
 0x128   : > { %v979_v6 = vrot.slane %v806_v50, 6 }
 0x129   : > { %v1358_v41 = vsel %vm1292_vm3, %v1355_v33, %v1357_v29  ;;  %v1731_v57 = vsel %vm1292_vm3, %v1728_v36, %v1730_v37 }
 0x12a   : > { %v1491_v12 = vadd.f32 %v1358_v41, %v1111_v53  ;;  %v1868_v25 = vadd.f32 %v1731_v57, %v1489_v28  ;;  %v980_v34 = vsel %vm912_vm2, %v977_v56, %v979_v6 }
 0x12b   : > { %v1112_v47 = vadd.f32 %v980_v34, %v4959_v46 }
 0x12c   : > { %v5143_v30 = vadd.f32 %v1943_v52, %v1868_v25 }
 0x12e   : > { %v1186_v9 = vpop.f32.mrf.mxu2  ;;  %v1566_v27 = vpop.f32.mrf.mxu3 }
 0x12f   : > { %v1359_v63 = vrot.slane %v1186_v9, 7  ;;  %v1732_v18 = vrot.slane %v1566_v27, 7  ;;  %v809_v5 = vpop.f32.mrf.mxu1  ;;  %v1948_v61 = vpop.f32.mrf.mxu0 }
 0x130   : > { %v981_v14 = vrot.slane %v809_v5, 6 }
 0x131   : > { %v1360_v39 = vsel %vm1292_vm3, %v1357_v29, %v1359_v63  ;;  %v1733_v33 = vsel %vm1292_vm3, %v1730_v37, %v1732_v18 }
 0x132   : > { %v1492_v36 = vadd.f32 %v1360_v39, %v1112_v47  ;;  %v1869_v53 = vadd.f32 %v1733_v33, %v1490_v4  ;;  %v982_v28 = vsel %vm912_vm2, %v979_v6, %v981_v14  ;;  %4352 = vmatmul.msk.bf16.gmra.mxu1 %vm375_vm0, %v4730_v7  ;;  %4442 = vmatmul.msk.bf16.gmra.mxu0 %vm375_vm0, %v4730_v7 }
 0x133   : > { %v1113_v46 = vadd.f32 %v982_v28, %v4971_v0  ;;  %4382 = vmatmul.msk.bf16.gmra.mxu2 %vm375_vm0, %v4730_v7  ;;  %4412 = vmatmul.msk.bf16.gmra.mxu3 %vm375_vm0, %v4730_v7 }
 0x134   : > { %v5157_v56 = vadd.f32 %v1945_v20, %v1869_v53 }
 0x136   : > { %v1189_v52 = vpop.f32.mrf.mxu2  ;;  %v1569_v4 = vpop.f32.mrf.mxu3 }
 0x137   : > { %v1361_v29 = vrot.slane %v1189_v52, 7  ;;  %v1734_v37 = vrot.slane %v1569_v4, 7  ;;  %v811_v50 = vpop.f32.mrf.mxu1  ;;  %v1950_v6 = vpop.f32.mrf.mxu0 }
 0x138   : > { %v983_v41 = vrot.slane %v811_v50, 6 }
 0x139   : > { %v1362_v57 = vsel %vm1292_vm3, %v1359_v63, %v1361_v29  ;;  %v1735_v25 = vsel %vm1292_vm3, %v1732_v18, %v1734_v37 }
 0x13a   : > { %v1493_v0 = vadd.f32 %v1362_v57, %v1113_v46  ;;  %v1870_v34 = vadd.f32 %v1735_v25, %v1491_v12  ;;  %v984_v47 = vsel %vm912_vm2, %v981_v14, %v983_v41 }
 0x13b   : > { %v1114_v9 = vadd.f32 %v984_v47, %v4991_v35 }
 0x13c   : > { %v5163_v7 = vadd.f32 %v1948_v61, %v1870_v34 }
 0x13e   : > { %v1191_v20 = vpop.f32.mrf.mxu2  ;;  %v1571_v27 = vpop.f32.mrf.mxu3 }
 0x13f   : > { %v1363_v5 = vrot.slane %v1191_v20, 7  ;;  %v1736_v39 = vrot.slane %v1571_v27, 7  ;;  %v814_v33 = vpop.f32.mrf.mxu1  ;;  %v1953_v53 = vpop.f32.mrf.mxu0 }
 0x140   : > { %v985_v28 = vrot.slane %v814_v33, 6 }
 0x141   : > { %v1364_v52 = vsel %vm1292_vm3, %v1361_v29, %v1363_v5  ;;  %v1737_v63 = vsel %vm1292_vm3, %v1734_v37, %v1736_v39 }
 0x142   : > { %v1494_v18 = vadd.f32 %v1364_v52, %v1114_v9  ;;  %v1871_v46 = vadd.f32 %v1737_v63, %v1492_v36  ;;  %v986_v12 = vsel %vm912_vm2, %v983_v41, %v985_v28  ;;  %4353 = vmatmul.msk.bf16.gmra.mxu1 %vm375_vm0, %v4744_v11  ;;  %4443 = vmatmul.msk.bf16.gmra.mxu0 %vm375_vm0, %v4744_v11 }
 0x143   : > { %v1115_v35 = vadd.f32 %v986_v12, %v5003_v16  ;;  %4383 = vmatmul.msk.bf16.gmra.mxu2 %vm375_vm0, %v4744_v11  ;;  %4413 = vmatmul.msk.bf16.gmra.mxu3 %vm375_vm0, %v4744_v11 }
 0x144   : > { %v5177_v61 = vadd.f32 %v1950_v6, %v1871_v46 }
 0x146   : > { %v1194_v14 = vpop.f32.mrf.mxu2  ;;  %v1574_v36 = vpop.f32.mrf.mxu3 }
 0x147   : > { %v1365_v4 = vrot.slane %v1194_v14, 7  ;;  %v1738_v29 = vrot.slane %v1574_v36, 7  ;;  %v816_v37 = vpop.f32.mrf.mxu1  ;;  %v1955_v50 = vpop.f32.mrf.mxu0 }
 0x148   : > { %v987_v41 = vrot.slane %v816_v37, 6 }
 0x149   : > { %v1366_v57 = vsel %vm1292_vm3, %v1363_v5, %v1365_v4  ;;  %v1739_v25 = vsel %vm1292_vm3, %v1736_v39, %v1738_v29 }
 0x14a   : > { %v1495_v16 = vadd.f32 %v1366_v57, %v1115_v35  ;;  %v1872_v34 = vadd.f32 %v1739_v25, %v1493_v0  ;;  %v988_v47 = vsel %vm912_vm2, %v985_v28, %v987_v41 }
 0x14b   : > { %v1116_v9 = vadd.f32 %v988_v47, %v5023_v45 }
 0x14c   : > { %v5183_v11 = vadd.f32 %v1953_v53, %v1872_v34 }
 0x14e   : > { %v1196_v6 = vpop.f32.mrf.mxu2  ;;  %v1576_v20 = vpop.f32.mrf.mxu3 }
 0x14f   : > { %v1367_v27 = vrot.slane %v1196_v6, 7  ;;  %v1740_v33 = vrot.slane %v1576_v20, 7  ;;  %v819_v52 = vpop.f32.mrf.mxu1  ;;  %v1958_v63 = vpop.f32.mrf.mxu0 }
 0x150   : > { %v989_v46 = vrot.slane %v819_v52, 6 }
 0x151   : > { %v1368_v12 = vsel %vm1292_vm3, %v1365_v4, %v1367_v27  ;;  %v1741_v5 = vsel %vm1292_vm3, %v1738_v29, %v1740_v33 }
 0x152   : > { %v1496_v39 = vadd.f32 %v1368_v12, %v1116_v9  ;;  %v1873_v35 = vadd.f32 %v1741_v5, %v1494_v18  ;;  %v990_v0 = vsel %vm912_vm2, %v987_v41, %v989_v46  ;;  %4354 = vmatmul.msk.bf16.gmra.mxu1 %vm375_vm0, %v4758_v15  ;;  %4444 = vmatmul.msk.bf16.gmra.mxu0 %vm375_vm0, %v4758_v15 }
 0x153   : > { %v1117_v45 = vadd.f32 %v990_v0, %v5028_v10  ;;  %4384 = vmatmul.msk.bf16.gmra.mxu2 %vm375_vm0, %v4758_v15  ;;  %4414 = vmatmul.msk.bf16.gmra.mxu3 %vm375_vm0, %v4758_v15 }
 0x154   : > { %v5197_v53 = vadd.f32 %v1955_v50, %v1873_v35 }
 0x156   : > { %v1199_v28 = vpop.f32.mrf.mxu2  ;;  %v1579_v18 = vpop.f32.mrf.mxu3 }
 0x157   : > { %v1369_v14 = vrot.slane %v1199_v28, 7  ;;  %v1742_v36 = vrot.slane %v1579_v18, 7  ;;  %v821_v4 = vpop.f32.mrf.mxu1  ;;  %v1960_v29 = vpop.f32.mrf.mxu0 }
 0x158   : > { %v991_v37 = vrot.slane %v821_v4, 6 }
 0x159   : > { %v1370_v41 = vsel %vm1292_vm3, %v1367_v27, %v1369_v14  ;;  %v1743_v57 = vsel %vm1292_vm3, %v1740_v33, %v1742_v36 }
 0x15a   : > { %v1497_v10 = vadd.f32 %v1370_v41, %v1117_v45  ;;  %v1874_v25 = vadd.f32 %v1743_v57, %v1495_v16  ;;  %v992_v34 = vsel %vm912_vm2, %v989_v46, %v991_v37 }
 0x15b   : > { %v1118_v47 = vadd.f32 %v992_v34, %v4860_v44 }
 0x15c   : > { %v5203_v15 = vadd.f32 %v1958_v63, %v1874_v25 }
 0x15e   : > { %v1201_v50 = vpop.f32.mrf.mxu2  ;;  %v1581_v9 = vpop.f32.mrf.mxu3 }
 0x15f   : > { %v1371_v6 = vrot.slane %v1201_v50, 7  ;;  %v1744_v20 = vrot.slane %v1581_v9, 7  ;;  %v824_v52 = vpop.f32.mrf.mxu1  ;;  %v1963_v12 = vpop.f32.mrf.mxu0 }
 0x160   : > { %v993_v5 = vrot.slane %v824_v52, 6 }
 0x161   : > { %v1372_v35 = vsel %vm1292_vm3, %v1369_v14, %v1371_v6  ;;  %v1745_v27 = vsel %vm1292_vm3, %v1742_v36, %v1744_v20 }
 0x162   : > { %v1498_v33 = vadd.f32 %v1372_v35, %v1118_v47  ;;  %v1875_v0 = vadd.f32 %v1745_v27, %v1496_v39  ;;  %v994_v16 = vsel %vm912_vm2, %v991_v37, %v993_v5  ;;  %4355 = vmatmul.msk.bf16.gmra.mxu1 %vm375_vm0, %v4774_v19  ;;  %4445 = vmatmul.msk.bf16.gmra.mxu0 %vm375_vm0, %v4774_v19 }
 0x163   : > { %v1119_v44 = vadd.f32 %v994_v16, %v4878_v58  ;;  %4385 = vmatmul.msk.bf16.gmra.mxu2 %vm375_vm0, %v4774_v19  ;;  %4415 = vmatmul.msk.bf16.gmra.mxu3 %vm375_vm0, %v4774_v19 }
 0x164   : > { %v5217_v63 = vadd.f32 %v1960_v29, %v1875_v0 }
 0x166   : > { %v1204_v46 = vpop.f32.mrf.mxu2  ;;  %v1584_v39 = vpop.f32.mrf.mxu3 }
 0x167   : > { %v1373_v45 = vrot.slane %v1204_v46, 7  ;;  %v1746_v28 = vrot.slane %v1584_v39, 7  ;;  %v826_v18 = vpop.f32.mrf.mxu1  ;;  %v1965_v14 = vpop.f32.mrf.mxu0 }
 0x168   : > { %v995_v36 = vrot.slane %v826_v18, 6 }
 0x169   : > { %v1374_v4 = vsel %vm1292_vm3, %v1371_v6, %v1373_v45  ;;  %v1747_v37 = vsel %vm1292_vm3, %v1744_v20, %v1746_v28 }
 0x16a   : > { %v1499_v58 = vadd.f32 %v1374_v4, %v1119_v44  ;;  %v1876_v41 = vadd.f32 %v1747_v37, %v1497_v10  ;;  %v996_v57 = vsel %vm912_vm2, %v993_v5, %v995_v36 }
 0x16b   : > { %v1120_v25 = vadd.f32 %v996_v57, %v4898_v8 }
 0x16c   : > { %v5223_v19 = vadd.f32 %v1963_v12, %v1876_v41 }
 0x16e   : > { %v1206_v29 = vpop.f32.mrf.mxu2  ;;  %v1586_v34 = vpop.f32.mrf.mxu3 }
 0x16f   : > { %v1375_v47 = vrot.slane %v1206_v29, 7  ;;  %v1748_v50 = vrot.slane %v1586_v34, 7  ;;  %v829_v9 = vpop.f32.mrf.mxu1  ;;  %v1968_v52 = vpop.f32.mrf.mxu0 }
 0x170   : > { %v997_v35 = vrot.slane %v829_v9, 6 }
 0x171   : > { %v1376_v27 = vsel %vm1292_vm3, %v1373_v45, %v1375_v47  ;;  %v1749_v6 = vsel %vm1292_vm3, %v1746_v28, %v1748_v50 }
 0x172   : > { %v1500_v20 = vadd.f32 %v1376_v27, %v1120_v25  ;;  %v1877_v0 = vadd.f32 %v1749_v6, %v1498_v33  ;;  %v998_v10 = vsel %vm912_vm2, %v995_v36, %v997_v35  ;;  %4356 = vmatmul.msk.bf16.gmra.mxu1 %vm375_vm0, %v4791_v23  ;;  %4446 = vmatmul.msk.bf16.gmra.mxu0 %vm375_vm0, %v4791_v23 }
 0x173   : > { %v1121_v8 = vadd.f32 %v998_v10, %v4910_v32  ;;  %4386 = vmatmul.msk.bf16.gmra.mxu2 %vm375_vm0, %v4791_v23  ;;  %4416 = vmatmul.msk.bf16.gmra.mxu3 %vm375_vm0, %v4791_v23 }
 0x174   : > { %v5237_v12 = vadd.f32 %v1965_v14, %v1877_v0 }
 0x176   : > { %v1209_v5 = vpop.f32.mrf.mxu2  ;;  %v1589_v33 = vpop.f32.mrf.mxu3 }
 0x177   : > { %v1377_v16 = vrot.slane %v1209_v5, 7  ;;  %v1750_v44 = vrot.slane %v1589_v33, 7  ;;  %v831_v46 = vpop.f32.mrf.mxu1  ;;  %v1970_v39 = vpop.f32.mrf.mxu0 }
 0x178   : > { %v999_v45 = vrot.slane %v831_v46, 6 }
 0x179   : > { %v1378_v28 = vsel %vm1292_vm3, %v1375_v47, %v1377_v16  ;;  %v1751_v18 = vsel %vm1292_vm3, %v1748_v50, %v1750_v44 }
 0x17a   : > { %v1501_v32 = vadd.f32 %v1378_v28, %v1121_v8  ;;  %v1878_v36 = vadd.f32 %v1751_v18, %v1499_v58  ;;  %v1000_v4 = vsel %vm912_vm2, %v997_v35, %v999_v45 }
 0x17b   : > { %v1122_v37 = vadd.f32 %v1000_v4, %v4930_v54 }
 0x17c   : > { %v5243_v23 = vadd.f32 %v1968_v52, %v1878_v36 }
 0x17e   : > { %v1211_v14 = vpop.f32.mrf.mxu2  ;;  %v1591_v41 = vpop.f32.mrf.mxu3 }
 0x17f   : > { %v1379_v57 = vrot.slane %v1211_v14, 7  ;;  %v1752_v25 = vrot.slane %v1591_v41, 7  ;;  %v834_v29 = vpop.f32.mrf.mxu1  ;;  %v1973_v34 = vpop.f32.mrf.mxu0 }
 0x180   : > { %v1001_v9 = vrot.slane %v834_v29, 6 }
 0x181   : > { %v1380_v27 = vsel %vm1292_vm3, %v1377_v16, %v1379_v57  ;;  %v1753_v47 = vsel %vm1292_vm3, %v1750_v44, %v1752_v25 }
 0x182   : > { %v1502_v50 = vadd.f32 %v1380_v27, %v1122_v37  ;;  %v1879_v6 = vadd.f32 %v1753_v47, %v1500_v20  ;;  %v1002_v58 = vsel %vm912_vm2, %v999_v45, %v1001_v9  ;;  %4357 = vmatmul.msk.bf16.gmra.mxu1 %vm375_vm0, %v4820_v31  ;;  %4447 = vmatmul.msk.bf16.gmra.mxu0 %vm375_vm0, %v4820_v31 }
 0x183   : > { %v1123_v54 = vadd.f32 %v1002_v58, %v4942_v13  ;;  %4387 = vmatmul.msk.bf16.gmra.mxu2 %vm375_vm0, %v4820_v31  ;;  %4417 = vmatmul.msk.bf16.gmra.mxu3 %vm375_vm0, %v4820_v31 }
 0x184   : > { %v5257_v52 = vadd.f32 %v1970_v39, %v1879_v6 }
 0x186   : > { %v1214_v35 = vpop.f32.mrf.mxu2  ;;  %v1594_v20 = vpop.f32.mrf.mxu3 }
 0x187   : > { %v1381_v0 = vrot.slane %v1214_v35, 7  ;;  %v1754_v10 = vrot.slane %v1594_v20, 7  ;;  %v836_v8 = vpop.f32.mrf.mxu1  ;;  %v1975_v5 = vpop.f32.mrf.mxu0 }
 0x188   : > { %v1003_v33 = vrot.slane %v836_v8, 6 }
 0x189   : > { %v1382_v16 = vsel %vm1292_vm3, %v1379_v57, %v1381_v0  ;;  %v1755_v44 = vsel %vm1292_vm3, %v1752_v25, %v1754_v10 }
 0x18a   : > { %v1503_v13 = vadd.f32 %v1382_v16, %v1123_v54  ;;  %v1880_v46 = vadd.f32 %v1755_v44, %v1501_v32  ;;  %v1004_v45 = vsel %vm912_vm2, %v1001_v9, %v1003_v33  ;;  %v4626_v9 = vld [vmem:[%s4723_s30 + $0x90] sm:$0xff] }
 0x18b   : > { %v1124_v31 = vadd.f32 %v1004_v45, %v4962_v49 }
 0x18c   : > { %v5263_v39 = vadd.f32 %v1973_v34, %v1880_v46 }
 0x18e   : > { %v1216_v28 = vpop.f32.mrf.mxu2  ;;  %v1596_v18 = vpop.f32.mrf.mxu3 }
 0x18f   : > { %v1383_v36 = vrot.slane %v1216_v28, 7  ;;  %v1756_v4 = vrot.slane %v1596_v18, 7  ;;  %v839_v37 = vpop.f32.mrf.mxu1  ;;  %v1978_v14 = vpop.f32.mrf.mxu0 }
 0x190   : > { %v1005_v41 = vrot.slane %v839_v37, 6 }
 0x191   : > { %v1384_v57 = vsel %vm1292_vm3, %v1381_v0, %v1383_v36  ;;  %v1757_v25 = vsel %vm1292_vm3, %v1754_v10, %v1756_v4 }
 0x192   : > { %v1504_v29 = vadd.f32 %v1384_v57, %v1124_v31  ;;  %v1881_v32 = vadd.f32 %v1757_v25, %v1502_v50  ;;  %v1006_v27 = vsel %vm912_vm2, %v1003_v33, %v1005_v41  ;;  %4358 = vmatmul.msk.bf16.gmra.mxu1 %vm375_vm0, %v4626_v9  ;;  %4448 = vmatmul.msk.bf16.gmra.mxu0 %vm375_vm0, %v4626_v9 }
 0x193   : > { %v1125_v49 = vadd.f32 %v1006_v27, %v4974_v1  ;;  %4388 = vmatmul.msk.bf16.gmra.mxu2 %vm375_vm0, %v4626_v9  ;;  %4418 = vmatmul.msk.bf16.gmra.mxu3 %vm375_vm0, %v4626_v9 }
 0x194   : > { %v5274_v34 = vadd.f32 %v1975_v5, %v1881_v32 }
 0x196   : > { %v1219_v47 = vpop.f32.mrf.mxu2  ;;  %v1599_v6 = vpop.f32.mrf.mxu3 }
 0x197   : > { %v1385_v58 = vrot.slane %v1219_v47, 7  ;;  %v1758_v54 = vrot.slane %v1599_v6, 7  ;;  %v841_v50 = vpop.f32.mrf.mxu1  ;;  %v1980_v35 = vpop.f32.mrf.mxu0 }
 0x198   : > { %v1007_v20 = vrot.slane %v841_v50, 6 }
 0x199   : > { %v1386_v0 = vsel %vm1292_vm3, %v1383_v36, %v1385_v58  ;;  %v1759_v10 = vsel %vm1292_vm3, %v1756_v4, %v1758_v54 }
 0x19a   : > { %v1505_v8 = vadd.f32 %v1386_v0, %v1125_v49  ;;  %v1882_v33 = vadd.f32 %v1759_v10, %v1503_v13  ;;  %v1008_v1 = vsel %vm912_vm2, %v1005_v41, %v1007_v20  ;;  %v4627_v41 = vld [vmem:[%s4723_s30 + $0x98] sm:$0xff] }
 0x19b   : > { %v1126_v16 = vadd.f32 %v1008_v1, %v4994_v48 }
 0x19c   : > { %v5280_v5 = vadd.f32 %v1978_v14, %v1882_v33 }
 0x19e   : > { %v1221_v44 = vpop.f32.mrf.mxu2  ;;  %v1601_v46 = vpop.f32.mrf.mxu3 }
 0x19f   : > { %v1387_v45 = vrot.slane %v1221_v44, 7  ;;  %v1760_v31 = vrot.slane %v1601_v46, 7  ;;  %v844_v28 = vpop.f32.mrf.mxu1  ;;  %v1983_v18 = vpop.f32.mrf.mxu0 }
 0x1a0   : > { %v1009_v37 = vrot.slane %v844_v28, 6 }
 0x1a1   : > { %v1388_v36 = vsel %vm1292_vm3, %v1385_v58, %v1387_v45  ;;  %v1761_v4 = vsel %vm1292_vm3, %v1758_v54, %v1760_v31 }
 0x1a2   : > { %v1506_v57 = vadd.f32 %v1388_v36, %v1126_v16  ;;  %v1883_v13 = vadd.f32 %v1761_v4, %v1504_v29  ;;  %v1010_v25 = vsel %vm912_vm2, %v1007_v20, %v1009_v37  ;;  %4359 = vmatmul.msk.bf16.gmra.mxu1 %vm375_vm0, %v4627_v41  ;;  %4449 = vmatmul.msk.bf16.gmra.mxu0 %vm375_vm0, %v4627_v41 }
 0x1a3   : > { %v1127_v48 = vadd.f32 %v1010_v25, %v5006_v17  ;;  %4389 = vmatmul.msk.bf16.gmra.mxu2 %vm375_vm0, %v4627_v41  ;;  %4419 = vmatmul.msk.bf16.gmra.mxu3 %vm375_vm0, %v4627_v41 }
 0x1a4   : > { %v5291_v14 = vadd.f32 %v1980_v35, %v1883_v13 }
 0x1a6   : > { %v1224_v32 = vpop.f32.mrf.mxu2  ;;  %v1604_v27 = vpop.f32.mrf.mxu3 }
 0x1a7   : > { %v1389_v9 = vrot.slane %v1224_v32, 7  ;;  %v1762_v49 = vrot.slane %v1604_v27, 7  ;;  %v846_v29 = vpop.f32.mrf.mxu1  ;;  %v1985_v47 = vpop.f32.mrf.mxu0 }
 0x1a8   : > { %v1011_v6 = vrot.slane %v846_v29, 6 }
 0x1a9   : > { %v1390_v58 = vsel %vm1292_vm3, %v1387_v45, %v1389_v9  ;;  %v1763_v54 = vsel %vm1292_vm3, %v1760_v31, %v1762_v49 }
 0x1aa   : > { %v1507_v50 = vadd.f32 %v1390_v58, %v1127_v48  ;;  %v1884_v20 = vadd.f32 %v1763_v54, %v1505_v8  ;;  %v1012_v17 = vsel %vm912_vm2, %v1009_v37, %v1011_v6  ;;  %v4628_v37 = vld [vmem:[%s4723_s30 + $0xa0] sm:$0xff] }
 0x1ab   : > { %v1128_v0 = vadd.f32 %v1012_v17, %v5031_v40 }
 0x1ac   : > { %v5297_v35 = vadd.f32 %v1983_v18, %v1884_v20 }
 0x1ae   : > { %v1226_v10 = vpop.f32.mrf.mxu2  ;;  %v1606_v33 = vpop.f32.mrf.mxu3 }
 0x1af   : > { %v1391_v1 = vrot.slane %v1226_v10, 7  ;;  %v1764_v16 = vrot.slane %v1606_v33, 7  ;;  %v849_v44 = vpop.f32.mrf.mxu1  ;;  %v1988_v46 = vpop.f32.mrf.mxu0 }
 0x1b0   : > { %v1013_v28 = vrot.slane %v849_v44, 6 }
 0x1b1   : > { %v1392_v45 = vsel %vm1292_vm3, %v1389_v9, %v1391_v1  ;;  %v1765_v31 = vsel %vm1292_vm3, %v1762_v49, %v1764_v16 }
 0x1b2   : > { %v1508_v36 = vadd.f32 %v1392_v45, %v1128_v0  ;;  %v1885_v8 = vadd.f32 %v1765_v31, %v1506_v57  ;;  %v1014_v4 = vsel %vm912_vm2, %v1011_v6, %v1013_v28  ;;  %4360 = vmatmul.msk.bf16.gmra.mxu1 %vm375_vm0, %v4628_v37  ;;  %4450 = vmatmul.msk.bf16.gmra.mxu0 %vm375_vm0, %v4628_v37 }
 0x1b3   : > { %v1129_v40 = vadd.f32 %v1014_v4, %v5036_v38  ;;  %4390 = vmatmul.msk.bf16.gmra.mxu2 %vm375_vm0, %v4628_v37  ;;  %4420 = vmatmul.msk.bf16.gmra.mxu3 %vm375_vm0, %v4628_v37 }
 0x1b4   : > { %v5308_v18 = vadd.f32 %v1985_v47, %v1885_v8 }
 0x1b6   : > { %v1229_v13 = vpop.f32.mrf.mxu2  ;;  %v1609_v25 = vpop.f32.mrf.mxu3 }
 0x1b7   : > { %v1393_v41 = vrot.slane %v1229_v13, 7  ;;  %v1766_v48 = vrot.slane %v1609_v25, 7  ;;  %v851_v57 = vpop.f32.mrf.mxu1  ;;  %v1990_v32 = vpop.f32.mrf.mxu0 }
 0x1b8   : > { %v1015_v27 = vrot.slane %v851_v57, 6 }
 0x1b9   : > { %v1394_v9 = vsel %vm1292_vm3, %v1391_v1, %v1393_v41  ;;  %v1767_v49 = vsel %vm1292_vm3, %v1764_v16, %v1766_v48 }
 0x1ba   : > { %v1509_v29 = vadd.f32 %v1394_v9, %v1129_v40  ;;  %v1886_v6 = vadd.f32 %v1767_v49, %v1507_v50  ;;  %v1016_v38 = vsel %vm912_vm2, %v1013_v28, %v1015_v27  ;;  %v4629_v28 = vld [vmem:[%s4723_s30 + $0xa8] sm:$0xff] }
 0x1bb   : > { %v1130_v58 = vadd.f32 %v1016_v38, %v4867_v55 }
 0x1bc   : > { %v5314_v47 = vadd.f32 %v1988_v46, %v1886_v6 }
 0x1be   : > { %v1231_v54 = vpop.f32.mrf.mxu2  ;;  %v1611_v20 = vpop.f32.mrf.mxu3 }
 0x1bf   : > { %v1395_v17 = vrot.slane %v1231_v54, 7  ;;  %v1768_v0 = vrot.slane %v1611_v20, 7  ;;  %v854_v10 = vpop.f32.mrf.mxu1  ;;  %v1993_v33 = vpop.f32.mrf.mxu0 }
 0x1c0   : > { %v1017_v44 = vrot.slane %v854_v10, 6 }
 0x1c1   : > { %v1396_v1 = vsel %vm1292_vm3, %v1393_v41, %v1395_v17  ;;  %v1769_v16 = vsel %vm1292_vm3, %v1766_v48, %v1768_v0 }
 0x1c2   : > { %v1510_v45 = vadd.f32 %v1396_v1, %v1130_v58  ;;  %v1887_v50 = vadd.f32 %v1769_v16, %v1508_v36  ;;  %v1018_v31 = vsel %vm912_vm2, %v1015_v27, %v1017_v44  ;;  %4361 = vmatmul.msk.bf16.gmra.mxu1 %vm375_vm0, %v4629_v28  ;;  %4451 = vmatmul.msk.bf16.gmra.mxu0 %vm375_vm0, %v4629_v28 }
 0x1c3   : > { %v1131_v55 = vadd.f32 %v1018_v31, %v4889_v3  ;;  %4391 = vmatmul.msk.bf16.gmra.mxu2 %vm375_vm0, %v4629_v28  ;;  %4421 = vmatmul.msk.bf16.gmra.mxu3 %vm375_vm0, %v4629_v28 }
 0x1c4   : > { %v5325_v46 = vadd.f32 %v1990_v32, %v1887_v50 }
 0x1c6   : > { %v1234_v8 = vpop.f32.mrf.mxu2  ;;  %v1614_v4 = vpop.f32.mrf.mxu3 }
 0x1c7   : > { %v1397_v37 = vrot.slane %v1234_v8, 7  ;;  %v1770_v40 = vrot.slane %v1614_v4, 7  ;;  %v856_v36 = vpop.f32.mrf.mxu1  ;;  %v1995_v13 = vpop.f32.mrf.mxu0 }
 0x1c8   : > { %v1019_v25 = vrot.slane %v856_v36, 6 }
 0x1c9   : > { %v1398_v41 = vsel %vm1292_vm3, %v1395_v17, %v1397_v37  ;;  %v1771_v48 = vsel %vm1292_vm3, %v1768_v0, %v1770_v40 }
 0x1ca   : > { %v1511_v57 = vadd.f32 %v1398_v41, %v1131_v55  ;;  %v1888_v27 = vadd.f32 %v1771_v48, %v1509_v29  ;;  %v1020_v3 = vsel %vm912_vm2, %v1017_v44, %v1019_v25  ;;  %v4630_v44 = vld [vmem:[%s4723_s30 + $0xb0] sm:$0xff] }
 0x1cb   : > { %v1132_v9 = vadd.f32 %v1020_v3, %v4901_v26 }
 0x1cc   : > { %v5331_v32 = vadd.f32 %v1993_v33, %v1888_v27 }
 0x1ce   : > { %v1236_v49 = vpop.f32.mrf.mxu2  ;;  %v1616_v6 = vpop.f32.mrf.mxu3 }
 0x1cf   : > { %v1399_v38 = vrot.slane %v1236_v49, 7  ;;  %v1772_v58 = vrot.slane %v1616_v6, 7  ;;  %v859_v54 = vpop.f32.mrf.mxu1  ;;  %v1998_v20 = vpop.f32.mrf.mxu0 }
 0x1d0   : > { %v1021_v10 = vrot.slane %v859_v54, 6 }
 0x1d1   : > { %v1400_v17 = vsel %vm1292_vm3, %v1397_v37, %v1399_v38  ;;  %v1773_v0 = vsel %vm1292_vm3, %v1770_v40, %v1772_v58 }
 0x1d2   : > { %v1512_v1 = vadd.f32 %v1400_v17, %v1132_v9  ;;  %v1889_v29 = vadd.f32 %v1773_v0, %v1510_v45  ;;  %v1022_v16 = vsel %vm912_vm2, %v1019_v25, %v1021_v10  ;;  %4362 = vmatmul.msk.bf16.gmra.mxu1 %vm375_vm0, %v4630_v44  ;;  %4452 = vmatmul.msk.bf16.gmra.mxu0 %vm375_vm0, %v4630_v44 }
 0x1d3   : > { %v1133_v26 = vadd.f32 %v1022_v16, %v4921_v51  ;;  %4392 = vmatmul.msk.bf16.gmra.mxu2 %vm375_vm0, %v4630_v44  ;;  %4422 = vmatmul.msk.bf16.gmra.mxu3 %vm375_vm0, %v4630_v44 }
 0x1d4   : > { %v5342_v33 = vadd.f32 %v1995_v13, %v1889_v29 }
 0x1d6   : > { %v1239_v50 = vpop.f32.mrf.mxu2  ;;  %v1619_v31 = vpop.f32.mrf.mxu3 }
 0x1d7   : > { %v1401_v28 = vrot.slane %v1239_v50, 7  ;;  %v1774_v55 = vrot.slane %v1619_v31, 7  ;;  %v861_v45 = vpop.f32.mrf.mxu1  ;;  %v2000_v8 = vpop.f32.mrf.mxu0 }
 0x1d8   : > { %v1023_v4 = vrot.slane %v861_v45, 6 }
 0x1d9   : > { %v1402_v37 = vsel %vm1292_vm3, %v1399_v38, %v1401_v28  ;;  %v1775_v40 = vsel %vm1292_vm3, %v1772_v58, %v1774_v55 }
 0x1da   : > { %v1513_v36 = vadd.f32 %v1402_v37, %v1133_v26  ;;  %v1890_v25 = vadd.f32 %v1775_v40, %v1511_v57  ;;  %v1024_v51 = vsel %vm912_vm2, %v1021_v10, %v1023_v4  ;;  %v4631_v10 = vld [vmem:[%s4723_s30 + $0xb8] sm:$0xff] }
 0x1db   : > { %v1134_v41 = vadd.f32 %v1024_v51, %v4933_v2 }
 0x1dc   : > { %v5348_v13 = vadd.f32 %v1998_v20, %v1890_v25 }
 0x1de   : > { %v1241_v48 = vpop.f32.mrf.mxu2  ;;  %v1621_v27 = vpop.f32.mrf.mxu3 }
 0x1df   : > { %v1403_v3 = vrot.slane %v1241_v48, 7  ;;  %v1776_v9 = vrot.slane %v1621_v27, 7  ;;  %v864_v49 = vpop.f32.mrf.mxu1  ;;  %v2003_v6 = vpop.f32.mrf.mxu0 }
 0x1e0   : > { %v1025_v54 = vrot.slane %v864_v49, 6 }
 0x1e1   : > { %v1404_v38 = vsel %vm1292_vm3, %v1401_v28, %v1403_v3  ;;  %v1777_v58 = vsel %vm1292_vm3, %v1774_v55, %v1776_v9 }
 0x1e2   : > { %v1514_v17 = vadd.f32 %v1404_v38, %v1134_v41  ;;  %v1891_v57 = vadd.f32 %v1777_v58, %v1512_v1  ;;  %v1026_v0 = vsel %vm912_vm2, %v1023_v4, %v1025_v54  ;;  %4363 = vmatmul.msk.bf16.gmra.mxu1 %vm375_vm0, %v4631_v10  ;;  %4453 = vmatmul.msk.bf16.gmra.mxu0 %vm375_vm0, %v4631_v10 }
 0x1e3   : > { %v1135_v2 = vadd.f32 %v1026_v0, %v4953_v42  ;;  %4393 = vmatmul.msk.bf16.gmra.mxu2 %vm375_vm0, %v4631_v10  ;;  %4423 = vmatmul.msk.bf16.gmra.mxu3 %vm375_vm0, %v4631_v10 }
 0x1e4   : > { %v5359_v20 = vadd.f32 %v2000_v8, %v1891_v57 }
 0x1e6   : > { %v1244_v29 = vpop.f32.mrf.mxu2  ;;  %v1624_v16 = vpop.f32.mrf.mxu3 }
 0x1e7   : > { %v1405_v44 = vrot.slane %v1244_v29, 7  ;;  %v1778_v26 = vrot.slane %v1624_v16, 7  ;;  %v866_v1 = vpop.f32.mrf.mxu1  ;;  %v2005_v50 = vpop.f32.mrf.mxu0 }
 0x1e8   : > { %v1027_v31 = vrot.slane %v866_v1, 6 }
 0x1e9   : > { %v1406_v28 = vsel %vm1292_vm3, %v1403_v3, %v1405_v44  ;;  %v1779_v55 = vsel %vm1292_vm3, %v1776_v9, %v1778_v26 }
 0x1ea   : > { %v1515_v45 = vadd.f32 %v1406_v28, %v1135_v2  ;;  %v1892_v4 = vadd.f32 %v1779_v55, %v1513_v36  ;;  %v1028_v42 = vsel %vm912_vm2, %v1025_v54, %v1027_v31  ;;  %v4632_v54 = vld [vmem:[%s4723_s30] sm:$0xff] }
 0x1eb   : > { %v1136_v37 = vadd.f32 %v1028_v42, %v4965_v60 }
 0x1ec   : > { %v5365_v8 = vadd.f32 %v2003_v6, %v1892_v4 }
 0x1ee   : > { %v1246_v40 = vpop.f32.mrf.mxu2  ;;  %v1626_v25 = vpop.f32.mrf.mxu3 }
 0x1ef   : > { %v1407_v51 = vrot.slane %v1246_v40, 7  ;;  %v1780_v41 = vrot.slane %v1626_v25, 7  ;;  %v869_v48 = vpop.f32.mrf.mxu1  ;;  %v2008_v27 = vpop.f32.mrf.mxu0 }
 0x1f0   : > { %v1029_v49 = vrot.slane %v869_v48, 6 }
 0x1f1   : > { %v1408_v3 = vsel %vm1292_vm3, %v1405_v44, %v1407_v51  ;;  %v1781_v9 = vsel %vm1292_vm3, %v1778_v26, %v1780_v41 }
 0x1f2   : > { %v1516_v38 = vadd.f32 %v1408_v3, %v1136_v37  ;;  %v1893_v36 = vadd.f32 %v1781_v9, %v1514_v17  ;;  %v1030_v58 = vsel %vm912_vm2, %v1027_v31, %v1029_v49  ;;  %4460 = vmatmul.msk.bf16.vlgmr.msra.gmra.mxu1 %vm375_vm0, %v4632_v54  ;;  %4550 = vmatmul.msk.bf16.vlgmr.msra.gmra.mxu0 %vm375_vm0, %v4632_v54 }
 0x1f3   : > { %v1137_v60 = vadd.f32 %v1030_v58, %v4985_v62  ;;  %4490 = vmatmul.msk.bf16.vlgmr.msra.gmra.mxu2 %vm375_vm0, %v4632_v54  ;;  %4520 = vmatmul.msk.bf16.vlgmr.msra.gmra.mxu3 %vm375_vm0, %v4632_v54 }
 0x1f4   : > { %v5376_v6 = vadd.f32 %v2005_v50, %v1893_v36 }
 0x1f6   : > { %v1249_v57 = vpop.f32.mrf.mxu2  ;;  %v1629_v0 = vpop.f32.mrf.mxu3 }
 0x1f7   : > { %v1409_v10 = vrot.slane %v1249_v57, 7  ;;  %v1782_v2 = vrot.slane %v1629_v0, 7  ;;  %v871_v17 = vpop.f32.mrf.mxu1  ;;  %v2010_v29 = vpop.f32.mrf.mxu0 }
 0x1f8   : > { %v1031_v16 = vrot.slane %v871_v17, 6 }
 0x1f9   : > { %v1410_v44 = vsel %vm1292_vm3, %v1407_v51, %v1409_v10  ;;  %v1783_v26 = vsel %vm1292_vm3, %v1780_v41, %v1782_v2 }
 0x1fa   : > { %v1517_v1 = vadd.f32 %v1410_v44, %v1137_v60  ;;  %v1894_v31 = vadd.f32 %v1783_v26, %v1515_v45  ;;  %v1032_v62 = vsel %vm912_vm2, %v1029_v49, %v1031_v16  ;;  %v4633_v49 = vld [vmem:[%s4723_s30 + $0x8] sm:$0xff]  ;;  %v6454_v26 = vld [vmem:[#allocation14_spill] sm:$0xff] }
 0x1fb   : > { %v1138_v28 = vadd.f32 %v1032_v62, %v4997_v21 }
 0x1fc   : > { %v5382_v50 = vadd.f32 %v2008_v27, %v1894_v31 }
 0x1fe   : > { %v1251_v55 = vpop.f32.mrf.mxu2  ;;  %v1631_v4 = vpop.f32.mrf.mxu3 }
 0x1ff   : > { %v1411_v42 = vrot.slane %v1251_v55, 7  ;;  %v1784_v37 = vrot.slane %v1631_v4, 7  ;;  %v874_v40 = vpop.f32.mrf.mxu1  ;;  %v2013_v25 = vpop.f32.mrf.mxu0 }
 0x200   : > { %v1033_v48 = vrot.slane %v874_v40, 6 }
 0x201   : > { %v1412_v51 = vsel %vm1292_vm3, %v1409_v10, %v1411_v42  ;;  %v1785_v41 = vsel %vm1292_vm3, %v1782_v2, %v1784_v37  ;;  %v4666_v10 = vmov 0   ;;  %v3715_v2 = vld [vmem:[%s6408_s3] sm:$0xff] }
 0x202   : > { %v1518_v3 = vadd.f32 %v1412_v51, %v1138_v28  ;;  %v1895_v45 = vadd.f32 %v1785_v41, %v1516_v38  ;;  %v1034_v9 = vsel %vm912_vm2, %v1031_v16, %v1033_v48  ;;  %4461 = vmatmul.msk.bf16.gmra.mxu1 %vm375_vm0, %v4633_v49  ;;  %4551 = vmatmul.msk.bf16.gmra.mxu0 %vm375_vm0, %v4633_v49 }
 0x203   : > { %v1139_v21 = vadd.f32 %v1034_v9, %v5017_v59  ;;  %4491 = vmatmul.msk.bf16.gmra.mxu2 %vm375_vm0, %v4633_v49  ;;  %4521 = vmatmul.msk.bf16.gmra.mxu3 %vm375_vm0, %v4633_v49  ;;  %v4634_v49 = vld [vmem:[%s4723_s30 + $0x10] sm:$0xff] }
 0x204   : > { %v5393_v27 = vadd.f32 %v2010_v29, %v1895_v45  ;;  %4622 = vset.pattern.permute.xlu0 %v4666_v10  ;;  %4623 = vset.pattern.permute.xlu1 %v4666_v10 }
 0x205   : > { %3765 = vperm.xlu0 %4622, %v3715_v2   ;;  %4624 = vset.pattern.permute.xlu2 %v4666_v10 }
 0x206   : > { %v1254_v36 = vpop.f32.mrf.mxu2  ;;  %v1634_v58 = vpop.f32.mrf.mxu3 }
 0x207   : > { %v1413_v54 = vrot.slane %v1254_v36, 7  ;;  %v1786_v60 = vrot.slane %v1634_v58, 7  ;;  %v876_v38 = vpop.f32.mrf.mxu1  ;;  %v2015_v57 = vpop.f32.mrf.mxu0 }
 0x208   : > { %v1035_v0 = vrot.slane %v876_v38, 6 }
 0x209   : > { %v1414_v59 = vsel %vm1292_vm3, %v1411_v42, %v1413_v54  ;;  %v1787_v17 = vsel %vm1292_vm3, %v1784_v37, %v1786_v60  ;;  %v3716_v37 = vld [vmem:[%s6408_s3 + $0x8] sm:$0xff] }
 0x20a   : > { %v1519_v29 = vadd.f32 %v1414_v59, %v1139_v21  ;;  %v1896_v16 = vadd.f32 %v1787_v17, %v1517_v1  ;;  %v1036_v44 = vsel %vm912_vm2, %v1033_v48, %v1035_v0  ;;  %v6455_v21 = vld [vmem:[#allocation15_spill] sm:$0xff]  ;;  %v3717_v59 = vld [vmem:[%s6408_s3 + $0x10] sm:$0xff] }
 0x20b   : > { %v1140_v31 = vadd.f32 %v1036_v44, %v6454_v26  ;;  %3775 = vperm.xlu1 %4623, %v3717_v59  }
 0x20c   : > { %v5402_v62 = vadd.f32 %v2013_v25, %v1896_v16 }
 0x20d   : > { %3770 = vperm.xlu0 %4622, %v3716_v37  }
 0x20e   : > { %v1256_v28 = vpop.f32.mrf.mxu2  ;;  %v1636_v55 = vpop.f32.mrf.mxu3 }
 0x20f   : > { %v1415_v4 = vrot.slane %v1256_v28, 7  ;;  %v1788_v40 = vrot.slane %v1636_v55, 7  ;;  %v879_v51 = vpop.f32.mrf.mxu1  ;;  %v2018_v41 = vpop.f32.mrf.mxu0 }
 0x210   : > { %v1037_v42 = vrot.slane %v879_v51, 6 }
 0x211   : > { %v1416_v1 = vsel %vm1292_vm3, %v1413_v54, %v1415_v4  ;;  %v1789_v48 = vsel %vm1292_vm3, %v1786_v60, %v1788_v40 }
 0x212   : > { %v1520_v45 = vadd.f32 %v1416_v1, %v1140_v31  ;;  %v1897_v9 = vadd.f32 %v1789_v48, %v1518_v3  ;;  %v1038_v25 = vsel %vm912_vm2, %v1035_v0, %v1037_v42  ;;  %4462 = vmatmul.msk.bf16.gmra.mxu1 %vm375_vm0, %v4634_v49  ;;  %4552 = vmatmul.msk.bf16.gmra.mxu0 %vm375_vm0, %v4634_v49  ;;  %v6456_v31 = vld [vmem:[#allocation2_spill] sm:$0xff] }
 0x213   : > { %v1141_v36 = vadd.f32 %v1038_v25, %v6455_v21  ;;  %4492 = vmatmul.msk.bf16.gmra.mxu2 %vm375_vm0, %v4634_v49  ;;  %4522 = vmatmul.msk.bf16.gmra.mxu3 %vm375_vm0, %v4634_v49 }
 0x214   : > { %v5416_v58 = vadd.f32 %v2015_v57, %v1897_v9 }
 0x216   : > { %v1259_v54 = vpop.f32.mrf.mxu2  ;;  %v1639_v60 = vpop.f32.mrf.mxu3 }
 0x217   : > { %v1417_v38 = vrot.slane %v1259_v54, 7  ;;  %v1790_v10 = vrot.slane %v1639_v60, 7  ;;  %v881_v3 = vpop.f32.mrf.mxu1  ;;  %v2020_v2 = vpop.f32.mrf.mxu0  ;;  %v6457_v54 = vld [vmem:[#allocation3_spill] sm:$0xff] }
 0x218   : > { %v1039_v0 = vrot.slane %v881_v3, 6 }
 0x219   : > { %v1418_v17 = vsel %vm1292_vm3, %v1415_v4, %v1417_v38  ;;  %v1791_v16 = vsel %vm1292_vm3, %v1788_v40, %v1790_v10  ;;  %v3718_v4 = vld [vmem:[%s6408_s3 + $0x18] sm:$0xff] }
 0x21a   : > { %v1521_v44 = vadd.f32 %v1418_v17, %v1141_v36  ;;  %v1898_v26 = vadd.f32 %v1791_v16, %v1519_v29  ;;  %v1040_v57 = vsel %vm912_vm2, %v1037_v42, %v1039_v0  ;;  %3780 = vperm.xlu1 %4623, %v3718_v4   ;;  %v4635_v36 = vld [vmem:[%s4723_s30 + $0x18] sm:$0xff] }
 0x21b   : > { %v1142_v28 = vadd.f32 %v1040_v57, %v6456_v31 }
 0x21c   : > { %v5425_v55 = vadd.f32 %v2018_v41, %v1898_v26 }
 0x21e   : > { %v1261_v51 = vpop.f32.mrf.mxu2  ;;  %v1641_v37 = vpop.f32.mrf.mxu3 }
 0x21f   : > { %v1419_v1 = vrot.slane %v1261_v51, 7  ;;  %v1792_v48 = vrot.slane %v1641_v37, 7  ;;  %v884_v9 = vpop.f32.mrf.mxu1  ;;  %v2023_v25 = vpop.f32.mrf.mxu0  ;;  %v6458_v37 = vld [vmem:[#allocation4_spill] sm:$0xff] }
 0x220   : > { %v1041_v49 = vrot.slane %v884_v9, 6 }
 0x221   : > { %v1420_v29 = vsel %vm1292_vm3, %v1417_v38, %v1419_v1  ;;  %v1793_v40 = vsel %vm1292_vm3, %v1790_v10, %v1792_v48 }
 0x222   : > { %v1522_v42 = vadd.f32 %v1420_v29, %v1142_v28  ;;  %v1899_v21 = vadd.f32 %v1793_v40, %v1520_v45  ;;  %v1042_v41 = vsel %vm912_vm2, %v1039_v0, %v1041_v49  ;;  %4463 = vmatmul.msk.bf16.gmra.mxu1 %vm375_vm0, %v4635_v36  ;;  %4553 = vmatmul.msk.bf16.gmra.mxu0 %vm375_vm0, %v4635_v36 }
 0x223   : > { %v1143_v60 = vadd.f32 %v1042_v41, %v6457_v54  ;;  %4493 = vmatmul.msk.bf16.gmra.mxu2 %vm375_vm0, %v4635_v36  ;;  %4523 = vmatmul.msk.bf16.gmra.mxu3 %vm375_vm0, %v4635_v36 }
 0x224   : > { %v5439_v3 = vadd.f32 %v2020_v2, %v1899_v21 }
 0x226   : > { %v1264_v38 = vpop.f32.mrf.mxu2  ;;  %v1644_v10 = vpop.f32.mrf.mxu3 }
 0x227   : > { %v1421_v59 = vrot.slane %v1264_v38, 7  ;;  %v1794_v17 = vrot.slane %v1644_v10, 7  ;;  %v886_v45 = vpop.f32.mrf.mxu1  ;;  %v2025_v16 = vpop.f32.mrf.mxu0 }
 0x228   : > { %v1043_v0 = vrot.slane %v886_v45, 6 }
 0x229   : > { %v1422_v26 = vsel %vm1292_vm3, %v1419_v1, %v1421_v59  ;;  %v1795_v57 = vsel %vm1292_vm3, %v1792_v48, %v1794_v17 }
 0x22a   : > { %v1523_v31 = vadd.f32 %v1422_v26, %v1143_v60  ;;  %v1900_v28 = vadd.f32 %v1795_v57, %v1521_v44  ;;  %v1044_v51 = vsel %vm912_vm2, %v1041_v49, %v1043_v0  ;;  %v4636_v49 = vld [vmem:[%s4723_s30 + $0x20] sm:$0xff] }
 0x22b   : > { %v1144_v9 = vadd.f32 %v1044_v51, %v6458_v37  ;;  %v3721_v51 = vld [vmem:[%s6408_s3 + $0x30] sm:$0xff] }
 0x22c   : > { %v5445_v2 = vadd.f32 %v2023_v25, %v1900_v28  ;;  %v6460_v25 = vld [vmem:[#allocation5_spill] sm:$0xff]  ;;  %3795 = vperm.xlu0 %4622, %v3721_v51  }
 0x22e   : > { %6459 = vst [vmem:[#allocation14_spill] sm:$0xff] %v5445_v2  ;;  %v1266_v4 = vpop.f32.mrf.mxu2  ;;  %v1646_v29 = vpop.f32.mrf.mxu3 }
 0x22f   : > { %v1423_v40 = vrot.slane %v1266_v4, 7  ;;  %v1796_v21 = vrot.slane %v1646_v29, 7  ;;  %v889_v41 = vpop.f32.mrf.mxu1  ;;  %v2028_v36 = vpop.f32.mrf.mxu0 }
 0x230   : > { %v1045_v54 = vrot.slane %v889_v41, 6  ;;  %v6462_v41 = vld [vmem:[#allocation6_spill] sm:$0xff] }
 0x231   : > { %v1424_v1 = vsel %vm1292_vm3, %v1421_v59, %v1423_v40  ;;  %v1797_v48 = vsel %vm1292_vm3, %v1794_v17, %v1796_v21 }
 0x232   : > { %v1524_v60 = vadd.f32 %v1424_v1, %v1144_v9  ;;  %v1901_v44 = vadd.f32 %v1797_v48, %v1522_v42  ;;  %v1046_v38 = vsel %vm912_vm2, %v1043_v0, %v1045_v54  ;;  %4464 = vmatmul.msk.bf16.gmra.mxu1 %vm375_vm0, %v4636_v49  ;;  %4554 = vmatmul.msk.bf16.gmra.mxu0 %vm375_vm0, %v4636_v49 }
 0x233   : > { %v1145_v10 = vadd.f32 %v1046_v38, %v6460_v25  ;;  %4494 = vmatmul.msk.bf16.gmra.mxu2 %vm375_vm0, %v4636_v49  ;;  %4524 = vmatmul.msk.bf16.gmra.mxu3 %vm375_vm0, %v4636_v49 }
 0x234   : > { %v5456_v45 = vadd.f32 %v2025_v16, %v1901_v44 }
 0x236   : > { %6461 = vst [vmem:[#allocation15_spill] sm:$0xff] %v5456_v45  ;;  %v1269_v59 = vpop.f32.mrf.mxu2  ;;  %v1649_v26 = vpop.f32.mrf.mxu3  ;;  %v6498_v45 = vld [vmem:[#allocation23_spill] sm:$0xff] }
 0x237   : > { %v1425_v17 = vrot.slane %v1269_v59, 7  ;;  %v1798_v57 = vrot.slane %v1649_v26, 7  ;;  %v891_v42 = vpop.f32.mrf.mxu1  ;;  %v2030_v28 = vpop.f32.mrf.mxu0 }
 0x238   : > { %v1047_v0 = vrot.slane %v891_v42, 6 }
 0x239   : > { %v1426_v37 = vsel %vm1292_vm3, %v1423_v40, %v1425_v17  ;;  %v1799_v9 = vsel %vm1292_vm3, %v1796_v21, %v1798_v57  ;;  %v3719_v40 = vld [vmem:[%s6408_s3 + $0x20] sm:$0xff] }
 0x23a   : > { %v1525_v4 = vadd.f32 %v1426_v37, %v1145_v10  ;;  %v1902_v29 = vadd.f32 %v1799_v9, %v1523_v31  ;;  %v1048_v16 = vsel %vm912_vm2, %v1045_v54, %v1047_v0  ;;  %v3722_v31 = vld [vmem:[%s6408_s3 + $0x38] sm:$0xff]  ;;  %3785 = vperm.xlu2 %4624, %v3719_v40   ;;  %v4637_v37 = vld [vmem:[%s4723_s30 + $0x28] sm:$0xff] }
 0x23b   : > { %v1146_v1 = vadd.f32 %v1048_v16, %v6462_v41  ;;  %3800 = vperm.xlu1 %4623, %v3722_v31   ;;  %v6464_v9 = vld [vmem:[#allocation7_spill] sm:$0xff] }
 0x23c   : > { %v5465_v48 = vadd.f32 %v2028_v36, %v1902_v29 }
 0x23e   : > { %6463 = vst [vmem:[#allocation2_spill] sm:$0xff] %v5465_v48  ;;  %v1271_v44 = vpop.f32.mrf.mxu2  ;;  %v1651_v38 = vpop.f32.mrf.mxu3 }
 0x23f   : > { %v1427_v49 = vrot.slane %v1271_v44, 7  ;;  %v1800_v25 = vrot.slane %v1651_v38, 7  ;;  %v894_v59 = vpop.f32.mrf.mxu1  ;;  %v2033_v26 = vpop.f32.mrf.mxu0  ;;  %v3720_v38 = vld [vmem:[%s6408_s3 + $0x28] sm:$0xff] }
 0x240   : > { %v1049_v42 = vrot.slane %v894_v59, 6 }
 0x241   : > { %v1428_v21 = vsel %vm1292_vm3, %v1425_v17, %v1427_v49  ;;  %v1801_v36 = vsel %vm1292_vm3, %v1798_v57, %v1800_v25 }
 0x242   : > { %v1526_v54 = vadd.f32 %v1428_v21, %v1146_v1  ;;  %v1903_v10 = vadd.f32 %v1801_v36, %v1524_v60  ;;  %v1050_v51 = vsel %vm912_vm2, %v1047_v0, %v1049_v42  ;;  %4465 = vmatmul.msk.bf16.gmra.mxu1 %vm375_vm0, %v4637_v37  ;;  %4555 = vmatmul.msk.bf16.gmra.mxu0 %vm375_vm0, %v4637_v37  ;;  %v6466_v36 = vld [vmem:[#allocation8_spill] sm:$0xff] }
 0x243   : > { %v1147_v29 = vadd.f32 %v1050_v51, %v6464_v9  ;;  %4495 = vmatmul.msk.bf16.gmra.mxu2 %vm375_vm0, %v4637_v37  ;;  %4525 = vmatmul.msk.bf16.gmra.mxu3 %vm375_vm0, %v4637_v37 }
 0x244   : > { %v5482_v17 = vadd.f32 %v2030_v28, %v1903_v10  ;;  %3790 = vperm.xlu2 %4624, %v3720_v38   ;;  %v4638_v38 = vld [vmem:[%s4723_s30 + $0x30] sm:$0xff] }
 0x246   : > { %6465 = vst [vmem:[#allocation3_spill] sm:$0xff] %v5482_v17  ;;  %v1274_v57 = vpop.f32.mrf.mxu2  ;;  %v1654_v16 = vpop.f32.mrf.mxu3 }
 0x247   : > { %v1429_v41 = vrot.slane %v1274_v57, 7  ;;  %v1802_v1 = vrot.slane %v1654_v16, 7  ;;  %v896_v60 = vpop.f32.mrf.mxu1  ;;  %v2035_v44 = vpop.f32.mrf.mxu0 }
 0x248   : > { %v1051_v0 = vrot.slane %v896_v60, 6 }
 0x249   : > { %v1430_v59 = vsel %vm1292_vm3, %v1427_v49, %v1429_v41  ;;  %v1803_v40 = vsel %vm1292_vm3, %v1800_v25, %v1802_v1  ;;  %v3724_v49 = vld [vmem:[%s6408_s3 + $0x48] sm:$0xff] }
 0x24a   : > { %v1527_v31 = vadd.f32 %v1430_v59, %v1147_v29  ;;  %v1904_v21 = vadd.f32 %v1803_v40, %v1525_v4  ;;  %v1052_v28 = vsel %vm912_vm2, %v1049_v42, %v1051_v0  ;;  %3810 = vperm.xlu0 %4622, %v3724_v49   ;;  %v6468_v59 = vld [vmem:[#allocation9_spill] sm:$0xff] }
 0x24b   : > { %v1148_v10 = vadd.f32 %v1052_v28, %v6466_v36 }
 0x24c   : > { %v5491_v51 = vadd.f32 %v2033_v26, %v1904_v21 }
 0x24e   : > { %6467 = vst [vmem:[#allocation4_spill] sm:$0xff] %v5491_v51  ;;  %v1276_v37 = vpop.f32.mrf.mxu2  ;;  %v1656_v9 = vpop.f32.mrf.mxu3 }
 0x24f   : > { %v1431_v57 = vrot.slane %v1276_v37, 7  ;;  %v1804_v16 = vrot.slane %v1656_v9, 7  ;;  %v899_v60 = vpop.f32.mrf.mxu1  ;;  %v2038_v17 = vpop.f32.mrf.mxu0 }
 0x250   : > { %v1053_v48 = vrot.slane %v899_v60, 6  ;;  %v3725_v60 = vld [vmem:[%s6408_s3 + $0x50] sm:$0xff] }
 0x251   : > { %v1432_v4 = vsel %vm1292_vm3, %v1429_v41, %v1431_v57  ;;  %v1805_v25 = vsel %vm1292_vm3, %v1802_v1, %v1804_v16  ;;  %3815 = vperm.xlu1 %4623, %v3725_v60  }
 0x252   : > { %v1528_v42 = vadd.f32 %v1432_v4, %v1148_v10  ;;  %v1905_v29 = vadd.f32 %v1805_v25, %v1526_v54  ;;  %v1054_v26 = vsel %vm912_vm2, %v1051_v0, %v1053_v48  ;;  %4466 = vmatmul.msk.bf16.gmra.mxu1 %vm375_vm0, %v4638_v38  ;;  %4556 = vmatmul.msk.bf16.gmra.mxu0 %vm375_vm0, %v4638_v38  ;;  %v6470_v25 = vld [vmem:[#allocation10_spill] sm:$0xff] }
 0x253   : > { %v1149_v40 = vadd.f32 %v1054_v26, %v6468_v59  ;;  %4496 = vmatmul.msk.bf16.gmra.mxu2 %vm375_vm0, %v4638_v38  ;;  %4526 = vmatmul.msk.bf16.gmra.mxu3 %vm375_vm0, %v4638_v38 }
 0x254   : > { %v5505_v21 = vadd.f32 %v2035_v44, %v1905_v29 }
 0x256   : > { %6469 = vst [vmem:[#allocation5_spill] sm:$0xff] %v5505_v21  ;;  %v1279_v41 = vpop.f32.mrf.mxu2  ;;  %v1659_v1 = vpop.f32.mrf.mxu3 }
 0x257   : > { %v1433_v28 = vrot.slane %v1279_v41, 7  ;;  %v1806_v36 = vrot.slane %v1659_v1, 7  ;;  %v901_v54 = vpop.f32.mrf.mxu1  ;;  %v2040_v10 = vpop.f32.mrf.mxu0 }
 0x258   : > { %v913_v0 = vrot.slane %v901_v54, 6 }
 0x259   : > { %v1434_v37 = vsel %vm1292_vm3, %v1431_v57, %v1433_v28  ;;  %v1807_v9 = vsel %vm1292_vm3, %v1804_v16, %v1806_v36 }
 0x25a   : > { %v1529_v49 = vadd.f32 %v1434_v37, %v1149_v40  ;;  %v1906_v4 = vadd.f32 %v1807_v9, %v1527_v31  ;;  %v1055_v44 = vsel %vm912_vm2, %v1053_v48, %v913_v0  ;;  %v3723_v31 = vld [vmem:[%s6408_s3 + $0x40] sm:$0xff]  ;;  %v4639_v37 = vld [vmem:[%s4723_s30 + $0x38] sm:$0xff] }
 0x25b   : > { %v1150_v29 = vadd.f32 %v1055_v44, %v6470_v25  ;;  %3805 = vperm.xlu2 %4624, %v3723_v31  }
 0x25c   : > { %v5514_v26 = vadd.f32 %v2038_v17, %v1906_v4 }
 0x25e   : > { %6471 = vst [vmem:[#allocation6_spill] sm:$0xff] %v5514_v26  ;;  %v1281_v38 = vpop.f32.mrf.mxu2  ;;  %v1661_v59 = vpop.f32.mrf.mxu3 }
 0x25f   : > { %v1293_v41 = vrot.slane %v1281_v38, 7  ;;  %v1808_v57 = vrot.slane %v1661_v59, 7  ;;  %v904_v1 = vpop.f32.mrf.mxu1  ;;  %v2043_v16 = vpop.f32.mrf.mxu0  ;;  %v6473_v59 = vld [vmem:[#allocation12_spill] sm:$0xff] }
 0x260   : > { %v914_v9 = vrot.slane %v904_v1, 6  ;;  %v6475_v1 = vld [vmem:[#allocation17_spill] sm:$0xff] }
 0x261   : > { %v1435_v54 = vsel %vm1292_vm3, %v1433_v28, %v1293_v41  ;;  %v1809_v21 = vsel %vm1292_vm3, %v1806_v36, %v1808_v57 }
 0x262   : > { %v1530_v48 = vadd.f32 %v1435_v54, %v1150_v29  ;;  %v1907_v40 = vadd.f32 %v1809_v21, %v1528_v42  ;;  %4467 = vmatmul.msk.bf16.gmra.mxu1 %vm375_vm0, %v4639_v37  ;;  %4557 = vmatmul.msk.bf16.gmra.mxu0 %vm375_vm0, %v4639_v37  ;;  %v3727_v29 = vld [vmem:[%s6408_s3 + $0x60] sm:$0xff]  ;;  %v6474_v54 = vrot.slane %v6473_v59, 6  ;;  %v915_v31 = vsel %vm912_vm2, %v913_v0, %v914_v9 }
 0x263   : > { %4497 = vmatmul.msk.bf16.gmra.mxu2 %vm375_vm0, %v4639_v37  ;;  %4527 = vmatmul.msk.bf16.gmra.mxu3 %vm375_vm0, %v4639_v37 }
 0x264   : > { %v5526_v17 = vadd.f32 %v2040_v10, %v1907_v40  ;;  %3825 = vperm.xlu0 %4622, %v3727_v29  }
 0x266   : > { %6472 = vst [vmem:[#allocation7_spill] sm:$0xff] %v5526_v17  ;;  %v1284_v28 = vpop.f32.mrf.mxu2  ;;  %v1664_v36 = vpop.f32.mrf.mxu3 }
 0x267   : > { %v1810_v60 = vrot.slane %v1664_v36, 7  ;;  %v906_v4 = vpop.f32.mrf.mxu1  ;;  %v2045_v44 = vpop.f32.mrf.mxu0  ;;  %v1294_v42 = vrot.slane %v1284_v28, 7  ;;  %v6477_v36 = vld [vmem:[#allocation11_spill] sm:$0xff] }
 0x268   : > { %v916_v25 = vrot.slane %v906_v4, 6  ;;  %v1103_v4 = vadd.f32 %v915_v31, %v6477_v36  ;;  %v6483_v31 = vld [vmem:[#allocation19_spill] sm:$0xff] }
 0x269   : > { %v1811_v21 = vsel %vm1292_vm3, %v1808_v57, %v1810_v60  ;;  %v1295_v28 = vsel %vm1292_vm3, %v1293_v41, %v1294_v42 }
 0x26a   : > { %v1908_v38 = vadd.f32 %v1811_v21, %v1529_v49  ;;  %v1102_v10 = vsel %vm912_vm2, %v916_v25, %v6474_v54  ;;  %v917_v57 = vsel %vm912_vm2, %v914_v9, %v916_v25  ;;  %v1483_v0 = vadd.f32 %v1295_v28, %v1103_v4  ;;  %v6480_v54 = vld [vmem:[#allocation16_spill] sm:$0xff] }
 0x26b   : > { %v1105_v40 = vadd.f32 %v1102_v10, %v6475_v1  ;;  %v1104_v10 = vadd.f32 %v917_v57, %v6480_v54  ;;  %v6484_v1 = vrot.slane %v6483_v31, 7  ;;  %v4640_v54 = vld [vmem:[%s4723_s30 + $0x40] sm:$0xff] }
 0x26c   : > { %v5537_v37 = vadd.f32 %v2043_v16, %v1908_v38  ;;  %v6481_v38 = vld [vmem:[#allocation18_spill] sm:$0xff] }
 0x26d   : > { %v6482_v41 = vrot.slane %v6481_v38, 7 }
 0x26e   : > { %6476 = vst [vmem:[#allocation8_spill] sm:$0xff] %v5537_v37  ;;  %v1286_v17 = vpop.f32.mrf.mxu2  ;;  %v1666_v26 = vpop.f32.mrf.mxu3 }
 0x26f   : > { %v1296_v49 = vrot.slane %v1286_v17, 7  ;;  %v1670_v21 = vrot.slane %v1666_v26, 7  ;;  %v5542_v59 = vpop.f32.mrf.mxu1  ;;  %v5544_v29 = vpop.f32.mrf.mxu0  ;;  %v3728_v26 = vld [vmem:[%s6408_s3 + $0x68] sm:$0xff] }
 0x270   : > { %6478 = vst [vmem:[#allocation9_spill] sm:$0xff] %v5542_v59  ;;  %3830 = vperm.xlu1 %4623, %v3728_v26  }
 0x271   : > { %6479 = vst [vmem:[#allocation10_spill] sm:$0xff] %v5544_v29  ;;  %v1297_v16 = vsel %vm1292_vm3, %v1294_v42, %v1296_v49  ;;  %v1482_v9 = vsel %vm1292_vm3, %v1296_v49, %v6482_v41  ;;  %v1812_v25 = vsel %vm1292_vm3, %v1810_v60, %v1670_v21  ;;  %v1861_v17 = vsel %vm1292_vm3, %v1670_v21, %v6484_v1  ;;  %v6485_v60 = vld [vmem:[#allocation22_spill] sm:$0xff] }
 0x272   : > { %v1484_v36 = vadd.f32 %v1297_v16, %v1104_v10  ;;  %v1485_v28 = vadd.f32 %v1482_v9, %v1105_v40  ;;  %v1862_v4 = vadd.f32 %v1861_v17, %v1483_v0  ;;  %v1909_v57 = vadd.f32 %v1812_v25, %v1530_v48  ;;  %4468 = vmatmul.msk.bf16.gmra.mxu1 %vm375_vm0, %v4640_v54 }
 0x273   : > { %4498 = vmatmul.msk.bf16.gmra.mxu2 %vm375_vm0, %v4640_v54  ;;  %4528 = vmatmul.msk.bf16.gmra.mxu3 %vm375_vm0, %v4640_v54  ;;  %v6420_v48 = vrot.slane %v5544_v29, 3 }
 0x274   : > { %v5563_v42 = vadd.f32 %v6485_v60, %v1484_v36  ;;  %v5566_v49 = vadd.f32 %v5101_v43, %v1485_v28  ;;  %4558 = vmatmul.msk.bf16.gmra.mxu0 %vm375_vm0, %v4640_v54  ;;  %v5569_v21 = vadd.f32 %v2045_v44, %v1909_v57  ;;  %v3726_v43 = vld [vmem:[%s6408_s3 + $0x58] sm:$0xff] }
 0x275   : > { %3820 = vperm.xlu2 %4624, %v3726_v43   ;;  %v3730_v60 = vld [vmem:[%s6408_s3 + $0x78] sm:$0xff]  ;;  %v4641_v43 = vld [vmem:[%s4723_s30 + $0x48] sm:$0xff] }
 0x276   : > { %6486 = vst [vmem:[#allocation12_spill] sm:$0xff] %v5569_v21  ;;  %v5572_v40 = vpop.f32.mrf.mxu2  ;;  %v5574_v0 = vpop.f32.mrf.mxu3  ;;  %3840 = vperm.xlu0 %4622, %v3730_v60  }
 0x277   : > { %6487 = vst [vmem:[#allocation17_spill] sm:$0xff] %v5572_v40  ;;  %v5576_v10 = vpop.f32.mrf.mxu1  ;;  %v3255_v16 = vpop.f32.mrf.mxu0  ;;  %v6422_v25 = vrot.slane %v5572_v40, 1  ;;  %v6421_v31 = vrot.slane %v5574_v0, 2 }
 0x278   : > { %6488 = vst [vmem:[#allocation11_spill] sm:$0xff] %v5574_v0  ;;  %v3560_v38 = vrot.slane %v3255_v16, 3  ;;  %v3731_v0 = vld [vmem:[%s6408_s3 + $0x80] sm:$0xff] }
 0x279   : > { %3845 = vperm.xlu1 %4623, %v3731_v0  }
 0x27a   : > { %v5584_v44 = vsel %vm3419_vm4, %v6420_v48, %v3560_v38 }
 0x27b   : > { %6489 = vst [vmem:[#allocation16_spill] sm:$0xff] %v5584_v44 }
 0x27e   : > { %v2496_v41 = vpop.f32.mrf.mxu2  ;;  %v2875_v9 = vpop.f32.mrf.mxu3 }
 0x27f   : > { %v2800_v1 = vrot.slane %v2496_v41, 1  ;;  %v3180_v17 = vrot.slane %v2875_v9, 2  ;;  %v5588_v26 = vpop.f32.mrf.mxu1  ;;  %v3258_v36 = vpop.f32.mrf.mxu0 }
 0x280   : > { %v3420_v28 = vrot.slane %v3258_v36, 3  ;;  %v2286_v0 = vrot.slane %v5588_v26, 1  ;;  %v5646_v26 = vld [vmem:[%s6407_s2] ss:$0 sm:$0xff] }
 0x281   : > { %v5593_v57 = vsel %vm2282_vm6, %v6422_v25, %v2800_v1  ;;  %v5598_v54 = vsel %vm3039_vm5, %v6421_v31, %v3180_v17 }
 0x282   : > { %6490 = vst [vmem:[#allocation18_spill] sm:$0xff] %v5593_v57  ;;  %v5604_v16 = vsel %vm3419_vm4, %v3560_v38, %v3420_v28  ;;  %4469 = vmatmul.msk.bf16.gmra.mxu1 %vm375_vm0, %v4641_v43  ;;  %v2284_v38 = vrot.slane %v5576_v10, 1 }
 0x283   : > { %6491 = vst [vmem:[#allocation19_spill] sm:$0xff] %v5598_v54  ;;  %4499 = vmatmul.msk.bf16.gmra.mxu2 %vm375_vm0, %v4641_v43  ;;  %4529 = vmatmul.msk.bf16.gmra.mxu3 %vm375_vm0, %v4641_v43 }
 0x284   : > { %6492 = vst [vmem:[#allocation22_spill] sm:$0xff] %v5604_v16  ;;  %4559 = vmatmul.msk.bf16.gmra.mxu0 %vm375_vm0, %v4641_v43  ;;  %v6426_v43 = vrot.slane %v5542_v59, 1 }
 0x286   : > { %v2499_v41 = vpop.f32.mrf.mxu2  ;;  %v2878_v9 = vpop.f32.mrf.mxu3 }
 0x287   : > { %v2660_v36 = vrot.slane %v2499_v41, 1  ;;  %v3040_v48 = vrot.slane %v2878_v9, 2  ;;  %v5611_v31 = vpop.f32.mrf.mxu1  ;;  %v3260_v25 = vpop.f32.mrf.mxu0  ;;  %v2285_v41 = vsel %vm2282_vm6, %v6426_v43, %v2284_v38  ;;  %v6495_v9 = vld [vmem:[#allocation13_spill] sm:$0xff]  ;;  %v3729_v43 = vld [vmem:[%s6408_s3 + $0x70] sm:$0xff] }
 0x288   : > { %v2048_v10 = vadd.f32 %v6495_v9, %v1862_v4  ;;  %v4642_v4 = vld [vmem:[%s4723_s30 + $0x50] sm:$0xff]  ;;  %3835 = vperm.xlu2 %4624, %v3729_v43  }
 0x289   : > { %v5615_v29 = vsel %vm2282_vm6, %v2800_v1, %v2660_v36  ;;  %v5618_v60 = vsel %vm3039_vm5, %v3180_v17, %v3040_v48  ;;  %v6496_v43 = vld [vmem:[#allocation20_spill] sm:$0xff] }
 0x28a   : > { %6493 = vst [vmem:[#allocation24_spill] sm:$0xff] %v5615_v29  ;;  %v2428_v54 = vadd.f32 %v2285_v41, %v2048_v10  ;;  %v3421_v29 = vrot.slane %v3260_v25, 3 }
 0x28b   : > { %6494 = vst [vmem:[#allocation25_spill] sm:$0xff] %v5618_v60 }
 0x28e   : > { %v2501_v40 = vpop.f32.mrf.mxu2  ;;  %v2880_v1 = vpop.f32.mrf.mxu3 }
 0x28f   : > { %v2661_v16 = vrot.slane %v2501_v40, 1  ;;  %v3041_v44 = vrot.slane %v2880_v1, 2  ;;  %v5628_v17 = vpop.f32.mrf.mxu1  ;;  %v5630_v60 = vpop.f32.mrf.mxu0 }
 0x291   : > { %v2662_v57 = vsel %vm2282_vm6, %v2660_v36, %v2661_v16  ;;  %v3042_v40 = vsel %vm3039_vm5, %v3040_v48, %v3041_v44  ;;  %v3422_v36 = vsel %vm3419_vm4, %v3420_v28, %v3421_v29  ;;  %v2049_v48 = vadd.f32 %v6496_v43, %v5563_v42  ;;  %v3733_v42 = vld [vmem:[%s6408_s3 + $0x90] sm:$0xff] }
 0x292   : > { %v2807_v21 = vadd.f32 %v2662_v57, %v2428_v54  ;;  %4470 = vmatmul.msk.bf16.gmra.mxu1 %vm375_vm0, %v4642_v4  ;;  %v2287_v57 = vsel %vm2282_vm6, %v2284_v38, %v2286_v0  ;;  %v3766_v54 = vpop.permute.xlu0 %3765  ;;  %v2288_v38 = vrot.slane %v5611_v31, 1  ;;  %v3423_v28 = vrot.slane %v5630_v60, 3  ;;  %3855 = vperm.xlu0 %4622, %v3733_v42   ;;  %v6497_v31 = vld [vmem:[#allocation21_spill] sm:$0xff] }
 0x293   : > { %4500 = vmatmul.msk.bf16.gmra.mxu2 %vm375_vm0, %v4642_v4  ;;  %4530 = vmatmul.msk.bf16.gmra.mxu3 %vm375_vm0, %v4642_v4 }
 0x294   : > { %4560 = vmatmul.msk.bf16.gmra.mxu0 %vm375_vm0, %v4642_v4  ;;  %v3187_v25 = vadd.f32 %v3042_v40, %v2807_v21  ;;  %v2429_v40 = vadd.f32 %v2287_v57, %v2049_v48  ;;  %v2289_v57 = vsel %vm2282_vm6, %v2286_v0, %v2288_v38  ;;  %v3424_v48 = vsel %vm3419_vm4, %v3421_v29, %v3423_v28 }
 0x296   : > { %v2504_v41 = vpop.f32.mrf.mxu2  ;;  %v2883_v9 = vpop.f32.mrf.mxu3  ;;  %v3567_v10 = vadd.f32 %v3422_v36, %v3187_v25 }
 0x297   : > { %v2663_v1 = vrot.slane %v2504_v41, 1  ;;  %v3043_v37 = vrot.slane %v2883_v9, 2  ;;  %v5652_v4 = vpop.f32.mrf.mxu1  ;;  %v5654_v21 = vpop.f32.mrf.mxu0 }
 0x298   : > { %v3619_v59 = vadd.f32 %v5646_v26, %v3567_v10 }
 0x299   : > { %v2664_v51 = vsel %vm2282_vm6, %v2661_v16, %v2663_v1  ;;  %v3044_v43 = vsel %vm3039_vm5, %v3041_v44, %v3043_v37 }
 0x29a   : > { %v2808_v25 = vadd.f32 %v2664_v51, %v2429_v40  ;;  %v3667_v36 = vmax.f32 %v3619_v59, 0.0  ;;  %v2050_v51 = vadd.f32 %v6497_v31, %v5566_v49  ;;  %v3425_v49 = vrot.slane %v5654_v21, 3  ;;  %v4643_v31 = vld [vmem:[%s4723_s30 + $0x58] sm:$0xff] }
 0x29c   : > { %v3188_v41 = vadd.f32 %v3044_v43, %v2808_v25  ;;  %v4003_v9 = vmul.f32 %v3766_v54, %v3667_v36  ;;  %v2430_v40 = vadd.f32 %v2289_v57, %v2050_v51  ;;  %v2290_v25 = vrot.slane %v5628_v17, 1  ;;  %v3771_v43 = vpop.permute.xlu0 %3770  ;;  %v3776_v51 = vpop.permute.xlu1 %3775 }
 0x29e   : > { %v4051_v59 = vpack.c.bf16 %v4003_v9, %v4003_v9  ;;  %v2506_v16 = vpop.f32.mrf.mxu2  ;;  %v2885_v44 = vpop.f32.mrf.mxu3  ;;  %v3568_v60 = vadd.f32 %v3424_v48, %v3188_v41  ;;  %v3734_v41 = vld [vmem:[%s6408_s3 + $0x98] sm:$0xff]  ;;  %v2291_v21 = vsel %vm2282_vm6, %v2288_v38, %v2290_v25  ;;  %v2292_v38 = vrot.slane %v5652_v4, 1 }
 0x29f   : > { %v2665_v54 = vrot.slane %v2506_v16, 1  ;;  %v3045_v0 = vrot.slane %v2885_v44, 2  ;;  %v5675_v10 = vpop.f32.mrf.mxu1  ;;  %v5677_v29 = vpop.f32.mrf.mxu0  ;;  %3860 = vperm.xlu1 %4623, %v3734_v41  }
 0x2a0   : > { %4100 = vst.msk [vmem:[%s5671_s9] sm:$0xf] %vm4099_vm7, %v4051_v59  ;;  %v3620_v42 = vadd.f32 %v5646_v26, %v3568_v60  ;;  %v3426_v59 = vsel %vm3419_vm4, %v3423_v28, %v3425_v49  ;;  %v3427_v28 = vrot.slane %v5677_v29, 3 }
 0x2a1   : > { %v2666_v36 = vsel %vm2282_vm6, %v2663_v1, %v2665_v54  ;;  %v3046_v57 = vsel %vm3039_vm5, %v3043_v37, %v3045_v0 }
 0x2a2   : > { %v2809_v9 = vadd.f32 %v2666_v36, %v2430_v40  ;;  %v3668_v48 = vmax.f32 %v3620_v42, 0.0  ;;  %4471 = vmatmul.msk.bf16.gmra.mxu1 %vm375_vm0, %v4643_v31  ;;  %v3428_v4 = vsel %vm3419_vm4, %v3425_v49, %v3427_v28 }
 0x2a3   : > { %4501 = vmatmul.msk.bf16.gmra.mxu2 %vm375_vm0, %v4643_v31  ;;  %4531 = vmatmul.msk.bf16.gmra.mxu3 %vm375_vm0, %v4643_v31 }
 0x2a4   : > { %v4004_v17 = vmul.f32 %v3771_v43, %v3668_v48  ;;  %4561 = vmatmul.msk.bf16.gmra.mxu0 %vm375_vm0, %v4643_v31  ;;  %v3189_v1 = vadd.f32 %v3046_v57, %v2809_v9  ;;  %v2431_v43 = vadd.f32 %v2291_v21, %v6498_v45  ;;  %v3732_v31 = vld [vmem:[%s6408_s3 + $0x88] sm:$0xff] }
 0x2a5   : > { %3850 = vperm.xlu2 %4624, %v3732_v31   ;;  %v3737_v31 = vld [vmem:[%s6408_s3 + $0xb0] sm:$0xff] }
 0x2a6   : > { %v4052_v16 = vpack.c.bf16 %v4004_v17, %v4004_v17  ;;  %v2509_v44 = vpop.f32.mrf.mxu2  ;;  %v2888_v60 = vpop.f32.mrf.mxu3  ;;  %v3569_v40 = vadd.f32 %v3426_v59, %v3189_v1  ;;  %v2293_v59 = vsel %vm2282_vm6, %v2290_v25, %v2292_v38  ;;  %v2294_v25 = vrot.slane %v5675_v10, 1 }
 0x2a7   : > { %v2667_v42 = vrot.slane %v2509_v44, 1  ;;  %v3047_v37 = vrot.slane %v2888_v60, 2  ;;  %v5696_v36 = vpop.f32.mrf.mxu1  ;;  %v5698_v41 = vpop.f32.mrf.mxu0  ;;  %3875 = vperm.xlu1 %4623, %v3737_v31  }
 0x2a8   : > { %4101 = vst.msk [vmem:[%s5671_s9 + $0x4] sm:$0xf] %vm4099_vm7, %v4052_v16  ;;  %v3621_v9 = vadd.f32 %v5646_v26, %v3569_v40  ;;  %v3429_v49 = vrot.slane %v5698_v41, 3 }
 0x2a9   : > { %v2668_v48 = vsel %vm2282_vm6, %v2665_v54, %v2667_v42  ;;  %v3048_v45 = vsel %vm3039_vm5, %v3045_v0, %v3047_v37 }
 0x2aa   : > { %v2810_v57 = vadd.f32 %v2668_v48, %v2431_v43  ;;  %v3669_v17 = vmax.f32 %v3621_v9, 0.0  ;;  %v2432_v9 = vadd.f32 %v2293_v59, %v5123_v22  ;;  %v3781_v48 = vpop.permute.xlu1 %3780  ;;  %v3430_v59 = vsel %vm3419_vm4, %v3427_v28, %v3429_v49 }
 0x2ac   : > { %v3190_v1 = vadd.f32 %v3048_v45, %v2810_v57  ;;  %v4005_v21 = vmul.f32 %v3776_v51, %v3669_v17  ;;  %v3736_v57 = vld [vmem:[%s6408_s3 + $0xa8] sm:$0xff]  ;;  %v4644_v45 = vld [vmem:[%s4723_s30 + $0x60] sm:$0xff] }
 0x2ad   : > { %3870 = vperm.xlu0 %4622, %v3736_v57   ;;  %v3740_v57 = vld [vmem:[%s6408_s3 + $0xc8] sm:$0xff] }
 0x2ae   : > { %v4053_v16 = vpack.c.bf16 %v4005_v21, %v4005_v21  ;;  %v2511_v29 = vpop.f32.mrf.mxu2  ;;  %v2890_v44 = vpop.f32.mrf.mxu3  ;;  %v3570_v54 = vadd.f32 %v3428_v4, %v3190_v1  ;;  %v2295_v1 = vsel %vm2282_vm6, %v2292_v38, %v2294_v25  ;;  %v2296_v38 = vrot.slane %v5696_v36, 1 }
 0x2af   : > { %v2669_v60 = vrot.slane %v2511_v29, 1  ;;  %v3049_v40 = vrot.slane %v2890_v44, 2  ;;  %v5713_v2 = vpop.f32.mrf.mxu1  ;;  %v5715_v43 = vpop.f32.mrf.mxu0  ;;  %3890 = vperm.xlu1 %4623, %v3740_v57   ;;  %v3743_v57 = vld [vmem:[%s6408_s3 + $0xe0] sm:$0xff] }
 0x2b0   : > { %4102 = vst.msk [vmem:[%s5671_s9 + $0x8] sm:$0xf] %vm4099_vm7, %v4053_v16  ;;  %v3622_v0 = vadd.f32 %v5646_v26, %v3570_v54  ;;  %v3786_v21 = vpop.permute.xlu2 %3785  ;;  %v3431_v28 = vrot.slane %v5715_v43, 3  ;;  %v2297_v43 = vsel %vm2282_vm6, %v2294_v25, %v2296_v38  ;;  %v2298_v25 = vrot.slane %v5713_v2, 1  ;;  %v3742_v2 = vld [vmem:[%s6408_s3 + $0xd8] sm:$0xff] }
 0x2b1   : > { %v2670_v51 = vsel %vm2282_vm6, %v2667_v42, %v2669_v60  ;;  %v3050_v10 = vsel %vm3039_vm5, %v3047_v37, %v3049_v40 }
 0x2b2   : > { %v2811_v22 = vadd.f32 %v2670_v51, %v2432_v9  ;;  %v3670_v17 = vmax.f32 %v3622_v0, 0.0  ;;  %4472 = vmatmul.msk.bf16.gmra.mxu1 %vm375_vm0, %v4644_v45  ;;  %v2433_v51 = vadd.f32 %v2295_v1, %v5137_v24 }
 0x2b3   : > { %4502 = vmatmul.msk.bf16.gmra.mxu2 %vm375_vm0, %v4644_v45  ;;  %4532 = vmatmul.msk.bf16.gmra.mxu3 %vm375_vm0, %v4644_v45 }
 0x2b4   : > { %v4006_v42 = vmul.f32 %v3781_v48, %v3670_v17  ;;  %4562 = vmatmul.msk.bf16.gmra.mxu0 %vm375_vm0, %v4644_v45  ;;  %v3191_v41 = vadd.f32 %v3050_v10, %v2811_v22  ;;  %v3739_v22 = vld [vmem:[%s6408_s3 + $0xc0] sm:$0xff] }
 0x2b5   : > { %3885 = vperm.xlu0 %4622, %v3739_v22  }
 0x2b6   : > { %v4054_v4 = vpack.c.bf16 %v4006_v42, %v4006_v42  ;;  %v2514_v16 = vpop.f32.mrf.mxu2  ;;  %v2893_v29 = vpop.f32.mrf.mxu3  ;;  %v3571_v44 = vadd.f32 %v3430_v59, %v3191_v41 }
 0x2b7   : > { %v2671_v37 = vrot.slane %v2514_v16, 1  ;;  %v3051_v54 = vrot.slane %v2893_v29, 2  ;;  %v5738_v9 = vpop.f32.mrf.mxu1  ;;  %v5740_v0 = vpop.f32.mrf.mxu0  ;;  %3905 = vperm.xlu1 %4623, %v3743_v57   ;;  %v3746_v57 = vld [vmem:[%s6408_s3 + $0xf8] sm:$0xff] }
 0x2b8   : > { %4103 = vst.msk [vmem:[%s5671_s9 + $0xc] sm:$0xf] %vm4099_vm7, %v4054_v4  ;;  %v3623_v48 = vadd.f32 %v5646_v26, %v3571_v44 }
 0x2b9   : > { %v2672_v31 = vsel %vm2282_vm6, %v2669_v60, %v2671_v37  ;;  %v3052_v45 = vsel %vm3039_vm5, %v3049_v40, %v3051_v54  ;;  %v3432_v60 = vsel %vm3419_vm4, %v3429_v49, %v3431_v28  ;;  %v2434_v40 = vadd.f32 %v2297_v43, %v5143_v30 }
 0x2ba   : > { %v2812_v17 = vadd.f32 %v2672_v31, %v2433_v51  ;;  %v3671_v24 = vmax.f32 %v3623_v48, 0.0  ;;  %v3433_v49 = vrot.slane %v5740_v0, 3  ;;  %v3791_v48 = vpop.permute.xlu2 %3790  ;;  %v3735_v31 = vld [vmem:[%s6408_s3 + $0xa0] sm:$0xff] }
 0x2bb   : > { %3865 = vperm.xlu2 %4624, %v3735_v31   ;;  %v3738_v31 = vld [vmem:[%s6408_s3 + $0xb8] sm:$0xff] }
 0x2bc   : > { %v3192_v10 = vadd.f32 %v3052_v45, %v2812_v17  ;;  %v4007_v36 = vmul.f32 %v3786_v21, %v3671_v24  ;;  %v4645_v17 = vld [vmem:[%s4723_s30 + $0x68] sm:$0xff]  ;;  %v2299_v45 = vsel %vm2282_vm6, %v2296_v38, %v2298_v25  ;;  %v2300_v38 = vrot.slane %v5738_v9, 1  ;;  %v3745_v9 = vld [vmem:[%s6408_s3 + $0xf0] sm:$0xff] }
 0x2bd   : > { %3900 = vperm.xlu0 %4622, %v3742_v2  }
 0x2be   : > { %v4055_v42 = vpack.c.bf16 %v4007_v36, %v4007_v36  ;;  %v2516_v41 = vpop.f32.mrf.mxu2  ;;  %v2895_v1 = vpop.f32.mrf.mxu3  ;;  %v3572_v59 = vadd.f32 %v3432_v60, %v3192_v10  ;;  %v3434_v10 = vsel %vm3419_vm4, %v3431_v28, %v3433_v49 }
 0x2bf   : > { %v2673_v4 = vrot.slane %v2516_v41, 1  ;;  %v3053_v16 = vrot.slane %v2895_v1, 2  ;;  %v5758_v29 = vpop.f32.mrf.mxu1  ;;  %v5760_v44 = vpop.f32.mrf.mxu0  ;;  %3920 = vperm.xlu1 %4623, %v3746_v57   ;;  %v4646_v57 = vld [vmem:[%s4723_s30 + $0x70] sm:$0xff] }
 0x2c0   : > { %4104 = vst.msk [vmem:[%s5671_s9 + $0x10] sm:$0xf] %vm4099_vm7, %v4055_v42  ;;  %v3624_v21 = vadd.f32 %v5646_v26, %v3572_v59  ;;  %v3435_v28 = vrot.slane %v5760_v44, 3 }
 0x2c1   : > { %v2674_v51 = vsel %vm2282_vm6, %v2671_v37, %v2673_v4  ;;  %v3054_v37 = vsel %vm3039_vm5, %v3051_v54, %v3053_v16 }
 0x2c2   : > { %v2813_v30 = vadd.f32 %v2674_v51, %v2434_v40  ;;  %v3672_v22 = vmax.f32 %v3624_v21, 0.0  ;;  %4473 = vmatmul.msk.bf16.gmra.mxu1 %vm375_vm0, %v4645_v17  ;;  %v2435_v40 = vadd.f32 %v2299_v45, %v5157_v56  ;;  %v3436_v2 = vsel %vm3419_vm4, %v3433_v49, %v3435_v28 }
 0x2c3   : > { %4503 = vmatmul.msk.bf16.gmra.mxu2 %vm375_vm0, %v4645_v17  ;;  %4533 = vmatmul.msk.bf16.gmra.mxu3 %vm375_vm0, %v4645_v17  ;;  %v2302_v49 = vrot.slane %v5758_v29, 1  ;;  %v3748_v29 = vld [vmem:[%s6408_s3 + $0x108] sm:$0xff] }
 0x2c4   : > { %v4008_v0 = vmul.f32 %v3791_v48, %v3672_v22  ;;  %4563 = vmatmul.msk.bf16.gmra.mxu0 %vm375_vm0, %v4645_v17  ;;  %v3193_v24 = vadd.f32 %v3054_v37, %v2813_v30  ;;  %v3796_v48 = vpop.permute.xlu0 %3795  ;;  %3880 = vperm.xlu2 %4624, %v3738_v31   ;;  %v2301_v17 = vsel %vm2282_vm6, %v2298_v25, %v2300_v38 }
 0x2c5   : > { %3915 = vperm.xlu0 %4622, %v3745_v9  }
 0x2c6   : > { %v4056_v36 = vpack.c.bf16 %v4008_v0, %v4008_v0  ;;  %v2519_v43 = vpop.f32.mrf.mxu2  ;;  %v2898_v60 = vpop.f32.mrf.mxu3  ;;  %v3573_v42 = vadd.f32 %v3434_v10, %v3193_v24 }
 0x2c7   : > { %v2675_v54 = vrot.slane %v2519_v43, 1  ;;  %v3055_v41 = vrot.slane %v2898_v60, 2  ;;  %v5786_v1 = vpop.f32.mrf.mxu1  ;;  %v5788_v59 = vpop.f32.mrf.mxu0 }
 0x2c8   : > { %4105 = vst.msk [vmem:[%s5671_s9 + $0x14] sm:$0xf] %vm4099_vm7, %v4056_v36  ;;  %v3625_v21 = vadd.f32 %v5646_v26, %v3573_v42  ;;  %v3437_v42 = vrot.slane %v5788_v59, 3 }
 0x2c9   : > { %v2676_v51 = vsel %vm2282_vm6, %v2673_v4, %v2675_v54  ;;  %v3056_v44 = vsel %vm3039_vm5, %v3053_v16, %v3055_v41  ;;  %v2436_v16 = vadd.f32 %v2301_v17, %v5163_v7 }
 0x2ca   : > { %v2814_v56 = vadd.f32 %v2676_v51, %v2435_v40  ;;  %v3673_v30 = vmax.f32 %v3625_v21, 0.0  ;;  %v3801_v21 = vpop.permute.xlu1 %3800  ;;  %v3741_v51 = vld [vmem:[%s6408_s3 + $0xd0] sm:$0xff]  ;;  %v3438_v9 = vsel %vm3419_vm4, %v3435_v28, %v3437_v42 }
 0x2cc   : > { %v3194_v4 = vadd.f32 %v3056_v44, %v2814_v56  ;;  %v4009_v22 = vmul.f32 %v3796_v48, %v3673_v30  ;;  %v3749_v48 = vld [vmem:[%s6408_s3 + $0x110] sm:$0xff]  ;;  %3895 = vperm.xlu2 %4624, %v3741_v51   ;;  %v2303_v30 = vsel %vm2282_vm6, %v2300_v38, %v2302_v49  ;;  %v2304_v38 = vrot.slane %v5786_v1, 1  ;;  %v3751_v1 = vld [vmem:[%s6408_s3 + $0x120] sm:$0xff] }
 0x2cd   : > { %3935 = vperm.xlu1 %4623, %v3749_v48   ;;  %3930 = vperm.xlu0 %4622, %v3748_v29  }
 0x2ce   : > { %v4057_v37 = vpack.c.bf16 %v4009_v22, %v4009_v22  ;;  %v2521_v0 = vpop.f32.mrf.mxu2  ;;  %v2900_v24 = vpop.f32.mrf.mxu3  ;;  %v3574_v45 = vadd.f32 %v3436_v2, %v3194_v4 }
 0x2cf   : > { %v2677_v10 = vrot.slane %v2521_v0, 1  ;;  %v3057_v36 = vrot.slane %v2900_v24, 2  ;;  %v5809_v43 = vpop.f32.mrf.mxu1  ;;  %v5811_v60 = vpop.f32.mrf.mxu0  ;;  %v2437_v24 = vadd.f32 %v2303_v30, %v5177_v61 }
 0x2d0   : > { %4106 = vst.msk [vmem:[%s5671_s9 + $0x18] sm:$0xf] %vm4099_vm7, %v4057_v37  ;;  %v3626_v25 = vadd.f32 %v5646_v26, %v3574_v45  ;;  %v3439_v28 = vrot.slane %v5811_v60, 3 }
 0x2d1   : > { %v2678_v40 = vsel %vm2282_vm6, %v2675_v54, %v2677_v10  ;;  %v3058_v54 = vsel %vm3039_vm5, %v3055_v41, %v3057_v36 }
 0x2d2   : > { %v2815_v7 = vadd.f32 %v2678_v40, %v2436_v16  ;;  %v3674_v31 = vmax.f32 %v3626_v25, 0.0  ;;  %4474 = vmatmul.msk.bf16.gmra.mxu1 %vm375_vm0, %v4646_v57  ;;  %v3806_v25 = vpop.permute.xlu2 %3805  ;;  %v3744_v40 = vld [vmem:[%s6408_s3 + $0xe8] sm:$0xff] }
 0x2d3   : > { %4504 = vmatmul.msk.bf16.gmra.mxu2 %vm375_vm0, %v4646_v57  ;;  %4534 = vmatmul.msk.bf16.gmra.mxu3 %vm375_vm0, %v4646_v57 }
 0x2d4   : > { %v4010_v59 = vmul.f32 %v3801_v21, %v3674_v31  ;;  %4564 = vmatmul.msk.bf16.gmra.mxu0 %vm375_vm0, %v4646_v57  ;;  %v3195_v56 = vadd.f32 %v3058_v54, %v2815_v7  ;;  %v3752_v21 = vld [vmem:[%s6408_s3 + $0x128] sm:$0xff]  ;;  %3910 = vperm.xlu2 %4624, %v3744_v40   ;;  %v2305_v7 = vsel %vm2282_vm6, %v2302_v49, %v2304_v38 }
 0x2d5   : > { %3950 = vperm.xlu1 %4623, %v3752_v21   ;;  %v3440_v31 = vsel %vm3419_vm4, %v3437_v42, %v3439_v28  ;;  %3945 = vperm.xlu0 %4622, %v3751_v1   ;;  %v2306_v42 = vrot.slane %v5809_v43, 1  ;;  %v3754_v43 = vld [vmem:[%s6408_s3 + $0x138] sm:$0xff] }
 0x2d6   : > { %v4058_v44 = vpack.c.bf16 %v4010_v59, %v4010_v59  ;;  %v2524_v4 = vpop.f32.mrf.mxu2  ;;  %v2903_v22 = vpop.f32.mrf.mxu3  ;;  %v3575_v17 = vadd.f32 %v3438_v9, %v3195_v56 }
 0x2d7   : > { %v2679_v41 = vrot.slane %v2524_v4, 1  ;;  %v3059_v2 = vrot.slane %v2903_v22, 2  ;;  %v5837_v37 = vpop.f32.mrf.mxu1  ;;  %v5839_v0 = vpop.f32.mrf.mxu0  ;;  %v2307_v21 = vsel %vm2282_vm6, %v2304_v38, %v2306_v42 }
 0x2d8   : > { %4107 = vst.msk [vmem:[%s5671_s9 + $0x1c] sm:$0xf] %vm4099_vm7, %v4058_v44  ;;  %v3627_v45 = vadd.f32 %v5646_v26, %v3575_v17  ;;  %v3441_v4 = vrot.slane %v5839_v0, 3  ;;  %v3811_v17 = vpop.permute.xlu0 %3810  ;;  %v2308_v38 = vrot.slane %v5837_v37, 1  ;;  %v3757_v37 = vld [vmem:[%s6408_s3 + $0x150] sm:$0xff] }
 0x2d9   : > { %v2680_v16 = vsel %vm2282_vm6, %v2677_v10, %v2679_v41  ;;  %v3060_v60 = vsel %vm3039_vm5, %v3057_v36, %v3059_v2  ;;  %v2438_v36 = vadd.f32 %v2305_v7, %v5183_v11 }
 0x2da   : > { %v2816_v61 = vadd.f32 %v2680_v16, %v2437_v24  ;;  %v3675_v51 = vmax.f32 %v3627_v45, 0.0  ;;  %v3747_v24 = vld [vmem:[%s6408_s3 + $0x100] sm:$0xff] }
 0x2db   : > { %v3755_v45 = vld [vmem:[%s6408_s3 + $0x140] sm:$0xff] }
 0x2dc   : > { %v3196_v10 = vadd.f32 %v3060_v60, %v2816_v61  ;;  %v4011_v48 = vmul.f32 %v3806_v25, %v3675_v51  ;;  %v4647_v25 = vld [vmem:[%s4723_s30 + $0x78] sm:$0xff]  ;;  %3925 = vperm.xlu2 %4624, %v3747_v24   ;;  %v3442_v61 = vsel %vm3419_vm4, %v3439_v28, %v3441_v4  ;;  %v2309_v24 = vsel %vm2282_vm6, %v2306_v42, %v2308_v38 }
 0x2dd   : > { %3965 = vperm.xlu1 %4623, %v3755_v45   ;;  %3960 = vperm.xlu0 %4622, %v3754_v43  }
 0x2de   : > { %v4059_v57 = vpack.c.bf16 %v4011_v48, %v4011_v48  ;;  %v2526_v29 = vpop.f32.mrf.mxu2  ;;  %v2905_v54 = vpop.f32.mrf.mxu3  ;;  %v3576_v59 = vadd.f32 %v3440_v31, %v3196_v10 }
 0x2df   : > { %v2681_v56 = vrot.slane %v2526_v29, 1  ;;  %v3061_v30 = vrot.slane %v2905_v54, 2  ;;  %v5860_v9 = vpop.f32.mrf.mxu1  ;;  %v5862_v44 = vpop.f32.mrf.mxu0 }
 0x2e0   : > { %4108 = vst.msk [vmem:[%s5671_s9 + $0x20] sm:$0xf] %vm4099_vm7, %v4059_v57  ;;  %v3628_v49 = vadd.f32 %v5646_v26, %v3576_v59  ;;  %v2439_v57 = vadd.f32 %v2307_v21, %v5197_v53  ;;  %v3443_v28 = vrot.slane %v5862_v44, 3  ;;  %v3816_v59 = vpop.permute.xlu1 %3815  ;;  %v2440_v21 = vadd.f32 %v2309_v24, %v5203_v15  ;;  %v3761_v15 = vld [vmem:[%s6408_s3 + $0x170] sm:$0xff] }
 0x2e1   : > { %v2682_v22 = vsel %vm2282_vm6, %v2679_v41, %v2681_v56  ;;  %v3062_v41 = vsel %vm3039_vm5, %v3059_v2, %v3061_v30  ;;  %v2310_v42 = vrot.slane %v5860_v9, 1  ;;  %v3760_v9 = vld [vmem:[%s6408_s3 + $0x168] sm:$0xff] }
 0x2e2   : > { %v2817_v11 = vadd.f32 %v2682_v22, %v2438_v36  ;;  %v3676_v16 = vmax.f32 %v3628_v49, 0.0  ;;  %4475 = vmatmul.msk.bf16.gmra.mxu1 %vm375_vm0, %v4647_v25  ;;  %v3750_v36 = vld [vmem:[%s6408_s3 + $0x118] sm:$0xff]  ;;  %v3444_v45 = vsel %vm3419_vm4, %v3441_v4, %v3443_v28 }
 0x2e3   : > { %4505 = vmatmul.msk.bf16.gmra.mxu2 %vm375_vm0, %v4647_v25  ;;  %4535 = vmatmul.msk.bf16.gmra.mxu3 %vm375_vm0, %v4647_v25  ;;  %v3758_v49 = vld [vmem:[%s6408_s3 + $0x158] sm:$0xff] }
 0x2e4   : > { %v4012_v0 = vmul.f32 %v3811_v17, %v3676_v16  ;;  %4565 = vmatmul.msk.bf16.gmra.mxu0 %vm375_vm0, %v4647_v25  ;;  %v3197_v40 = vadd.f32 %v3062_v41, %v2817_v11  ;;  %3940 = vperm.xlu2 %4624, %v3750_v36  }
 0x2e5   : > { %3980 = vperm.xlu1 %4623, %v3758_v49   ;;  %3975 = vperm.xlu0 %4622, %v3757_v37  }
 0x2e6   : > { %v4060_v51 = vpack.c.bf16 %v4012_v0, %v4012_v0  ;;  %v2529_v1 = vpop.f32.mrf.mxu2  ;;  %v2908_v60 = vpop.f32.mrf.mxu3  ;;  %v3577_v10 = vadd.f32 %v3442_v61, %v3197_v40 }
 0x2e7   : > { %v2683_v2 = vrot.slane %v2529_v1, 1  ;;  %v3063_v48 = vrot.slane %v2908_v60, 2  ;;  %v5888_v7 = vpop.f32.mrf.mxu1  ;;  %v5890_v31 = vpop.f32.mrf.mxu0  ;;  %v3753_v60 = vld [vmem:[%s6408_s3 + $0x130] sm:$0xff] }
 0x2e8   : > { %4109 = vst.msk [vmem:[%s5671_s9 + $0x24] sm:$0xf] %vm4099_vm7, %v4060_v51  ;;  %v3629_v29 = vadd.f32 %v5646_v26, %v3577_v10  ;;  %v3445_v4 = vrot.slane %v5890_v31, 3  ;;  %v3821_v1 = vpop.permute.xlu2 %3820 }
 0x2e9   : > { %v2684_v54 = vsel %vm2282_vm6, %v2681_v56, %v2683_v2  ;;  %v3064_v44 = vsel %vm3039_vm5, %v3061_v30, %v3063_v48 }
 0x2ea   : > { %v2818_v53 = vadd.f32 %v2684_v54, %v2439_v57  ;;  %v3677_v22 = vmax.f32 %v3629_v29, 0.0  ;;  %v4648_v29 = vld [vmem:[%s4723_s30 + $0x80] sm:$0xff]  ;;  %v3446_v36 = vsel %vm3419_vm4, %v3443_v28, %v3445_v4 }
 0x2ec   : > { %v3198_v56 = vadd.f32 %v3064_v44, %v2818_v53  ;;  %v4013_v17 = vmul.f32 %v3816_v59, %v3677_v22  ;;  %3955 = vperm.xlu2 %4624, %v3753_v60   ;;  %v2311_v59 = vsel %vm2282_vm6, %v2308_v38, %v2310_v42 }
 0x2ed   : > { %3995 = vperm.xlu1 %4623, %v3761_v15   ;;  %3990 = vperm.xlu0 %4622, %v3760_v9  }
 0x2ee   : > { %v4061_v11 = vpack.c.bf16 %v4013_v17, %v4013_v17  ;;  %v2531_v16 = vpop.f32.mrf.mxu2  ;;  %v2910_v25 = vpop.f32.mrf.mxu3  ;;  %v3578_v43 = vadd.f32 %v3444_v45, %v3198_v56  ;;  %v2441_v17 = vadd.f32 %v2311_v59, %v5217_v63  ;;  %v2312_v45 = vrot.slane %v5888_v7, 1  ;;  %v3759_v59 = vld [vmem:[%s6408_s3 + $0x160] sm:$0xff] }
 0x2ef   : > { %v2685_v41 = vrot.slane %v2531_v16, 1  ;;  %v3065_v0 = vrot.slane %v2910_v25, 2  ;;  %v5911_v40 = vpop.f32.mrf.mxu1  ;;  %v3826_v16 = vpop.permute.xlu0 %3825  ;;  %v3756_v25 = vld [vmem:[%s6408_s3 + $0x148] sm:$0xff] }
 0x2f0   : > { %4110 = vst.msk [vmem:[%s5671_s9 + $0x28] sm:$0xf] %vm4099_vm7, %v4061_v11  ;;  %v3630_v30 = vadd.f32 %v5646_v26, %v3578_v43  ;;  %v2313_v7 = vsel %vm2282_vm6, %v2310_v42, %v2312_v45 }
 0x2f1   : > { %v2686_v61 = vsel %vm2282_vm6, %v2683_v2, %v2685_v41  ;;  %v5920_v51 = vpop.f32.mrf.mxu0  ;;  %v3066_v2 = vsel %vm3039_vm5, %v3063_v48, %v3065_v0  ;;  %v2442_v9 = vadd.f32 %v2313_v7, %v5223_v19  ;;  %v4649_v19 = vld [vmem:[%s4723_s30 + $0x88] sm:$0xff]  ;;  %v3762_v7 = vld [vmem:[%s6408_s3 + $0x178] sm:$0xff] }
 0x2f2   : > { %v2819_v10 = vadd.f32 %v2686_v61, %v2440_v21  ;;  %v3678_v57 = vmax.f32 %v3630_v30, 0.0  ;;  %4476 = vmatmul.msk.bf16.gmra.mxu1 %vm375_vm0, %v4648_v29  ;;  %v3447_v38 = vrot.slane %v5920_v51, 3 }
 0x2f3   : > { %4506 = vmatmul.msk.bf16.gmra.mxu2 %vm375_vm0, %v4648_v29  ;;  %4536 = vmatmul.msk.bf16.gmra.mxu3 %vm375_vm0, %v4648_v29 }
 0x2f4   : > { %v4014_v31 = vmul.f32 %v3821_v1, %v3678_v57  ;;  %4566 = vmatmul.msk.bf16.gmra.mxu0 %vm375_vm0, %v4648_v29  ;;  %v3199_v54 = vadd.f32 %v3066_v2, %v2819_v10  ;;  %3970 = vperm.xlu2 %4624, %v3756_v25   ;;  %v3448_v51 = vsel %vm3419_vm4, %v3445_v4, %v3447_v38  ;;  %v2314_v2 = vrot.slane %v5911_v40, 1 }
 0x2f6   : > { %v4062_v49 = vpack.c.bf16 %v4014_v31, %v4014_v31  ;;  %v2534_v53 = vpop.f32.mrf.mxu2  ;;  %v2913_v22 = vpop.f32.mrf.mxu3  ;;  %v3579_v37 = vadd.f32 %v3446_v36, %v3199_v54 }
 0x2f7   : > { %v2687_v48 = vrot.slane %v2534_v53, 1  ;;  %v3067_v44 = vrot.slane %v2913_v22, 2  ;;  %v5939_v56 = vpop.f32.mrf.mxu1  ;;  %v3831_v54 = vpop.permute.xlu1 %3830 }
 0x2f8   : > { %4111 = vst.msk [vmem:[%s5671_s9 + $0x2c] sm:$0xf] %vm4099_vm7, %v4062_v49  ;;  %v3631_v24 = vadd.f32 %v5646_v26, %v3579_v37  ;;  %v2315_v37 = vsel %vm2282_vm6, %v2312_v45, %v2314_v2 }
 0x2f9   : > { %v2688_v28 = vsel %vm2282_vm6, %v2685_v41, %v2687_v48  ;;  %v5948_v11 = vpop.f32.mrf.mxu0  ;;  %v3068_v21 = vsel %vm3039_vm5, %v3065_v0, %v3067_v44 }
 0x2fa   : > { %v2820_v43 = vadd.f32 %v2688_v28, %v2441_v17  ;;  %v3679_v63 = vmax.f32 %v3631_v24, 0.0  ;;  %v3449_v42 = vrot.slane %v5948_v11, 3 }
 0x2fc   : > { %v3200_v30 = vadd.f32 %v3068_v21, %v2820_v43  ;;  %v4015_v61 = vmul.f32 %v3826_v16, %v3679_v63  ;;  %3985 = vperm.xlu2 %4624, %v3759_v59   ;;  %v2443_v43 = vadd.f32 %v2315_v37, %v5237_v12  ;;  %v2316_v21 = vrot.slane %v5939_v56, 1  ;;  %v4650_v37 = vld [vmem:[%s4723_s30 + $0x90] sm:$0xff] }
 0x2fe   : > { %v4063_v41 = vpack.c.bf16 %v4015_v61, %v4015_v61  ;;  %v2536_v1 = vpop.f32.mrf.mxu2  ;;  %v2915_v60 = vpop.f32.mrf.mxu3  ;;  %v3580_v15 = vadd.f32 %v3448_v51, %v3200_v30  ;;  %v2317_v56 = vsel %vm2282_vm6, %v2314_v2, %v2316_v21 }
 0x2ff   : > { %v2689_v10 = vrot.slane %v2536_v1, 1  ;;  %v3069_v57 = vrot.slane %v2915_v60, 2  ;;  %v5956_v29 = vpop.f32.mrf.mxu1  ;;  %v3836_v61 = vpop.permute.xlu2 %3835 }
 0x300   : > { %4112 = vst.msk [vmem:[%s5671_s9 + $0x30] sm:$0xf] %vm4099_vm7, %v4063_v41  ;;  %v3632_v0 = vadd.f32 %v5646_v26, %v3580_v15 }
 0x301   : > { %v2690_v4 = vsel %vm2282_vm6, %v2687_v48, %v2689_v10  ;;  %v5965_v31 = vpop.f32.mrf.mxu0  ;;  %v3070_v53 = vsel %vm3039_vm5, %v3067_v44, %v3069_v57  ;;  %v3450_v48 = vsel %vm3419_vm4, %v3447_v38, %v3449_v42 }
 0x302   : > { %v2821_v36 = vadd.f32 %v2690_v4, %v2442_v9  ;;  %v3680_v49 = vmax.f32 %v3632_v0, 0.0  ;;  %4477 = vmatmul.msk.bf16.gmra.mxu1 %vm375_vm0, %v4649_v19  ;;  %v3451_v45 = vrot.slane %v5965_v31, 3 }
 0x303   : > { %4507 = vmatmul.msk.bf16.gmra.mxu2 %vm375_vm0, %v4649_v19  ;;  %4537 = vmatmul.msk.bf16.gmra.mxu3 %vm375_vm0, %v4649_v19 }
 0x304   : > { %v4016_v40 = vmul.f32 %v3831_v54, %v3680_v49  ;;  %4567 = vmatmul.msk.bf16.gmra.mxu0 %vm375_vm0, %v4649_v19  ;;  %v3201_v22 = vadd.f32 %v3070_v53, %v2821_v36  ;;  %4000 = vperm.xlu2 %4624, %v3762_v7   ;;  %v3452_v15 = vsel %vm3419_vm4, %v3449_v42, %v3451_v45  ;;  %v2318_v49 = vrot.slane %v5956_v29, 1  ;;  %v3841_v53 = vpop.permute.xlu0 %3840 }
 0x305   : > { %v2444_v36 = vadd.f32 %v2317_v56, %v5243_v23 }
 0x306   : > { %v4064_v17 = vpack.c.bf16 %v4016_v40, %v4016_v40  ;;  %v2539_v24 = vpop.f32.mrf.mxu2  ;;  %v2918_v28 = vpop.f32.mrf.mxu3  ;;  %v3581_v11 = vadd.f32 %v3450_v48, %v3201_v22 }
 0x307   : > { %v2691_v16 = vrot.slane %v2539_v24, 1  ;;  %v3071_v25 = vrot.slane %v2918_v28, 2  ;;  %v5978_v44 = vpop.f32.mrf.mxu1 }
 0x308   : > { %4113 = vst.msk [vmem:[%s5671_s9 + $0x34] sm:$0xf] %vm4099_vm7, %v4064_v17  ;;  %v3633_v63 = vadd.f32 %v5646_v26, %v3581_v11  ;;  %v2319_v17 = vsel %vm2282_vm6, %v2316_v21, %v2318_v49  ;;  %v2320_v7 = vrot.slane %v5978_v44, 1 }
 0x309   : > { %v2692_v38 = vsel %vm2282_vm6, %v2689_v10, %v2691_v16  ;;  %v3300_v30 = vpop.f32.mrf.mxu0  ;;  %v3072_v12 = vsel %vm3039_vm5, %v3069_v57, %v3071_v25 }
 0x30a   : > { %v2822_v51 = vadd.f32 %v2692_v38, %v2443_v43  ;;  %v3681_v41 = vmax.f32 %v3633_v63, 0.0  ;;  %v3453_v2 = vrot.slane %v3300_v30, 3  ;;  %v2445_v30 = vadd.f32 %v2319_v17, %v5257_v52 }
 0x30b   : > { %v2321_v52 = vsel %vm2282_vm6, %v2318_v49, %v2320_v7 }
 0x30c   : > { %v3202_v1 = vadd.f32 %v3072_v12, %v2822_v51  ;;  %v4017_v60 = vmul.f32 %v3836_v61, %v3681_v41  ;;  %v3454_v24 = vsel %vm3419_vm4, %v3451_v45, %v3453_v2  ;;  %v3846_v41 = vpop.permute.xlu1 %3845 }
 0x30e   : > { %v4065_v9 = vpack.c.bf16 %v4017_v60, %v4017_v60  ;;  %v2541_v10 = vpop.f32.mrf.mxu2  ;;  %v2920_v0 = vpop.f32.mrf.mxu3  ;;  %v3582_v4 = vadd.f32 %v3452_v15, %v3202_v1 }
 0x30f   : > { %v2693_v31 = vrot.slane %v2541_v10, 1  ;;  %v3073_v54 = vrot.slane %v2920_v0, 2  ;;  %v5993_v59 = vpop.f32.mrf.mxu1 }
 0x310   : > { %4114 = vst.msk [vmem:[%s5671_s9 + $0x38] sm:$0xf] %vm4099_vm7, %v4065_v9  ;;  %v3634_v57 = vadd.f32 %v5646_v26, %v3582_v4 }
 0x311   : > { %v2694_v42 = vsel %vm2282_vm6, %v2691_v16, %v2693_v31  ;;  %v6001_v19 = vpop.f32.mrf.mxu0  ;;  %v3074_v48 = vsel %vm3039_vm5, %v3071_v25, %v3073_v54 }
 0x312   : > { %v2823_v40 = vadd.f32 %v2694_v42, %v2444_v36  ;;  %v3682_v22 = vmax.f32 %v3634_v57, 0.0  ;;  %4478 = vmatmul.msk.bf16.gmra.mxu1 %vm375_vm0, %v4650_v37  ;;  %v3455_v21 = vrot.slane %v6001_v19, 3  ;;  %v2446_v42 = vadd.f32 %v2321_v52, %v5263_v39 }
 0x313   : > { %4508 = vmatmul.msk.bf16.gmra.mxu2 %vm375_vm0, %v4650_v37  ;;  %4538 = vmatmul.msk.bf16.gmra.mxu3 %vm375_vm0, %v4650_v37  ;;  %v2322_v19 = vrot.slane %v5993_v59, 1 }
 0x314   : > { %v4018_v23 = vmul.f32 %v3841_v53, %v3682_v22  ;;  %4568 = vmatmul.msk.bf16.gmra.mxu0 %vm375_vm0, %v4650_v37  ;;  %v3203_v29 = vadd.f32 %v3074_v48, %v2823_v40  ;;  %v3456_v9 = vsel %vm3419_vm4, %v3453_v2, %v3455_v21  ;;  %v3851_v40 = vpop.permute.xlu2 %3850  ;;  %v4651_v48 = vld [vmem:[%s4723_s30 + $0x98] sm:$0xff] }
 0x316   : > { %v4066_v28 = vpack.c.bf16 %v4018_v23, %v4018_v23  ;;  %v2544_v11 = vpop.f32.mrf.mxu2  ;;  %v2923_v16 = vpop.f32.mrf.mxu3  ;;  %v3583_v43 = vadd.f32 %v3454_v24, %v3203_v29  ;;  %v2323_v29 = vsel %vm2282_vm6, %v2320_v7, %v2322_v19 }
 0x317   : > { %v2695_v63 = vrot.slane %v2544_v11, 1  ;;  %v3075_v38 = vrot.slane %v2923_v16, 2  ;;  %v6011_v25 = vpop.f32.mrf.mxu1 }
 0x318   : > { %4115 = vst.msk [vmem:[%s5671_s9 + $0x3c] sm:$0xf] %vm4099_vm7, %v4066_v28  ;;  %v3635_v61 = vadd.f32 %v5646_v26, %v3583_v43 }
 0x319   : > { %v2696_v45 = vsel %vm2282_vm6, %v2693_v31, %v2695_v63  ;;  %v3305_v51 = vpop.f32.mrf.mxu0  ;;  %v3076_v60 = vsel %vm3039_vm5, %v3073_v54, %v3075_v38 }
 0x31a   : > { %v2824_v12 = vadd.f32 %v2696_v45, %v2445_v30  ;;  %v3683_v1 = vmax.f32 %v3635_v61, 0.0  ;;  %v3457_v49 = vrot.slane %v3305_v51, 3  ;;  %v2447_v30 = vadd.f32 %v2323_v29, %v5274_v34 }
 0x31b   : > { %v2324_v45 = vrot.slane %v6011_v25, 1 }
 0x31c   : > { %v3204_v56 = vadd.f32 %v3076_v60, %v2824_v12  ;;  %v4019_v15 = vmul.f32 %v3846_v41, %v3683_v1  ;;  %v3458_v17 = vsel %vm3419_vm4, %v3455_v21, %v3457_v49  ;;  %v3856_v41 = vpop.permute.xlu0 %3855 }
 0x31d   : > { %v2325_v34 = vsel %vm2282_vm6, %v2322_v19, %v2324_v45 }
 0x31e   : > { %v4067_v10 = vpack.c.bf16 %v4019_v15, %v4019_v15  ;;  %v2546_v0 = vpop.f32.mrf.mxu2  ;;  %v2925_v44 = vpop.f32.mrf.mxu3  ;;  %v3584_v4 = vadd.f32 %v3456_v9, %v3204_v56 }
 0x31f   : > { %v2697_v36 = vrot.slane %v2546_v0, 1  ;;  %v3077_v31 = vrot.slane %v2925_v44, 2  ;;  %v6023_v57 = vpop.f32.mrf.mxu1 }
 0x320   : > { %4116 = vst.msk [vmem:[%s5671_s9 + $0x40] sm:$0xf] %vm4099_vm7, %v4067_v10  ;;  %v3636_v54 = vadd.f32 %v5646_v26, %v3584_v4 }
 0x321   : > { %v2698_v2 = vsel %vm2282_vm6, %v2695_v63, %v2697_v36  ;;  %v6031_v53 = vpop.f32.mrf.mxu0  ;;  %v3078_v23 = vsel %vm3039_vm5, %v3075_v38, %v3077_v31 }
 0x322   : > { %v2825_v22 = vadd.f32 %v2698_v2, %v2446_v42  ;;  %v3684_v37 = vmax.f32 %v3636_v54, 0.0  ;;  %4479 = vmatmul.msk.bf16.gmra.mxu1 %vm375_vm0, %v4651_v48  ;;  %v3459_v7 = vrot.slane %v6031_v53, 3  ;;  %v2326_v54 = vrot.slane %v6023_v57, 1  ;;  %v3861_v53 = vpop.permute.xlu1 %3860 }
 0x323   : > { %4509 = vmatmul.msk.bf16.gmra.mxu2 %vm375_vm0, %v4651_v48  ;;  %4539 = vmatmul.msk.bf16.gmra.mxu3 %vm375_vm0, %v4651_v48 }
 0x324   : > { %v4020_v39 = vmul.f32 %v3851_v40, %v3684_v37  ;;  %4569 = vmatmul.msk.bf16.gmra.mxu0 %vm375_vm0, %v4651_v48  ;;  %v3205_v59 = vadd.f32 %v3078_v23, %v2825_v22  ;;  %v3460_v52 = vsel %vm3419_vm4, %v3457_v49, %v3459_v7  ;;  %v2327_v23 = vsel %vm2282_vm6, %v2324_v45, %v2326_v54 }
 0x326   : > { %v4068_v24 = vpack.c.bf16 %v4020_v39, %v4020_v39  ;;  %v2549_v28 = vpop.f32.mrf.mxu2  ;;  %v2928_v11 = vpop.f32.mrf.mxu3  ;;  %v3585_v16 = vadd.f32 %v3458_v17, %v3205_v59 }
 0x327   : > { %v2699_v43 = vrot.slane %v2549_v28, 1  ;;  %v3079_v63 = vrot.slane %v2928_v11, 2  ;;  %v6041_v38 = vpop.f32.mrf.mxu1 }
 0x328   : > { %4117 = vst.msk [vmem:[%s5671_s9 + $0x44] sm:$0xf] %vm4099_vm7, %v4068_v24  ;;  %v3637_v61 = vadd.f32 %v5646_v26, %v3585_v16 }
 0x329   : > { %v2700_v21 = vsel %vm2282_vm6, %v2697_v36, %v2699_v43  ;;  %v3310_v51 = vpop.f32.mrf.mxu0  ;;  %v3080_v60 = vsel %vm3039_vm5, %v3077_v31, %v3079_v63  ;;  %v2448_v36 = vadd.f32 %v2325_v34, %v5280_v5  ;;  %v6061_v31 = vld [vmem:[%s6407_s2] ss:$0 sm:$0xff] }
 0x32a   : > { %v2826_v12 = vadd.f32 %v2700_v21, %v2447_v30  ;;  %v3685_v1 = vmax.f32 %v3637_v61, 0.0  ;;  %v3461_v19 = vrot.slane %v3310_v51, 3  ;;  %v4653_v5 = vld [vmem:[%s4723_s30 + $0xa0] sm:$0xff]  ;;  %v2328_v30 = vrot.slane %v6041_v38, 1  ;;  %v3866_v21 = vpop.permute.xlu2 %3865 }
 0x32c   : > { %v3206_v56 = vadd.f32 %v3080_v60, %v2826_v12  ;;  %v4021_v15 = vmul.f32 %v3856_v41, %v3685_v1  ;;  %v3462_v39 = vsel %vm3419_vm4, %v3459_v7, %v3461_v19 }
 0x32e   : > { %v4069_v26 = vpack.c.bf16 %v4021_v15, %v4021_v15  ;;  %v2551_v9 = vpop.f32.mrf.mxu2  ;;  %v2930_v25 = vpop.f32.mrf.mxu3  ;;  %v3586_v10 = vadd.f32 %v3460_v52, %v3206_v56 }
 0x32f   : > { %v2701_v0 = vrot.slane %v2551_v9, 1  ;;  %v3081_v44 = vrot.slane %v2930_v25, 2  ;;  %v6053_v4 = vpop.f32.mrf.mxu1 }
 0x330   : > { %4118 = vst.msk [vmem:[%s5671_s9 + $0x48] sm:$0xf] %vm4099_vm7, %v4069_v26  ;;  %v3638_v42 = vadd.f32 %v6061_v31, %v3586_v10 }
 0x331   : > { %v2702_v49 = vsel %vm2282_vm6, %v2699_v43, %v2701_v0  ;;  %v6066_v2 = vpop.f32.mrf.mxu0  ;;  %v3082_v37 = vsel %vm3039_vm5, %v3079_v63, %v3081_v44  ;;  %v2449_v43 = vadd.f32 %v2327_v23, %v5291_v14  ;;  %v2329_v14 = vsel %vm2282_vm6, %v2326_v54, %v2328_v30 }
 0x332   : > { %v2827_v40 = vadd.f32 %v2702_v49, %v2448_v36  ;;  %v3686_v22 = vmax.f32 %v3638_v42, 0.0  ;;  %4480 = vmatmul.msk.bf16.gmra.mxu1 %vm375_vm0, %v4653_v5  ;;  %v3463_v61 = vrot.slane %v6066_v2, 3  ;;  %v2450_v10 = vadd.f32 %v2329_v14, %v5297_v35 }
 0x333   : > { %4510 = vmatmul.msk.bf16.gmra.mxu2 %vm375_vm0, %v4653_v5  ;;  %4540 = vmatmul.msk.bf16.gmra.mxu3 %vm375_vm0, %v4653_v5 }
 0x334   : > { %v4022_v48 = vmul.f32 %v3861_v53, %v3686_v22  ;;  %4570 = vmatmul.msk.bf16.gmra.mxu0 %vm375_vm0, %v4653_v5  ;;  %v3207_v57 = vadd.f32 %v3082_v37, %v2827_v40  ;;  %v3464_v56 = vsel %vm3419_vm4, %v3461_v19, %v3463_v61  ;;  %v3871_v19 = vpop.permute.xlu0 %3870  ;;  %v4654_v53 = vld [vmem:[%s4723_s30 + $0xa8] sm:$0xff] }
 0x336   : > { %v4070_v59 = vpack.c.bf16 %v4022_v48, %v4022_v48  ;;  %v2554_v29 = vpop.f32.mrf.mxu2  ;;  %v2933_v17 = vpop.f32.mrf.mxu3  ;;  %v3587_v24 = vadd.f32 %v3462_v39, %v3207_v57 }
 0x337   : > { %v2703_v28 = vrot.slane %v2554_v29, 1  ;;  %v3083_v11 = vrot.slane %v2933_v17, 2  ;;  %v6076_v16 = vpop.f32.mrf.mxu1 }
 0x338   : > { %4119 = vst.msk [vmem:[%s5671_s9 + $0x4c] sm:$0xf] %vm4099_vm7, %v4070_v59  ;;  %v3639_v63 = vadd.f32 %v6061_v31, %v3587_v24 }
 0x339   : > { %v2704_v45 = vsel %vm2282_vm6, %v2701_v0, %v2703_v28  ;;  %v3315_v7 = vpop.f32.mrf.mxu0  ;;  %v3084_v12 = vsel %vm3039_vm5, %v3081_v44, %v3083_v11  ;;  %v2330_v44 = vrot.slane %v6053_v4, 1 }
 0x33a   : > { %v2828_v51 = vadd.f32 %v2704_v45, %v2449_v43  ;;  %v3687_v41 = vmax.f32 %v3639_v63, 0.0  ;;  %v3465_v36 = vrot.slane %v3315_v7, 3  ;;  %v3876_v45 = vpop.permute.xlu1 %3875 }
 0x33b   : > { %v2331_v22 = vsel %vm2282_vm6, %v2328_v30, %v2330_v44 }
 0x33c   : > { %v3208_v1 = vadd.f32 %v3084_v12, %v2828_v51  ;;  %v4023_v60 = vmul.f32 %v3866_v21, %v3687_v41  ;;  %v3466_v5 = vsel %vm3419_vm4, %v3463_v61, %v3465_v36  ;;  %v2451_v17 = vadd.f32 %v2331_v22, %v5308_v18 }
 0x33e   : > { %v4071_v15 = vpack.c.bf16 %v4023_v60, %v4023_v60  ;;  %v2556_v34 = vpop.f32.mrf.mxu2  ;;  %v2935_v38 = vpop.f32.mrf.mxu3  ;;  %v3588_v52 = vadd.f32 %v3464_v56, %v3208_v1 }
 0x33f   : > { %v2705_v26 = vrot.slane %v2556_v34, 1  ;;  %v3085_v9 = vrot.slane %v2935_v38, 2  ;;  %v6088_v25 = vpop.f32.mrf.mxu1 }
 0x340   : > { %4120 = vst.msk [vmem:[%s5671_s9 + $0x50] sm:$0xf] %vm4099_vm7, %v4071_v15  ;;  %v3640_v0 = vadd.f32 %v6061_v31, %v3588_v52  ;;  %v2334_v52 = vrot.slane %v6088_v25, 1 }
 0x341   : > { %v2706_v42 = vsel %vm2282_vm6, %v2703_v28, %v2705_v26  ;;  %v6096_v54 = vpop.f32.mrf.mxu0  ;;  %v3086_v40 = vsel %vm3039_vm5, %v3083_v11, %v3085_v9  ;;  %v2332_v28 = vrot.slane %v6076_v16, 1 }
 0x342   : > { %v2829_v49 = vadd.f32 %v2706_v42, %v2450_v10  ;;  %v3688_v2 = vmax.f32 %v3640_v0, 0.0  ;;  %4481 = vmatmul.msk.bf16.gmra.mxu1 %vm375_vm0, %v4654_v53  ;;  %v3467_v11 = vrot.slane %v6096_v54, 3  ;;  %v3881_v42 = vpop.permute.xlu2 %3880 }
 0x343   : > { %4511 = vmatmul.msk.bf16.gmra.mxu2 %vm375_vm0, %v4654_v53  ;;  %4541 = vmatmul.msk.bf16.gmra.mxu3 %vm375_vm0, %v4654_v53  ;;  %v2333_v18 = vsel %vm2282_vm6, %v2330_v44, %v2332_v28 }
 0x344   : > { %v3209_v35 = vadd.f32 %v3086_v40, %v2829_v49  ;;  %v4024_v4 = vmul.f32 %v3871_v19, %v3688_v2  ;;  %4571 = vmatmul.msk.bf16.gmra.mxu0 %vm375_vm0, %v4654_v53  ;;  %v3468_v41 = vsel %vm3419_vm4, %v3465_v36, %v3467_v11  ;;  %v2452_v34 = vadd.f32 %v2333_v18, %v5314_v47  ;;  %v4655_v36 = vld [vmem:[%s4723_s30 + $0xb0] sm:$0xff] }
 0x345   : > { %v2335_v19 = vsel %vm2282_vm6, %v2332_v28, %v2334_v52  ;;  %v3886_v28 = vpop.permute.xlu0 %3885 }
 0x346   : > { %v3589_v37 = vadd.f32 %v3466_v5, %v3209_v35  ;;  %v4072_v48 = vpack.c.bf16 %v4024_v4, %v4024_v4  ;;  %v2559_v57 = vpop.f32.mrf.mxu2  ;;  %v2938_v23 = vpop.f32.mrf.mxu3 }
 0x347   : > { %v2707_v39 = vrot.slane %v2559_v57, 1  ;;  %v3087_v59 = vrot.slane %v2938_v23, 2  ;;  %v6106_v29 = vpop.f32.mrf.mxu1 }
 0x348   : > { %v3641_v24 = vadd.f32 %v6061_v31, %v3589_v37  ;;  %4121 = vst.msk [vmem:[%s5671_s9 + $0x54] sm:$0xf] %vm4099_vm7, %v4072_v48  ;;  %v2453_v37 = vadd.f32 %v2335_v19, %v5325_v46  ;;  %v2336_v57 = vrot.slane %v6106_v29, 1 }
 0x349   : > { %v2708_v43 = vsel %vm2282_vm6, %v2705_v26, %v2707_v39  ;;  %v3320_v63 = vpop.f32.mrf.mxu0  ;;  %v3088_v7 = vsel %vm3039_vm5, %v3085_v9, %v3087_v59 }
 0x34a   : > { %v3689_v30 = vmax.f32 %v3641_v24, 0.0  ;;  %v2830_v61 = vadd.f32 %v2708_v43, %v2451_v17  ;;  %v3469_v26 = vrot.slane %v3320_v63, 3  ;;  %v2337_v46 = vsel %vm2282_vm6, %v2334_v52, %v2336_v57  ;;  %v3891_v52 = vpop.permute.xlu1 %3890 }
 0x34c   : > { %v4025_v21 = vmul.f32 %v3876_v45, %v3689_v30  ;;  %v3210_v51 = vadd.f32 %v3088_v7, %v2830_v61  ;;  %v3470_v49 = vsel %vm3419_vm4, %v3467_v11, %v3469_v26 }
 0x34e   : > { %v4073_v12 = vpack.c.bf16 %v4025_v21, %v4025_v21  ;;  %v3590_v16 = vadd.f32 %v3468_v41, %v3210_v51  ;;  %v2561_v1 = vpop.f32.mrf.mxu2  ;;  %v2940_v60 = vpop.f32.mrf.mxu3  ;;  %v2454_v41 = vadd.f32 %v2337_v46, %v5331_v32 }
 0x34f   : > { %v2709_v14 = vrot.slane %v2561_v1, 1  ;;  %v3089_v56 = vrot.slane %v2940_v60, 2  ;;  %v6118_v15 = vpop.f32.mrf.mxu1 }
 0x350   : > { %4122 = vst.msk [vmem:[%s5671_s9 + $0x58] sm:$0xf] %vm4099_vm7, %v4073_v12  ;;  %v3642_v38 = vadd.f32 %v6061_v31, %v3590_v16  ;;  %v2338_v16 = vrot.slane %v6118_v15, 1 }
 0x351   : > { %v2710_v9 = vsel %vm2282_vm6, %v2707_v39, %v2709_v14  ;;  %v6126_v10 = vpop.f32.mrf.mxu0  ;;  %v3090_v54 = vsel %vm3039_vm5, %v3087_v59, %v3089_v56 }
 0x352   : > { %v3690_v0 = vmax.f32 %v3642_v38, 0.0  ;;  %v2831_v44 = vadd.f32 %v2710_v9, %v2452_v34  ;;  %4482 = vmatmul.msk.bf16.gmra.mxu1 %vm375_vm0, %v4655_v36  ;;  %v3471_v23 = vrot.slane %v6126_v10, 3  ;;  %v4656_v38 = vld [vmem:[%s4723_s30 + $0xb8] sm:$0xff]  ;;  %v2339_v15 = vsel %vm2282_vm6, %v2336_v57, %v2338_v16 }
 0x353   : > { %4512 = vmatmul.msk.bf16.gmra.mxu2 %vm375_vm0, %v4655_v36  ;;  %4542 = vmatmul.msk.bf16.gmra.mxu3 %vm375_vm0, %v4655_v36  ;;  %v2455_v19 = vadd.f32 %v2339_v15, %v5342_v33 }
 0x354   : > { %v4026_v47 = vmul.f32 %v3881_v42, %v3690_v0  ;;  %v3211_v25 = vadd.f32 %v3090_v54, %v2831_v44  ;;  %4572 = vmatmul.msk.bf16.gmra.mxu0 %vm375_vm0, %v4655_v36  ;;  %v3472_v30 = vsel %vm3419_vm4, %v3469_v26, %v3471_v23 }
 0x356   : > { %v4074_v2 = vpack.c.bf16 %v4026_v47, %v4026_v47  ;;  %v3591_v53 = vadd.f32 %v3470_v49, %v3211_v25  ;;  %v2564_v40 = vpop.f32.mrf.mxu2  ;;  %v2943_v35 = vpop.f32.mrf.mxu3 }
 0x357   : > { %v2711_v4 = vrot.slane %v2564_v40, 1  ;;  %v3091_v22 = vrot.slane %v2943_v35, 2  ;;  %v6136_v5 = vpop.f32.mrf.mxu1 }
 0x358   : > { %4123 = vst.msk [vmem:[%s5671_s9 + $0x5c] sm:$0xf] %vm4099_vm7, %v4074_v2  ;;  %v3643_v48 = vadd.f32 %v6061_v31, %v3591_v53  ;;  %v2340_v2 = vrot.slane %v6136_v5, 1 }
 0x359   : > { %v2712_v39 = vsel %vm2282_vm6, %v2709_v14, %v2711_v4  ;;  %v3325_v59 = vpop.f32.mrf.mxu0  ;;  %v3092_v11 = vsel %vm3039_vm5, %v3089_v56, %v3091_v22 }
 0x35a   : > { %v3691_v17 = vmax.f32 %v3643_v48, 0.0  ;;  %v2832_v24 = vadd.f32 %v2712_v39, %v2453_v37  ;;  %v3473_v1 = vrot.slane %v3325_v59, 3  ;;  %v3896_v37 = vpop.permute.xlu2 %3895  ;;  %v2341_v33 = vsel %vm2282_vm6, %v2338_v16, %v2340_v2 }
 0x35c   : > { %v4027_v43 = vmul.f32 %v3886_v28, %v3691_v17  ;;  %v3212_v63 = vadd.f32 %v3092_v11, %v2832_v24  ;;  %v3474_v10 = vsel %vm3419_vm4, %v3471_v23, %v3473_v1 }
 0x35e   : > { %v4075_v61 = vpack.c.bf16 %v4027_v43, %v4027_v43  ;;  %v3592_v29 = vadd.f32 %v3472_v30, %v3212_v63  ;;  %v2566_v45 = vpop.f32.mrf.mxu2  ;;  %v2945_v7 = vpop.f32.mrf.mxu3  ;;  %v2456_v63 = vadd.f32 %v2341_v33, %v5348_v13 }
 0x35f   : > { %v2713_v21 = vrot.slane %v2566_v45, 1  ;;  %v3093_v51 = vrot.slane %v2945_v7, 2  ;;  %v6148_v18 = vpop.f32.mrf.mxu1 }
 0x360   : > { %4124 = vst.msk [vmem:[%s5671_s9 + $0x60] sm:$0xf] %vm4099_vm7, %v4075_v61  ;;  %v3644_v12 = vadd.f32 %v6061_v31, %v3592_v29  ;;  %v2342_v30 = vrot.slane %v6148_v18, 1 }
 0x361   : > { %v2714_v60 = vsel %vm2282_vm6, %v2711_v4, %v2713_v21  ;;  %v3328_v14 = vpop.f32.mrf.mxu0  ;;  %v3094_v26 = vsel %vm3039_vm5, %v3091_v22, %v3093_v51 }
 0x362   : > { %v3692_v56 = vmax.f32 %v3644_v12, 0.0  ;;  %v2833_v34 = vadd.f32 %v2714_v60, %v2454_v41  ;;  %4483 = vmatmul.msk.bf16.gmra.mxu1 %vm375_vm0, %v4656_v38  ;;  %v3475_v53 = vrot.slane %v3328_v14, 3  ;;  %v2343_v13 = vsel %vm2282_vm6, %v2340_v2, %v2342_v30 }
 0x363   : > { %4513 = vmatmul.msk.bf16.gmra.mxu2 %vm375_vm0, %v4656_v38  ;;  %4543 = vmatmul.msk.bf16.gmra.mxu3 %vm375_vm0, %v4656_v38 }
 0x364   : > { %v4028_v32 = vmul.f32 %v3891_v52, %v3692_v56  ;;  %v3213_v9 = vadd.f32 %v3094_v26, %v2833_v34  ;;  %4573 = vmatmul.msk.bf16.gmra.mxu0 %vm375_vm0, %v4656_v38  ;;  %v3476_v39 = vsel %vm3419_vm4, %v3473_v1, %v3475_v53  ;;  %v2457_v26 = vadd.f32 %v2343_v13, %v5359_v20 }
 0x366   : > { %v4076_v0 = vpack.c.bf16 %v4028_v32, %v4028_v32  ;;  %v3593_v44 = vadd.f32 %v3474_v10, %v3213_v9  ;;  %v2569_v36 = vpop.f32.mrf.mxu2  ;;  %v2948_v42 = vpop.f32.mrf.mxu3 }
 0x367   : > { %v2715_v54 = vrot.slane %v2569_v36, 1  ;;  %v3095_v47 = vrot.slane %v2948_v42, 2  ;;  %v6164_v25 = vpop.f32.mrf.mxu1  ;;  %v3906_v42 = vpop.permute.xlu1 %3905 }
 0x368   : > { %4125 = vst.msk [vmem:[%s5671_s9 + $0x64] sm:$0xf] %vm4099_vm7, %v4076_v0  ;;  %v3645_v49 = vadd.f32 %v6061_v31, %v3593_v44  ;;  %v2344_v9 = vrot.slane %v6164_v25, 1 }
 0x369   : > { %v2716_v40 = vsel %vm2282_vm6, %v2713_v21, %v2715_v54  ;;  %v3330_v35 = vpop.f32.mrf.mxu0  ;;  %v3096_v48 = vsel %vm3039_vm5, %v3093_v51, %v3095_v47  ;;  %v3901_v51 = vpop.permute.xlu0 %3900 }
 0x36a   : > { %v3693_v4 = vmax.f32 %v3645_v49, 0.0  ;;  %v2834_v22 = vadd.f32 %v2716_v40, %v2455_v19  ;;  %v3477_v61 = vrot.slane %v3330_v35, 3  ;;  %v2345_v20 = vsel %vm2282_vm6, %v2342_v30, %v2344_v9 }
 0x36c   : > { %v4029_v57 = vmul.f32 %v3896_v37, %v3693_v4  ;;  %v3214_v23 = vadd.f32 %v3096_v48, %v2834_v22  ;;  %v3478_v1 = vsel %vm3419_vm4, %v3475_v53, %v3477_v61  ;;  %v2458_v37 = vadd.f32 %v2345_v20, %v5365_v8 }
 0x36e   : > { %v4077_v59 = vpack.c.bf16 %v4029_v57, %v4029_v57  ;;  %v3594_v17 = vadd.f32 %v3476_v39, %v3214_v23  ;;  %v2571_v24 = vpop.f32.mrf.mxu2  ;;  %v2950_v5 = vpop.f32.mrf.mxu3 }
 0x36f   : > { %v2717_v28 = vrot.slane %v2571_v24, 1  ;;  %v3097_v11 = vrot.slane %v2950_v5, 2  ;;  %v6175_v43 = vpop.f32.mrf.mxu1  ;;  %v3911_v24 = vpop.permute.xlu2 %3910 }
 0x370   : > { %4126 = vst.msk [vmem:[%s5671_s9 + $0x68] sm:$0xf] %vm4099_vm7, %v4077_v59  ;;  %v3646_v46 = vadd.f32 %v6061_v31, %v3594_v17  ;;  %v2346_v57 = vrot.slane %v6175_v43, 1 }
 0x371   : > { %v2718_v29 = vsel %vm2282_vm6, %v2715_v54, %v2717_v28  ;;  %v3333_v45 = vpop.f32.mrf.mxu0  ;;  %v3098_v41 = vsel %vm3039_vm5, %v3095_v47, %v3097_v11 }
 0x372   : > { %v3694_v7 = vmax.f32 %v3646_v46, 0.0  ;;  %v2835_v21 = vadd.f32 %v2718_v29, %v2456_v63  ;;  %v3479_v15 = vrot.slane %v3333_v45, 3  ;;  %v2347_v8 = vsel %vm2282_vm6, %v2344_v9, %v2346_v57 }
 0x374   : > { %v4030_v12 = vmul.f32 %v3901_v51, %v3694_v7  ;;  %v3215_v16 = vadd.f32 %v3098_v41, %v2835_v21  ;;  %v3480_v49 = vsel %vm3419_vm4, %v3477_v61, %v3479_v15  ;;  %v2459_v21 = vadd.f32 %v2347_v8, %v5376_v6 }
 0x376   : > { %v4078_v60 = vpack.c.bf16 %v4030_v12, %v4030_v12  ;;  %v3595_v14 = vadd.f32 %v3478_v1, %v3215_v16  ;;  %v2574_v56 = vpop.f32.mrf.mxu2  ;;  %v2953_v18 = vpop.f32.mrf.mxu3 }
 0x377   : > { %v2719_v34 = vrot.slane %v2574_v56, 1  ;;  %v3099_v38 = vrot.slane %v2953_v18, 2  ;;  %v6186_v52 = vpop.f32.mrf.mxu1 }
 0x378   : > { %4127 = vst.msk [vmem:[%s5671_s9 + $0x6c] sm:$0xf] %vm4099_vm7, %v4078_v60  ;;  %v3647_v32 = vadd.f32 %v6061_v31, %v3595_v14  ;;  %v2348_v41 = vrot.slane %v6186_v52, 1  ;;  %v3916_v14 = vpop.permute.xlu0 %3915 }
 0x379   : > { %v2720_v10 = vsel %vm2282_vm6, %v2717_v28, %v2719_v34  ;;  %v3335_v0 = vpop.f32.mrf.mxu0  ;;  %v3100_v54 = vsel %vm3039_vm5, %v3097_v11, %v3099_v38 }
 0x37a   : > { %v3695_v44 = vmax.f32 %v3647_v32, 0.0  ;;  %v2836_v36 = vadd.f32 %v2720_v10, %v2457_v26  ;;  %v3481_v23 = vrot.slane %v3335_v0, 3  ;;  %v2349_v6 = vsel %vm2282_vm6, %v2346_v57, %v2348_v41 }
 0x37c   : > { %v4031_v47 = vmul.f32 %v3906_v42, %v3695_v44  ;;  %v3216_v19 = vadd.f32 %v3100_v54, %v2836_v36  ;;  %v3482_v63 = vsel %vm3419_vm4, %v3479_v15, %v3481_v23  ;;  %v2460_v44 = vadd.f32 %v2349_v6, %v5382_v50 }
 0x37e   : > { %v4079_v2 = vpack.c.bf16 %v4031_v47, %v4031_v47  ;;  %v3596_v53 = vadd.f32 %v3480_v49, %v3216_v19  ;;  %v2576_v40 = vpop.f32.mrf.mxu2  ;;  %v2955_v25 = vpop.f32.mrf.mxu3 }
 0x37f   : > { %v2721_v35 = vrot.slane %v2576_v40, 1  ;;  %v3101_v4 = vrot.slane %v2955_v25, 2  ;;  %v6197_v22 = vpop.f32.mrf.mxu1 }
 0x380   : > { %4128 = vst.msk [vmem:[%s5671_s9 + $0x70] sm:$0xf] %vm4099_vm7, %v4079_v2  ;;  %v3648_v48 = vadd.f32 %v6061_v31, %v3596_v53  ;;  %v2350_v42 = vrot.slane %v6197_v22, 1  ;;  %v3921_v2 = vpop.permute.xlu1 %3920  ;;  %v3931_v6 = vpop.permute.xlu0 %3930 }
 0x381   : > { %v2722_v33 = vsel %vm2282_vm6, %v2719_v34, %v2721_v35  ;;  %v3338_v39 = vpop.f32.mrf.mxu0  ;;  %v3102_v5 = vsel %vm3039_vm5, %v3099_v38, %v3101_v4 }
 0x382   : > { %v3696_v59 = vmax.f32 %v3648_v48, 0.0  ;;  %v2837_v17 = vadd.f32 %v2722_v33, %v2458_v37  ;;  %v3483_v12 = vrot.slane %v3338_v39, 3  ;;  %v2351_v50 = vsel %vm2282_vm6, %v2348_v41, %v2350_v42 }
 0x383   : > { %v2461_v39 = vadd.f32 %v2351_v50, %v5393_v27 }
 0x384   : > { %v4032_v28 = vmul.f32 %v3911_v24, %v3696_v59  ;;  %v3217_v11 = vadd.f32 %v3102_v5, %v2837_v17  ;;  %v3484_v38 = vsel %vm3419_vm4, %v3481_v23, %v3483_v12 }
 0x386   : > { %v4080_v46 = vpack.c.bf16 %v4032_v28, %v4032_v28  ;;  %v3597_v30 = vadd.f32 %v3482_v63, %v3217_v11  ;;  %v2579_v61 = vpop.f32.mrf.mxu2  ;;  %v2958_v43 = vpop.f32.mrf.mxu3 }
 0x387   : > { %v2723_v29 = vrot.slane %v2579_v61, 1  ;;  %v3103_v45 = vrot.slane %v2958_v43, 2  ;;  %v6208_v7 = vpop.f32.mrf.mxu1  ;;  %v3926_v63 = vpop.permute.xlu2 %3925 }
 0x388   : > { %4129 = vst.msk [vmem:[%s5671_s9 + $0x74] sm:$0xf] %vm4099_vm7, %v4080_v46  ;;  %v3649_v51 = vadd.f32 %v6061_v31, %v3597_v30  ;;  %v2352_v17 = vrot.slane %v6208_v7, 1 }
 0x389   : > { %v2724_v16 = vsel %vm2282_vm6, %v2721_v35, %v2723_v29  ;;  %v3340_v13 = vpop.f32.mrf.mxu0  ;;  %v3104_v56 = vsel %vm3039_vm5, %v3101_v4, %v3103_v45 }
 0x38a   : > { %v3697_v1 = vmax.f32 %v3649_v51, 0.0  ;;  %v2838_v60 = vadd.f32 %v2724_v16, %v2459_v21  ;;  %v3485_v54 = vrot.slane %v3340_v13, 3  ;;  %v2353_v27 = vsel %vm2282_vm6, %v2350_v42, %v2352_v17 }
 0x38b   : > { %v2462_v16 = vadd.f32 %v2353_v27, %v5402_v62 }
 0x38c   : > { %v4033_v18 = vmul.f32 %v3916_v14, %v3697_v1  ;;  %v3218_v34 = vadd.f32 %v3104_v56, %v2838_v60  ;;  %v3486_v35 = vsel %vm3419_vm4, %v3483_v12, %v3485_v54 }
 0x38e   : > { %v4081_v26 = vpack.c.bf16 %v4033_v18, %v4033_v18  ;;  %v3598_v32 = vadd.f32 %v3484_v38, %v3218_v34  ;;  %v2581_v9 = vpop.f32.mrf.mxu2  ;;  %v2960_v52 = vpop.f32.mrf.mxu3 }
 0x38f   : > { %v2725_v15 = vrot.slane %v2581_v9, 1  ;;  %v3105_v10 = vrot.slane %v2960_v52, 2  ;;  %v6219_v0 = vpop.f32.mrf.mxu1 }
 0x390   : > { %4130 = vst.msk [vmem:[%s5671_s9 + $0x78] sm:$0xf] %vm4099_vm7, %v4081_v26  ;;  %v3650_v36 = vadd.f32 %v6061_v31, %v3598_v32  ;;  %v2354_v1 = vrot.slane %v6219_v0, 1 }
 0x391   : > { %v2726_v47 = vsel %vm2282_vm6, %v2723_v29, %v2725_v15  ;;  %v3343_v19 = vpop.f32.mrf.mxu0  ;;  %v3106_v53 = vsel %vm3039_vm5, %v3103_v45, %v3105_v10 }
 0x392   : > { %v3698_v20 = vmax.f32 %v3650_v36, 0.0  ;;  %v2839_v49 = vadd.f32 %v2726_v47, %v2460_v44  ;;  %v3487_v24 = vrot.slane %v3343_v19, 3  ;;  %v2355_v62 = vsel %vm2282_vm6, %v2352_v17, %v2354_v1 }
 0x394   : > { %v4034_v40 = vmul.f32 %v3921_v2, %v3698_v20  ;;  %v3219_v25 = vadd.f32 %v3106_v53, %v2839_v49  ;;  %v3488_v43 = vsel %vm3419_vm4, %v3485_v54, %v3487_v24  ;;  %v2463_v54 = vadd.f32 %v2355_v62, %v5416_v58 }
 0x396   : > { %v4082_v4 = vpack.c.bf16 %v4034_v40, %v4034_v40  ;;  %v3599_v37 = vadd.f32 %v3486_v35, %v3219_v25  ;;  %v2584_v48 = vpop.f32.mrf.mxu2  ;;  %v2963_v22 = vpop.f32.mrf.mxu3 }
 0x397   : > { %v2727_v57 = vrot.slane %v2584_v48, 1  ;;  %v3107_v23 = vrot.slane %v2963_v22, 2  ;;  %v6230_v33 = vpop.f32.mrf.mxu1  ;;  %v3936_v25 = vpop.permute.xlu1 %3935 }
 0x398   : > { %4131 = vst.msk [vmem:[%s5671_s9 + $0x7c] sm:$0xf] %vm4099_vm7, %v4082_v4  ;;  %v3651_v59 = vadd.f32 %v6061_v31, %v3599_v37  ;;  %v2356_v19 = vrot.slane %v6230_v33, 1 }
 0x399   : > { %v2728_v5 = vsel %vm2282_vm6, %v2725_v15, %v2727_v57  ;;  %v3345_v28 = vpop.f32.mrf.mxu0  ;;  %v3108_v46 = vsel %vm3039_vm5, %v3105_v10, %v3107_v23 }
 0x39a   : > { %v3699_v11 = vmax.f32 %v3651_v59, 0.0  ;;  %v2840_v8 = vadd.f32 %v2728_v5, %v2461_v39  ;;  %v3489_v60 = vrot.slane %v3345_v28, 3  ;;  %v2357_v58 = vsel %vm2282_vm6, %v2354_v1, %v2356_v19 }
 0x39b   : > { %v2464_v17 = vadd.f32 %v2357_v58, %v5425_v55 }
 0x39c   : > { %v4035_v30 = vmul.f32 %v3926_v63, %v3699_v11  ;;  %v3220_v61 = vadd.f32 %v3108_v46, %v2840_v8  ;;  %v3490_v9 = vsel %vm3419_vm4, %v3487_v24, %v3489_v60 }
 0x39e   : > { %v4083_v29 = vpack.c.bf16 %v4035_v30, %v4035_v30  ;;  %v3600_v45 = vadd.f32 %v3488_v43, %v3220_v61  ;;  %v2586_v21 = vpop.f32.mrf.mxu2  ;;  %v2965_v7 = vpop.f32.mrf.mxu3 }
 0x39f   : > { %v2729_v51 = vrot.slane %v2586_v21, 1  ;;  %v3109_v41 = vrot.slane %v2965_v7, 2  ;;  %v6241_v12 = vpop.f32.mrf.mxu1  ;;  %v3941_v30 = vpop.permute.xlu2 %3940 }
 0x3a0   : > { %4132 = vst.msk [vmem:[%s5671_s9 + $0x80] sm:$0xf] %vm4099_vm7, %v4083_v29  ;;  %v3652_v13 = vadd.f32 %v6061_v31, %v3600_v45  ;;  %v2358_v5 = vrot.slane %v6241_v12, 1 }
 0x3a1   : > { %v2730_v14 = vsel %vm2282_vm6, %v2727_v57, %v2729_v51  ;;  %v3348_v56 = vpop.f32.mrf.mxu0  ;;  %v3110_v38 = vsel %vm3039_vm5, %v3107_v23, %v3109_v41 }
 0x3a2   : > { %v3700_v18 = vmax.f32 %v3652_v13, 0.0  ;;  %v2841_v34 = vadd.f32 %v2730_v14, %v2462_v16  ;;  %v3491_v20 = vrot.slane %v3348_v56, 3  ;;  %v2359_v55 = vsel %vm2282_vm6, %v2356_v19, %v2358_v5 }
 0x3a3   : > { %v2465_v13 = vadd.f32 %v2359_v55, %v5439_v3 }
 0x3a4   : > { %v4036_v26 = vmul.f32 %v3931_v6, %v3700_v18  ;;  %v3221_v32 = vadd.f32 %v3110_v38, %v2841_v34  ;;  %v3492_v37 = vsel %vm3419_vm4, %v3489_v60, %v3491_v20  ;;  %v3946_v38 = vpop.permute.xlu0 %3945 }
 0x3a6   : > { %v4084_v52 = vpack.c.bf16 %v4036_v26, %v4036_v26  ;;  %v3601_v15 = vadd.f32 %v3490_v9, %v3221_v32  ;;  %v2589_v10 = vpop.f32.mrf.mxu2  ;;  %v2968_v0 = vpop.f32.mrf.mxu3 }
 0x3a7   : > { %v2731_v44 = vrot.slane %v2589_v10, 1  ;;  %v3111_v36 = vrot.slane %v2968_v0, 2  ;;  %v6252_v42 = vpop.f32.mrf.mxu1 }
 0x3a8   : > { %4133 = vst.msk [vmem:[%s5671_s9 + $0x84] sm:$0xf] %vm4099_vm7, %v4084_v52  ;;  %v3653_v47 = vadd.f32 %v6061_v31, %v3601_v15  ;;  %v2360_v60 = vrot.slane %v6252_v42, 1 }
 0x3a9   : > { %v2732_v49 = vsel %vm2282_vm6, %v2729_v51, %v2731_v44  ;;  %v3350_v2 = vpop.f32.mrf.mxu0  ;;  %v3112_v50 = vsel %vm3039_vm5, %v3109_v41, %v3111_v36 }
 0x3aa   : > { %v3701_v53 = vmax.f32 %v3653_v47, 0.0  ;;  %v2842_v40 = vadd.f32 %v2732_v49, %v2463_v54  ;;  %v3493_v28 = vrot.slane %v3350_v2, 3  ;;  %v2361_v3 = vsel %vm2282_vm6, %v2358_v5, %v2360_v60  ;;  %v6499_v54 = vld [vmem:[#allocation14_spill] sm:$0xff] }
 0x3ab   : > { %v2466_v47 = vadd.f32 %v2361_v3, %v6499_v54 }
 0x3ac   : > { %v4037_v35 = vmul.f32 %v3936_v25, %v3701_v53  ;;  %v3222_v4 = vadd.f32 %v3112_v50, %v2842_v40  ;;  %v3494_v29 = vsel %vm3419_vm4, %v3491_v20, %v3493_v28  ;;  %v3951_v50 = vpop.permute.xlu1 %3950 }
 0x3ae   : > { %v4085_v48 = vpack.c.bf16 %v4037_v35, %v4037_v35  ;;  %v3602_v22 = vadd.f32 %v3492_v37, %v3222_v4  ;;  %v2591_v57 = vpop.f32.mrf.mxu2  ;;  %v2970_v23 = vpop.f32.mrf.mxu3 }
 0x3af   : > { %v2733_v33 = vrot.slane %v2591_v57, 1  ;;  %v3113_v39 = vrot.slane %v2970_v23, 2  ;;  %v6263_v59 = vpop.f32.mrf.mxu1 }
 0x3b0   : > { %4134 = vst.msk [vmem:[%s5671_s9 + $0x88] sm:$0xf] %vm4099_vm7, %v4085_v48  ;;  %v3654_v24 = vadd.f32 %v6061_v31, %v3602_v22  ;;  %v2362_v20 = vrot.slane %v6263_v59, 1 }
 0x3b1   : > { %v2734_v11 = vsel %vm2282_vm6, %v2731_v44, %v2733_v33  ;;  %v3353_v8 = vpop.f32.mrf.mxu0  ;;  %v3114_v61 = vsel %vm3039_vm5, %v3111_v36, %v3113_v39 }
 0x3b2   : > { %v3702_v63 = vmax.f32 %v3654_v24, 0.0  ;;  %v2843_v46 = vadd.f32 %v2734_v11, %v2464_v17  ;;  %v3495_v14 = vrot.slane %v3353_v8, 3  ;;  %v2363_v37 = vsel %vm2282_vm6, %v2360_v60, %v2362_v20  ;;  %v6500_v24 = vld [vmem:[#allocation15_spill] sm:$0xff]  ;;  %v6501_v60 = vld [vmem:[#allocation2_spill] sm:$0xff] }
 0x3b3   : > { %v2467_v5 = vadd.f32 %v2363_v37, %v6500_v24 }
 0x3b4   : > { %v4038_v27 = vmul.f32 %v3941_v30, %v3702_v63  ;;  %v3223_v43 = vadd.f32 %v3114_v61, %v2843_v46  ;;  %v3496_v9 = vsel %vm3419_vm4, %v3493_v28, %v3495_v14 }
 0x3b6   : > { %v4086_v45 = vpack.c.bf16 %v4038_v27, %v4038_v27  ;;  %v3603_v21 = vadd.f32 %v3494_v29, %v3223_v43  ;;  %v2594_v7 = vpop.f32.mrf.mxu2  ;;  %v2973_v51 = vpop.f32.mrf.mxu3 }
 0x3b7   : > { %v2735_v41 = vrot.slane %v2594_v7, 1  ;;  %v3115_v12 = vrot.slane %v2973_v51, 2  ;;  %v6274_v16 = vpop.f32.mrf.mxu1  ;;  %v3956_v27 = vpop.permute.xlu2 %3955 }
 0x3b8   : > { %4135 = vst.msk [vmem:[%s5671_s9 + $0x8c] sm:$0xf] %vm4099_vm7, %v4086_v45  ;;  %v3655_v1 = vadd.f32 %v6061_v31, %v3603_v21  ;;  %v2364_v11 = vrot.slane %v6274_v16, 1 }
 0x3b9   : > { %v2736_v56 = vsel %vm2282_vm6, %v2733_v33, %v2735_v41  ;;  %v3355_v18 = vpop.f32.mrf.mxu0  ;;  %v3116_v26 = vsel %vm3039_vm5, %v3113_v39, %v3115_v12 }
 0x3ba   : > { %v3703_v34 = vmax.f32 %v3655_v1, 0.0  ;;  %v2844_v6 = vadd.f32 %v2736_v56, %v2465_v13  ;;  %v3497_v49 = vrot.slane %v3355_v18, 3  ;;  %v2365_v45 = vsel %vm2282_vm6, %v2362_v20, %v2364_v11  ;;  %v6502_v20 = vld [vmem:[#allocation3_spill] sm:$0xff] }
 0x3bc   : > { %v4039_v32 = vmul.f32 %v3946_v38, %v3703_v34  ;;  %v3224_v62 = vadd.f32 %v3116_v26, %v2844_v6  ;;  %v3498_v48 = vsel %vm3419_vm4, %v3495_v14, %v3497_v49  ;;  %v2468_v14 = vadd.f32 %v2365_v45, %v6501_v60 }
 0x3be   : > { %v4087_v52 = vpack.c.bf16 %v4039_v32, %v4039_v32  ;;  %v3604_v15 = vadd.f32 %v3496_v9, %v3224_v62  ;;  %v2596_v10 = vpop.f32.mrf.mxu2  ;;  %v2975_v0 = vpop.f32.mrf.mxu3 }
 0x3bf   : > { %v2737_v44 = vrot.slane %v2596_v10, 1  ;;  %v3117_v36 = vrot.slane %v2975_v0, 2  ;;  %v6285_v42 = vpop.f32.mrf.mxu1  ;;  %v3961_v62 = vpop.permute.xlu0 %3960 }
 0x3c0   : > { %4136 = vst.msk [vmem:[%s5671_s9 + $0x90] sm:$0xf] %vm4099_vm7, %v4087_v52  ;;  %v3656_v19 = vadd.f32 %v6061_v31, %v3604_v15  ;;  %v2366_v18 = vrot.slane %v6285_v42, 1 }
 0x3c1   : > { %v2738_v2 = vsel %vm2282_vm6, %v2735_v41, %v2737_v44  ;;  %v3358_v53 = vpop.f32.mrf.mxu0  ;;  %v3118_v35 = vsel %vm3039_vm5, %v3115_v12, %v3117_v36 }
 0x3c2   : > { %v3704_v40 = vmax.f32 %v3656_v19, 0.0  ;;  %v2845_v25 = vadd.f32 %v2738_v2, %v2466_v47  ;;  %v3499_v8 = vrot.slane %v3358_v53, 3  ;;  %v2367_v15 = vsel %vm2282_vm6, %v2364_v11, %v2366_v18  ;;  %v6503_v11 = vld [vmem:[#allocation4_spill] sm:$0xff] }
 0x3c4   : > { %v4040_v4 = vmul.f32 %v3951_v50, %v3704_v40  ;;  %v3225_v58 = vadd.f32 %v3118_v35, %v2845_v25  ;;  %v3500_v21 = vsel %vm3419_vm4, %v3497_v49, %v3499_v8  ;;  %v2469_v49 = vadd.f32 %v2367_v15, %v6502_v20 }
 0x3c6   : > { %v4088_v22 = vpack.c.bf16 %v4040_v4, %v4040_v4  ;;  %v3605_v57 = vadd.f32 %v3498_v48, %v3225_v58  ;;  %v2599_v23 = vpop.f32.mrf.mxu2  ;;  %v2978_v33 = vpop.f32.mrf.mxu3 }
 0x3c7   : > { %v2739_v39 = vrot.slane %v2599_v23, 1  ;;  %v3119_v59 = vrot.slane %v2978_v33, 2  ;;  %v6296_v17 = vpop.f32.mrf.mxu1  ;;  %v3966_v58 = vpop.permute.xlu1 %3965 }
 0x3c8   : > { %4137 = vst.msk [vmem:[%s5671_s9 + $0x94] sm:$0xf] %vm4099_vm7, %v4088_v22  ;;  %v3657_v28 = vadd.f32 %v6061_v31, %v3605_v57  ;;  %v2368_v53 = vrot.slane %v6296_v17, 1 }
 0x3c9   : > { %v2740_v63 = vsel %vm2282_vm6, %v2737_v44, %v2739_v39  ;;  %v3360_v46 = vpop.f32.mrf.mxu0  ;;  %v3120_v43 = vsel %vm3039_vm5, %v3117_v36, %v3119_v59 }
 0x3ca   : > { %v3705_v30 = vmax.f32 %v3657_v28, 0.0  ;;  %v2846_v61 = vadd.f32 %v2740_v63, %v2467_v5  ;;  %v3501_v34 = vrot.slane %v3360_v46, 3  ;;  %v2369_v57 = vsel %vm2282_vm6, %v2366_v18, %v2368_v53 }
 0x3cc   : > { %v4041_v55 = vmul.f32 %v3956_v27, %v3705_v30  ;;  %v3226_v29 = vadd.f32 %v3120_v43, %v2846_v61  ;;  %v3502_v10 = vsel %vm3419_vm4, %v3499_v8, %v3501_v34  ;;  %v2470_v8 = vadd.f32 %v2369_v57, %v6503_v11  ;;  %v3971_v27 = vpop.permute.xlu2 %3970 }
 0x3ce   : > { %v4089_v7 = vpack.c.bf16 %v4041_v55, %v4041_v55  ;;  %v3606_v51 = vadd.f32 %v3500_v21, %v3226_v29  ;;  %v2601_v41 = vpop.f32.mrf.mxu2  ;;  %v2980_v12 = vpop.f32.mrf.mxu3 }
 0x3cf   : > { %v2741_v16 = vrot.slane %v2601_v41, 1  ;;  %v3121_v13 = vrot.slane %v2980_v12, 2  ;;  %v6307_v1 = vpop.f32.mrf.mxu1 }
 0x3d0   : > { %4138 = vst.msk [vmem:[%s5671_s9 + $0x98] sm:$0xf] %vm4099_vm7, %v4089_v7  ;;  %v3658_v56 = vadd.f32 %v6061_v31, %v3606_v51  ;;  %v2370_v63 = vrot.slane %v6307_v1, 1  ;;  %v6504_v1 = vld [vmem:[#allocation5_spill] sm:$0xff] }
 0x3d1   : > { %v2742_v6 = vsel %vm2282_vm6, %v2739_v39, %v2741_v16  ;;  %v3363_v38 = vpop.f32.mrf.mxu0  ;;  %v3122_v3 = vsel %vm3039_vm5, %v3119_v59, %v3121_v13 }
 0x3d2   : > { %v3706_v26 = vmax.f32 %v3658_v56, 0.0  ;;  %v2847_v32 = vadd.f32 %v2742_v6, %v2468_v14  ;;  %v3503_v40 = vrot.slane %v3363_v38, 3  ;;  %v2371_v21 = vsel %vm2282_vm6, %v2368_v53, %v2370_v63  ;;  %v6350_v6 = vld [vmem:[%s6407_s2] ss:$0 sm:$0xff] }
 0x3d3   : > { %v2471_v60 = vadd.f32 %v2371_v21, %v6504_v1 }
 0x3d4   : > { %v4042_v9 = vmul.f32 %v3961_v62, %v3706_v26  ;;  %v3227_v52 = vadd.f32 %v3122_v3, %v2847_v32  ;;  %v3504_v23 = vsel %vm3419_vm4, %v3501_v34, %v3503_v40 }
 0x3d6   : > { %v4090_v0 = vpack.c.bf16 %v4042_v9, %v4042_v9  ;;  %v3607_v44 = vadd.f32 %v3502_v10, %v3227_v52  ;;  %v2604_v36 = vpop.f32.mrf.mxu2  ;;  %v2983_v42 = vpop.f32.mrf.mxu3  ;;  %v6505_v10 = vld [vmem:[#allocation9_spill] sm:$0xff] }
 0x3d7   : > { %v2743_v54 = vrot.slane %v2604_v36, 1  ;;  %v3123_v47 = vrot.slane %v2983_v42, 2  ;;  %v6318_v19 = vpop.f32.mrf.mxu1  ;;  %v3976_v36 = vpop.permute.xlu0 %3975 }
 0x3d8   : > { %4139 = vst.msk [vmem:[%s5671_s9 + $0x9c] sm:$0xf] %vm4099_vm7, %v4090_v0  ;;  %v3659_v2 = vadd.f32 %v6061_v31, %v3607_v44  ;;  %v2372_v34 = vrot.slane %v6318_v19, 1  ;;  %v6506_v0 = vrot.slane %v6505_v10, 1  ;;  %v6508_v19 = vld [vmem:[#allocation12_spill] sm:$0xff] }
 0x3d9   : > { %v2744_v25 = vsel %vm2282_vm6, %v2741_v16, %v2743_v54  ;;  %v6326_v50 = vpop.f32.mrf.mxu0  ;;  %v3124_v37 = vsel %vm3039_vm5, %v3121_v13, %v3123_v47 }
 0x3da   : > { %v3707_v35 = vmax.f32 %v3659_v2, 0.0  ;;  %v2848_v4 = vadd.f32 %v2744_v25, %v2469_v49  ;;  %v3505_v30 = vrot.slane %v6326_v50, 3  ;;  %v3986_v49 = vpop.permute.xlu2 %3985  ;;  %v3981_v2 = vpop.permute.xlu1 %3980  ;;  %v2373_v53 = vsel %vm2282_vm6, %v2370_v63, %v2372_v34 }
 0x3dc   : > { %v4043_v48 = vmul.f32 %v3966_v58, %v3707_v35  ;;  %v3228_v22 = vadd.f32 %v3124_v37, %v2848_v4  ;;  %v3506_v41 = vsel %vm3419_vm4, %v3503_v40, %v3505_v30  ;;  %v6509_v4 = vld [vmem:[#allocation18_spill] sm:$0xff]  ;;  %v6510_v37 = vld [vmem:[#allocation24_spill] sm:$0xff] }
 0x3de   : > { %v4091_v33 = vpack.c.bf16 %v4043_v48, %v4043_v48  ;;  %v3608_v39 = vadd.f32 %v3504_v23, %v3228_v22  ;;  %v2606_v59 = vpop.f32.mrf.mxu2  ;;  %v2985_v17 = vpop.f32.mrf.mxu3 }
 0x3df   : > { %v2745_v24 = vrot.slane %v2606_v59, 1  ;;  %v3125_v5 = vrot.slane %v2985_v17, 2  ;;  %v2229_v28 = vpop.f32.mrf.mxu1  ;;  %v6511_v59 = vld [vmem:[#allocation19_spill] sm:$0xff] }
 0x3e0   : > { %4140 = vst.msk [vmem:[%s5671_s9 + $0xa0] sm:$0xf] %vm4099_vm7, %v4091_v33  ;;  %v3660_v46 = vadd.f32 %v6061_v31, %v3608_v39  ;;  %v2374_v26 = vrot.slane %v2229_v28, 1 }
 0x3e1   : > { %v2746_v61 = vsel %vm2282_vm6, %v2743_v54, %v2745_v24  ;;  %v3126_v29 = vsel %vm3039_vm5, %v3123_v47, %v3125_v5  ;;  %v6339_v45 = vpop.f32.mrf.mxu0  ;;  %v6507_v54 = vld [vmem:[#allocation8_spill] sm:$0xff] }
 0x3e2   : > { %v3708_v43 = vmax.f32 %v3660_v46, 0.0  ;;  %v2849_v55 = vadd.f32 %v2746_v61, %v2470_v8  ;;  %v3507_v62 = vrot.slane %v6339_v45, 3  ;;  %v2375_v50 = vsel %vm2282_vm6, %v2372_v34, %v2374_v26  ;;  %v6513_v8 = vld [vmem:[#allocation6_spill] sm:$0xff]  ;;  %v6514_v46 = vld [vmem:[#allocation7_spill] sm:$0xff] }
 0x3e3   : > { %v2472_v63 = vadd.f32 %v2373_v53, %v6513_v8 }
 0x3e4   : > { %v4044_v7 = vmul.f32 %v3971_v27, %v3708_v43  ;;  %v3229_v51 = vadd.f32 %v3126_v29, %v2849_v55  ;;  %v3508_v35 = vsel %vm3419_vm4, %v3505_v30, %v3507_v62  ;;  %v2473_v30 = vadd.f32 %v2375_v50, %v6514_v46  ;;  %v6515_v43 = vld [vmem:[#allocation16_spill] sm:$0xff]  ;;  %v6516_v29 = vld [vmem:[#allocation22_spill] sm:$0xff]  ;;  %v3991_v50 = vpop.permute.xlu0 %3990 }
 0x3e6   : > { %v4092_v12 = vpack.c.bf16 %v4044_v7, %v4044_v7  ;;  %v3609_v31 = vadd.f32 %v3506_v41, %v3229_v51  ;;  %v2609_v16 = vpop.f32.mrf.mxu2  ;;  %v2988_v13 = vpop.f32.mrf.mxu3  ;;  %v6517_v7 = vld [vmem:[#allocation17_spill] sm:$0xff] }
 0x3e7   : > { %v2747_v14 = vrot.slane %v2609_v16, 1  ;;  %v3127_v56 = vrot.slane %v2988_v13, 2  ;;  %v2231_v18 = vpop.f32.mrf.mxu1  ;;  %v6518_v51 = vrot.slane %v6517_v7, 1 }
 0x3e8   : > { %4141 = vst.msk [vmem:[%s5671_s9 + $0xa4] sm:$0xf] %vm4099_vm7, %v4092_v12  ;;  %v3661_v38 = vadd.f32 %v6350_v6, %v3609_v31  ;;  %v2376_v32 = vrot.slane %v2231_v18, 1  ;;  %v6519_v18 = vld [vmem:[#allocation11_spill] sm:$0xff] }
 0x3e9   : > { %v2748_v3 = vsel %vm2282_vm6, %v2745_v24, %v2747_v14  ;;  %v3128_v42 = vsel %vm3039_vm5, %v3125_v5, %v3127_v56  ;;  %v3370_v22 = vpop.f32.mrf.mxu0  ;;  %v6512_v24 = vld [vmem:[#allocation25_spill] sm:$0xff]  ;;  %v6520_v34 = vrot.slane %v6519_v18, 2 }
 0x3ea   : > { %v3709_v9 = vmax.f32 %v3661_v38, 0.0  ;;  %v2850_v52 = vadd.f32 %v2748_v3, %v2471_v60  ;;  %v2377_v15 = vsel %vm2282_vm6, %v2374_v26, %v2376_v32  ;;  %v2427_v44 = vsel %vm2282_vm6, %v2376_v32, %v6506_v0 }
 0x3eb   : > { %v2474_v47 = vadd.f32 %v2377_v15, %v6507_v54  ;;  %v2475_v20 = vadd.f32 %v2427_v44, %v6508_v19  ;;  %v3509_v27 = vrot.slane %v3370_v22, 3  ;;  %v6521_v15 = vld [vmem:[#allocation10_spill] sm:$0xff]  ;;  %v4001_v44 = vpop.permute.xlu2 %4000 }
 0x3ec   : > { %v4045_v40 = vmul.f32 %v3976_v36, %v3709_v9  ;;  %v3230_v25 = vadd.f32 %v3128_v42, %v2850_v52  ;;  %v6522_v10 = vrot.slane %v6521_v15, 3 }
 0x3ed   : > { %v2853_v58 = vadd.f32 %v6509_v4, %v2474_v47  ;;  %v2854_v48 = vadd.f32 %v6510_v37, %v2475_v20  ;;  %v3510_v52 = vsel %vm3419_vm4, %v3507_v62, %v3509_v27 }
 0x3ee   : > { %v4093_v57 = vpack.c.bf16 %v4045_v40, %v4045_v40  ;;  %v3610_v23 = vadd.f32 %v3508_v35, %v3230_v25  ;;  %v2611_v33 = vpop.f32.mrf.mxu2  ;;  %v2990_v39 = vpop.f32.mrf.mxu3  ;;  %v3566_v0 = vsel %vm3419_vm4, %v3509_v27, %v6522_v10 }
 0x3ef   : > { %v3233_v17 = vadd.f32 %v6511_v59, %v2853_v58  ;;  %v3234_v5 = vadd.f32 %v6512_v24, %v2854_v48  ;;  %v2749_v28 = vrot.slane %v2611_v33, 1  ;;  %v3129_v11 = vrot.slane %v2990_v39, 2 }
 0x3f0   : > { %4142 = vst.msk [vmem:[%s5671_s9 + $0xa8] sm:$0xf] %vm4099_vm7, %v4093_v57  ;;  %v3662_v61 = vadd.f32 %v6350_v6, %v3610_v23 }
 0x3f1   : > { %v3613_v55 = vadd.f32 %v6515_v43, %v3233_v17  ;;  %v3614_v45 = vadd.f32 %v6516_v29, %v3234_v5  ;;  %v2750_v21 = vsel %vm2282_vm6, %v2747_v14, %v2749_v28  ;;  %v2806_v41 = vsel %vm2282_vm6, %v2749_v28, %v6518_v51 }
 0x3f2   : > { %v3710_v12 = vmax.f32 %v3662_v61, 0.0  ;;  %v2851_v31 = vadd.f32 %v2750_v21, %v2472_v63  ;;  %v2852_v16 = vadd.f32 %v2806_v41, %v2473_v30  ;;  %v3130_v60 = vsel %vm3039_vm5, %v3127_v56, %v3129_v11  ;;  %v3996_v56 = vpop.permute.xlu1 %3995 }
 0x3f3   : > { %v3665_v13 = vadd.f32 %v6350_v6, %v3613_v55  ;;  %v3666_v1 = vadd.f32 %v6350_v6, %v3614_v45  ;;  %v3186_v38 = vsel %vm3039_vm5, %v3129_v11, %v6520_v34 }
 0x3f4   : > { %v4046_v26 = vmul.f32 %v3981_v2, %v3710_v12  ;;  %v3231_v14 = vadd.f32 %v3130_v60, %v2851_v31  ;;  %v3232_v32 = vadd.f32 %v3186_v38, %v2852_v16 }
 0x3f5   : > { %v3713_v3 = vmax.f32 %v3665_v13, 0.0  ;;  %v3714_v9 = vmax.f32 %v3666_v1, 0.0 }
 0x3f6   : > { %v4094_v36 = vpack.c.bf16 %v4046_v26, %v4046_v26  ;;  %v3611_v42 = vadd.f32 %v3510_v52, %v3231_v14  ;;  %v3612_v54 = vadd.f32 %v3566_v0, %v3232_v32 }
 0x3f7   : > { %v4049_v47 = vmul.f32 %v3996_v56, %v3713_v3  ;;  %v4050_v19 = vmul.f32 %v4001_v44, %v3714_v9 }
 0x3f8   : > { %4143 = vst.msk [vmem:[%s5671_s9 + $0xac] sm:$0xf] %vm4099_vm7, %v4094_v36  ;;  %v3663_v20 = vadd.f32 %v6350_v6, %v3611_v42  ;;  %v3664_v62 = vadd.f32 %v6350_v6, %v3612_v54 }
 0x3f9   : > { %v4097_v2 = vpack.c.bf16 %v4049_v47, %v4049_v47  ;;  %v4098_v53 = vpack.c.bf16 %v4050_v19, %v4050_v19 }
 0x3fa   : > { %v3711_v40 = vmax.f32 %v3663_v20, 0.0  ;;  %v3712_v25 = vmax.f32 %v3664_v62, 0.0 }
 0x3fb   : > { %4146 = vst.msk [vmem:[%s5671_s9 + $0xb8] sm:$0xf] %vm4099_vm7, %v4097_v2 }
 0x3fc   : > { %4147 = vst.msk [vmem:[%s5671_s9 + $0xbc] sm:$0xf] %vm4099_vm7, %v4098_v53  ;;  %v4047_v35 = vmul.f32 %v3986_v49, %v3711_v40  ;;  %v4048_v4 = vmul.f32 %v3991_v50, %v3712_v25 }
 0x3fe   : > { %v4095_v58 = vpack.c.bf16 %v4047_v35, %v4047_v35  ;;  %v4096_v37 = vpack.c.bf16 %v4048_v4, %v4048_v4 }
 0x400   : > { %4144 = vst.msk [vmem:[%s5671_s9 + $0xb0] sm:$0xf] %vm4099_vm7, %v4095_v58 }
 0x401   : > { %4145 = vst.msk [vmem:[%s5671_s9 + $0xb4] sm:$0xf] %vm4099_vm7, %v4096_v37 }
 0x402 PF: > { %s14_s15 = sadd.s32 1, %s4664_s15  }
 0x403   : > { %p11_p4 = scmp.ge.s32.totalorder %s14_s15, 4  }
 0x405   :  { %13 = sbr.rel (!%p11_p4) target bundleno = 1 (0x1), region = 74 }

// kernel: hg_block.8
= control target key start
LH: loop header
LB: loop body
LE: loop exit
PB: predicated region body
PF: predicated region fallthrough
CT: control target
= control target key end

     0   :  { %s4604_s15 = smov 0   ;;  %s6333_s0 = inlined_call_operand.vmem [shape: bf16[2,384,8], index: 0, kind: input, shape index: {}]   ;;  %s6334_s1 = inlined_call_operand.vmem [shape: bf16[9,8,8], index: 1, kind: input, shape index: {}]   ;;  %s6335_s2 = inlined_call_operand.vmem [shape: f32[1,8], index: 2, kind: input, shape index: {}]   ;;  %s6336_s3 = inlined_call_operand.vmem [shape: f32[384,1], index: 3, kind: input, shape index: {}]   ;;  %s6337_s4 = inlined_call_operand.vmem [shape: bf16[2,384,8], index: 4, kind: output, shape index: {}]  }
   0x1 LB: > { %s4168_s16 = sadd.s32 4294967295, %s4576_s15   ;;  %p4172_p0 = scmp.ge.s32.totalorder %s4576_s15, 1  ;;  %s4576_s15 = sphi %s4604_s15, %s14_s15  }
   0x2   : > { %p162_p1 = scmp.lt.s32.totalorder %s4576_s15, 3 }
   0x4   : > { %p163_p2 = pnand %p4172_p0, %p162_p1 }
   0x6   : > { %166 = sbr.rel (%p163_p2) target bundleno = 1027 (0x403), region = 36 }
   0xb   : > { %v247_v0 = vld [vmem:[%s6334_s1] sm:$0xf]  ;;  %vm441_vm0 = vcmask 1043456   ;;  %p188_p3 = scmp.lt.s32.totalorder %s4168_s16, 1  ;;  %v4320_v2 = vld [vmem:[%s6334_s1 + $0x8] sm:$0xf] }
   0xc   : > { %v443_v1 = vsel %vm441_vm0, %v247_v0, 0  ;;  %v4345_v3 = vld [vmem:[%s6334_s1 + $0xc] sm:$0xf]  ;;  %v1147_v4 = vsel %vm441_vm0, %v4320_v2, 0  ;;  %v4295_v6 = vld [vmem:[%s6334_s1 + $0x4] sm:$0xf] }
   0xd   : > { %452 = vmatpush.bf16.msra.mxu0 %v443_v1  ;;  %4521 = vmatpush.bf16.msra.mxu1 %v443_v1  ;;  %s6452_s16 = smov (!%p188_p3, %s4168_s16), 1  ;;  %v1523_v5 = vsel %vm441_vm0, %v4345_v3, 0  ;;  %v771_v7 = vsel %vm441_vm0, %v4295_v6, 0  ;;  %v4370_v8 = vld [vmem:[%s6334_s1 + $0x10] sm:$0xf]  ;;  %vm368_vm1 = vcmask 64512  }
   0xe   : > { %4522 = vmatpush.bf16.msra.mxu2 %v443_v1  ;;  %4523 = vmatpush.bf16.msra.mxu3 %v443_v1  ;;  %s4524_s27 = smul.u32 192, %s6452_s16  ;;  %v1898_v9 = vsel %vm441_vm0, %v4370_v8, 0  ;;  %v4420_v30 = vld [vmem:[%s6334_s1 + $0x18] sm:$0xf]  ;;  %v4445_v31 = vld [vmem:[%s6334_s1 + $0x1c] sm:$0xf] }
   0xf   : > { %v4395_v32 = vld [vmem:[%s6334_s1 + $0x14] sm:$0xf]  ;;  %v2456_v33 = vsel %vm441_vm0, %v4420_v30, 0  ;;  %v2831_v34 = vsel %vm441_vm0, %v4445_v31, 0  ;;  %v4470_v36 = vld [vmem:[%s6334_s1 + $0x20] sm:$0xf] }
  0x10   : > { %s4640_s30 = scalar_lea.vmem %s6333_s0, %s4524_s27  ;;  %v2080_v35 = vsel %vm441_vm0, %v4395_v32, 0  ;;  %v3207_v37 = vsel %vm441_vm0, %v4470_v36, 0  ;;  %vm577_vm2 = vcmask 1042432   ;;  %vm905_vm3 = vcmask 1041408   ;;  %s5599_s9 = scalar_lea.vmem %s6337_s4, %s4524_s27 }
  0x11   : > { %780 = vmatpush.bf16.msrb.mxu1 %v771_v7  ;;  %1907 = vmatpush.bf16.msrb.mxu0 %v1898_v9  ;;  %v4643_v10 = vld [vmem:[%s4640_s30] sm:$0xff]  ;;  %v4646_v11 = vld [vmem:[%s4640_s30 + $0x30] sm:$0xff]  ;;  %v4498_v14 = vld [vmem:[%s4640_s30 + $0x8] sm:$0xff]  ;;  %vm1281_vm4 = vcmask 1040384   ;;  %vm3384_vm5 = vcmask 1044480   ;;  %vm3008_vm6 = vcmask 1045504  }
  0x12   : > { %1156 = vmatpush.bf16.msrb.mxu2 %v1147_v4  ;;  %1532 = vmatpush.bf16.msrb.mxu3 %v1523_v5  ;;  %v4649_v12 = vld [vmem:[%s4640_s30 + $0x60] sm:$0xff]  ;;  %v4515_v13 = vld [vmem:[%s4640_s30 + $0x90] sm:$0xff]  ;;  %v4661_v15 = vld [vmem:[%s4640_s30 + $0x38] sm:$0xff]  ;;  %vm2259_vm7 = vcmask 1046528   ;;  %vm4064_vm8 = vcmask 60416  }
  0x13   : > { %4271 = vmatmul.msk.bf16.vlgmr.msra.gmra.mxu0 %vm368_vm1, %v4643_v10  ;;  %4277 = vmatmul.msk.bf16.vlgmr.msra.gmra.mxu1 %vm368_vm1, %v4646_v11  ;;  %v4664_v16 = vld [vmem:[%s4640_s30 + $0x68] sm:$0xff]  ;;  %v4516_v17 = vld [vmem:[%s4640_s30 + $0x98] sm:$0xff]  ;;  %v4499_v18 = vld [vmem:[%s4640_s30 + $0x10] sm:$0xff] }
  0x14   : > { %4283 = vmatmul.msk.bf16.vlgmr.msra.gmra.mxu2 %vm368_vm1, %v4649_v12  ;;  %4289 = vmatmul.msk.bf16.vlgmr.msra.gmra.mxu3 %vm368_vm1, %v4515_v13  ;;  %v4675_v19 = vld [vmem:[%s4640_s30 + $0x40] sm:$0xff]  ;;  %v4678_v20 = vld [vmem:[%s4640_s30 + $0x70] sm:$0xff]  ;;  %v4688_v22 = vld [vmem:[%s4640_s30 + $0x18] sm:$0xff] }
  0x15   : > { %v4517_v21 = vld [vmem:[%s4640_s30 + $0xa0] sm:$0xff]  ;;  %v4691_v23 = vld [vmem:[%s4640_s30 + $0x48] sm:$0xff]  ;;  %v4694_v24 = vld [vmem:[%s4640_s30 + $0x78] sm:$0xff]  ;;  %2089 = vmatpush.bf16.msra.mxu1 %v2080_v35  ;;  %3216 = vmatpush.bf16.msra.mxu0 %v3207_v37 }
  0x16   : > { %v4518_v25 = vld [vmem:[%s4640_s30 + $0xa8] sm:$0xff]  ;;  %v4705_v26 = vld [vmem:[%s4640_s30 + $0x20] sm:$0xff]  ;;  %v4708_v27 = vld [vmem:[%s4640_s30 + $0x50] sm:$0xff]  ;;  %2465 = vmatpush.bf16.msra.mxu2 %v2456_v33  ;;  %2840 = vmatpush.bf16.msra.mxu3 %v2831_v34 }
  0x17   : > { %v4711_v28 = vld [vmem:[%s4640_s30 + $0x80] sm:$0xff]  ;;  %v4519_v29 = vld [vmem:[%s4640_s30 + $0xb0] sm:$0xff]  ;;  %v4738_v38 = vld [vmem:[%s4640_s30 + $0x28] sm:$0xff] }
  0x18   : > { %v4741_v39 = vld [vmem:[%s4640_s30 + $0x58] sm:$0xff]  ;;  %v4744_v40 = vld [vmem:[%s4640_s30 + $0x88] sm:$0xff] }
  0x19   : > { %v4520_v41 = vld [vmem:[%s4640_s30 + $0xb8] sm:$0xff] }
  0x23   : > { %4272 = vmatmul.msk.bf16.gmra.mxu0 %vm368_vm1, %v4498_v14  ;;  %4278 = vmatmul.msk.bf16.gmra.mxu1 %vm368_vm1, %v4661_v15 }
  0x24   : > { %4284 = vmatmul.msk.bf16.gmra.mxu2 %vm368_vm1, %v4664_v16  ;;  %4290 = vmatmul.msk.bf16.gmra.mxu3 %vm368_vm1, %v4516_v17 }
  0x33   : > { %4273 = vmatmul.msk.bf16.gmra.mxu0 %vm368_vm1, %v4499_v18  ;;  %4279 = vmatmul.msk.bf16.gmra.mxu1 %vm368_vm1, %v4675_v19 }
  0x34   : > { %4285 = vmatmul.msk.bf16.gmra.mxu2 %vm368_vm1, %v4678_v20  ;;  %4291 = vmatmul.msk.bf16.gmra.mxu3 %vm368_vm1, %v4517_v21 }
  0x43   : > { %4274 = vmatmul.msk.bf16.gmra.mxu0 %vm368_vm1, %v4688_v22  ;;  %4280 = vmatmul.msk.bf16.gmra.mxu1 %vm368_vm1, %v4691_v23 }
  0x44   : > { %4286 = vmatmul.msk.bf16.gmra.mxu2 %vm368_vm1, %v4694_v24  ;;  %4292 = vmatmul.msk.bf16.gmra.mxu3 %vm368_vm1, %v4518_v25 }
  0x53   : > { %4275 = vmatmul.msk.bf16.gmra.mxu0 %vm368_vm1, %v4705_v26  ;;  %4281 = vmatmul.msk.bf16.gmra.mxu1 %vm368_vm1, %v4708_v27 }
  0x54   : > { %4287 = vmatmul.msk.bf16.gmra.mxu2 %vm368_vm1, %v4711_v28  ;;  %4293 = vmatmul.msk.bf16.gmra.mxu3 %vm368_vm1, %v4519_v29 }
  0x63   : > { %4276 = vmatmul.msk.bf16.gmra.mxu0 %vm368_vm1, %v4738_v38  ;;  %4282 = vmatmul.msk.bf16.gmra.mxu1 %vm368_vm1, %v4741_v39 }
  0x64   : > { %4288 = vmatmul.msk.bf16.gmra.mxu2 %vm368_vm1, %v4744_v40  ;;  %4294 = vmatmul.msk.bf16.gmra.mxu3 %vm368_vm1, %v4520_v41 }
  0x73   : > { %4296 = vmatmul.msk.bf16.vlgmr.msrb.gmra.mxu1 %vm368_vm1, %v4643_v10  ;;  %4371 = vmatmul.msk.bf16.vlgmr.msrb.gmra.mxu0 %vm368_vm1, %v4643_v10 }
  0x74   : > { %4321 = vmatmul.msk.bf16.vlgmr.msrb.gmra.mxu2 %vm368_vm1, %v4643_v10  ;;  %4346 = vmatmul.msk.bf16.vlgmr.msrb.gmra.mxu3 %vm368_vm1, %v4643_v10 }
  0x83   : > { %4297 = vmatmul.msk.bf16.gmra.mxu1 %vm368_vm1, %v4498_v14  ;;  %4372 = vmatmul.msk.bf16.gmra.mxu0 %vm368_vm1, %v4498_v14 }
  0x84   : > { %4322 = vmatmul.msk.bf16.gmra.mxu2 %vm368_vm1, %v4498_v14  ;;  %4347 = vmatmul.msk.bf16.gmra.mxu3 %vm368_vm1, %v4498_v14 }
  0x90   : > { %v4766_v42 = vpop.f32.mrf.mxu0  ;;  %v4768_v43 = vpop.f32.mrf.mxu1 }
  0x91   : > { %v6338_v44 = vrot.slane %v4766_v42, 5  ;;  %v6341_v49 = vrot.slane %v4768_v43, 5 }
  0x93   : > { %4298 = vmatmul.msk.bf16.gmra.mxu1 %vm368_vm1, %v4499_v18  ;;  %4373 = vmatmul.msk.bf16.gmra.mxu0 %vm368_vm1, %v4499_v18 }
  0x94   : > { %4323 = vmatmul.msk.bf16.gmra.mxu2 %vm368_vm1, %v4499_v18  ;;  %4348 = vmatmul.msk.bf16.gmra.mxu3 %vm368_vm1, %v4499_v18 }
  0x97   : > { %v4775_v45 = vpop.f32.mrf.mxu2  ;;  %v4777_v46 = vpop.f32.mrf.mxu3 }
  0x98   : > { %v456_v47 = vpop.f32.mrf.mxu0  ;;  %v486_v48 = vpop.f32.mrf.mxu1  ;;  %v6340_v56 = vrot.slane %v4775_v45, 5  ;;  %v6339_v57 = vrot.slane %v4777_v46, 5 }
  0x99   : > { %v632_v50 = vrot.slane %v456_v47, 5  ;;  %v656_v51 = vrot.slane %v486_v48, 5 }
  0x9b   : > { %v4783_v52 = vsel %vm577_vm2, %v6338_v44, %v632_v50  ;;  %v4788_v53 = vsel %vm577_vm2, %v6341_v49, %v656_v51 }
  0x9f   : > { %v516_v54 = vpop.f32.mrf.mxu2  ;;  %v546_v55 = vpop.f32.mrf.mxu3 }
  0xa0   : > { %v680_v58 = vrot.slane %v516_v54, 5  ;;  %v704_v59 = vrot.slane %v546_v55, 5  ;;  %v459_v60 = vpop.f32.mrf.mxu0  ;;  %v489_v61 = vpop.f32.mrf.mxu1 }
  0xa1   : > { %v634_v62 = vrot.slane %v459_v60, 5  ;;  %v658_v63 = vrot.slane %v489_v61, 5 }
  0xa2   : > { %v4795_v0 = vsel %vm577_vm2, %v6340_v56, %v680_v58  ;;  %v4800_v1 = vsel %vm577_vm2, %v6339_v57, %v704_v59 }
  0xa3   : > { %6356 = vst [vmem:[#allocation2_spill] sm:$0xff] %v4800_v1  ;;  %v4803_v2 = vsel %vm577_vm2, %v632_v50, %v634_v62  ;;  %v4806_v3 = vsel %vm577_vm2, %v656_v51, %v658_v63  ;;  %4299 = vmatmul.msk.bf16.gmra.mxu1 %vm368_vm1, %v4688_v22  ;;  %4374 = vmatmul.msk.bf16.gmra.mxu0 %vm368_vm1, %v4688_v22 }
  0xa4   : > { %4324 = vmatmul.msk.bf16.gmra.mxu2 %vm368_vm1, %v4688_v22  ;;  %4349 = vmatmul.msk.bf16.gmra.mxu3 %vm368_vm1, %v4688_v22 }
  0xa7   : > { %v519_v4 = vpop.f32.mrf.mxu2  ;;  %v549_v5 = vpop.f32.mrf.mxu3 }
  0xa8   : > { %v682_v6 = vrot.slane %v519_v4, 5  ;;  %v706_v7 = vrot.slane %v549_v5, 5  ;;  %v461_v8 = vpop.f32.mrf.mxu0  ;;  %v491_v9 = vpop.f32.mrf.mxu1 }
  0xa9   : > { %v636_v10 = vrot.slane %v461_v8, 5  ;;  %v660_v13 = vrot.slane %v491_v9, 5 }
  0xaa   : > { %v4817_v14 = vsel %vm577_vm2, %v680_v58, %v682_v6  ;;  %v4820_v17 = vsel %vm577_vm2, %v704_v59, %v706_v7 }
  0xab   : > { %6357 = vst [vmem:[#allocation3_spill] sm:$0xff] %v4820_v17  ;;  %v4823_v18 = vsel %vm577_vm2, %v634_v62, %v636_v10  ;;  %v4826_v21 = vsel %vm577_vm2, %v658_v63, %v660_v13 }
  0xaf   : > { %v521_v22 = vpop.f32.mrf.mxu2  ;;  %v551_v25 = vpop.f32.mrf.mxu3 }
  0xb0   : > { %v684_v29 = vrot.slane %v521_v22, 5  ;;  %v708_v30 = vrot.slane %v551_v25, 5  ;;  %v464_v31 = vpop.f32.mrf.mxu0  ;;  %v494_v32 = vpop.f32.mrf.mxu1 }
  0xb1   : > { %v638_v33 = vrot.slane %v464_v31, 5  ;;  %v662_v34 = vrot.slane %v494_v32, 5 }
  0xb2   : > { %v4829_v35 = vsel %vm577_vm2, %v682_v6, %v684_v29  ;;  %v4832_v36 = vsel %vm577_vm2, %v706_v7, %v708_v30 }
  0xb3   : > { %6358 = vst [vmem:[#allocation4_spill] sm:$0xff] %v4832_v36  ;;  %v4835_v37 = vsel %vm577_vm2, %v636_v10, %v638_v33  ;;  %v4838_v41 = vsel %vm577_vm2, %v660_v13, %v662_v34  ;;  %4300 = vmatmul.msk.bf16.gmra.mxu1 %vm368_vm1, %v4705_v26  ;;  %4375 = vmatmul.msk.bf16.gmra.mxu0 %vm368_vm1, %v4705_v26 }
  0xb4   : > { %4325 = vmatmul.msk.bf16.gmra.mxu2 %vm368_vm1, %v4705_v26  ;;  %4350 = vmatmul.msk.bf16.gmra.mxu3 %vm368_vm1, %v4705_v26 }
  0xb7   : > { %v524_v47 = vpop.f32.mrf.mxu2  ;;  %v554_v48 = vpop.f32.mrf.mxu3 }
  0xb8   : > { %v686_v50 = vrot.slane %v524_v47, 5  ;;  %v710_v51 = vrot.slane %v554_v48, 5  ;;  %v466_v54 = vpop.f32.mrf.mxu0  ;;  %v496_v55 = vpop.f32.mrf.mxu1 }
  0xb9   : > { %v640_v58 = vrot.slane %v466_v54, 5  ;;  %v664_v59 = vrot.slane %v496_v55, 5 }
  0xba   : > { %v4849_v60 = vsel %vm577_vm2, %v684_v29, %v686_v50  ;;  %v4852_v61 = vsel %vm577_vm2, %v708_v30, %v710_v51 }
  0xbb   : > { %6359 = vst [vmem:[#allocation5_spill] sm:$0xff] %v4852_v61  ;;  %v4855_v62 = vsel %vm577_vm2, %v638_v33, %v640_v58  ;;  %v4858_v63 = vsel %vm577_vm2, %v662_v34, %v664_v59 }
  0xbf   : > { %v526_v26 = vpop.f32.mrf.mxu2  ;;  %v556_v4 = vpop.f32.mrf.mxu3 }
  0xc0   : > { %v688_v5 = vrot.slane %v526_v26, 5  ;;  %v712_v6 = vrot.slane %v556_v4, 5  ;;  %v469_v7 = vpop.f32.mrf.mxu0  ;;  %v499_v8 = vpop.f32.mrf.mxu1 }
  0xc1   : > { %v642_v9 = vrot.slane %v469_v7, 5  ;;  %v666_v10 = vrot.slane %v499_v8, 5 }
  0xc2   : > { %v4861_v13 = vsel %vm577_vm2, %v686_v50, %v688_v5  ;;  %v4864_v22 = vsel %vm577_vm2, %v710_v51, %v712_v6 }
  0xc3   : > { %6360 = vst [vmem:[#allocation6_spill] sm:$0xff] %v4864_v22  ;;  %v4867_v25 = vsel %vm577_vm2, %v640_v58, %v642_v9  ;;  %v4870_v29 = vsel %vm577_vm2, %v664_v59, %v666_v10  ;;  %4301 = vmatmul.msk.bf16.gmra.mxu1 %vm368_vm1, %v4738_v38  ;;  %4376 = vmatmul.msk.bf16.gmra.mxu0 %vm368_vm1, %v4738_v38  ;;  %v6366_v22 = vrot.slane %v4768_v43, 5 }
  0xc4   : > { %4326 = vmatmul.msk.bf16.gmra.mxu2 %vm368_vm1, %v4738_v38  ;;  %4351 = vmatmul.msk.bf16.gmra.mxu3 %vm368_vm1, %v4738_v38 }
  0xc7   : > { %v529_v30 = vpop.f32.mrf.mxu2  ;;  %v559_v31 = vpop.f32.mrf.mxu3 }
  0xc8   : > { %v690_v32 = vrot.slane %v529_v30, 5  ;;  %v714_v33 = vrot.slane %v559_v31, 5  ;;  %v471_v34 = vpop.f32.mrf.mxu0  ;;  %v501_v47 = vpop.f32.mrf.mxu1 }
  0xc9   : > { %v644_v48 = vrot.slane %v471_v34, 5  ;;  %v668_v50 = vrot.slane %v501_v47, 5 }
  0xca   : > { %v4881_v51 = vsel %vm577_vm2, %v688_v5, %v690_v32  ;;  %v4884_v54 = vsel %vm577_vm2, %v712_v6, %v714_v33 }
  0xcb   : > { %6361 = vst [vmem:[#allocation7_spill] sm:$0xff] %v4884_v54  ;;  %v4887_v55 = vsel %vm577_vm2, %v642_v9, %v644_v48  ;;  %v4890_v58 = vsel %vm577_vm2, %v666_v10, %v668_v50 }
  0xcf   : > { %v531_v38 = vpop.f32.mrf.mxu2  ;;  %v561_v59 = vpop.f32.mrf.mxu3 }
  0xd0   : > { %v692_v26 = vrot.slane %v531_v38, 5  ;;  %v716_v4 = vrot.slane %v561_v59, 5  ;;  %v474_v7 = vpop.f32.mrf.mxu0  ;;  %v504_v8 = vpop.f32.mrf.mxu1 }
  0xd1   : > { %v646_v30 = vrot.slane %v474_v7, 5  ;;  %v670_v31 = vrot.slane %v504_v8, 5 }
  0xd2   : > { %v4893_v5 = vsel %vm577_vm2, %v690_v32, %v692_v26  ;;  %v4896_v6 = vsel %vm577_vm2, %v714_v33, %v716_v4 }
  0xd3   : > { %6362 = vst [vmem:[#allocation8_spill] sm:$0xff] %v4896_v6  ;;  %v4899_v9 = vsel %vm577_vm2, %v644_v48, %v646_v30  ;;  %v4902_v10 = vsel %vm577_vm2, %v668_v50, %v670_v31  ;;  %4302 = vmatmul.msk.bf16.gmra.mxu1 %vm368_vm1, %v4646_v11  ;;  %4377 = vmatmul.msk.bf16.gmra.mxu0 %vm368_vm1, %v4646_v11 }
  0xd4   : > { %4327 = vmatmul.msk.bf16.gmra.mxu2 %vm368_vm1, %v4646_v11  ;;  %4352 = vmatmul.msk.bf16.gmra.mxu3 %vm368_vm1, %v4646_v11 }
  0xd7   : > { %v534_v32 = vpop.f32.mrf.mxu2  ;;  %v564_v33 = vpop.f32.mrf.mxu3 }
  0xd8   : > { %v694_v34 = vrot.slane %v534_v32, 5  ;;  %v718_v47 = vrot.slane %v564_v33, 5  ;;  %v476_v48 = vpop.f32.mrf.mxu0  ;;  %v506_v38 = vpop.f32.mrf.mxu1 }
  0xd9   : > { %v648_v50 = vrot.slane %v476_v48, 5  ;;  %v672_v59 = vrot.slane %v506_v38, 5 }
  0xda   : > { %v4913_v7 = vsel %vm577_vm2, %v692_v26, %v694_v34  ;;  %v4916_v8 = vsel %vm577_vm2, %v716_v4, %v718_v47 }
  0xdb   : > { %6363 = vst [vmem:[#allocation9_spill] sm:$0xff] %v4916_v8  ;;  %v4919_v44 = vsel %vm577_vm2, %v646_v30, %v648_v50  ;;  %v4922_v57 = vsel %vm577_vm2, %v670_v31, %v672_v59 }
  0xdf   : > { %v536_v11 = vpop.f32.mrf.mxu2  ;;  %v566_v56 = vpop.f32.mrf.mxu3 }
  0xe0   : > { %v696_v32 = vrot.slane %v536_v11, 5  ;;  %v578_v33 = vrot.slane %v566_v56, 5  ;;  %v479_v49 = vpop.f32.mrf.mxu0  ;;  %v509_v6 = vpop.f32.mrf.mxu1 }
  0xe1   : > { %v650_v48 = vrot.slane %v479_v49, 5  ;;  %v674_v38 = vrot.slane %v509_v6, 5 }
  0xe2   : > { %v4925_v26 = vsel %vm577_vm2, %v694_v34, %v696_v32  ;;  %v4928_v4 = vsel %vm577_vm2, %v718_v47, %v578_v33 }
  0xe3   : > { %6364 = vst [vmem:[#allocation10_spill] sm:$0xff] %v4928_v4  ;;  %v4931_v30 = vsel %vm577_vm2, %v648_v50, %v650_v48  ;;  %v4934_v31 = vsel %vm577_vm2, %v672_v59, %v674_v38  ;;  %4303 = vmatmul.msk.bf16.gmra.mxu1 %vm368_vm1, %v4661_v15  ;;  %4378 = vmatmul.msk.bf16.gmra.mxu0 %vm368_vm1, %v4661_v15 }
  0xe4   : > { %4328 = vmatmul.msk.bf16.gmra.mxu2 %vm368_vm1, %v4661_v15  ;;  %4353 = vmatmul.msk.bf16.gmra.mxu3 %vm368_vm1, %v4661_v15 }
  0xe7   : > { %v539_v49 = vpop.f32.mrf.mxu2  ;;  %v569_v56 = vpop.f32.mrf.mxu3 }
  0xe8   : > { %v698_v6 = vrot.slane %v539_v49, 5  ;;  %v579_v34 = vrot.slane %v569_v56, 5  ;;  %v481_v47 = vpop.f32.mrf.mxu0  ;;  %v511_v50 = vpop.f32.mrf.mxu1  ;;  %v6367_v56 = vrot.slane %v4775_v45, 5 }
  0xe9   : > { %v652_v59 = vrot.slane %v481_v47, 5  ;;  %v676_v11 = vrot.slane %v511_v50, 5 }
  0xea   : > { %v4945_v4 = vsel %vm577_vm2, %v696_v32, %v698_v6  ;;  %v4948_v8 = vsel %vm577_vm2, %v578_v33, %v579_v34 }
  0xeb   : > { %6365 = vst [vmem:[#allocation11_spill] sm:$0xff] %v4948_v8  ;;  %v4951_v54 = vsel %vm577_vm2, %v650_v48, %v652_v59  ;;  %v4956_v15 = vsel %vm577_vm2, %v652_v59, %v6366_v22  ;;  %v4959_v49 = vsel %vm577_vm2, %v674_v38, %v676_v11  ;;  %v4964_v47 = vsel %vm577_vm2, %v676_v11, %v6367_v56 }
  0xec   : > { %v6371_v22 = vrot.slane %v4777_v46, 5  ;;  %v6374_v59 = vrot.slane %v4766_v42, 5 }
  0xef   : > { %v541_v32 = vpop.f32.mrf.mxu2  ;;  %v571_v50 = vpop.f32.mrf.mxu3 }
  0xf0   : > { %v700_v33 = vrot.slane %v541_v32, 5  ;;  %v581_v8 = vrot.slane %v571_v50, 5  ;;  %v4966_v61 = vpop.f32.mrf.mxu1  ;;  %v4968_v48 = vpop.f32.mrf.mxu0 }
  0xf1   : > { %6368 = vst [vmem:[#allocation12_spill] sm:$0xff] %v4966_v61 }
  0xf2   : > { %6369 = vst [vmem:[#allocation13_spill] sm:$0xff] %v4968_v48  ;;  %v4971_v43 = vsel %vm577_vm2, %v698_v6, %v700_v33  ;;  %v4976_v38 = vsel %vm577_vm2, %v700_v33, %v6371_v22  ;;  %v4979_v45 = vsel %vm577_vm2, %v579_v34, %v581_v8  ;;  %v4984_v11 = vsel %vm577_vm2, %v581_v8, %v6374_v59 }
  0xf3   : > { %6370 = vst [vmem:[#allocation14_spill] sm:$0xff] %v4971_v43  ;;  %4304 = vmatmul.msk.bf16.gmra.mxu1 %vm368_vm1, %v4675_v19  ;;  %4379 = vmatmul.msk.bf16.gmra.mxu0 %vm368_vm1, %v4675_v19  ;;  %v6342_v34 = vrot.slane %v4966_v61, 6 }
  0xf4   : > { %6372 = vst [vmem:[#allocation15_spill] sm:$0xff] %v4976_v38  ;;  %4329 = vmatmul.msk.bf16.gmra.mxu2 %vm368_vm1, %v4675_v19  ;;  %4354 = vmatmul.msk.bf16.gmra.mxu3 %vm368_vm1, %v4675_v19 }
  0xf5   : > { %6373 = vst [vmem:[#allocation16_spill] sm:$0xff] %v4979_v45 }
  0xf6   : > { %6375 = vst [vmem:[#allocation17_spill] sm:$0xff] %v4984_v11 }
  0xf7   : > { %v4994_v46 = vpop.f32.mrf.mxu2  ;;  %v4996_v6 = vpop.f32.mrf.mxu3 }
  0xf8   : > { %6376 = vst [vmem:[#allocation18_spill] sm:$0xff] %v4994_v46  ;;  %v784_v42 = vpop.f32.mrf.mxu1  ;;  %v4998_v8 = vpop.f32.mrf.mxu0  ;;  %v6344_v22 = vrot.slane %v4994_v46, 7  ;;  %v6343_v59 = vrot.slane %v4996_v6, 7 }
  0xf9   : > { %6377 = vst [vmem:[#allocation19_spill] sm:$0xff] %v4996_v6  ;;  %v960_v56 = vrot.slane %v784_v42, 6 }
  0xfa   : > { %6378 = vst [vmem:[#allocation20_spill] sm:$0xff] %v4998_v8 }
  0xfb   : > { %v961_v32 = vsel %vm905_vm3, %v6342_v34, %v960_v56 }
  0xfc   : > { %v1099_v50 = vadd.f32 %v961_v32, %v4783_v52 }
  0xff   : > { %v1160_v33 = vpop.f32.mrf.mxu2  ;;  %v1536_v19 = vpop.f32.mrf.mxu3 }
 0x100   : > { %v1336_v48 = vrot.slane %v1160_v33, 7  ;;  %v1705_v45 = vrot.slane %v1536_v19, 7  ;;  %v787_v11 = vpop.f32.mrf.mxu1  ;;  %v5007_v8 = vpop.f32.mrf.mxu0 }
 0x101   : > { %6379 = vst [vmem:[#allocation21_spill] sm:$0xff] %v5007_v8  ;;  %v962_v36 = vrot.slane %v787_v11, 6 }
 0x102   : > { %v1337_v42 = vsel %vm1281_vm4, %v6344_v22, %v1336_v48  ;;  %v5015_v52 = vsel %vm1281_vm4, %v6343_v59, %v1705_v45 }
 0x103   : > { %6380 = vst [vmem:[#allocation22_spill] sm:$0xff] %v5015_v52  ;;  %v1475_v32 = vadd.f32 %v1337_v42, %v1099_v50  ;;  %v963_v34 = vsel %vm905_vm3, %v960_v56, %v962_v36  ;;  %4305 = vmatmul.msk.bf16.gmra.mxu1 %vm368_vm1, %v4691_v23  ;;  %4380 = vmatmul.msk.bf16.gmra.mxu0 %vm368_vm1, %v4691_v23 }
 0x104   : > { %v1100_v11 = vadd.f32 %v963_v34, %v4803_v2  ;;  %4330 = vmatmul.msk.bf16.gmra.mxu2 %vm368_vm1, %v4691_v23  ;;  %4355 = vmatmul.msk.bf16.gmra.mxu3 %vm368_vm1, %v4691_v23 }
 0x107   : > { %v1163_v33 = vpop.f32.mrf.mxu2  ;;  %v1539_v19 = vpop.f32.mrf.mxu3 }
 0x108   : > { %v1338_v59 = vrot.slane %v1163_v33, 7  ;;  %v1707_v50 = vrot.slane %v1539_v19, 7  ;;  %v789_v42 = vpop.f32.mrf.mxu1  ;;  %v1916_v56 = vpop.f32.mrf.mxu0 }
 0x109   : > { %v964_v22 = vrot.slane %v789_v42, 6 }
 0x10a   : > { %v1339_v8 = vsel %vm1281_vm4, %v1336_v48, %v1338_v59  ;;  %v5029_v52 = vsel %vm1281_vm4, %v1705_v45, %v1707_v50 }
 0x10b   : > { %v1476_v6 = vadd.f32 %v1339_v8, %v1100_v11  ;;  %v965_v2 = vsel %vm905_vm3, %v962_v36, %v964_v22 }
 0x10c   : > { %v1101_v34 = vadd.f32 %v965_v2, %v4823_v18 }
 0x10f   : > { %v1165_v46 = vpop.f32.mrf.mxu2  ;;  %v1541_v61 = vpop.f32.mrf.mxu3 }
 0x110   : > { %v1340_v23 = vrot.slane %v1165_v46, 7  ;;  %v1709_v17 = vrot.slane %v1541_v61, 7  ;;  %v792_v1 = vpop.f32.mrf.mxu1  ;;  %v1919_v33 = vpop.f32.mrf.mxu0 }
 0x111   : > { %v966_v19 = vrot.slane %v792_v1, 6 }
 0x112   : > { %v1341_v38 = vsel %vm1281_vm4, %v1338_v59, %v1340_v23  ;;  %v1710_v42 = vsel %vm1281_vm4, %v1707_v50, %v1709_v17 }
 0x113   : > { %v1477_v48 = vadd.f32 %v1341_v38, %v1101_v34  ;;  %v1850_v43 = vadd.f32 %v1710_v42, %v1475_v32  ;;  %v967_v45 = vsel %vm905_vm3, %v964_v22, %v966_v19  ;;  %4306 = vmatmul.msk.bf16.gmra.mxu1 %vm368_vm1, %v4708_v27  ;;  %4381 = vmatmul.msk.bf16.gmra.mxu0 %vm368_vm1, %v4708_v27 }
 0x114   : > { %v1102_v18 = vadd.f32 %v967_v45, %v4835_v37  ;;  %4331 = vmatmul.msk.bf16.gmra.mxu2 %vm368_vm1, %v4708_v27  ;;  %4356 = vmatmul.msk.bf16.gmra.mxu3 %vm368_vm1, %v4708_v27 }
 0x115   : > { %v5045_v1 = vadd.f32 %v1916_v56, %v1850_v43 }
 0x117   : > { %6381 = vst [vmem:[#allocation23_spill] sm:$0xff] %v5045_v1  ;;  %v1168_v36 = vpop.f32.mrf.mxu2  ;;  %v1544_v61 = vpop.f32.mrf.mxu3 }
 0x118   : > { %v1342_v38 = vrot.slane %v1168_v36, 7  ;;  %v1711_v46 = vrot.slane %v1544_v61, 7  ;;  %v794_v8 = vpop.f32.mrf.mxu1  ;;  %v1921_v22 = vpop.f32.mrf.mxu0 }
 0x119   : > { %v968_v59 = vrot.slane %v794_v8, 6 }
 0x11a   : > { %v1343_v32 = vsel %vm1281_vm4, %v1340_v23, %v1342_v38  ;;  %v1712_v11 = vsel %vm1281_vm4, %v1709_v17, %v1711_v46 }
 0x11b   : > { %v1478_v37 = vadd.f32 %v1343_v32, %v1102_v18  ;;  %v1851_v50 = vadd.f32 %v1712_v11, %v1476_v6  ;;  %v969_v2 = vsel %vm905_vm3, %v966_v19, %v968_v59 }
 0x11c   : > { %v1103_v34 = vadd.f32 %v969_v2, %v4855_v62 }
 0x11d   : > { %v5051_v27 = vadd.f32 %v1919_v33, %v1851_v50 }
 0x11f   : > { %v1170_v43 = vpop.f32.mrf.mxu2  ;;  %v1546_v56 = vpop.f32.mrf.mxu3 }
 0x120   : > { %v1344_v42 = vrot.slane %v1170_v43, 7  ;;  %v1713_v45 = vrot.slane %v1546_v56, 7  ;;  %v797_v36 = vpop.f32.mrf.mxu1  ;;  %v1924_v61 = vpop.f32.mrf.mxu0 }
 0x121   : > { %v970_v1 = vrot.slane %v797_v36, 6 }
 0x122   : > { %v1345_v8 = vsel %vm1281_vm4, %v1342_v38, %v1344_v42  ;;  %v1714_v23 = vsel %vm1281_vm4, %v1711_v46, %v1713_v45 }
 0x123   : > { %v1479_v17 = vadd.f32 %v1345_v8, %v1103_v34  ;;  %v1852_v18 = vadd.f32 %v1714_v23, %v1477_v48  ;;  %v971_v6 = vsel %vm905_vm3, %v968_v59, %v970_v1  ;;  %4307 = vmatmul.msk.bf16.gmra.mxu1 %vm368_vm1, %v4741_v39  ;;  %4382 = vmatmul.msk.bf16.gmra.mxu0 %vm368_vm1, %v4741_v39 }
 0x124   : > { %v1104_v62 = vadd.f32 %v971_v6, %v4867_v25  ;;  %4332 = vmatmul.msk.bf16.gmra.mxu2 %vm368_vm1, %v4741_v39  ;;  %4357 = vmatmul.msk.bf16.gmra.mxu3 %vm368_vm1, %v4741_v39 }
 0x125   : > { %v5065_v33 = vadd.f32 %v1921_v22, %v1852_v18 }
 0x127   : > { %v1173_v19 = vpop.f32.mrf.mxu2  ;;  %v1549_v48 = vpop.f32.mrf.mxu3 }
 0x128   : > { %v1346_v38 = vrot.slane %v1173_v19, 7  ;;  %v1715_v46 = vrot.slane %v1549_v48, 7  ;;  %v799_v59 = vpop.f32.mrf.mxu1  ;;  %v1926_v32 = vpop.f32.mrf.mxu0 }
 0x129   : > { %v972_v11 = vrot.slane %v799_v59, 6 }
 0x12a   : > { %v1347_v50 = vsel %vm1281_vm4, %v1344_v42, %v1346_v38  ;;  %v1716_v2 = vsel %vm1281_vm4, %v1713_v45, %v1715_v46 }
 0x12b   : > { %v1480_v25 = vadd.f32 %v1347_v50, %v1104_v62  ;;  %v1853_v34 = vadd.f32 %v1716_v2, %v1478_v37  ;;  %v973_v43 = vsel %vm905_vm3, %v970_v1, %v972_v11 }
 0x12c   : > { %v1105_v56 = vadd.f32 %v973_v43, %v4887_v55 }
 0x12d   : > { %v5071_v39 = vadd.f32 %v1924_v61, %v1853_v34 }
 0x12f   : > { %v1175_v22 = vpop.f32.mrf.mxu2  ;;  %v1551_v36 = vpop.f32.mrf.mxu3 }
 0x130   : > { %v1348_v8 = vrot.slane %v1175_v22, 7  ;;  %v1717_v23 = vrot.slane %v1551_v36, 7  ;;  %v802_v18 = vpop.f32.mrf.mxu1  ;;  %v1929_v6 = vpop.f32.mrf.mxu0 }
 0x131   : > { %v974_v19 = vrot.slane %v802_v18, 6 }
 0x132   : > { %v1349_v48 = vsel %vm1281_vm4, %v1346_v38, %v1348_v8  ;;  %v1718_v42 = vsel %vm1281_vm4, %v1715_v46, %v1717_v23 }
 0x133   : > { %v1481_v45 = vadd.f32 %v1349_v48, %v1105_v56  ;;  %v1854_v62 = vadd.f32 %v1718_v42, %v1479_v17  ;;  %v975_v37 = vsel %vm905_vm3, %v972_v11, %v974_v19  ;;  %4308 = vmatmul.msk.bf16.gmra.mxu1 %vm368_vm1, %v4649_v12  ;;  %4383 = vmatmul.msk.bf16.gmra.mxu0 %vm368_vm1, %v4649_v12 }
 0x134   : > { %v1106_v55 = vadd.f32 %v975_v37, %v4899_v9  ;;  %4333 = vmatmul.msk.bf16.gmra.mxu2 %vm368_vm1, %v4649_v12  ;;  %4358 = vmatmul.msk.bf16.gmra.mxu3 %vm368_vm1, %v4649_v12 }
 0x135   : > { %v5085_v1 = vadd.f32 %v1926_v32, %v1854_v62 }
 0x137   : > { %v1178_v61 = vpop.f32.mrf.mxu2  ;;  %v1554_v17 = vpop.f32.mrf.mxu3 }
 0x138   : > { %v1350_v38 = vrot.slane %v1178_v61, 7  ;;  %v1719_v46 = vrot.slane %v1554_v17, 7  ;;  %v804_v59 = vpop.f32.mrf.mxu1  ;;  %v1931_v11 = vpop.f32.mrf.mxu0 }
 0x139   : > { %v976_v50 = vrot.slane %v804_v59, 6 }
 0x13a   : > { %v1351_v2 = vsel %vm1281_vm4, %v1348_v8, %v1350_v38  ;;  %v1720_v34 = vsel %vm1281_vm4, %v1717_v23, %v1719_v46 }
 0x13b   : > { %v1482_v9 = vadd.f32 %v1351_v2, %v1106_v55  ;;  %v1855_v43 = vadd.f32 %v1720_v34, %v1480_v25  ;;  %v977_v56 = vsel %vm905_vm3, %v974_v19, %v976_v50 }
 0x13c   : > { %v1107_v22 = vadd.f32 %v977_v56, %v4919_v44 }
 0x13d   : > { %v5091_v12 = vadd.f32 %v1929_v6, %v1855_v43 }
 0x13f   : > { %v1180_v32 = vpop.f32.mrf.mxu2  ;;  %v1556_v36 = vpop.f32.mrf.mxu3 }
 0x140   : > { %v1352_v18 = vrot.slane %v1180_v32, 7  ;;  %v1721_v48 = vrot.slane %v1556_v36, 7  ;;  %v807_v42 = vpop.f32.mrf.mxu1  ;;  %v1934_v62 = vpop.f32.mrf.mxu0 }
 0x141   : > { %v978_v37 = vrot.slane %v807_v42, 6 }
 0x142   : > { %v1353_v61 = vsel %vm1281_vm4, %v1350_v38, %v1352_v18  ;;  %v1722_v8 = vsel %vm1281_vm4, %v1719_v46, %v1721_v48 }
 0x143   : > { %v1483_v23 = vadd.f32 %v1353_v61, %v1107_v22  ;;  %v1856_v55 = vadd.f32 %v1722_v8, %v1481_v45  ;;  %v979_v25 = vsel %vm905_vm3, %v976_v50, %v978_v37  ;;  %4309 = vmatmul.msk.bf16.gmra.mxu1 %vm368_vm1, %v4664_v16  ;;  %4384 = vmatmul.msk.bf16.gmra.mxu0 %vm368_vm1, %v4664_v16 }
 0x144   : > { %v1108_v44 = vadd.f32 %v979_v25, %v4931_v30  ;;  %4334 = vmatmul.msk.bf16.gmra.mxu2 %vm368_vm1, %v4664_v16  ;;  %4359 = vmatmul.msk.bf16.gmra.mxu3 %vm368_vm1, %v4664_v16 }
 0x145   : > { %v5105_v6 = vadd.f32 %v1931_v11, %v1856_v55 }
 0x147   : > { %v1183_v19 = vpop.f32.mrf.mxu2  ;;  %v1559_v45 = vpop.f32.mrf.mxu3 }
 0x148   : > { %v1354_v17 = vrot.slane %v1183_v19, 7  ;;  %v1723_v38 = vrot.slane %v1559_v45, 7  ;;  %v809_v46 = vpop.f32.mrf.mxu1  ;;  %v1936_v59 = vpop.f32.mrf.mxu0 }
 0x149   : > { %v980_v50 = vrot.slane %v809_v46, 6 }
 0x14a   : > { %v1355_v2 = vsel %vm1281_vm4, %v1352_v18, %v1354_v17  ;;  %v1724_v34 = vsel %vm1281_vm4, %v1721_v48, %v1723_v38 }
 0x14b   : > { %v1484_v30 = vadd.f32 %v1355_v2, %v1108_v44  ;;  %v1857_v43 = vadd.f32 %v1724_v34, %v1482_v9  ;;  %v981_v56 = vsel %vm905_vm3, %v978_v37, %v980_v50 }
 0x14c   : > { %v1109_v22 = vadd.f32 %v981_v56, %v4951_v54 }
 0x14d   : > { %v5111_v16 = vadd.f32 %v1934_v62, %v1857_v43 }
 0x14f   : > { %v1185_v11 = vpop.f32.mrf.mxu2  ;;  %v1561_v32 = vpop.f32.mrf.mxu3 }
 0x150   : > { %v1356_v36 = vrot.slane %v1185_v11, 7  ;;  %v1725_v42 = vrot.slane %v1561_v32, 7  ;;  %v812_v61 = vpop.f32.mrf.mxu1  ;;  %v1939_v8 = vpop.f32.mrf.mxu0 }
 0x151   : > { %v982_v55 = vrot.slane %v812_v61, 6 }
 0x152   : > { %v1357_v25 = vsel %vm1281_vm4, %v1354_v17, %v1356_v36  ;;  %v1726_v18 = vsel %vm1281_vm4, %v1723_v38, %v1725_v42 }
 0x153   : > { %v1485_v48 = vadd.f32 %v1357_v25, %v1109_v22  ;;  %v1858_v44 = vadd.f32 %v1726_v18, %v1483_v23  ;;  %v983_v9 = vsel %vm905_vm3, %v980_v50, %v982_v55  ;;  %4310 = vmatmul.msk.bf16.gmra.mxu1 %vm368_vm1, %v4678_v20  ;;  %4385 = vmatmul.msk.bf16.gmra.mxu0 %vm368_vm1, %v4678_v20 }
 0x154   : > { %v1110_v54 = vadd.f32 %v983_v9, %v4956_v15  ;;  %4335 = vmatmul.msk.bf16.gmra.mxu2 %vm368_vm1, %v4678_v20  ;;  %4360 = vmatmul.msk.bf16.gmra.mxu3 %vm368_vm1, %v4678_v20 }
 0x155   : > { %v5125_v62 = vadd.f32 %v1936_v59, %v1858_v44 }
 0x157   : > { %v1188_v37 = vpop.f32.mrf.mxu2  ;;  %v1564_v23 = vpop.f32.mrf.mxu3 }
 0x158   : > { %v1358_v19 = vrot.slane %v1188_v37, 7  ;;  %v1727_v45 = vrot.slane %v1564_v23, 7  ;;  %v814_v17 = vpop.f32.mrf.mxu1  ;;  %v1941_v38 = vpop.f32.mrf.mxu0 }
 0x159   : > { %v984_v46 = vrot.slane %v814_v17, 6 }
 0x15a   : > { %v1359_v50 = vsel %vm1281_vm4, %v1356_v36, %v1358_v19  ;;  %v1728_v2 = vsel %vm1281_vm4, %v1725_v42, %v1727_v45 }
 0x15b   : > { %v1486_v15 = vadd.f32 %v1359_v50, %v1110_v54  ;;  %v1859_v34 = vadd.f32 %v1728_v2, %v1484_v30  ;;  %v985_v43 = vsel %vm905_vm3, %v982_v55, %v984_v46 }
 0x15c   : > { %v1111_v56 = vadd.f32 %v985_v43, %v4788_v53 }
 0x15d   : > { %v5131_v20 = vadd.f32 %v1939_v8, %v1859_v34 }
 0x15f   : > { %v1190_v59 = vpop.f32.mrf.mxu2  ;;  %v1566_v22 = vpop.f32.mrf.mxu3 }
 0x160   : > { %v1360_v11 = vrot.slane %v1190_v59, 7  ;;  %v1729_v32 = vrot.slane %v1566_v22, 7  ;;  %v817_v61 = vpop.f32.mrf.mxu1  ;;  %v1944_v25 = vpop.f32.mrf.mxu0 }
 0x161   : > { %v986_v18 = vrot.slane %v817_v61, 6 }
 0x162   : > { %v1361_v44 = vsel %vm1281_vm4, %v1358_v19, %v1360_v11  ;;  %v1730_v36 = vsel %vm1281_vm4, %v1727_v45, %v1729_v32 }
 0x163   : > { %v1487_v42 = vadd.f32 %v1361_v44, %v1111_v56  ;;  %v1860_v9 = vadd.f32 %v1730_v36, %v1485_v48  ;;  %v987_v30 = vsel %vm905_vm3, %v984_v46, %v986_v18  ;;  %4311 = vmatmul.msk.bf16.gmra.mxu1 %vm368_vm1, %v4694_v24  ;;  %4386 = vmatmul.msk.bf16.gmra.mxu0 %vm368_vm1, %v4694_v24 }
 0x164   : > { %v1112_v53 = vadd.f32 %v987_v30, %v4806_v3  ;;  %4336 = vmatmul.msk.bf16.gmra.mxu2 %vm368_vm1, %v4694_v24  ;;  %4361 = vmatmul.msk.bf16.gmra.mxu3 %vm368_vm1, %v4694_v24 }
 0x165   : > { %v5145_v8 = vadd.f32 %v1941_v38, %v1860_v9 }
 0x167   : > { %v1193_v55 = vpop.f32.mrf.mxu2  ;;  %v1569_v48 = vpop.f32.mrf.mxu3 }
 0x168   : > { %v1362_v54 = vrot.slane %v1193_v55, 7  ;;  %v1731_v37 = vrot.slane %v1569_v48, 7  ;;  %v819_v23 = vpop.f32.mrf.mxu1  ;;  %v1946_v19 = vpop.f32.mrf.mxu0 }
 0x169   : > { %v988_v45 = vrot.slane %v819_v23, 6 }
 0x16a   : > { %v1363_v17 = vsel %vm1281_vm4, %v1360_v11, %v1362_v54  ;;  %v1732_v46 = vsel %vm1281_vm4, %v1729_v32, %v1731_v37 }
 0x16b   : > { %v1488_v3 = vadd.f32 %v1363_v17, %v1112_v53  ;;  %v1861_v50 = vadd.f32 %v1732_v46, %v1486_v15  ;;  %v989_v2 = vsel %vm905_vm3, %v986_v18, %v988_v45 }
 0x16c   : > { %v1113_v34 = vadd.f32 %v989_v2, %v4826_v21 }
 0x16d   : > { %v5151_v24 = vadd.f32 %v1944_v25, %v1861_v50 }
 0x16f   : > { %v1195_v38 = vpop.f32.mrf.mxu2  ;;  %v1571_v43 = vpop.f32.mrf.mxu3 }
 0x170   : > { %v1364_v56 = vrot.slane %v1195_v38, 7  ;;  %v1733_v59 = vrot.slane %v1571_v43, 7  ;;  %v822_v22 = vpop.f32.mrf.mxu1  ;;  %v1949_v61 = vpop.f32.mrf.mxu0 }
 0x171   : > { %v990_v44 = vrot.slane %v822_v22, 6 }
 0x172   : > { %v1365_v36 = vsel %vm1281_vm4, %v1362_v54, %v1364_v56  ;;  %v1734_v11 = vsel %vm1281_vm4, %v1731_v37, %v1733_v59 }
 0x173   : > { %v1489_v32 = vadd.f32 %v1365_v36, %v1113_v34  ;;  %v1862_v9 = vadd.f32 %v1734_v11, %v1487_v42  ;;  %v991_v15 = vsel %vm905_vm3, %v988_v45, %v990_v44  ;;  %4312 = vmatmul.msk.bf16.gmra.mxu1 %vm368_vm1, %v4711_v28  ;;  %4387 = vmatmul.msk.bf16.gmra.mxu0 %vm368_vm1, %v4711_v28 }
 0x174   : > { %v1114_v21 = vadd.f32 %v991_v15, %v4838_v41  ;;  %4337 = vmatmul.msk.bf16.gmra.mxu2 %vm368_vm1, %v4711_v28  ;;  %4362 = vmatmul.msk.bf16.gmra.mxu3 %vm368_vm1, %v4711_v28 }
 0x175   : > { %v5165_v25 = vadd.f32 %v1946_v19, %v1862_v9 }
 0x177   : > { %v1198_v18 = vpop.f32.mrf.mxu2  ;;  %v1574_v42 = vpop.f32.mrf.mxu3 }
 0x178   : > { %v1366_v30 = vrot.slane %v1198_v18, 7  ;;  %v1735_v53 = vrot.slane %v1574_v42, 7  ;;  %v824_v55 = vpop.f32.mrf.mxu1  ;;  %v1951_v48 = vpop.f32.mrf.mxu0 }
 0x179   : > { %v992_v54 = vrot.slane %v824_v55, 6 }
 0x17a   : > { %v1367_v37 = vsel %vm1281_vm4, %v1364_v56, %v1366_v30  ;;  %v1736_v23 = vsel %vm1281_vm4, %v1733_v59, %v1735_v53 }
 0x17b   : > { %v1490_v41 = vadd.f32 %v1367_v37, %v1114_v21  ;;  %v1863_v45 = vadd.f32 %v1736_v23, %v1488_v3  ;;  %v993_v17 = vsel %vm905_vm3, %v990_v44, %v992_v54 }
 0x17c   : > { %v1115_v46 = vadd.f32 %v993_v17, %v4858_v63 }
 0x17d   : > { %v5171_v28 = vadd.f32 %v1949_v61, %v1863_v45 }
 0x17f   : > { %v1200_v19 = vpop.f32.mrf.mxu2  ;;  %v1576_v50 = vpop.f32.mrf.mxu3 }
 0x180   : > { %v1368_v2 = vrot.slane %v1200_v19, 7  ;;  %v1737_v34 = vrot.slane %v1576_v50, 7  ;;  %v827_v38 = vpop.f32.mrf.mxu1  ;;  %v1954_v43 = vpop.f32.mrf.mxu0 }
 0x181   : > { %v994_v22 = vrot.slane %v827_v38, 6 }
 0x182   : > { %v1369_v36 = vsel %vm1281_vm4, %v1366_v30, %v1368_v2  ;;  %v1738_v56 = vsel %vm1281_vm4, %v1735_v53, %v1737_v34 }
 0x183   : > { %v1491_v59 = vadd.f32 %v1369_v36, %v1115_v46  ;;  %v1864_v11 = vadd.f32 %v1738_v56, %v1489_v32  ;;  %v995_v3 = vsel %vm905_vm3, %v992_v54, %v994_v22  ;;  %4313 = vmatmul.msk.bf16.gmra.mxu1 %vm368_vm1, %v4744_v40  ;;  %4388 = vmatmul.msk.bf16.gmra.mxu0 %vm368_vm1, %v4744_v40 }
 0x184   : > { %v1116_v63 = vadd.f32 %v995_v3, %v4870_v29  ;;  %4338 = vmatmul.msk.bf16.gmra.mxu2 %vm368_vm1, %v4744_v40  ;;  %4363 = vmatmul.msk.bf16.gmra.mxu3 %vm368_vm1, %v4744_v40 }
 0x185   : > { %v5185_v61 = vadd.f32 %v1951_v48, %v1864_v11 }
 0x187   : > { %v1203_v44 = vpop.f32.mrf.mxu2  ;;  %v1579_v32 = vpop.f32.mrf.mxu3 }
 0x188   : > { %v1370_v9 = vrot.slane %v1203_v44, 7  ;;  %v1739_v15 = vrot.slane %v1579_v32, 7  ;;  %v829_v21 = vpop.f32.mrf.mxu1  ;;  %v1956_v18 = vpop.f32.mrf.mxu0 }
 0x189   : > { %v996_v42 = vrot.slane %v829_v21, 6 }
 0x18a   : > { %v1371_v30 = vsel %vm1281_vm4, %v1368_v2, %v1370_v9  ;;  %v1740_v53 = vsel %vm1281_vm4, %v1737_v34, %v1739_v15 }
 0x18b   : > { %v1492_v29 = vadd.f32 %v1371_v30, %v1116_v63  ;;  %v1865_v55 = vadd.f32 %v1740_v53, %v1490_v41  ;;  %v997_v54 = vsel %vm905_vm3, %v994_v22, %v996_v42  ;;  %v4538_v22 = vld [vmem:[%s4640_s30 + $0x90] sm:$0xff] }
 0x18c   : > { %v1117_v40 = vadd.f32 %v997_v54, %v4890_v58 }
 0x18d   : > { %v5191_v48 = vadd.f32 %v1954_v43, %v1865_v55 }
 0x18f   : > { %v1205_v37 = vpop.f32.mrf.mxu2  ;;  %v1581_v23 = vpop.f32.mrf.mxu3 }
 0x190   : > { %v1372_v45 = vrot.slane %v1205_v37, 7  ;;  %v1741_v17 = vrot.slane %v1581_v23, 7  ;;  %v832_v46 = vpop.f32.mrf.mxu1  ;;  %v1959_v19 = vpop.f32.mrf.mxu0 }
 0x191   : > { %v998_v50 = vrot.slane %v832_v46, 6 }
 0x192   : > { %v1373_v2 = vsel %vm1281_vm4, %v1370_v9, %v1372_v45  ;;  %v1742_v34 = vsel %vm1281_vm4, %v1739_v15, %v1741_v17 }
 0x193   : > { %v1493_v38 = vadd.f32 %v1373_v2, %v1117_v40  ;;  %v1866_v41 = vadd.f32 %v1742_v34, %v1491_v59  ;;  %v999_v36 = vsel %vm905_vm3, %v996_v42, %v998_v50  ;;  %4314 = vmatmul.msk.bf16.gmra.mxu1 %vm368_vm1, %v4538_v22  ;;  %4389 = vmatmul.msk.bf16.gmra.mxu0 %vm368_vm1, %v4538_v22 }
 0x194   : > { %v1118_v58 = vadd.f32 %v999_v36, %v4902_v10  ;;  %4339 = vmatmul.msk.bf16.gmra.mxu2 %vm368_vm1, %v4538_v22  ;;  %4364 = vmatmul.msk.bf16.gmra.mxu3 %vm368_vm1, %v4538_v22 }
 0x195   : > { %v5202_v43 = vadd.f32 %v1956_v18, %v1866_v41 }
 0x197   : > { %v1208_v56 = vpop.f32.mrf.mxu2  ;;  %v1584_v11 = vpop.f32.mrf.mxu3 }
 0x198   : > { %v1374_v3 = vrot.slane %v1208_v56, 7  ;;  %v1743_v63 = vrot.slane %v1584_v11, 7  ;;  %v834_v59 = vpop.f32.mrf.mxu1  ;;  %v1961_v44 = vpop.f32.mrf.mxu0 }
 0x199   : > { %v1000_v32 = vrot.slane %v834_v59, 6 }
 0x19a   : > { %v1375_v9 = vsel %vm1281_vm4, %v1372_v45, %v1374_v3  ;;  %v1744_v15 = vsel %vm1281_vm4, %v1741_v17, %v1743_v63 }
 0x19b   : > { %v1494_v21 = vadd.f32 %v1375_v9, %v1118_v58  ;;  %v1867_v42 = vadd.f32 %v1744_v15, %v1492_v29  ;;  %v1001_v10 = vsel %vm905_vm3, %v998_v50, %v1000_v32  ;;  %v4539_v50 = vld [vmem:[%s4640_s30 + $0x98] sm:$0xff] }
 0x19c   : > { %v1119_v30 = vadd.f32 %v1001_v10, %v4922_v57 }
 0x19d   : > { %v5208_v18 = vadd.f32 %v1959_v19, %v1867_v42 }
 0x19f   : > { %v1210_v53 = vpop.f32.mrf.mxu2  ;;  %v1586_v55 = vpop.f32.mrf.mxu3 }
 0x1a0   : > { %v1376_v54 = vrot.slane %v1210_v53, 7  ;;  %v1745_v40 = vrot.slane %v1586_v55, 7  ;;  %v837_v37 = vpop.f32.mrf.mxu1  ;;  %v1964_v23 = vpop.f32.mrf.mxu0 }
 0x1a1   : > { %v1002_v46 = vrot.slane %v837_v37, 6 }
 0x1a2   : > { %v1377_v45 = vsel %vm1281_vm4, %v1374_v3, %v1376_v54  ;;  %v1746_v17 = vsel %vm1281_vm4, %v1743_v63, %v1745_v40 }
 0x1a3   : > { %v1495_v2 = vadd.f32 %v1377_v45, %v1119_v30  ;;  %v1868_v29 = vadd.f32 %v1746_v17, %v1493_v38  ;;  %v1003_v34 = vsel %vm905_vm3, %v1000_v32, %v1002_v46  ;;  %4315 = vmatmul.msk.bf16.gmra.mxu1 %vm368_vm1, %v4539_v50  ;;  %4390 = vmatmul.msk.bf16.gmra.mxu0 %vm368_vm1, %v4539_v50 }
 0x1a4   : > { %v1120_v57 = vadd.f32 %v1003_v34, %v4934_v31  ;;  %4340 = vmatmul.msk.bf16.gmra.mxu2 %vm368_vm1, %v4539_v50  ;;  %4365 = vmatmul.msk.bf16.gmra.mxu3 %vm368_vm1, %v4539_v50 }
 0x1a5   : > { %v5219_v19 = vadd.f32 %v1961_v44, %v1868_v29 }
 0x1a7   : > { %v1213_v41 = vpop.f32.mrf.mxu2  ;;  %v1589_v36 = vpop.f32.mrf.mxu3 }
 0x1a8   : > { %v1378_v22 = vrot.slane %v1213_v41, 7  ;;  %v1747_v58 = vrot.slane %v1589_v36, 7  ;;  %v839_v38 = vpop.f32.mrf.mxu1  ;;  %v1966_v56 = vpop.f32.mrf.mxu0 }
 0x1a9   : > { %v1004_v11 = vrot.slane %v839_v38, 6 }
 0x1aa   : > { %v1379_v3 = vsel %vm1281_vm4, %v1376_v54, %v1378_v22  ;;  %v1748_v63 = vsel %vm1281_vm4, %v1745_v40, %v1747_v58 }
 0x1ab   : > { %v1496_v59 = vadd.f32 %v1379_v3, %v1120_v57  ;;  %v1869_v32 = vadd.f32 %v1748_v63, %v1494_v21  ;;  %v1005_v31 = vsel %vm905_vm3, %v1002_v46, %v1004_v11  ;;  %v4540_v46 = vld [vmem:[%s4640_s30 + $0xa0] sm:$0xff] }
 0x1ac   : > { %v1121_v9 = vadd.f32 %v1005_v31, %v4959_v49 }
 0x1ad   : > { %v5225_v44 = vadd.f32 %v1964_v23, %v1869_v32 }
 0x1af   : > { %v1215_v15 = vpop.f32.mrf.mxu2  ;;  %v1591_v42 = vpop.f32.mrf.mxu3 }
 0x1b0   : > { %v1380_v10 = vrot.slane %v1215_v15, 7  ;;  %v1749_v30 = vrot.slane %v1591_v42, 7  ;;  %v842_v53 = vpop.f32.mrf.mxu1  ;;  %v1969_v55 = vpop.f32.mrf.mxu0 }
 0x1b1   : > { %v1006_v37 = vrot.slane %v842_v53, 6 }
 0x1b2   : > { %v1381_v54 = vsel %vm1281_vm4, %v1378_v22, %v1380_v10  ;;  %v1750_v40 = vsel %vm1281_vm4, %v1747_v58, %v1749_v30 }
 0x1b3   : > { %v1497_v45 = vadd.f32 %v1381_v54, %v1121_v9  ;;  %v1870_v21 = vadd.f32 %v1750_v40, %v1495_v2  ;;  %v1007_v17 = vsel %vm905_vm3, %v1004_v11, %v1006_v37  ;;  %4316 = vmatmul.msk.bf16.gmra.mxu1 %vm368_vm1, %v4540_v46  ;;  %4391 = vmatmul.msk.bf16.gmra.mxu0 %vm368_vm1, %v4540_v46 }
 0x1b4   : > { %v1122_v49 = vadd.f32 %v1007_v17, %v4964_v47  ;;  %4341 = vmatmul.msk.bf16.gmra.mxu2 %vm368_vm1, %v4540_v46  ;;  %4366 = vmatmul.msk.bf16.gmra.mxu3 %vm368_vm1, %v4540_v46 }
 0x1b5   : > { %v5236_v23 = vadd.f32 %v1966_v56, %v1870_v21 }
 0x1b7   : > { %v1218_v29 = vpop.f32.mrf.mxu2  ;;  %v1594_v34 = vpop.f32.mrf.mxu3 }
 0x1b8   : > { %v1382_v50 = vrot.slane %v1218_v29, 7  ;;  %v1751_v57 = vrot.slane %v1594_v34, 7  ;;  %v844_v2 = vpop.f32.mrf.mxu1  ;;  %v1971_v41 = vpop.f32.mrf.mxu0 }
 0x1b9   : > { %v1008_v36 = vrot.slane %v844_v2, 6 }
 0x1ba   : > { %v1383_v22 = vsel %vm1281_vm4, %v1380_v10, %v1382_v50  ;;  %v1752_v58 = vsel %vm1281_vm4, %v1749_v30, %v1751_v57 }
 0x1bb   : > { %v1498_v38 = vadd.f32 %v1383_v22, %v1122_v49  ;;  %v1871_v11 = vadd.f32 %v1752_v58, %v1496_v59  ;;  %v1009_v47 = vsel %vm905_vm3, %v1006_v37, %v1008_v36  ;;  %v4541_v37 = vld [vmem:[%s4640_s30 + $0xa8] sm:$0xff] }
 0x1bc   : > { %v1123_v3 = vadd.f32 %v1009_v47, %v4795_v0 }
 0x1bd   : > { %v5242_v56 = vadd.f32 %v1969_v55, %v1871_v11 }
 0x1bf   : > { %v1220_v63 = vpop.f32.mrf.mxu2  ;;  %v1596_v32 = vpop.f32.mrf.mxu3 }
 0x1c0   : > { %v1384_v31 = vrot.slane %v1220_v63, 7  ;;  %v1753_v9 = vrot.slane %v1596_v32, 7  ;;  %v847_v15 = vpop.f32.mrf.mxu1  ;;  %v1974_v42 = vpop.f32.mrf.mxu0 }
 0x1c1   : > { %v1010_v53 = vrot.slane %v847_v15, 6 }
 0x1c2   : > { %v1385_v10 = vsel %vm1281_vm4, %v1382_v50, %v1384_v31  ;;  %v1754_v30 = vsel %vm1281_vm4, %v1751_v57, %v1753_v9 }
 0x1c3   : > { %v1499_v54 = vadd.f32 %v1385_v10, %v1123_v3  ;;  %v1872_v59 = vadd.f32 %v1754_v30, %v1497_v45  ;;  %v1011_v40 = vsel %vm905_vm3, %v1008_v36, %v1010_v53  ;;  %4317 = vmatmul.msk.bf16.gmra.mxu1 %vm368_vm1, %v4541_v37  ;;  %4392 = vmatmul.msk.bf16.gmra.mxu0 %vm368_vm1, %v4541_v37 }
 0x1c4   : > { %v1124_v0 = vadd.f32 %v1011_v40, %v4817_v14  ;;  %4342 = vmatmul.msk.bf16.gmra.mxu2 %vm368_vm1, %v4541_v37  ;;  %4367 = vmatmul.msk.bf16.gmra.mxu3 %vm368_vm1, %v4541_v37 }
 0x1c5   : > { %v5253_v55 = vadd.f32 %v1971_v41, %v1872_v59 }
 0x1c7   : > { %v1223_v21 = vpop.f32.mrf.mxu2  ;;  %v1599_v17 = vpop.f32.mrf.mxu3 }
 0x1c8   : > { %v1386_v46 = vrot.slane %v1223_v21, 7  ;;  %v1755_v49 = vrot.slane %v1599_v17, 7  ;;  %v849_v45 = vpop.f32.mrf.mxu1  ;;  %v1976_v29 = vpop.f32.mrf.mxu0 }
 0x1c9   : > { %v1012_v34 = vrot.slane %v849_v45, 6 }
 0x1ca   : > { %v1387_v50 = vsel %vm1281_vm4, %v1384_v31, %v1386_v46  ;;  %v1756_v57 = vsel %vm1281_vm4, %v1753_v9, %v1755_v49 }
 0x1cb   : > { %v1500_v2 = vadd.f32 %v1387_v50, %v1124_v0  ;;  %v1873_v36 = vadd.f32 %v1756_v57, %v1498_v38  ;;  %v1013_v14 = vsel %vm905_vm3, %v1010_v53, %v1012_v34  ;;  %v4542_v53 = vld [vmem:[%s4640_s30 + $0xb0] sm:$0xff] }
 0x1cc   : > { %v1125_v22 = vadd.f32 %v1013_v14, %v4829_v35 }
 0x1cd   : > { %v5259_v41 = vadd.f32 %v1974_v42, %v1873_v36 }
 0x1cf   : > { %v1225_v58 = vpop.f32.mrf.mxu2  ;;  %v1601_v11 = vpop.f32.mrf.mxu3 }
 0x1d0   : > { %v1388_v47 = vrot.slane %v1225_v58, 7  ;;  %v1757_v3 = vrot.slane %v1601_v11, 7  ;;  %v852_v63 = vpop.f32.mrf.mxu1  ;;  %v1979_v32 = vpop.f32.mrf.mxu0 }
 0x1d1   : > { %v1014_v15 = vrot.slane %v852_v63, 6 }
 0x1d2   : > { %v1389_v31 = vsel %vm1281_vm4, %v1386_v46, %v1388_v47  ;;  %v1758_v9 = vsel %vm1281_vm4, %v1755_v49, %v1757_v3 }
 0x1d3   : > { %v1501_v10 = vadd.f32 %v1389_v31, %v1125_v22  ;;  %v1874_v38 = vadd.f32 %v1758_v9, %v1499_v54  ;;  %v1015_v30 = vsel %vm905_vm3, %v1012_v34, %v1014_v15  ;;  %4318 = vmatmul.msk.bf16.gmra.mxu1 %vm368_vm1, %v4542_v53  ;;  %4393 = vmatmul.msk.bf16.gmra.mxu0 %vm368_vm1, %v4542_v53 }
 0x1d4   : > { %v1126_v35 = vadd.f32 %v1015_v30, %v4849_v60  ;;  %4343 = vmatmul.msk.bf16.gmra.mxu2 %vm368_vm1, %v4542_v53  ;;  %4368 = vmatmul.msk.bf16.gmra.mxu3 %vm368_vm1, %v4542_v53 }
 0x1d5   : > { %v5270_v42 = vadd.f32 %v1976_v29, %v1874_v38 }
 0x1d7   : > { %v1228_v59 = vpop.f32.mrf.mxu2  ;;  %v1604_v40 = vpop.f32.mrf.mxu3 }
 0x1d8   : > { %v1390_v37 = vrot.slane %v1228_v59, 7  ;;  %v1759_v0 = vrot.slane %v1604_v40, 7  ;;  %v854_v54 = vpop.f32.mrf.mxu1  ;;  %v1981_v21 = vpop.f32.mrf.mxu0 }
 0x1d9   : > { %v1016_v17 = vrot.slane %v854_v54, 6 }
 0x1da   : > { %v1391_v46 = vsel %vm1281_vm4, %v1388_v47, %v1390_v37  ;;  %v1760_v49 = vsel %vm1281_vm4, %v1757_v3, %v1759_v0 }
 0x1db   : > { %v1502_v45 = vadd.f32 %v1391_v46, %v1126_v35  ;;  %v1875_v34 = vadd.f32 %v1760_v49, %v1500_v2  ;;  %v1017_v60 = vsel %vm905_vm3, %v1014_v15, %v1016_v17  ;;  %v4543_v15 = vld [vmem:[%s4640_s30 + $0xb8] sm:$0xff] }
 0x1dc   : > { %v1127_v50 = vadd.f32 %v1017_v60, %v4861_v13 }
 0x1dd   : > { %v5276_v29 = vadd.f32 %v1979_v32, %v1875_v34 }
 0x1df   : > { %v1230_v57 = vpop.f32.mrf.mxu2  ;;  %v1606_v36 = vpop.f32.mrf.mxu3 }
 0x1e0   : > { %v1392_v14 = vrot.slane %v1230_v57, 7  ;;  %v1761_v22 = vrot.slane %v1606_v36, 7  ;;  %v857_v58 = vpop.f32.mrf.mxu1  ;;  %v1984_v11 = vpop.f32.mrf.mxu0 }
 0x1e1   : > { %v1018_v63 = vrot.slane %v857_v58, 6 }
 0x1e2   : > { %v1393_v47 = vsel %vm1281_vm4, %v1390_v37, %v1392_v14  ;;  %v1762_v3 = vsel %vm1281_vm4, %v1759_v0, %v1761_v22 }
 0x1e3   : > { %v1503_v31 = vadd.f32 %v1393_v47, %v1127_v50  ;;  %v1876_v2 = vadd.f32 %v1762_v3, %v1501_v10  ;;  %v1019_v9 = vsel %vm905_vm3, %v1016_v17, %v1018_v63  ;;  %4319 = vmatmul.msk.bf16.gmra.mxu1 %vm368_vm1, %v4543_v15  ;;  %4394 = vmatmul.msk.bf16.gmra.mxu0 %vm368_vm1, %v4543_v15 }
 0x1e4   : > { %v1128_v13 = vadd.f32 %v1019_v9, %v4881_v51  ;;  %4344 = vmatmul.msk.bf16.gmra.mxu2 %vm368_vm1, %v4543_v15  ;;  %4369 = vmatmul.msk.bf16.gmra.mxu3 %vm368_vm1, %v4543_v15 }
 0x1e5   : > { %v5287_v32 = vadd.f32 %v1981_v21, %v1876_v2 }
 0x1e7   : > { %v1233_v38 = vpop.f32.mrf.mxu2  ;;  %v1609_v30 = vpop.f32.mrf.mxu3 }
 0x1e8   : > { %v1394_v53 = vrot.slane %v1233_v38, 7  ;;  %v1763_v35 = vrot.slane %v1609_v30, 7  ;;  %v859_v10 = vpop.f32.mrf.mxu1  ;;  %v1986_v59 = vpop.f32.mrf.mxu0 }
 0x1e9   : > { %v1020_v40 = vrot.slane %v859_v10, 6 }
 0x1ea   : > { %v1395_v37 = vsel %vm1281_vm4, %v1392_v14, %v1394_v53  ;;  %v1764_v0 = vsel %vm1281_vm4, %v1761_v22, %v1763_v35 }
 0x1eb   : > { %v1504_v54 = vadd.f32 %v1395_v37, %v1128_v13  ;;  %v1877_v17 = vadd.f32 %v1764_v0, %v1502_v45  ;;  %v1021_v51 = vsel %vm905_vm3, %v1018_v63, %v1020_v40  ;;  %v4544_v63 = vld [vmem:[%s4640_s30] sm:$0xff] }
 0x1ec   : > { %v1129_v46 = vadd.f32 %v1021_v51, %v4893_v5 }
 0x1ed   : > { %v5293_v21 = vadd.f32 %v1984_v11, %v1877_v17 }
 0x1ef   : > { %v1235_v49 = vpop.f32.mrf.mxu2  ;;  %v1611_v34 = vpop.f32.mrf.mxu3 }
 0x1f0   : > { %v1396_v60 = vrot.slane %v1235_v49, 7  ;;  %v1765_v50 = vrot.slane %v1611_v34, 7  ;;  %v862_v57 = vpop.f32.mrf.mxu1  ;;  %v1989_v36 = vpop.f32.mrf.mxu0 }
 0x1f1   : > { %v1022_v58 = vrot.slane %v862_v57, 6 }
 0x1f2   : > { %v1397_v14 = vsel %vm1281_vm4, %v1394_v53, %v1396_v60  ;;  %v1766_v22 = vsel %vm1281_vm4, %v1763_v35, %v1765_v50 }
 0x1f3   : > { %v1505_v47 = vadd.f32 %v1397_v14, %v1129_v46  ;;  %v1878_v45 = vadd.f32 %v1766_v22, %v1503_v31  ;;  %v1023_v3 = vsel %vm905_vm3, %v1020_v40, %v1022_v58  ;;  %4396 = vmatmul.msk.bf16.vlgmr.msra.gmra.mxu1 %vm368_vm1, %v4544_v63  ;;  %4471 = vmatmul.msk.bf16.vlgmr.msra.gmra.mxu0 %vm368_vm1, %v4544_v63 }
 0x1f4   : > { %v1130_v5 = vadd.f32 %v1023_v3, %v4913_v7  ;;  %4421 = vmatmul.msk.bf16.vlgmr.msra.gmra.mxu2 %vm368_vm1, %v4544_v63  ;;  %4446 = vmatmul.msk.bf16.vlgmr.msra.gmra.mxu3 %vm368_vm1, %v4544_v63 }
 0x1f5   : > { %v5304_v11 = vadd.f32 %v1986_v59, %v1878_v45 }
 0x1f7   : > { %v1238_v2 = vpop.f32.mrf.mxu2  ;;  %v1614_v9 = vpop.f32.mrf.mxu3 }
 0x1f8   : > { %v1398_v15 = vrot.slane %v1238_v2, 7  ;;  %v1767_v13 = vrot.slane %v1614_v9, 7  ;;  %v864_v31 = vpop.f32.mrf.mxu1  ;;  %v1991_v38 = vpop.f32.mrf.mxu0 }
 0x1f9   : > { %v1024_v30 = vrot.slane %v864_v31, 6 }
 0x1fa   : > { %v1399_v53 = vsel %vm1281_vm4, %v1396_v60, %v1398_v15  ;;  %v1768_v35 = vsel %vm1281_vm4, %v1765_v50, %v1767_v13 }
 0x1fb   : > { %v1506_v10 = vadd.f32 %v1399_v53, %v1130_v5  ;;  %v1879_v40 = vadd.f32 %v1768_v35, %v1504_v54  ;;  %v1025_v7 = vsel %vm905_vm3, %v1022_v58, %v1024_v30  ;;  %v4545_v58 = vld [vmem:[%s4640_s30 + $0x8] sm:$0xff]  ;;  %v6382_v35 = vld [vmem:[#allocation14_spill] sm:$0xff] }
 0x1fc   : > { %v1131_v37 = vadd.f32 %v1025_v7, %v4925_v26 }
 0x1fd   : > { %v5310_v59 = vadd.f32 %v1989_v36, %v1879_v40 }
 0x1ff   : > { %v1240_v0 = vpop.f32.mrf.mxu2  ;;  %v1616_v17 = vpop.f32.mrf.mxu3 }
 0x200   : > { %v1400_v51 = vrot.slane %v1240_v0, 7  ;;  %v1769_v46 = vrot.slane %v1616_v17, 7  ;;  %v867_v49 = vpop.f32.mrf.mxu1  ;;  %v1994_v34 = vpop.f32.mrf.mxu0 }
 0x201   : > { %v1026_v57 = vrot.slane %v867_v49, 6 }
 0x202   : > { %v1401_v60 = vsel %vm1281_vm4, %v1398_v15, %v1400_v51  ;;  %v1770_v50 = vsel %vm1281_vm4, %v1767_v13, %v1769_v46  ;;  %v4578_v15 = vmov 0   ;;  %v3680_v13 = vld [vmem:[%s6336_s3] sm:$0xff] }
 0x203   : > { %v1507_v14 = vadd.f32 %v1401_v60, %v1131_v37  ;;  %v1880_v54 = vadd.f32 %v1770_v50, %v1505_v47  ;;  %v1027_v22 = vsel %vm905_vm3, %v1024_v30, %v1026_v57  ;;  %4397 = vmatmul.msk.bf16.gmra.mxu1 %vm368_vm1, %v4545_v58  ;;  %4472 = vmatmul.msk.bf16.gmra.mxu0 %vm368_vm1, %v4545_v58 }
 0x204   : > { %v1132_v26 = vadd.f32 %v1027_v22, %v4945_v4  ;;  %4422 = vmatmul.msk.bf16.gmra.mxu2 %vm368_vm1, %v4545_v58  ;;  %4447 = vmatmul.msk.bf16.gmra.mxu3 %vm368_vm1, %v4545_v58  ;;  %v4546_v58 = vld [vmem:[%s4640_s30 + $0x10] sm:$0xff] }
 0x205   : > { %v5321_v36 = vadd.f32 %v1991_v38, %v1880_v54  ;;  %4534 = vset.pattern.permute.xlu0 %v4578_v15  ;;  %4535 = vset.pattern.permute.xlu1 %v4578_v15 }
 0x206   : > { %3730 = vperm.xlu0 %4534, %v3680_v13   ;;  %4536 = vset.pattern.permute.xlu2 %v4578_v15 }
 0x207   : > { %v1243_v45 = vpop.f32.mrf.mxu2  ;;  %v1619_v3 = vpop.f32.mrf.mxu3 }
 0x208   : > { %v1402_v63 = vrot.slane %v1243_v45, 7  ;;  %v1771_v5 = vrot.slane %v1619_v3, 7  ;;  %v869_v47 = vpop.f32.mrf.mxu1  ;;  %v1996_v2 = vpop.f32.mrf.mxu0 }
 0x209   : > { %v1028_v9 = vrot.slane %v869_v47, 6 }
 0x20a   : > { %v1403_v4 = vsel %vm1281_vm4, %v1400_v51, %v1402_v63  ;;  %v1772_v31 = vsel %vm1281_vm4, %v1769_v46, %v1771_v5  ;;  %v3681_v46 = vld [vmem:[%s6336_s3 + $0x8] sm:$0xff] }
 0x20b   : > { %v1508_v38 = vadd.f32 %v1403_v4, %v1132_v26  ;;  %v1881_v30 = vadd.f32 %v1772_v31, %v1506_v10  ;;  %v1029_v53 = vsel %vm905_vm3, %v1026_v57, %v1028_v9  ;;  %v6383_v26 = vld [vmem:[#allocation15_spill] sm:$0xff]  ;;  %v3682_v4 = vld [vmem:[%s6336_s3 + $0x10] sm:$0xff] }
 0x20c   : > { %v1133_v40 = vadd.f32 %v1029_v53, %v6382_v35  ;;  %3740 = vperm.xlu1 %4535, %v3682_v4  }
 0x20d   : > { %v5330_v7 = vadd.f32 %v1994_v34, %v1881_v30 }
 0x20e   : > { %3735 = vperm.xlu0 %4534, %v3681_v46  }
 0x20f   : > { %v1245_v37 = vpop.f32.mrf.mxu2  ;;  %v1621_v0 = vpop.f32.mrf.mxu3 }
 0x210   : > { %v1404_v17 = vrot.slane %v1245_v37, 7  ;;  %v1773_v49 = vrot.slane %v1621_v0, 7  ;;  %v872_v60 = vpop.f32.mrf.mxu1  ;;  %v1999_v50 = vpop.f32.mrf.mxu0 }
 0x211   : > { %v1030_v51 = vrot.slane %v872_v60, 6 }
 0x212   : > { %v1405_v10 = vsel %vm1281_vm4, %v1402_v63, %v1404_v17  ;;  %v1774_v57 = vsel %vm1281_vm4, %v1771_v5, %v1773_v49 }
 0x213   : > { %v1509_v54 = vadd.f32 %v1405_v10, %v1133_v40  ;;  %v1882_v22 = vadd.f32 %v1774_v57, %v1507_v14  ;;  %v1031_v34 = vsel %vm905_vm3, %v1028_v9, %v1030_v51  ;;  %4398 = vmatmul.msk.bf16.gmra.mxu1 %vm368_vm1, %v4546_v58  ;;  %4473 = vmatmul.msk.bf16.gmra.mxu0 %vm368_vm1, %v4546_v58  ;;  %v6384_v40 = vld [vmem:[#allocation2_spill] sm:$0xff] }
 0x214   : > { %v1134_v45 = vadd.f32 %v1031_v34, %v6383_v26  ;;  %4423 = vmatmul.msk.bf16.gmra.mxu2 %vm368_vm1, %v4546_v58  ;;  %4448 = vmatmul.msk.bf16.gmra.mxu3 %vm368_vm1, %v4546_v58 }
 0x215   : > { %v5344_v3 = vadd.f32 %v1996_v2, %v1882_v22 }
 0x217   : > { %v1248_v63 = vpop.f32.mrf.mxu2  ;;  %v1624_v5 = vpop.f32.mrf.mxu3 }
 0x218   : > { %v1406_v47 = vrot.slane %v1248_v63, 7  ;;  %v1775_v15 = vrot.slane %v1624_v5, 7  ;;  %v874_v14 = vpop.f32.mrf.mxu1  ;;  %v2001_v13 = vpop.f32.mrf.mxu0  ;;  %v6385_v63 = vld [vmem:[#allocation3_spill] sm:$0xff] }
 0x219   : > { %v1032_v9 = vrot.slane %v874_v14, 6 }
 0x21a   : > { %v1407_v31 = vsel %vm1281_vm4, %v1404_v17, %v1406_v47  ;;  %v1776_v30 = vsel %vm1281_vm4, %v1773_v49, %v1775_v15  ;;  %v3683_v17 = vld [vmem:[%s6336_s3 + $0x18] sm:$0xff] }
 0x21b   : > { %v1510_v53 = vadd.f32 %v1407_v31, %v1134_v45  ;;  %v1883_v35 = vadd.f32 %v1776_v30, %v1508_v38  ;;  %v1033_v2 = vsel %vm905_vm3, %v1030_v51, %v1032_v9  ;;  %3745 = vperm.xlu1 %4535, %v3683_v17   ;;  %v4547_v45 = vld [vmem:[%s4640_s30 + $0x18] sm:$0xff] }
 0x21c   : > { %v1135_v37 = vadd.f32 %v1033_v2, %v6384_v40 }
 0x21d   : > { %v5353_v0 = vadd.f32 %v1999_v50, %v1883_v35 }
 0x21f   : > { %v1250_v60 = vpop.f32.mrf.mxu2  ;;  %v1626_v46 = vpop.f32.mrf.mxu3 }
 0x220   : > { %v1408_v10 = vrot.slane %v1250_v60, 7  ;;  %v1777_v57 = vrot.slane %v1626_v46, 7  ;;  %v877_v22 = vpop.f32.mrf.mxu1  ;;  %v2004_v34 = vpop.f32.mrf.mxu0  ;;  %v6386_v46 = vld [vmem:[#allocation4_spill] sm:$0xff] }
 0x221   : > { %v1034_v58 = vrot.slane %v877_v22, 6 }
 0x222   : > { %v1409_v38 = vsel %vm1281_vm4, %v1406_v47, %v1408_v10  ;;  %v1778_v49 = vsel %vm1281_vm4, %v1775_v15, %v1777_v57 }
 0x223   : > { %v1511_v51 = vadd.f32 %v1409_v38, %v1135_v37  ;;  %v1884_v26 = vadd.f32 %v1778_v49, %v1509_v54  ;;  %v1035_v50 = vsel %vm905_vm3, %v1032_v9, %v1034_v58  ;;  %4399 = vmatmul.msk.bf16.gmra.mxu1 %vm368_vm1, %v4547_v45  ;;  %4474 = vmatmul.msk.bf16.gmra.mxu0 %vm368_vm1, %v4547_v45 }
 0x224   : > { %v1136_v5 = vadd.f32 %v1035_v50, %v6385_v63  ;;  %4424 = vmatmul.msk.bf16.gmra.mxu2 %vm368_vm1, %v4547_v45  ;;  %4449 = vmatmul.msk.bf16.gmra.mxu3 %vm368_vm1, %v4547_v45 }
 0x225   : > { %v5367_v14 = vadd.f32 %v2001_v13, %v1884_v26 }
 0x227   : > { %v1253_v47 = vpop.f32.mrf.mxu2  ;;  %v1629_v15 = vpop.f32.mrf.mxu3 }
 0x228   : > { %v1410_v4 = vrot.slane %v1253_v47, 7  ;;  %v1779_v31 = vrot.slane %v1629_v15, 7  ;;  %v879_v54 = vpop.f32.mrf.mxu1  ;;  %v2006_v30 = vpop.f32.mrf.mxu0 }
 0x229   : > { %v1036_v9 = vrot.slane %v879_v54, 6 }
 0x22a   : > { %v1411_v35 = vsel %vm1281_vm4, %v1408_v10, %v1410_v4  ;;  %v1780_v2 = vsel %vm1281_vm4, %v1777_v57, %v1779_v31 }
 0x22b   : > { %v1512_v40 = vadd.f32 %v1411_v35, %v1136_v5  ;;  %v1885_v37 = vadd.f32 %v1780_v2, %v1510_v53  ;;  %v1037_v60 = vsel %vm905_vm3, %v1034_v58, %v1036_v9  ;;  %v4548_v58 = vld [vmem:[%s4640_s30 + $0x20] sm:$0xff] }
 0x22c   : > { %v1137_v22 = vadd.f32 %v1037_v60, %v6386_v46  ;;  %v3686_v60 = vld [vmem:[%s6336_s3 + $0x30] sm:$0xff] }
 0x22d   : > { %v5373_v13 = vadd.f32 %v2004_v34, %v1885_v37  ;;  %v6388_v34 = vld [vmem:[#allocation5_spill] sm:$0xff]  ;;  %3760 = vperm.xlu0 %4534, %v3686_v60  }
 0x22f   : > { %6387 = vst [vmem:[#allocation14_spill] sm:$0xff] %v5373_v13  ;;  %v1255_v17 = vpop.f32.mrf.mxu2  ;;  %v1631_v38 = vpop.f32.mrf.mxu3 }
 0x230   : > { %v1412_v49 = vrot.slane %v1255_v17, 7  ;;  %v1781_v26 = vrot.slane %v1631_v38, 7  ;;  %v882_v50 = vpop.f32.mrf.mxu1  ;;  %v2009_v45 = vpop.f32.mrf.mxu0 }
 0x231   : > { %v1038_v63 = vrot.slane %v882_v50, 6  ;;  %v6390_v50 = vld [vmem:[#allocation6_spill] sm:$0xff] }
 0x232   : > { %v1413_v10 = vsel %vm1281_vm4, %v1410_v4, %v1412_v49  ;;  %v1782_v57 = vsel %vm1281_vm4, %v1779_v31, %v1781_v26 }
 0x233   : > { %v1513_v5 = vadd.f32 %v1413_v10, %v1137_v22  ;;  %v1886_v53 = vadd.f32 %v1782_v57, %v1511_v51  ;;  %v1039_v47 = vsel %vm905_vm3, %v1036_v9, %v1038_v63  ;;  %4400 = vmatmul.msk.bf16.gmra.mxu1 %vm368_vm1, %v4548_v58  ;;  %4475 = vmatmul.msk.bf16.gmra.mxu0 %vm368_vm1, %v4548_v58 }
 0x234   : > { %v1138_v15 = vadd.f32 %v1039_v47, %v6388_v34  ;;  %4425 = vmatmul.msk.bf16.gmra.mxu2 %vm368_vm1, %v4548_v58  ;;  %4450 = vmatmul.msk.bf16.gmra.mxu3 %vm368_vm1, %v4548_v58 }
 0x235   : > { %v5384_v54 = vadd.f32 %v2006_v30, %v1886_v53 }
 0x237   : > { %6389 = vst [vmem:[#allocation15_spill] sm:$0xff] %v5384_v54  ;;  %v1258_v4 = vpop.f32.mrf.mxu2  ;;  %v1634_v35 = vpop.f32.mrf.mxu3  ;;  %v6426_v54 = vld [vmem:[#allocation23_spill] sm:$0xff] }
 0x238   : > { %v1414_v31 = vrot.slane %v1258_v4, 7  ;;  %v1783_v2 = vrot.slane %v1634_v35, 7  ;;  %v884_v51 = vpop.f32.mrf.mxu1  ;;  %v2011_v37 = vpop.f32.mrf.mxu0 }
 0x239   : > { %v1040_v9 = vrot.slane %v884_v51, 6 }
 0x23a   : > { %v1415_v46 = vsel %vm1281_vm4, %v1412_v49, %v1414_v31  ;;  %v1784_v22 = vsel %vm1281_vm4, %v1781_v26, %v1783_v2  ;;  %v3684_v49 = vld [vmem:[%s6336_s3 + $0x20] sm:$0xff] }
 0x23b   : > { %v1514_v17 = vadd.f32 %v1415_v46, %v1138_v15  ;;  %v1887_v38 = vadd.f32 %v1784_v22, %v1512_v40  ;;  %v1041_v30 = vsel %vm905_vm3, %v1038_v63, %v1040_v9  ;;  %v3687_v40 = vld [vmem:[%s6336_s3 + $0x38] sm:$0xff]  ;;  %3750 = vperm.xlu2 %4536, %v3684_v49   ;;  %v4549_v46 = vld [vmem:[%s4640_s30 + $0x28] sm:$0xff] }
 0x23c   : > { %v1139_v10 = vadd.f32 %v1041_v30, %v6390_v50  ;;  %3765 = vperm.xlu1 %4535, %v3687_v40   ;;  %v6392_v22 = vld [vmem:[#allocation7_spill] sm:$0xff] }
 0x23d   : > { %v5393_v57 = vadd.f32 %v2009_v45, %v1887_v38 }
 0x23f   : > { %6391 = vst [vmem:[#allocation2_spill] sm:$0xff] %v5393_v57  ;;  %v1260_v53 = vpop.f32.mrf.mxu2  ;;  %v1636_v47 = vpop.f32.mrf.mxu3 }
 0x240   : > { %v1416_v58 = vrot.slane %v1260_v53, 7  ;;  %v1785_v34 = vrot.slane %v1636_v47, 7  ;;  %v887_v4 = vpop.f32.mrf.mxu1  ;;  %v2014_v35 = vpop.f32.mrf.mxu0  ;;  %v3685_v47 = vld [vmem:[%s6336_s3 + $0x28] sm:$0xff] }
 0x241   : > { %v1042_v51 = vrot.slane %v887_v4, 6 }
 0x242   : > { %v1417_v26 = vsel %vm1281_vm4, %v1414_v31, %v1416_v58  ;;  %v1786_v45 = vsel %vm1281_vm4, %v1783_v2, %v1785_v34 }
 0x243   : > { %v1515_v63 = vadd.f32 %v1417_v26, %v1139_v10  ;;  %v1888_v15 = vadd.f32 %v1786_v45, %v1513_v5  ;;  %v1043_v60 = vsel %vm905_vm3, %v1040_v9, %v1042_v51  ;;  %4401 = vmatmul.msk.bf16.gmra.mxu1 %vm368_vm1, %v4549_v46  ;;  %4476 = vmatmul.msk.bf16.gmra.mxu0 %vm368_vm1, %v4549_v46  ;;  %v6394_v45 = vld [vmem:[#allocation8_spill] sm:$0xff] }
 0x244   : > { %v1140_v38 = vadd.f32 %v1043_v60, %v6392_v22  ;;  %4426 = vmatmul.msk.bf16.gmra.mxu2 %vm368_vm1, %v4549_v46  ;;  %4451 = vmatmul.msk.bf16.gmra.mxu3 %vm368_vm1, %v4549_v46 }
 0x245   : > { %v5410_v31 = vadd.f32 %v2011_v37, %v1888_v15  ;;  %3755 = vperm.xlu2 %4536, %v3685_v47   ;;  %v4550_v47 = vld [vmem:[%s4640_s30 + $0x30] sm:$0xff] }
 0x247   : > { %6393 = vst [vmem:[#allocation3_spill] sm:$0xff] %v5410_v31  ;;  %v1263_v2 = vpop.f32.mrf.mxu2  ;;  %v1639_v30 = vpop.f32.mrf.mxu3 }
 0x248   : > { %v1418_v50 = vrot.slane %v1263_v2, 7  ;;  %v1787_v10 = vrot.slane %v1639_v30, 7  ;;  %v889_v5 = vpop.f32.mrf.mxu1  ;;  %v2016_v53 = vpop.f32.mrf.mxu0 }
 0x249   : > { %v1044_v9 = vrot.slane %v889_v5, 6 }
 0x24a   : > { %v1419_v4 = vsel %vm1281_vm4, %v1416_v58, %v1418_v50  ;;  %v1788_v49 = vsel %vm1281_vm4, %v1785_v34, %v1787_v10  ;;  %v3689_v58 = vld [vmem:[%s6336_s3 + $0x48] sm:$0xff] }
 0x24b   : > { %v1516_v40 = vadd.f32 %v1419_v4, %v1140_v38  ;;  %v1889_v26 = vadd.f32 %v1788_v49, %v1514_v17  ;;  %v1045_v37 = vsel %vm905_vm3, %v1042_v51, %v1044_v9  ;;  %3775 = vperm.xlu0 %4534, %v3689_v58   ;;  %v6396_v4 = vld [vmem:[#allocation9_spill] sm:$0xff] }
 0x24c   : > { %v1141_v15 = vadd.f32 %v1045_v37, %v6394_v45 }
 0x24d   : > { %v5419_v60 = vadd.f32 %v2014_v35, %v1889_v26 }
 0x24f   : > { %6395 = vst [vmem:[#allocation4_spill] sm:$0xff] %v5419_v60  ;;  %v1265_v46 = vpop.f32.mrf.mxu2  ;;  %v1641_v22 = vpop.f32.mrf.mxu3 }
 0x250   : > { %v1420_v2 = vrot.slane %v1265_v46, 7  ;;  %v1789_v30 = vrot.slane %v1641_v22, 7  ;;  %v892_v5 = vpop.f32.mrf.mxu1  ;;  %v2019_v31 = vpop.f32.mrf.mxu0 }
 0x251   : > { %v1046_v57 = vrot.slane %v892_v5, 6  ;;  %v3690_v5 = vld [vmem:[%s6336_s3 + $0x50] sm:$0xff] }
 0x252   : > { %v1421_v17 = vsel %vm1281_vm4, %v1418_v50, %v1420_v2  ;;  %v1790_v34 = vsel %vm1281_vm4, %v1787_v10, %v1789_v30  ;;  %3780 = vperm.xlu1 %4535, %v3690_v5  }
 0x253   : > { %v1517_v51 = vadd.f32 %v1421_v17, %v1141_v15  ;;  %v1890_v38 = vadd.f32 %v1790_v34, %v1515_v63  ;;  %v1047_v35 = vsel %vm905_vm3, %v1044_v9, %v1046_v57  ;;  %4402 = vmatmul.msk.bf16.gmra.mxu1 %vm368_vm1, %v4550_v47  ;;  %4477 = vmatmul.msk.bf16.gmra.mxu0 %vm368_vm1, %v4550_v47  ;;  %v6398_v34 = vld [vmem:[#allocation10_spill] sm:$0xff] }
 0x254   : > { %v1142_v49 = vadd.f32 %v1047_v35, %v6396_v4  ;;  %4427 = vmatmul.msk.bf16.gmra.mxu2 %vm368_vm1, %v4550_v47  ;;  %4452 = vmatmul.msk.bf16.gmra.mxu3 %vm368_vm1, %v4550_v47 }
 0x255   : > { %v5433_v26 = vadd.f32 %v2016_v53, %v1890_v38 }
 0x257   : > { %6397 = vst [vmem:[#allocation5_spill] sm:$0xff] %v5433_v26  ;;  %v1268_v50 = vpop.f32.mrf.mxu2  ;;  %v1644_v10 = vpop.f32.mrf.mxu3 }
 0x258   : > { %v1422_v37 = vrot.slane %v1268_v50, 7  ;;  %v1791_v45 = vrot.slane %v1644_v10, 7  ;;  %v894_v63 = vpop.f32.mrf.mxu1  ;;  %v2021_v15 = vpop.f32.mrf.mxu0 }
 0x259   : > { %v906_v9 = vrot.slane %v894_v63, 6 }
 0x25a   : > { %v1423_v46 = vsel %vm1281_vm4, %v1420_v2, %v1422_v37  ;;  %v1792_v22 = vsel %vm1281_vm4, %v1789_v30, %v1791_v45 }
 0x25b   : > { %v1518_v58 = vadd.f32 %v1423_v46, %v1142_v49  ;;  %v1891_v17 = vadd.f32 %v1792_v22, %v1516_v40  ;;  %v1048_v53 = vsel %vm905_vm3, %v1046_v57, %v906_v9  ;;  %v3688_v40 = vld [vmem:[%s6336_s3 + $0x40] sm:$0xff]  ;;  %v4551_v46 = vld [vmem:[%s4640_s30 + $0x38] sm:$0xff] }
 0x25c   : > { %v1143_v38 = vadd.f32 %v1048_v53, %v6398_v34  ;;  %3770 = vperm.xlu2 %4536, %v3688_v40  }
 0x25d   : > { %v5442_v35 = vadd.f32 %v2019_v31, %v1891_v17 }
 0x25f   : > { %6399 = vst [vmem:[#allocation6_spill] sm:$0xff] %v5442_v35  ;;  %v1270_v47 = vpop.f32.mrf.mxu2  ;;  %v1646_v4 = vpop.f32.mrf.mxu3 }
 0x260   : > { %v1282_v50 = vrot.slane %v1270_v47, 7  ;;  %v1793_v2 = vrot.slane %v1646_v4, 7  ;;  %v897_v10 = vpop.f32.mrf.mxu1  ;;  %v2024_v30 = vpop.f32.mrf.mxu0  ;;  %v6401_v4 = vld [vmem:[#allocation12_spill] sm:$0xff] }
 0x261   : > { %v907_v22 = vrot.slane %v897_v10, 6  ;;  %v6403_v10 = vld [vmem:[#allocation17_spill] sm:$0xff] }
 0x262   : > { %v1424_v63 = vsel %vm1281_vm4, %v1422_v37, %v1282_v50  ;;  %v1794_v26 = vsel %vm1281_vm4, %v1791_v45, %v1793_v2 }
 0x263   : > { %v1519_v57 = vadd.f32 %v1424_v63, %v1143_v38  ;;  %v1892_v49 = vadd.f32 %v1794_v26, %v1517_v51  ;;  %4403 = vmatmul.msk.bf16.gmra.mxu1 %vm368_vm1, %v4551_v46  ;;  %4478 = vmatmul.msk.bf16.gmra.mxu0 %vm368_vm1, %v4551_v46  ;;  %v3692_v38 = vld [vmem:[%s6336_s3 + $0x60] sm:$0xff]  ;;  %v6402_v63 = vrot.slane %v6401_v4, 6  ;;  %v908_v40 = vsel %vm905_vm3, %v906_v9, %v907_v22 }
 0x264   : > { %4428 = vmatmul.msk.bf16.gmra.mxu2 %vm368_vm1, %v4551_v46  ;;  %4453 = vmatmul.msk.bf16.gmra.mxu3 %vm368_vm1, %v4551_v46 }
 0x265   : > { %v5454_v31 = vadd.f32 %v2021_v15, %v1892_v49  ;;  %3790 = vperm.xlu0 %4534, %v3692_v38  }
 0x267   : > { %6400 = vst [vmem:[#allocation7_spill] sm:$0xff] %v5454_v31  ;;  %v1273_v37 = vpop.f32.mrf.mxu2  ;;  %v1649_v45 = vpop.f32.mrf.mxu3 }
 0x268   : > { %v1795_v5 = vrot.slane %v1649_v45, 7  ;;  %v899_v17 = vpop.f32.mrf.mxu1  ;;  %v2026_v53 = vpop.f32.mrf.mxu0  ;;  %v1283_v51 = vrot.slane %v1273_v37, 7  ;;  %v6405_v45 = vld [vmem:[#allocation11_spill] sm:$0xff] }
 0x269   : > { %v909_v34 = vrot.slane %v899_v17, 6  ;;  %v1096_v17 = vadd.f32 %v908_v40, %v6405_v45  ;;  %v6411_v40 = vld [vmem:[#allocation19_spill] sm:$0xff] }
 0x26a   : > { %v1796_v26 = vsel %vm1281_vm4, %v1793_v2, %v1795_v5  ;;  %v1284_v37 = vsel %vm1281_vm4, %v1282_v50, %v1283_v51 }
 0x26b   : > { %v1893_v47 = vadd.f32 %v1796_v26, %v1518_v58  ;;  %v1095_v15 = vsel %vm905_vm3, %v909_v34, %v6402_v63  ;;  %v910_v2 = vsel %vm905_vm3, %v907_v22, %v909_v34  ;;  %v1472_v9 = vadd.f32 %v1284_v37, %v1096_v17  ;;  %v6408_v63 = vld [vmem:[#allocation16_spill] sm:$0xff] }
 0x26c   : > { %v1098_v49 = vadd.f32 %v1095_v15, %v6403_v10  ;;  %v1097_v15 = vadd.f32 %v910_v2, %v6408_v63  ;;  %v6412_v10 = vrot.slane %v6411_v40, 7  ;;  %v4552_v63 = vld [vmem:[%s4640_s30 + $0x40] sm:$0xff] }
 0x26d   : > { %v5465_v46 = vadd.f32 %v2024_v30, %v1893_v47  ;;  %v6409_v47 = vld [vmem:[#allocation18_spill] sm:$0xff] }
 0x26e   : > { %v6410_v50 = vrot.slane %v6409_v47, 7 }
 0x26f   : > { %6404 = vst [vmem:[#allocation8_spill] sm:$0xff] %v5465_v46  ;;  %v1275_v31 = vpop.f32.mrf.mxu2  ;;  %v1651_v35 = vpop.f32.mrf.mxu3 }
 0x270   : > { %v1285_v58 = vrot.slane %v1275_v31, 7  ;;  %v1655_v26 = vrot.slane %v1651_v35, 7  ;;  %v5470_v4 = vpop.f32.mrf.mxu1  ;;  %v5472_v38 = vpop.f32.mrf.mxu0  ;;  %v3693_v35 = vld [vmem:[%s6336_s3 + $0x68] sm:$0xff] }
 0x271   : > { %6406 = vst [vmem:[#allocation9_spill] sm:$0xff] %v5470_v4  ;;  %3795 = vperm.xlu1 %4535, %v3693_v35  }
 0x272   : > { %6407 = vst [vmem:[#allocation10_spill] sm:$0xff] %v5472_v38  ;;  %v1286_v30 = vsel %vm1281_vm4, %v1283_v51, %v1285_v58  ;;  %v1471_v22 = vsel %vm1281_vm4, %v1285_v58, %v6410_v50  ;;  %v1797_v34 = vsel %vm1281_vm4, %v1795_v5, %v1655_v26  ;;  %v1846_v31 = vsel %vm1281_vm4, %v1655_v26, %v6412_v10  ;;  %v6413_v5 = vld [vmem:[#allocation22_spill] sm:$0xff] }
 0x273   : > { %v1473_v45 = vadd.f32 %v1286_v30, %v1097_v15  ;;  %v1474_v37 = vadd.f32 %v1471_v22, %v1098_v49  ;;  %v1847_v17 = vadd.f32 %v1846_v31, %v1472_v9  ;;  %v1894_v2 = vadd.f32 %v1797_v34, %v1519_v57  ;;  %4404 = vmatmul.msk.bf16.gmra.mxu1 %vm368_vm1, %v4552_v63 }
 0x274   : > { %4429 = vmatmul.msk.bf16.gmra.mxu2 %vm368_vm1, %v4552_v63  ;;  %4454 = vmatmul.msk.bf16.gmra.mxu3 %vm368_vm1, %v4552_v63  ;;  %v6348_v57 = vrot.slane %v5472_v38, 3 }
 0x275   : > { %v5491_v51 = vadd.f32 %v6413_v5, %v1473_v45  ;;  %v5494_v58 = vadd.f32 %v5029_v52, %v1474_v37  ;;  %4479 = vmatmul.msk.bf16.gmra.mxu0 %vm368_vm1, %v4552_v63  ;;  %v5497_v26 = vadd.f32 %v2026_v53, %v1894_v2  ;;  %v3691_v52 = vld [vmem:[%s6336_s3 + $0x58] sm:$0xff] }
 0x276   : > { %3785 = vperm.xlu2 %4536, %v3691_v52   ;;  %v3695_v5 = vld [vmem:[%s6336_s3 + $0x78] sm:$0xff]  ;;  %v4553_v52 = vld [vmem:[%s4640_s30 + $0x48] sm:$0xff] }
 0x277   : > { %6414 = vst [vmem:[#allocation12_spill] sm:$0xff] %v5497_v26  ;;  %v5500_v49 = vpop.f32.mrf.mxu2  ;;  %v5502_v9 = vpop.f32.mrf.mxu3  ;;  %3805 = vperm.xlu0 %4534, %v3695_v5  }
 0x278   : > { %6415 = vst [vmem:[#allocation17_spill] sm:$0xff] %v5500_v49  ;;  %v5504_v15 = vpop.f32.mrf.mxu1  ;;  %v3220_v30 = vpop.f32.mrf.mxu0  ;;  %v6350_v34 = vrot.slane %v5500_v49, 1  ;;  %v6349_v40 = vrot.slane %v5502_v9, 2 }
 0x279   : > { %6416 = vst [vmem:[#allocation11_spill] sm:$0xff] %v5502_v9  ;;  %v3525_v47 = vrot.slane %v3220_v30, 3  ;;  %v3696_v9 = vld [vmem:[%s6336_s3 + $0x80] sm:$0xff] }
 0x27a   : > { %3810 = vperm.xlu1 %4535, %v3696_v9  }
 0x27b   : > { %v5512_v53 = vsel %vm3384_vm5, %v6348_v57, %v3525_v47 }
 0x27c   : > { %6417 = vst [vmem:[#allocation16_spill] sm:$0xff] %v5512_v53 }
 0x27f   : > { %v2469_v50 = vpop.f32.mrf.mxu2  ;;  %v2844_v22 = vpop.f32.mrf.mxu3 }
 0x280   : > { %v2773_v10 = vrot.slane %v2469_v50, 1  ;;  %v3149_v31 = vrot.slane %v2844_v22, 2  ;;  %v5516_v35 = vpop.f32.mrf.mxu1  ;;  %v3223_v45 = vpop.f32.mrf.mxu0 }
 0x281   : > { %v3385_v37 = vrot.slane %v3223_v45, 3  ;;  %v2263_v9 = vrot.slane %v5516_v35, 1  ;;  %v5574_v35 = vld [vmem:[%s6335_s2] ss:$0 sm:$0xff] }
 0x282   : > { %v5521_v2 = vsel %vm2259_vm7, %v6350_v34, %v2773_v10  ;;  %v5526_v63 = vsel %vm3008_vm6, %v6349_v40, %v3149_v31 }
 0x283   : > { %6418 = vst [vmem:[#allocation18_spill] sm:$0xff] %v5521_v2  ;;  %v5532_v30 = vsel %vm3384_vm5, %v3525_v47, %v3385_v37  ;;  %4405 = vmatmul.msk.bf16.gmra.mxu1 %vm368_vm1, %v4553_v52  ;;  %v2261_v47 = vrot.slane %v5504_v15, 1 }
 0x284   : > { %6419 = vst [vmem:[#allocation19_spill] sm:$0xff] %v5526_v63  ;;  %4430 = vmatmul.msk.bf16.gmra.mxu2 %vm368_vm1, %v4553_v52  ;;  %4455 = vmatmul.msk.bf16.gmra.mxu3 %vm368_vm1, %v4553_v52 }
 0x285   : > { %6420 = vst [vmem:[#allocation22_spill] sm:$0xff] %v5532_v30  ;;  %4480 = vmatmul.msk.bf16.gmra.mxu0 %vm368_vm1, %v4553_v52  ;;  %v6354_v52 = vrot.slane %v5470_v4, 1 }
 0x287   : > { %v2472_v50 = vpop.f32.mrf.mxu2  ;;  %v2847_v22 = vpop.f32.mrf.mxu3 }
 0x288   : > { %v2633_v45 = vrot.slane %v2472_v50, 1  ;;  %v3009_v57 = vrot.slane %v2847_v22, 2  ;;  %v5539_v40 = vpop.f32.mrf.mxu1  ;;  %v3225_v34 = vpop.f32.mrf.mxu0  ;;  %v2262_v50 = vsel %vm2259_vm7, %v6354_v52, %v2261_v47  ;;  %v6423_v22 = vld [vmem:[#allocation13_spill] sm:$0xff]  ;;  %v3694_v52 = vld [vmem:[%s6336_s3 + $0x70] sm:$0xff] }
 0x289   : > { %v2029_v15 = vadd.f32 %v6423_v22, %v1847_v17  ;;  %v4554_v17 = vld [vmem:[%s4640_s30 + $0x50] sm:$0xff]  ;;  %3800 = vperm.xlu2 %4536, %v3694_v52  }
 0x28a   : > { %v5543_v38 = vsel %vm2259_vm7, %v2773_v10, %v2633_v45  ;;  %v5546_v5 = vsel %vm3008_vm6, %v3149_v31, %v3009_v57  ;;  %v6424_v52 = vld [vmem:[#allocation20_spill] sm:$0xff] }
 0x28b   : > { %6421 = vst [vmem:[#allocation24_spill] sm:$0xff] %v5543_v38  ;;  %v2405_v63 = vadd.f32 %v2262_v50, %v2029_v15  ;;  %v3386_v38 = vrot.slane %v3225_v34, 3 }
 0x28c   : > { %6422 = vst [vmem:[#allocation25_spill] sm:$0xff] %v5546_v5 }
 0x28f   : > { %v2474_v49 = vpop.f32.mrf.mxu2  ;;  %v2849_v10 = vpop.f32.mrf.mxu3 }
 0x290   : > { %v2634_v30 = vrot.slane %v2474_v49, 1  ;;  %v3010_v53 = vrot.slane %v2849_v10, 2  ;;  %v5556_v31 = vpop.f32.mrf.mxu1  ;;  %v5558_v5 = vpop.f32.mrf.mxu0 }
 0x292   : > { %v2635_v2 = vsel %vm2259_vm7, %v2633_v45, %v2634_v30  ;;  %v3011_v49 = vsel %vm3008_vm6, %v3009_v57, %v3010_v53  ;;  %v3387_v45 = vsel %vm3384_vm5, %v3385_v37, %v3386_v38  ;;  %v2030_v57 = vadd.f32 %v6424_v52, %v5491_v51  ;;  %v3698_v51 = vld [vmem:[%s6336_s3 + $0x90] sm:$0xff] }
 0x293   : > { %v2780_v26 = vadd.f32 %v2635_v2, %v2405_v63  ;;  %4406 = vmatmul.msk.bf16.gmra.mxu1 %vm368_vm1, %v4554_v17  ;;  %v2264_v2 = vsel %vm2259_vm7, %v2261_v47, %v2263_v9  ;;  %v3731_v63 = vpop.permute.xlu0 %3730  ;;  %v2265_v47 = vrot.slane %v5539_v40, 1  ;;  %v3388_v37 = vrot.slane %v5558_v5, 3  ;;  %3820 = vperm.xlu0 %4534, %v3698_v51   ;;  %v6425_v40 = vld [vmem:[#allocation21_spill] sm:$0xff] }
 0x294   : > { %4431 = vmatmul.msk.bf16.gmra.mxu2 %vm368_vm1, %v4554_v17  ;;  %4456 = vmatmul.msk.bf16.gmra.mxu3 %vm368_vm1, %v4554_v17 }
 0x295   : > { %4481 = vmatmul.msk.bf16.gmra.mxu0 %vm368_vm1, %v4554_v17  ;;  %v3156_v34 = vadd.f32 %v3011_v49, %v2780_v26  ;;  %v2406_v49 = vadd.f32 %v2264_v2, %v2030_v57  ;;  %v2266_v2 = vsel %vm2259_vm7, %v2263_v9, %v2265_v47  ;;  %v3389_v57 = vsel %vm3384_vm5, %v3386_v38, %v3388_v37 }
 0x297   : > { %v2477_v50 = vpop.f32.mrf.mxu2  ;;  %v2852_v22 = vpop.f32.mrf.mxu3  ;;  %v3532_v15 = vadd.f32 %v3387_v45, %v3156_v34 }
 0x298   : > { %v2636_v10 = vrot.slane %v2477_v50, 1  ;;  %v3012_v46 = vrot.slane %v2852_v22, 2  ;;  %v5580_v17 = vpop.f32.mrf.mxu1  ;;  %v5582_v26 = vpop.f32.mrf.mxu0 }
 0x299   : > { %v3584_v4 = vadd.f32 %v5574_v35, %v3532_v15 }
 0x29a   : > { %v2637_v60 = vsel %vm2259_vm7, %v2634_v30, %v2636_v10  ;;  %v3013_v52 = vsel %vm3008_vm6, %v3010_v53, %v3012_v46 }
 0x29b   : > { %v2781_v34 = vadd.f32 %v2637_v60, %v2406_v49  ;;  %v3632_v45 = vmax.f32 %v3584_v4, 0.0  ;;  %v2031_v60 = vadd.f32 %v6425_v40, %v5494_v58  ;;  %v3390_v58 = vrot.slane %v5582_v26, 3  ;;  %v4555_v40 = vld [vmem:[%s4640_s30 + $0x58] sm:$0xff] }
 0x29d   : > { %v3157_v50 = vadd.f32 %v3013_v52, %v2781_v34  ;;  %v3968_v22 = vmul.f32 %v3731_v63, %v3632_v45  ;;  %v2407_v49 = vadd.f32 %v2266_v2, %v2031_v60  ;;  %v2267_v34 = vrot.slane %v5556_v31, 1  ;;  %v3736_v52 = vpop.permute.xlu0 %3735  ;;  %v3741_v60 = vpop.permute.xlu1 %3740 }
 0x29f   : > { %v4016_v4 = vpack.c.bf16 %v3968_v22, %v3968_v22  ;;  %v2479_v30 = vpop.f32.mrf.mxu2  ;;  %v2854_v53 = vpop.f32.mrf.mxu3  ;;  %v3533_v5 = vadd.f32 %v3389_v57, %v3157_v50  ;;  %v3699_v50 = vld [vmem:[%s6336_s3 + $0x98] sm:$0xff]  ;;  %v2268_v26 = vsel %vm2259_vm7, %v2265_v47, %v2267_v34  ;;  %v2269_v47 = vrot.slane %v5580_v17, 1 }
 0x2a0   : > { %v2638_v63 = vrot.slane %v2479_v30, 1  ;;  %v3014_v9 = vrot.slane %v2854_v53, 2  ;;  %v5603_v15 = vpop.f32.mrf.mxu1  ;;  %v5605_v38 = vpop.f32.mrf.mxu0  ;;  %3825 = vperm.xlu1 %4535, %v3699_v50  }
 0x2a1   : > { %4065 = vst.msk [vmem:[%s5599_s9] sm:$0xf] %vm4064_vm8, %v4016_v4  ;;  %v3585_v51 = vadd.f32 %v5574_v35, %v3533_v5  ;;  %v3391_v4 = vsel %vm3384_vm5, %v3388_v37, %v3390_v58  ;;  %v3392_v37 = vrot.slane %v5605_v38, 3 }
 0x2a2   : > { %v2639_v45 = vsel %vm2259_vm7, %v2636_v10, %v2638_v63  ;;  %v3015_v2 = vsel %vm3008_vm6, %v3012_v46, %v3014_v9 }
 0x2a3   : > { %v2782_v22 = vadd.f32 %v2639_v45, %v2407_v49  ;;  %v3633_v57 = vmax.f32 %v3585_v51, 0.0  ;;  %4407 = vmatmul.msk.bf16.gmra.mxu1 %vm368_vm1, %v4555_v40  ;;  %v3393_v17 = vsel %vm3384_vm5, %v3390_v58, %v3392_v37 }
 0x2a4   : > { %4432 = vmatmul.msk.bf16.gmra.mxu2 %vm368_vm1, %v4555_v40  ;;  %4457 = vmatmul.msk.bf16.gmra.mxu3 %vm368_vm1, %v4555_v40 }
 0x2a5   : > { %v3969_v31 = vmul.f32 %v3736_v52, %v3633_v57  ;;  %4482 = vmatmul.msk.bf16.gmra.mxu0 %vm368_vm1, %v4555_v40  ;;  %v3158_v10 = vadd.f32 %v3015_v2, %v2782_v22  ;;  %v2408_v52 = vadd.f32 %v2268_v26, %v6426_v54  ;;  %v3697_v40 = vld [vmem:[%s6336_s3 + $0x88] sm:$0xff] }
 0x2a6   : > { %3815 = vperm.xlu2 %4536, %v3697_v40   ;;  %v3702_v40 = vld [vmem:[%s6336_s3 + $0xb0] sm:$0xff] }
 0x2a7   : > { %v4017_v30 = vpack.c.bf16 %v3969_v31, %v3969_v31  ;;  %v2482_v53 = vpop.f32.mrf.mxu2  ;;  %v2857_v5 = vpop.f32.mrf.mxu3  ;;  %v3534_v49 = vadd.f32 %v3391_v4, %v3158_v10  ;;  %v2270_v4 = vsel %vm2259_vm7, %v2267_v34, %v2269_v47  ;;  %v2271_v34 = vrot.slane %v5603_v15, 1 }
 0x2a8   : > { %v2640_v51 = vrot.slane %v2482_v53, 1  ;;  %v3016_v46 = vrot.slane %v2857_v5, 2  ;;  %v5624_v45 = vpop.f32.mrf.mxu1  ;;  %v5626_v50 = vpop.f32.mrf.mxu0  ;;  %3840 = vperm.xlu1 %4535, %v3702_v40  }
 0x2a9   : > { %4066 = vst.msk [vmem:[%s5599_s9 + $0x4] sm:$0xf] %vm4064_vm8, %v4017_v30  ;;  %v3586_v22 = vadd.f32 %v5574_v35, %v3534_v49  ;;  %v3394_v58 = vrot.slane %v5626_v50, 3 }
 0x2aa   : > { %v2641_v57 = vsel %vm2259_vm7, %v2638_v63, %v2640_v51  ;;  %v3017_v54 = vsel %vm3008_vm6, %v3014_v9, %v3016_v46 }
 0x2ab   : > { %v2783_v2 = vadd.f32 %v2641_v57, %v2408_v52  ;;  %v3634_v31 = vmax.f32 %v3586_v22, 0.0  ;;  %v2409_v22 = vadd.f32 %v2270_v4, %v5051_v27  ;;  %v3746_v57 = vpop.permute.xlu1 %3745  ;;  %v3395_v4 = vsel %vm3384_vm5, %v3392_v37, %v3394_v58 }
 0x2ad   : > { %v3159_v10 = vadd.f32 %v3017_v54, %v2783_v2  ;;  %v3970_v26 = vmul.f32 %v3741_v60, %v3634_v31  ;;  %v3701_v2 = vld [vmem:[%s6336_s3 + $0xa8] sm:$0xff]  ;;  %v4556_v54 = vld [vmem:[%s4640_s30 + $0x60] sm:$0xff] }
 0x2ae   : > { %3835 = vperm.xlu0 %4534, %v3701_v2   ;;  %v3705_v2 = vld [vmem:[%s6336_s3 + $0xc8] sm:$0xff] }
 0x2af   : > { %v4018_v30 = vpack.c.bf16 %v3970_v26, %v3970_v26  ;;  %v2484_v38 = vpop.f32.mrf.mxu2  ;;  %v2859_v53 = vpop.f32.mrf.mxu3  ;;  %v3535_v63 = vadd.f32 %v3393_v17, %v3159_v10  ;;  %v2272_v10 = vsel %vm2259_vm7, %v2269_v47, %v2271_v34  ;;  %v2273_v47 = vrot.slane %v5624_v45, 1 }
 0x2b0   : > { %v2642_v5 = vrot.slane %v2484_v38, 1  ;;  %v3018_v49 = vrot.slane %v2859_v53, 2  ;;  %v5641_v13 = vpop.f32.mrf.mxu1  ;;  %v5643_v52 = vpop.f32.mrf.mxu0  ;;  %3855 = vperm.xlu1 %4535, %v3705_v2   ;;  %v3708_v2 = vld [vmem:[%s6336_s3 + $0xe0] sm:$0xff] }
 0x2b1   : > { %4067 = vst.msk [vmem:[%s5599_s9 + $0x8] sm:$0xf] %vm4064_vm8, %v4018_v30  ;;  %v3587_v9 = vadd.f32 %v5574_v35, %v3535_v63  ;;  %v3751_v26 = vpop.permute.xlu2 %3750  ;;  %v3396_v37 = vrot.slane %v5643_v52, 3  ;;  %v2274_v52 = vsel %vm2259_vm7, %v2271_v34, %v2273_v47  ;;  %v2275_v34 = vrot.slane %v5641_v13, 1  ;;  %v3707_v13 = vld [vmem:[%s6336_s3 + $0xd8] sm:$0xff] }
 0x2b2   : > { %v2643_v60 = vsel %vm2259_vm7, %v2640_v51, %v2642_v5  ;;  %v3019_v15 = vsel %vm3008_vm6, %v3016_v46, %v3018_v49 }
 0x2b3   : > { %v2784_v27 = vadd.f32 %v2643_v60, %v2409_v22  ;;  %v3635_v31 = vmax.f32 %v3587_v9, 0.0  ;;  %4408 = vmatmul.msk.bf16.gmra.mxu1 %vm368_vm1, %v4556_v54  ;;  %v2410_v60 = vadd.f32 %v2272_v10, %v5065_v33 }
 0x2b4   : > { %4433 = vmatmul.msk.bf16.gmra.mxu2 %vm368_vm1, %v4556_v54  ;;  %4458 = vmatmul.msk.bf16.gmra.mxu3 %vm368_vm1, %v4556_v54 }
 0x2b5   : > { %v3971_v51 = vmul.f32 %v3746_v57, %v3635_v31  ;;  %4483 = vmatmul.msk.bf16.gmra.mxu0 %vm368_vm1, %v4556_v54  ;;  %v3160_v50 = vadd.f32 %v3019_v15, %v2784_v27  ;;  %v3704_v27 = vld [vmem:[%s6336_s3 + $0xc0] sm:$0xff] }
 0x2b6   : > { %3850 = vperm.xlu0 %4534, %v3704_v27  }
 0x2b7   : > { %v4019_v17 = vpack.c.bf16 %v3971_v51, %v3971_v51  ;;  %v2487_v30 = vpop.f32.mrf.mxu2  ;;  %v2862_v38 = vpop.f32.mrf.mxu3  ;;  %v3536_v53 = vadd.f32 %v3395_v4, %v3160_v50 }
 0x2b8   : > { %v2644_v46 = vrot.slane %v2487_v30, 1  ;;  %v3020_v63 = vrot.slane %v2862_v38, 2  ;;  %v5666_v22 = vpop.f32.mrf.mxu1  ;;  %v5668_v9 = vpop.f32.mrf.mxu0  ;;  %3870 = vperm.xlu1 %4535, %v3708_v2   ;;  %v3711_v2 = vld [vmem:[%s6336_s3 + $0xf8] sm:$0xff] }
 0x2b9   : > { %4068 = vst.msk [vmem:[%s5599_s9 + $0xc] sm:$0xf] %vm4064_vm8, %v4019_v17  ;;  %v3588_v57 = vadd.f32 %v5574_v35, %v3536_v53 }
 0x2ba   : > { %v2645_v40 = vsel %vm2259_vm7, %v2642_v5, %v2644_v46  ;;  %v3021_v54 = vsel %vm3008_vm6, %v3018_v49, %v3020_v63  ;;  %v3397_v5 = vsel %vm3384_vm5, %v3394_v58, %v3396_v37  ;;  %v2411_v49 = vadd.f32 %v2274_v52, %v5071_v39 }
 0x2bb   : > { %v2785_v31 = vadd.f32 %v2645_v40, %v2410_v60  ;;  %v3636_v33 = vmax.f32 %v3588_v57, 0.0  ;;  %v3398_v58 = vrot.slane %v5668_v9, 3  ;;  %v3756_v57 = vpop.permute.xlu2 %3755  ;;  %v3700_v40 = vld [vmem:[%s6336_s3 + $0xa0] sm:$0xff] }
 0x2bc   : > { %3830 = vperm.xlu2 %4536, %v3700_v40   ;;  %v3703_v40 = vld [vmem:[%s6336_s3 + $0xb8] sm:$0xff] }
 0x2bd   : > { %v3161_v15 = vadd.f32 %v3021_v54, %v2785_v31  ;;  %v3972_v45 = vmul.f32 %v3751_v26, %v3636_v33  ;;  %v4557_v31 = vld [vmem:[%s4640_s30 + $0x68] sm:$0xff]  ;;  %v2276_v54 = vsel %vm2259_vm7, %v2273_v47, %v2275_v34  ;;  %v2277_v47 = vrot.slane %v5666_v22, 1  ;;  %v3710_v22 = vld [vmem:[%s6336_s3 + $0xf0] sm:$0xff] }
 0x2be   : > { %3865 = vperm.xlu0 %4534, %v3707_v13  }
 0x2bf   : > { %v4020_v51 = vpack.c.bf16 %v3972_v45, %v3972_v45  ;;  %v2489_v50 = vpop.f32.mrf.mxu2  ;;  %v2864_v10 = vpop.f32.mrf.mxu3  ;;  %v3537_v4 = vadd.f32 %v3397_v5, %v3161_v15  ;;  %v3399_v15 = vsel %vm3384_vm5, %v3396_v37, %v3398_v58 }
 0x2c0   : > { %v2646_v17 = vrot.slane %v2489_v50, 1  ;;  %v3022_v30 = vrot.slane %v2864_v10, 2  ;;  %v5686_v38 = vpop.f32.mrf.mxu1  ;;  %v5688_v53 = vpop.f32.mrf.mxu0  ;;  %3885 = vperm.xlu1 %4535, %v3711_v2   ;;  %v4558_v2 = vld [vmem:[%s4640_s30 + $0x70] sm:$0xff] }
 0x2c1   : > { %4069 = vst.msk [vmem:[%s5599_s9 + $0x10] sm:$0xf] %vm4064_vm8, %v4020_v51  ;;  %v3589_v26 = vadd.f32 %v5574_v35, %v3537_v4  ;;  %v3400_v37 = vrot.slane %v5688_v53, 3 }
 0x2c2   : > { %v2647_v60 = vsel %vm2259_vm7, %v2644_v46, %v2646_v17  ;;  %v3023_v46 = vsel %vm3008_vm6, %v3020_v63, %v3022_v30 }
 0x2c3   : > { %v2786_v39 = vadd.f32 %v2647_v60, %v2411_v49  ;;  %v3637_v27 = vmax.f32 %v3589_v26, 0.0  ;;  %4409 = vmatmul.msk.bf16.gmra.mxu1 %vm368_vm1, %v4557_v31  ;;  %v2412_v49 = vadd.f32 %v2276_v54, %v5085_v1  ;;  %v3401_v13 = vsel %vm3384_vm5, %v3398_v58, %v3400_v37 }
 0x2c4   : > { %4434 = vmatmul.msk.bf16.gmra.mxu2 %vm368_vm1, %v4557_v31  ;;  %4459 = vmatmul.msk.bf16.gmra.mxu3 %vm368_vm1, %v4557_v31  ;;  %v2279_v58 = vrot.slane %v5686_v38, 1  ;;  %v3713_v38 = vld [vmem:[%s6336_s3 + $0x108] sm:$0xff] }
 0x2c5   : > { %v3973_v9 = vmul.f32 %v3756_v57, %v3637_v27  ;;  %4484 = vmatmul.msk.bf16.gmra.mxu0 %vm368_vm1, %v4557_v31  ;;  %v3162_v33 = vadd.f32 %v3023_v46, %v2786_v39  ;;  %v3761_v57 = vpop.permute.xlu0 %3760  ;;  %3845 = vperm.xlu2 %4536, %v3703_v40   ;;  %v2278_v31 = vsel %vm2259_vm7, %v2275_v34, %v2277_v47 }
 0x2c6   : > { %3880 = vperm.xlu0 %4534, %v3710_v22  }
 0x2c7   : > { %v4021_v45 = vpack.c.bf16 %v3973_v9, %v3973_v9  ;;  %v2492_v52 = vpop.f32.mrf.mxu2  ;;  %v2867_v5 = vpop.f32.mrf.mxu3  ;;  %v3538_v51 = vadd.f32 %v3399_v15, %v3162_v33 }
 0x2c8   : > { %v2648_v63 = vrot.slane %v2492_v52, 1  ;;  %v3024_v50 = vrot.slane %v2867_v5, 2  ;;  %v5714_v10 = vpop.f32.mrf.mxu1  ;;  %v5716_v4 = vpop.f32.mrf.mxu0 }
 0x2c9   : > { %4070 = vst.msk [vmem:[%s5599_s9 + $0x14] sm:$0xf] %vm4064_vm8, %v4021_v45  ;;  %v3590_v26 = vadd.f32 %v5574_v35, %v3538_v51  ;;  %v3402_v51 = vrot.slane %v5716_v4, 3 }
 0x2ca   : > { %v2649_v60 = vsel %vm2259_vm7, %v2646_v17, %v2648_v63  ;;  %v3025_v53 = vsel %vm3008_vm6, %v3022_v30, %v3024_v50  ;;  %v2413_v30 = vadd.f32 %v2278_v31, %v5091_v12 }
 0x2cb   : > { %v2787_v1 = vadd.f32 %v2649_v60, %v2412_v49  ;;  %v3638_v39 = vmax.f32 %v3590_v26, 0.0  ;;  %v3766_v26 = vpop.permute.xlu1 %3765  ;;  %v3706_v60 = vld [vmem:[%s6336_s3 + $0xd0] sm:$0xff]  ;;  %v3403_v22 = vsel %vm3384_vm5, %v3400_v37, %v3402_v51 }
 0x2cd   : > { %v3163_v17 = vadd.f32 %v3025_v53, %v2787_v1  ;;  %v3974_v27 = vmul.f32 %v3761_v57, %v3638_v39  ;;  %v3714_v57 = vld [vmem:[%s6336_s3 + $0x110] sm:$0xff]  ;;  %3860 = vperm.xlu2 %4536, %v3706_v60   ;;  %v2280_v39 = vsel %vm2259_vm7, %v2277_v47, %v2279_v58  ;;  %v2281_v47 = vrot.slane %v5714_v10, 1  ;;  %v3716_v10 = vld [vmem:[%s6336_s3 + $0x120] sm:$0xff] }
 0x2ce   : > { %3900 = vperm.xlu1 %4535, %v3714_v57   ;;  %3895 = vperm.xlu0 %4534, %v3713_v38  }
 0x2cf   : > { %v4022_v46 = vpack.c.bf16 %v3974_v27, %v3974_v27  ;;  %v2494_v9 = vpop.f32.mrf.mxu2  ;;  %v2869_v33 = vpop.f32.mrf.mxu3  ;;  %v3539_v54 = vadd.f32 %v3401_v13, %v3163_v17 }
 0x2d0   : > { %v2650_v15 = vrot.slane %v2494_v9, 1  ;;  %v3026_v45 = vrot.slane %v2869_v33, 2  ;;  %v5737_v52 = vpop.f32.mrf.mxu1  ;;  %v5739_v5 = vpop.f32.mrf.mxu0  ;;  %v2414_v33 = vadd.f32 %v2280_v39, %v5105_v6 }
 0x2d1   : > { %4071 = vst.msk [vmem:[%s5599_s9 + $0x18] sm:$0xf] %vm4064_vm8, %v4022_v46  ;;  %v3591_v34 = vadd.f32 %v5574_v35, %v3539_v54  ;;  %v3404_v37 = vrot.slane %v5739_v5, 3 }
 0x2d2   : > { %v2651_v49 = vsel %vm2259_vm7, %v2648_v63, %v2650_v15  ;;  %v3027_v63 = vsel %vm3008_vm6, %v3024_v50, %v3026_v45 }
 0x2d3   : > { %v2788_v12 = vadd.f32 %v2651_v49, %v2413_v30  ;;  %v3639_v40 = vmax.f32 %v3591_v34, 0.0  ;;  %4410 = vmatmul.msk.bf16.gmra.mxu1 %vm368_vm1, %v4558_v2  ;;  %v3771_v34 = vpop.permute.xlu2 %3770  ;;  %v3709_v49 = vld [vmem:[%s6336_s3 + $0xe8] sm:$0xff] }
 0x2d4   : > { %4435 = vmatmul.msk.bf16.gmra.mxu2 %vm368_vm1, %v4558_v2  ;;  %4460 = vmatmul.msk.bf16.gmra.mxu3 %vm368_vm1, %v4558_v2 }
 0x2d5   : > { %v3975_v4 = vmul.f32 %v3766_v26, %v3639_v40  ;;  %4485 = vmatmul.msk.bf16.gmra.mxu0 %vm368_vm1, %v4558_v2  ;;  %v3164_v1 = vadd.f32 %v3027_v63, %v2788_v12  ;;  %v3717_v26 = vld [vmem:[%s6336_s3 + $0x128] sm:$0xff]  ;;  %3875 = vperm.xlu2 %4536, %v3709_v49   ;;  %v2282_v12 = vsel %vm2259_vm7, %v2279_v58, %v2281_v47 }
 0x2d6   : > { %3915 = vperm.xlu1 %4535, %v3717_v26   ;;  %v3405_v40 = vsel %vm3384_vm5, %v3402_v51, %v3404_v37  ;;  %3910 = vperm.xlu0 %4534, %v3716_v10   ;;  %v2283_v51 = vrot.slane %v5737_v52, 1  ;;  %v3719_v52 = vld [vmem:[%s6336_s3 + $0x138] sm:$0xff] }
 0x2d7   : > { %v4023_v53 = vpack.c.bf16 %v3975_v4, %v3975_v4  ;;  %v2497_v17 = vpop.f32.mrf.mxu2  ;;  %v2872_v27 = vpop.f32.mrf.mxu3  ;;  %v3540_v31 = vadd.f32 %v3403_v22, %v3164_v1 }
 0x2d8   : > { %v2652_v50 = vrot.slane %v2497_v17, 1  ;;  %v3028_v13 = vrot.slane %v2872_v27, 2  ;;  %v5765_v46 = vpop.f32.mrf.mxu1  ;;  %v5767_v9 = vpop.f32.mrf.mxu0  ;;  %v2284_v26 = vsel %vm2259_vm7, %v2281_v47, %v2283_v51 }
 0x2d9   : > { %4072 = vst.msk [vmem:[%s5599_s9 + $0x1c] sm:$0xf] %vm4064_vm8, %v4023_v53  ;;  %v3592_v54 = vadd.f32 %v5574_v35, %v3540_v31  ;;  %v3406_v17 = vrot.slane %v5767_v9, 3  ;;  %v3776_v31 = vpop.permute.xlu0 %3775  ;;  %v2285_v47 = vrot.slane %v5765_v46, 1  ;;  %v3722_v46 = vld [vmem:[%s6336_s3 + $0x150] sm:$0xff] }
 0x2da   : > { %v2653_v30 = vsel %vm2259_vm7, %v2650_v15, %v2652_v50  ;;  %v3029_v5 = vsel %vm3008_vm6, %v3026_v45, %v3028_v13  ;;  %v2415_v45 = vadd.f32 %v2282_v12, %v5111_v16 }
 0x2db   : > { %v2789_v6 = vadd.f32 %v2653_v30, %v2414_v33  ;;  %v3640_v60 = vmax.f32 %v3592_v54, 0.0  ;;  %v3712_v33 = vld [vmem:[%s6336_s3 + $0x100] sm:$0xff] }
 0x2dc   : > { %v3720_v54 = vld [vmem:[%s6336_s3 + $0x140] sm:$0xff] }
 0x2dd   : > { %v3165_v15 = vadd.f32 %v3029_v5, %v2789_v6  ;;  %v3976_v57 = vmul.f32 %v3771_v34, %v3640_v60  ;;  %v4559_v34 = vld [vmem:[%s4640_s30 + $0x78] sm:$0xff]  ;;  %3890 = vperm.xlu2 %4536, %v3712_v33   ;;  %v3407_v6 = vsel %vm3384_vm5, %v3404_v37, %v3406_v17  ;;  %v2286_v33 = vsel %vm2259_vm7, %v2283_v51, %v2285_v47 }
 0x2de   : > { %3930 = vperm.xlu1 %4535, %v3720_v54   ;;  %3925 = vperm.xlu0 %4534, %v3719_v52  }
 0x2df   : > { %v4024_v2 = vpack.c.bf16 %v3976_v57, %v3976_v57  ;;  %v2499_v38 = vpop.f32.mrf.mxu2  ;;  %v2874_v63 = vpop.f32.mrf.mxu3  ;;  %v3541_v4 = vadd.f32 %v3405_v40, %v3165_v15 }
 0x2e0   : > { %v2654_v1 = vrot.slane %v2499_v38, 1  ;;  %v3030_v39 = vrot.slane %v2874_v63, 2  ;;  %v5788_v22 = vpop.f32.mrf.mxu1  ;;  %v5790_v53 = vpop.f32.mrf.mxu0 }
 0x2e1   : > { %4073 = vst.msk [vmem:[%s5599_s9 + $0x20] sm:$0xf] %vm4064_vm8, %v4024_v2  ;;  %v3593_v58 = vadd.f32 %v5574_v35, %v3541_v4  ;;  %v2416_v2 = vadd.f32 %v2284_v26, %v5125_v62  ;;  %v3408_v37 = vrot.slane %v5790_v53, 3  ;;  %v3781_v4 = vpop.permute.xlu1 %3780  ;;  %v2417_v26 = vadd.f32 %v2286_v33, %v5131_v20  ;;  %v3726_v20 = vld [vmem:[%s6336_s3 + $0x170] sm:$0xff] }
 0x2e2   : > { %v2655_v27 = vsel %vm2259_vm7, %v2652_v50, %v2654_v1  ;;  %v3031_v50 = vsel %vm3008_vm6, %v3028_v13, %v3030_v39  ;;  %v2287_v51 = vrot.slane %v5788_v22, 1  ;;  %v3725_v22 = vld [vmem:[%s6336_s3 + $0x168] sm:$0xff] }
 0x2e3   : > { %v2790_v16 = vadd.f32 %v2655_v27, %v2415_v45  ;;  %v3641_v30 = vmax.f32 %v3593_v58, 0.0  ;;  %4411 = vmatmul.msk.bf16.gmra.mxu1 %vm368_vm1, %v4559_v34  ;;  %v3715_v45 = vld [vmem:[%s6336_s3 + $0x118] sm:$0xff]  ;;  %v3409_v54 = vsel %vm3384_vm5, %v3406_v17, %v3408_v37 }
 0x2e4   : > { %4436 = vmatmul.msk.bf16.gmra.mxu2 %vm368_vm1, %v4559_v34  ;;  %4461 = vmatmul.msk.bf16.gmra.mxu3 %vm368_vm1, %v4559_v34  ;;  %v3723_v58 = vld [vmem:[%s6336_s3 + $0x158] sm:$0xff] }
 0x2e5   : > { %v3977_v9 = vmul.f32 %v3776_v31, %v3641_v30  ;;  %4486 = vmatmul.msk.bf16.gmra.mxu0 %vm368_vm1, %v4559_v34  ;;  %v3166_v49 = vadd.f32 %v3031_v50, %v2790_v16  ;;  %3905 = vperm.xlu2 %4536, %v3715_v45  }
 0x2e6   : > { %3945 = vperm.xlu1 %4535, %v3723_v58   ;;  %3940 = vperm.xlu0 %4534, %v3722_v46  }
 0x2e7   : > { %v4025_v60 = vpack.c.bf16 %v3977_v9, %v3977_v9  ;;  %v2502_v10 = vpop.f32.mrf.mxu2  ;;  %v2877_v5 = vpop.f32.mrf.mxu3  ;;  %v3542_v15 = vadd.f32 %v3407_v6, %v3166_v49 }
 0x2e8   : > { %v2656_v13 = vrot.slane %v2502_v10, 1  ;;  %v3032_v57 = vrot.slane %v2877_v5, 2  ;;  %v5816_v12 = vpop.f32.mrf.mxu1  ;;  %v5818_v40 = vpop.f32.mrf.mxu0  ;;  %v3718_v5 = vld [vmem:[%s6336_s3 + $0x130] sm:$0xff] }
 0x2e9   : > { %4074 = vst.msk [vmem:[%s5599_s9 + $0x24] sm:$0xf] %vm4064_vm8, %v4025_v60  ;;  %v3594_v38 = vadd.f32 %v5574_v35, %v3542_v15  ;;  %v3410_v17 = vrot.slane %v5818_v40, 3  ;;  %v3786_v10 = vpop.permute.xlu2 %3785 }
 0x2ea   : > { %v2657_v63 = vsel %vm2259_vm7, %v2654_v1, %v2656_v13  ;;  %v3033_v53 = vsel %vm3008_vm6, %v3030_v39, %v3032_v57 }
 0x2eb   : > { %v2791_v62 = vadd.f32 %v2657_v63, %v2416_v2  ;;  %v3642_v27 = vmax.f32 %v3594_v38, 0.0  ;;  %v4560_v38 = vld [vmem:[%s4640_s30 + $0x80] sm:$0xff]  ;;  %v3411_v45 = vsel %vm3384_vm5, %v3408_v37, %v3410_v17 }
 0x2ed   : > { %v3167_v1 = vadd.f32 %v3033_v53, %v2791_v62  ;;  %v3978_v31 = vmul.f32 %v3781_v4, %v3642_v27  ;;  %3920 = vperm.xlu2 %4536, %v3718_v5   ;;  %v2288_v4 = vsel %vm2259_vm7, %v2285_v47, %v2287_v51 }
 0x2ee   : > { %3960 = vperm.xlu1 %4535, %v3726_v20   ;;  %3955 = vperm.xlu0 %4534, %v3725_v22  }
 0x2ef   : > { %v4026_v16 = vpack.c.bf16 %v3978_v31, %v3978_v31  ;;  %v2504_v30 = vpop.f32.mrf.mxu2  ;;  %v2879_v34 = vpop.f32.mrf.mxu3  ;;  %v3543_v52 = vadd.f32 %v3409_v54, %v3167_v1  ;;  %v2418_v31 = vadd.f32 %v2288_v4, %v5145_v8  ;;  %v2289_v54 = vrot.slane %v5816_v12, 1  ;;  %v3724_v4 = vld [vmem:[%s6336_s3 + $0x160] sm:$0xff] }
 0x2f0   : > { %v2658_v50 = vrot.slane %v2504_v30, 1  ;;  %v3034_v9 = vrot.slane %v2879_v34, 2  ;;  %v5839_v49 = vpop.f32.mrf.mxu1  ;;  %v3791_v30 = vpop.permute.xlu0 %3790  ;;  %v3721_v34 = vld [vmem:[%s6336_s3 + $0x148] sm:$0xff] }
 0x2f1   : > { %4075 = vst.msk [vmem:[%s5599_s9 + $0x28] sm:$0xf] %vm4064_vm8, %v4026_v16  ;;  %v3595_v39 = vadd.f32 %v5574_v35, %v3543_v52  ;;  %v2290_v12 = vsel %vm2259_vm7, %v2287_v51, %v2289_v54 }
 0x2f2   : > { %v2659_v6 = vsel %vm2259_vm7, %v2656_v13, %v2658_v50  ;;  %v5848_v60 = vpop.f32.mrf.mxu0  ;;  %v3035_v13 = vsel %vm3008_vm6, %v3032_v57, %v3034_v9  ;;  %v2419_v22 = vadd.f32 %v2290_v12, %v5151_v24  ;;  %v4561_v24 = vld [vmem:[%s4640_s30 + $0x88] sm:$0xff]  ;;  %v3727_v12 = vld [vmem:[%s6336_s3 + $0x178] sm:$0xff] }
 0x2f3   : > { %v2792_v15 = vadd.f32 %v2659_v6, %v2417_v26  ;;  %v3643_v2 = vmax.f32 %v3595_v39, 0.0  ;;  %4412 = vmatmul.msk.bf16.gmra.mxu1 %vm368_vm1, %v4560_v38  ;;  %v3412_v47 = vrot.slane %v5848_v60, 3 }
 0x2f4   : > { %4437 = vmatmul.msk.bf16.gmra.mxu2 %vm368_vm1, %v4560_v38  ;;  %4462 = vmatmul.msk.bf16.gmra.mxu3 %vm368_vm1, %v4560_v38 }
 0x2f5   : > { %v3979_v40 = vmul.f32 %v3786_v10, %v3643_v2  ;;  %4487 = vmatmul.msk.bf16.gmra.mxu0 %vm368_vm1, %v4560_v38  ;;  %v3168_v63 = vadd.f32 %v3035_v13, %v2792_v15  ;;  %3935 = vperm.xlu2 %4536, %v3721_v34   ;;  %v3413_v60 = vsel %vm3384_vm5, %v3410_v17, %v3412_v47  ;;  %v2291_v13 = vrot.slane %v5839_v49, 1 }
 0x2f7   : > { %v4027_v58 = vpack.c.bf16 %v3979_v40, %v3979_v40  ;;  %v2507_v62 = vpop.f32.mrf.mxu2  ;;  %v2882_v27 = vpop.f32.mrf.mxu3  ;;  %v3544_v46 = vadd.f32 %v3411_v45, %v3168_v63 }
 0x2f8   : > { %v2660_v57 = vrot.slane %v2507_v62, 1  ;;  %v3036_v53 = vrot.slane %v2882_v27, 2  ;;  %v5867_v1 = vpop.f32.mrf.mxu1  ;;  %v3796_v63 = vpop.permute.xlu1 %3795 }
 0x2f9   : > { %4076 = vst.msk [vmem:[%s5599_s9 + $0x2c] sm:$0xf] %vm4064_vm8, %v4027_v58  ;;  %v3596_v33 = vadd.f32 %v5574_v35, %v3544_v46  ;;  %v2292_v46 = vsel %vm2259_vm7, %v2289_v54, %v2291_v13 }
 0x2fa   : > { %v2661_v37 = vsel %vm2259_vm7, %v2658_v50, %v2660_v57  ;;  %v5876_v16 = vpop.f32.mrf.mxu0  ;;  %v3037_v26 = vsel %vm3008_vm6, %v3034_v9, %v3036_v53 }
 0x2fb   : > { %v2793_v52 = vadd.f32 %v2661_v37, %v2418_v31  ;;  %v3644_v8 = vmax.f32 %v3596_v33, 0.0  ;;  %v3414_v51 = vrot.slane %v5876_v16, 3 }
 0x2fd   : > { %v3169_v39 = vadd.f32 %v3037_v26, %v2793_v52  ;;  %v3980_v6 = vmul.f32 %v3791_v30, %v3644_v8  ;;  %3950 = vperm.xlu2 %4536, %v3724_v4   ;;  %v2420_v52 = vadd.f32 %v2292_v46, %v5165_v25  ;;  %v2293_v26 = vrot.slane %v5867_v1, 1  ;;  %v4562_v46 = vld [vmem:[%s4640_s30 + $0x90] sm:$0xff] }
 0x2ff   : > { %v4028_v50 = vpack.c.bf16 %v3980_v6, %v3980_v6  ;;  %v2509_v10 = vpop.f32.mrf.mxu2  ;;  %v2884_v5 = vpop.f32.mrf.mxu3  ;;  %v3545_v20 = vadd.f32 %v3413_v60, %v3169_v39  ;;  %v2294_v1 = vsel %vm2259_vm7, %v2291_v13, %v2293_v26 }
 0x300   : > { %v2662_v15 = vrot.slane %v2509_v10, 1  ;;  %v3038_v2 = vrot.slane %v2884_v5, 2  ;;  %v5884_v38 = vpop.f32.mrf.mxu1  ;;  %v3801_v6 = vpop.permute.xlu2 %3800 }
 0x301   : > { %4077 = vst.msk [vmem:[%s5599_s9 + $0x30] sm:$0xf] %vm4064_vm8, %v4028_v50  ;;  %v3597_v9 = vadd.f32 %v5574_v35, %v3545_v20 }
 0x302   : > { %v2663_v17 = vsel %vm2259_vm7, %v2660_v57, %v2662_v15  ;;  %v5893_v40 = vpop.f32.mrf.mxu0  ;;  %v3039_v62 = vsel %vm3008_vm6, %v3036_v53, %v3038_v2  ;;  %v3415_v57 = vsel %vm3384_vm5, %v3412_v47, %v3414_v51 }
 0x303   : > { %v2794_v45 = vadd.f32 %v2663_v17, %v2419_v22  ;;  %v3645_v58 = vmax.f32 %v3597_v9, 0.0  ;;  %4413 = vmatmul.msk.bf16.gmra.mxu1 %vm368_vm1, %v4561_v24  ;;  %v3416_v54 = vrot.slane %v5893_v40, 3 }
 0x304   : > { %4438 = vmatmul.msk.bf16.gmra.mxu2 %vm368_vm1, %v4561_v24  ;;  %4463 = vmatmul.msk.bf16.gmra.mxu3 %vm368_vm1, %v4561_v24 }
 0x305   : > { %v3981_v49 = vmul.f32 %v3796_v63, %v3645_v58  ;;  %4488 = vmatmul.msk.bf16.gmra.mxu0 %vm368_vm1, %v4561_v24  ;;  %v3170_v27 = vadd.f32 %v3039_v62, %v2794_v45  ;;  %3965 = vperm.xlu2 %4536, %v3727_v12   ;;  %v3417_v20 = vsel %vm3384_vm5, %v3414_v51, %v3416_v54  ;;  %v2295_v58 = vrot.slane %v5884_v38, 1  ;;  %v3806_v62 = vpop.permute.xlu0 %3805 }
 0x306   : > { %v2421_v45 = vadd.f32 %v2294_v1, %v5171_v28 }
 0x307   : > { %v4029_v31 = vpack.c.bf16 %v3981_v49, %v3981_v49  ;;  %v2512_v33 = vpop.f32.mrf.mxu2  ;;  %v2887_v37 = vpop.f32.mrf.mxu3  ;;  %v3546_v16 = vadd.f32 %v3415_v57, %v3170_v27 }
 0x308   : > { %v2664_v30 = vrot.slane %v2512_v33, 1  ;;  %v3040_v34 = vrot.slane %v2887_v37, 2  ;;  %v5906_v53 = vpop.f32.mrf.mxu1 }
 0x309   : > { %4078 = vst.msk [vmem:[%s5599_s9 + $0x34] sm:$0xf] %vm4064_vm8, %v4029_v31  ;;  %v3598_v8 = vadd.f32 %v5574_v35, %v3546_v16  ;;  %v2296_v31 = vsel %vm2259_vm7, %v2293_v26, %v2295_v58  ;;  %v2297_v12 = vrot.slane %v5906_v53, 1 }
 0x30a   : > { %v2665_v47 = vsel %vm2259_vm7, %v2662_v15, %v2664_v30  ;;  %v3265_v39 = vpop.f32.mrf.mxu0  ;;  %v3041_v25 = vsel %vm3008_vm6, %v3038_v2, %v3040_v34 }
 0x30b   : > { %v2795_v60 = vadd.f32 %v2665_v47, %v2420_v52  ;;  %v3646_v50 = vmax.f32 %v3598_v8, 0.0  ;;  %v3418_v13 = vrot.slane %v3265_v39, 3  ;;  %v2422_v39 = vadd.f32 %v2296_v31, %v5185_v61 }
 0x30c   : > { %v2298_v61 = vsel %vm2259_vm7, %v2295_v58, %v2297_v12 }
 0x30d   : > { %v3171_v10 = vadd.f32 %v3041_v25, %v2795_v60  ;;  %v3982_v5 = vmul.f32 %v3801_v6, %v3646_v50  ;;  %v3419_v33 = vsel %vm3384_vm5, %v3416_v54, %v3418_v13  ;;  %v3811_v50 = vpop.permute.xlu1 %3810 }
 0x30f   : > { %v4030_v22 = vpack.c.bf16 %v3982_v5, %v3982_v5  ;;  %v2514_v15 = vpop.f32.mrf.mxu2  ;;  %v2889_v9 = vpop.f32.mrf.mxu3  ;;  %v3547_v17 = vadd.f32 %v3417_v20, %v3171_v10 }
 0x310   : > { %v2666_v40 = vrot.slane %v2514_v15, 1  ;;  %v3042_v63 = vrot.slane %v2889_v9, 2  ;;  %v5921_v4 = vpop.f32.mrf.mxu1 }
 0x311   : > { %4079 = vst.msk [vmem:[%s5599_s9 + $0x38] sm:$0xf] %vm4064_vm8, %v4030_v22  ;;  %v3599_v2 = vadd.f32 %v5574_v35, %v3547_v17 }
 0x312   : > { %v2667_v51 = vsel %vm2259_vm7, %v2664_v30, %v2666_v40  ;;  %v5929_v24 = vpop.f32.mrf.mxu0  ;;  %v3043_v57 = vsel %vm3008_vm6, %v3040_v34, %v3042_v63 }
 0x313   : > { %v2796_v49 = vadd.f32 %v2667_v51, %v2421_v45  ;;  %v3647_v27 = vmax.f32 %v3599_v2, 0.0  ;;  %4414 = vmatmul.msk.bf16.gmra.mxu1 %vm368_vm1, %v4562_v46  ;;  %v3420_v26 = vrot.slane %v5929_v24, 3  ;;  %v2423_v51 = vadd.f32 %v2298_v61, %v5191_v48 }
 0x314   : > { %4439 = vmatmul.msk.bf16.gmra.mxu2 %vm368_vm1, %v4562_v46  ;;  %4464 = vmatmul.msk.bf16.gmra.mxu3 %vm368_vm1, %v4562_v46  ;;  %v2299_v24 = vrot.slane %v5921_v4, 1 }
 0x315   : > { %v3983_v28 = vmul.f32 %v3806_v62, %v3647_v27  ;;  %4489 = vmatmul.msk.bf16.gmra.mxu0 %vm368_vm1, %v4562_v46  ;;  %v3172_v38 = vadd.f32 %v3043_v57, %v2796_v49  ;;  %v3421_v22 = vsel %vm3384_vm5, %v3418_v13, %v3420_v26  ;;  %v3816_v49 = vpop.permute.xlu2 %3815  ;;  %v4563_v57 = vld [vmem:[%s4640_s30 + $0x98] sm:$0xff] }
 0x317   : > { %v4031_v37 = vpack.c.bf16 %v3983_v28, %v3983_v28  ;;  %v2517_v16 = vpop.f32.mrf.mxu2  ;;  %v2892_v30 = vpop.f32.mrf.mxu3  ;;  %v3548_v52 = vadd.f32 %v3419_v33, %v3172_v38  ;;  %v2300_v38 = vsel %vm2259_vm7, %v2297_v12, %v2299_v24 }
 0x318   : > { %v2668_v8 = vrot.slane %v2517_v16, 1  ;;  %v3044_v47 = vrot.slane %v2892_v30, 2  ;;  %v5939_v34 = vpop.f32.mrf.mxu1 }
 0x319   : > { %4080 = vst.msk [vmem:[%s5599_s9 + $0x3c] sm:$0xf] %vm4064_vm8, %v4031_v37  ;;  %v3600_v6 = vadd.f32 %v5574_v35, %v3548_v52 }
 0x31a   : > { %v2669_v54 = vsel %vm2259_vm7, %v2666_v40, %v2668_v8  ;;  %v3270_v60 = vpop.f32.mrf.mxu0  ;;  %v3045_v5 = vsel %vm3008_vm6, %v3042_v63, %v3044_v47 }
 0x31b   : > { %v2797_v25 = vadd.f32 %v2669_v54, %v2422_v39  ;;  %v3648_v10 = vmax.f32 %v3600_v6, 0.0  ;;  %v3422_v58 = vrot.slane %v3270_v60, 3  ;;  %v2424_v39 = vadd.f32 %v2300_v38, %v5202_v43 }
 0x31c   : > { %v2301_v54 = vrot.slane %v5939_v34, 1 }
 0x31d   : > { %v3173_v1 = vadd.f32 %v3045_v5, %v2797_v25  ;;  %v3984_v20 = vmul.f32 %v3811_v50, %v3648_v10  ;;  %v3423_v31 = vsel %vm3384_vm5, %v3420_v26, %v3422_v58  ;;  %v3821_v50 = vpop.permute.xlu0 %3820 }
 0x31e   : > { %v2302_v43 = vsel %vm2259_vm7, %v2299_v24, %v2301_v54 }
 0x31f   : > { %v4032_v15 = vpack.c.bf16 %v3984_v20, %v3984_v20  ;;  %v2519_v9 = vpop.f32.mrf.mxu2  ;;  %v2894_v53 = vpop.f32.mrf.mxu3  ;;  %v3549_v17 = vadd.f32 %v3421_v22, %v3173_v1 }
 0x320   : > { %v2670_v45 = vrot.slane %v2519_v9, 1  ;;  %v3046_v40 = vrot.slane %v2894_v53, 2  ;;  %v5951_v2 = vpop.f32.mrf.mxu1 }
 0x321   : > { %4081 = vst.msk [vmem:[%s5599_s9 + $0x40] sm:$0xf] %vm4064_vm8, %v4032_v15  ;;  %v3601_v63 = vadd.f32 %v5574_v35, %v3549_v17 }
 0x322   : > { %v2671_v13 = vsel %vm2259_vm7, %v2668_v8, %v2670_v45  ;;  %v5959_v62 = vpop.f32.mrf.mxu0  ;;  %v3047_v28 = vsel %vm3008_vm6, %v3044_v47, %v3046_v40 }
 0x323   : > { %v2798_v27 = vadd.f32 %v2671_v13, %v2423_v51  ;;  %v3649_v46 = vmax.f32 %v3601_v63, 0.0  ;;  %4415 = vmatmul.msk.bf16.gmra.mxu1 %vm368_vm1, %v4563_v57  ;;  %v3424_v12 = vrot.slane %v5959_v62, 3  ;;  %v2303_v63 = vrot.slane %v5951_v2, 1  ;;  %v3826_v62 = vpop.permute.xlu1 %3825 }
 0x324   : > { %4440 = vmatmul.msk.bf16.gmra.mxu2 %vm368_vm1, %v4563_v57  ;;  %4465 = vmatmul.msk.bf16.gmra.mxu3 %vm368_vm1, %v4563_v57 }
 0x325   : > { %v3985_v48 = vmul.f32 %v3816_v49, %v3649_v46  ;;  %4490 = vmatmul.msk.bf16.gmra.mxu0 %vm368_vm1, %v4563_v57  ;;  %v3174_v4 = vadd.f32 %v3047_v28, %v2798_v27  ;;  %v3425_v61 = vsel %vm3384_vm5, %v3422_v58, %v3424_v12  ;;  %v2304_v28 = vsel %vm2259_vm7, %v2301_v54, %v2303_v63 }
 0x327   : > { %v4033_v33 = vpack.c.bf16 %v3985_v48, %v3985_v48  ;;  %v2522_v37 = vpop.f32.mrf.mxu2  ;;  %v2897_v16 = vpop.f32.mrf.mxu3  ;;  %v3550_v30 = vadd.f32 %v3423_v31, %v3174_v4 }
 0x328   : > { %v2672_v52 = vrot.slane %v2522_v37, 1  ;;  %v3048_v8 = vrot.slane %v2897_v16, 2  ;;  %v5969_v47 = vpop.f32.mrf.mxu1 }
 0x329   : > { %4082 = vst.msk [vmem:[%s5599_s9 + $0x44] sm:$0xf] %vm4064_vm8, %v4033_v33  ;;  %v3602_v6 = vadd.f32 %v5574_v35, %v3550_v30 }
 0x32a   : > { %v2673_v26 = vsel %vm2259_vm7, %v2670_v45, %v2672_v52  ;;  %v3275_v60 = vpop.f32.mrf.mxu0  ;;  %v3049_v5 = vsel %vm3008_vm6, %v3046_v40, %v3048_v8  ;;  %v2425_v45 = vadd.f32 %v2302_v43, %v5208_v18  ;;  %v5989_v40 = vld [vmem:[%s6335_s2] ss:$0 sm:$0xff] }
 0x32b   : > { %v2799_v25 = vadd.f32 %v2673_v26, %v2424_v39  ;;  %v3650_v10 = vmax.f32 %v3602_v6, 0.0  ;;  %v3426_v24 = vrot.slane %v3275_v60, 3  ;;  %v4565_v18 = vld [vmem:[%s4640_s30 + $0xa0] sm:$0xff]  ;;  %v2305_v39 = vrot.slane %v5969_v47, 1  ;;  %v3831_v26 = vpop.permute.xlu2 %3830 }
 0x32d   : > { %v3175_v1 = vadd.f32 %v3049_v5, %v2799_v25  ;;  %v3986_v20 = vmul.f32 %v3821_v50, %v3650_v10  ;;  %v3427_v48 = vsel %vm3384_vm5, %v3424_v12, %v3426_v24 }
 0x32f   : > { %v4034_v35 = vpack.c.bf16 %v3986_v20, %v3986_v20  ;;  %v2524_v22 = vpop.f32.mrf.mxu2  ;;  %v2899_v34 = vpop.f32.mrf.mxu3  ;;  %v3551_v15 = vadd.f32 %v3425_v61, %v3175_v1 }
 0x330   : > { %v2674_v9 = vrot.slane %v2524_v22, 1  ;;  %v3050_v53 = vrot.slane %v2899_v34, 2  ;;  %v5981_v17 = vpop.f32.mrf.mxu1 }
 0x331   : > { %4083 = vst.msk [vmem:[%s5599_s9 + $0x48] sm:$0xf] %vm4064_vm8, %v4034_v35  ;;  %v3603_v51 = vadd.f32 %v5989_v40, %v3551_v15 }
 0x332   : > { %v2675_v58 = vsel %vm2259_vm7, %v2672_v52, %v2674_v9  ;;  %v5994_v13 = vpop.f32.mrf.mxu0  ;;  %v3051_v46 = vsel %vm3008_vm6, %v3048_v8, %v3050_v53  ;;  %v2426_v52 = vadd.f32 %v2304_v28, %v5219_v19  ;;  %v2306_v19 = vsel %vm2259_vm7, %v2303_v63, %v2305_v39 }
 0x333   : > { %v2800_v49 = vadd.f32 %v2675_v58, %v2425_v45  ;;  %v3651_v27 = vmax.f32 %v3603_v51, 0.0  ;;  %4416 = vmatmul.msk.bf16.gmra.mxu1 %vm368_vm1, %v4565_v18  ;;  %v3428_v6 = vrot.slane %v5994_v13, 3  ;;  %v2427_v15 = vadd.f32 %v2306_v19, %v5225_v44 }
 0x334   : > { %4441 = vmatmul.msk.bf16.gmra.mxu2 %vm368_vm1, %v4565_v18  ;;  %4466 = vmatmul.msk.bf16.gmra.mxu3 %vm368_vm1, %v4565_v18 }
 0x335   : > { %v3987_v57 = vmul.f32 %v3826_v62, %v3651_v27  ;;  %4491 = vmatmul.msk.bf16.gmra.mxu0 %vm368_vm1, %v4565_v18  ;;  %v3176_v2 = vadd.f32 %v3051_v46, %v2800_v49  ;;  %v3429_v1 = vsel %vm3384_vm5, %v3426_v24, %v3428_v6  ;;  %v3836_v24 = vpop.permute.xlu0 %3835  ;;  %v4566_v62 = vld [vmem:[%s4640_s30 + $0xa8] sm:$0xff] }
 0x337   : > { %v4035_v4 = vpack.c.bf16 %v3987_v57, %v3987_v57  ;;  %v2527_v38 = vpop.f32.mrf.mxu2  ;;  %v2902_v31 = vpop.f32.mrf.mxu3  ;;  %v3552_v33 = vadd.f32 %v3427_v48, %v3176_v2 }
 0x338   : > { %v2676_v37 = vrot.slane %v2527_v38, 1  ;;  %v3052_v16 = vrot.slane %v2902_v31, 2  ;;  %v6004_v30 = vpop.f32.mrf.mxu1 }
 0x339   : > { %4084 = vst.msk [vmem:[%s5599_s9 + $0x4c] sm:$0xf] %vm4064_vm8, %v4035_v4  ;;  %v3604_v8 = vadd.f32 %v5989_v40, %v3552_v33 }
 0x33a   : > { %v2677_v54 = vsel %vm2259_vm7, %v2674_v9, %v2676_v37  ;;  %v3280_v12 = vpop.f32.mrf.mxu0  ;;  %v3053_v25 = vsel %vm3008_vm6, %v3050_v53, %v3052_v16  ;;  %v2307_v53 = vrot.slane %v5981_v17, 1 }
 0x33b   : > { %v2801_v60 = vadd.f32 %v2677_v54, %v2426_v52  ;;  %v3652_v50 = vmax.f32 %v3604_v8, 0.0  ;;  %v3430_v45 = vrot.slane %v3280_v12, 3  ;;  %v3841_v54 = vpop.permute.xlu1 %3840 }
 0x33c   : > { %v2308_v27 = vsel %vm2259_vm7, %v2305_v39, %v2307_v53 }
 0x33d   : > { %v3177_v10 = vadd.f32 %v3053_v25, %v2801_v60  ;;  %v3988_v5 = vmul.f32 %v3831_v26, %v3652_v50  ;;  %v3431_v18 = vsel %vm3384_vm5, %v3428_v6, %v3430_v45  ;;  %v2428_v31 = vadd.f32 %v2308_v27, %v5236_v23 }
 0x33f   : > { %v4036_v20 = vpack.c.bf16 %v3988_v5, %v3988_v5  ;;  %v2529_v43 = vpop.f32.mrf.mxu2  ;;  %v2904_v47 = vpop.f32.mrf.mxu3  ;;  %v3553_v61 = vadd.f32 %v3429_v1, %v3177_v10 }
 0x340   : > { %v2678_v35 = vrot.slane %v2529_v43, 1  ;;  %v3054_v22 = vrot.slane %v2904_v47, 2  ;;  %v6016_v34 = vpop.f32.mrf.mxu1 }
 0x341   : > { %4085 = vst.msk [vmem:[%s5599_s9 + $0x50] sm:$0xf] %vm4064_vm8, %v4036_v20  ;;  %v3605_v9 = vadd.f32 %v5989_v40, %v3553_v61  ;;  %v2311_v61 = vrot.slane %v6016_v34, 1 }
 0x342   : > { %v2679_v51 = vsel %vm2259_vm7, %v2676_v37, %v2678_v35  ;;  %v6024_v63 = vpop.f32.mrf.mxu0  ;;  %v3055_v49 = vsel %vm3008_vm6, %v3052_v16, %v3054_v22  ;;  %v2309_v37 = vrot.slane %v6004_v30, 1 }
 0x343   : > { %v2802_v58 = vadd.f32 %v2679_v51, %v2427_v15  ;;  %v3653_v13 = vmax.f32 %v3605_v9, 0.0  ;;  %4417 = vmatmul.msk.bf16.gmra.mxu1 %vm368_vm1, %v4566_v62  ;;  %v3432_v16 = vrot.slane %v6024_v63, 3  ;;  %v3846_v51 = vpop.permute.xlu2 %3845 }
 0x344   : > { %4442 = vmatmul.msk.bf16.gmra.mxu2 %vm368_vm1, %v4566_v62  ;;  %4467 = vmatmul.msk.bf16.gmra.mxu3 %vm368_vm1, %v4566_v62  ;;  %v2310_v23 = vsel %vm2259_vm7, %v2307_v53, %v2309_v37 }
 0x345   : > { %v3178_v44 = vadd.f32 %v3055_v49, %v2802_v58  ;;  %v3989_v17 = vmul.f32 %v3836_v24, %v3653_v13  ;;  %4492 = vmatmul.msk.bf16.gmra.mxu0 %vm368_vm1, %v4566_v62  ;;  %v3433_v50 = vsel %vm3384_vm5, %v3430_v45, %v3432_v16  ;;  %v2429_v43 = vadd.f32 %v2310_v23, %v5242_v56  ;;  %v4567_v45 = vld [vmem:[%s4640_s30 + $0xb0] sm:$0xff] }
 0x346   : > { %v2312_v24 = vsel %vm2259_vm7, %v2309_v37, %v2311_v61  ;;  %v3851_v37 = vpop.permute.xlu0 %3850 }
 0x347   : > { %v3554_v46 = vadd.f32 %v3431_v18, %v3178_v44  ;;  %v4037_v57 = vpack.c.bf16 %v3989_v17, %v3989_v17  ;;  %v2532_v2 = vpop.f32.mrf.mxu2  ;;  %v2907_v28 = vpop.f32.mrf.mxu3 }
 0x348   : > { %v2680_v48 = vrot.slane %v2532_v2, 1  ;;  %v3056_v4 = vrot.slane %v2907_v28, 2  ;;  %v6034_v38 = vpop.f32.mrf.mxu1 }
 0x349   : > { %v3606_v33 = vadd.f32 %v5989_v40, %v3554_v46  ;;  %4086 = vst.msk [vmem:[%s5599_s9 + $0x54] sm:$0xf] %vm4064_vm8, %v4037_v57  ;;  %v2430_v46 = vadd.f32 %v2312_v24, %v5253_v55  ;;  %v2313_v2 = vrot.slane %v6034_v38, 1 }
 0x34a   : > { %v2681_v52 = vsel %vm2259_vm7, %v2678_v35, %v2680_v48  ;;  %v3285_v8 = vpop.f32.mrf.mxu0  ;;  %v3057_v12 = vsel %vm3008_vm6, %v3054_v22, %v3056_v4 }
 0x34b   : > { %v3654_v39 = vmax.f32 %v3606_v33, 0.0  ;;  %v2803_v6 = vadd.f32 %v2681_v52, %v2428_v31  ;;  %v3434_v35 = vrot.slane %v3285_v8, 3  ;;  %v2314_v55 = vsel %vm2259_vm7, %v2311_v61, %v2313_v2  ;;  %v3856_v61 = vpop.permute.xlu1 %3855 }
 0x34d   : > { %v3990_v26 = vmul.f32 %v3841_v54, %v3654_v39  ;;  %v3179_v60 = vadd.f32 %v3057_v12, %v2803_v6  ;;  %v3435_v58 = vsel %vm3384_vm5, %v3432_v16, %v3434_v35 }
 0x34f   : > { %v4038_v25 = vpack.c.bf16 %v3990_v26, %v3990_v26  ;;  %v3555_v30 = vadd.f32 %v3433_v50, %v3179_v60  ;;  %v2534_v10 = vpop.f32.mrf.mxu2  ;;  %v2909_v5 = vpop.f32.mrf.mxu3  ;;  %v2431_v50 = vadd.f32 %v2314_v55, %v5259_v41 }
 0x350   : > { %v2682_v19 = vrot.slane %v2534_v10, 1  ;;  %v3058_v1 = vrot.slane %v2909_v5, 2  ;;  %v6046_v20 = vpop.f32.mrf.mxu1 }
 0x351   : > { %4087 = vst.msk [vmem:[%s5599_s9 + $0x58] sm:$0xf] %vm4064_vm8, %v4038_v25  ;;  %v3607_v47 = vadd.f32 %v5989_v40, %v3555_v30  ;;  %v2315_v30 = vrot.slane %v6046_v20, 1 }
 0x352   : > { %v2683_v22 = vsel %vm2259_vm7, %v2680_v48, %v2682_v19  ;;  %v6054_v15 = vpop.f32.mrf.mxu0  ;;  %v3059_v63 = vsel %vm3008_vm6, %v3056_v4, %v3058_v1 }
 0x353   : > { %v3655_v9 = vmax.f32 %v3607_v47, 0.0  ;;  %v2804_v53 = vadd.f32 %v2683_v22, %v2429_v43  ;;  %4418 = vmatmul.msk.bf16.gmra.mxu1 %vm368_vm1, %v4567_v45  ;;  %v3436_v28 = vrot.slane %v6054_v15, 3  ;;  %v4568_v47 = vld [vmem:[%s4640_s30 + $0xb8] sm:$0xff]  ;;  %v2316_v20 = vsel %vm2259_vm7, %v2313_v2, %v2315_v30 }
 0x354   : > { %4443 = vmatmul.msk.bf16.gmra.mxu2 %vm368_vm1, %v4567_v45  ;;  %4468 = vmatmul.msk.bf16.gmra.mxu3 %vm368_vm1, %v4567_v45  ;;  %v2432_v24 = vadd.f32 %v2316_v20, %v5270_v42 }
 0x355   : > { %v3991_v56 = vmul.f32 %v3846_v51, %v3655_v9  ;;  %v3180_v34 = vadd.f32 %v3059_v63, %v2804_v53  ;;  %4493 = vmatmul.msk.bf16.gmra.mxu0 %vm368_vm1, %v4567_v45  ;;  %v3437_v39 = vsel %vm3384_vm5, %v3434_v35, %v3436_v28 }
 0x357   : > { %v4039_v13 = vpack.c.bf16 %v3991_v56, %v3991_v56  ;;  %v3556_v62 = vadd.f32 %v3435_v58, %v3180_v34  ;;  %v2537_v49 = vpop.f32.mrf.mxu2  ;;  %v2912_v44 = vpop.f32.mrf.mxu3 }
 0x358   : > { %v2684_v17 = vrot.slane %v2537_v49, 1  ;;  %v3060_v27 = vrot.slane %v2912_v44, 2  ;;  %v6064_v18 = vpop.f32.mrf.mxu1 }
 0x359   : > { %4088 = vst.msk [vmem:[%s5599_s9 + $0x5c] sm:$0xf] %vm4064_vm8, %v4039_v13  ;;  %v3608_v57 = vadd.f32 %v5989_v40, %v3556_v62  ;;  %v2317_v13 = vrot.slane %v6064_v18, 1 }
 0x35a   : > { %v2685_v48 = vsel %vm2259_vm7, %v2682_v19, %v2684_v17  ;;  %v3290_v4 = vpop.f32.mrf.mxu0  ;;  %v3061_v16 = vsel %vm3008_vm6, %v3058_v1, %v3060_v27 }
 0x35b   : > { %v3656_v31 = vmax.f32 %v3608_v57, 0.0  ;;  %v2805_v33 = vadd.f32 %v2685_v48, %v2430_v46  ;;  %v3438_v10 = vrot.slane %v3290_v4, 3  ;;  %v3861_v46 = vpop.permute.xlu2 %3860  ;;  %v2318_v42 = vsel %vm2259_vm7, %v2315_v30, %v2317_v13 }
 0x35d   : > { %v3992_v52 = vmul.f32 %v3851_v37, %v3656_v31  ;;  %v3181_v8 = vadd.f32 %v3061_v16, %v2805_v33  ;;  %v3439_v15 = vsel %vm3384_vm5, %v3436_v28, %v3438_v10 }
 0x35f   : > { %v4040_v6 = vpack.c.bf16 %v3992_v52, %v3992_v52  ;;  %v3557_v38 = vadd.f32 %v3437_v39, %v3181_v8  ;;  %v2539_v54 = vpop.f32.mrf.mxu2  ;;  %v2914_v12 = vpop.f32.mrf.mxu3  ;;  %v2433_v8 = vadd.f32 %v2318_v42, %v5276_v29 }
 0x360   : > { %v2686_v26 = vrot.slane %v2539_v54, 1  ;;  %v3062_v60 = vrot.slane %v2914_v12, 2  ;;  %v6076_v23 = vpop.f32.mrf.mxu1 }
 0x361   : > { %4089 = vst.msk [vmem:[%s5599_s9 + $0x60] sm:$0xf] %vm4064_vm8, %v4040_v6  ;;  %v3609_v25 = vadd.f32 %v5989_v40, %v3557_v38  ;;  %v2319_v39 = vrot.slane %v6076_v23, 1 }
 0x362   : > { %v2687_v5 = vsel %vm2259_vm7, %v2684_v17, %v2686_v26  ;;  %v3293_v19 = vpop.f32.mrf.mxu0  ;;  %v3063_v35 = vsel %vm3008_vm6, %v3060_v27, %v3062_v60 }
 0x363   : > { %v3657_v1 = vmax.f32 %v3609_v25, 0.0  ;;  %v2806_v43 = vadd.f32 %v2687_v5, %v2431_v50  ;;  %4419 = vmatmul.msk.bf16.gmra.mxu1 %vm368_vm1, %v4568_v47  ;;  %v3440_v62 = vrot.slane %v3293_v19, 3  ;;  %v2320_v29 = vsel %vm2259_vm7, %v2317_v13, %v2319_v39 }
 0x364   : > { %4444 = vmatmul.msk.bf16.gmra.mxu2 %vm368_vm1, %v4568_v47  ;;  %4469 = vmatmul.msk.bf16.gmra.mxu3 %vm368_vm1, %v4568_v47 }
 0x365   : > { %v3993_v41 = vmul.f32 %v3856_v61, %v3657_v1  ;;  %v3182_v22 = vadd.f32 %v3063_v35, %v2806_v43  ;;  %4494 = vmatmul.msk.bf16.gmra.mxu0 %vm368_vm1, %v4568_v47  ;;  %v3441_v48 = vsel %vm3384_vm5, %v3438_v10, %v3440_v62  ;;  %v2434_v35 = vadd.f32 %v2320_v29, %v5287_v32 }
 0x367   : > { %v4041_v9 = vpack.c.bf16 %v3993_v41, %v3993_v41  ;;  %v3558_v53 = vadd.f32 %v3439_v15, %v3182_v22  ;;  %v2542_v45 = vpop.f32.mrf.mxu2  ;;  %v2917_v51 = vpop.f32.mrf.mxu3 }
 0x368   : > { %v2688_v63 = vrot.slane %v2542_v45, 1  ;;  %v3064_v56 = vrot.slane %v2917_v51, 2  ;;  %v6092_v34 = vpop.f32.mrf.mxu1  ;;  %v3871_v51 = vpop.permute.xlu1 %3870 }
 0x369   : > { %4090 = vst.msk [vmem:[%s5599_s9 + $0x64] sm:$0xf] %vm4064_vm8, %v4041_v9  ;;  %v3610_v58 = vadd.f32 %v5989_v40, %v3558_v53  ;;  %v2321_v22 = vrot.slane %v6092_v34, 1 }
 0x36a   : > { %v2689_v49 = vsel %vm2259_vm7, %v2686_v26, %v2688_v63  ;;  %v3295_v44 = vpop.f32.mrf.mxu0  ;;  %v3065_v57 = vsel %vm3008_vm6, %v3062_v60, %v3064_v56  ;;  %v3866_v60 = vpop.permute.xlu0 %3865 }
 0x36b   : > { %v3658_v17 = vmax.f32 %v3610_v58, 0.0  ;;  %v2807_v27 = vadd.f32 %v2689_v49, %v2432_v24  ;;  %v3442_v6 = vrot.slane %v3295_v44, 3  ;;  %v2322_v32 = vsel %vm2259_vm7, %v2319_v39, %v2321_v22 }
 0x36d   : > { %v3994_v2 = vmul.f32 %v3861_v46, %v3658_v17  ;;  %v3183_v28 = vadd.f32 %v3065_v57, %v2807_v27  ;;  %v3443_v10 = vsel %vm3384_vm5, %v3440_v62, %v3442_v6  ;;  %v2435_v46 = vadd.f32 %v2322_v32, %v5293_v21 }
 0x36f   : > { %v4042_v4 = vpack.c.bf16 %v3994_v2, %v3994_v2  ;;  %v3559_v31 = vadd.f32 %v3441_v48, %v3183_v28  ;;  %v2544_v33 = vpop.f32.mrf.mxu2  ;;  %v2919_v18 = vpop.f32.mrf.mxu3 }
 0x370   : > { %v2690_v37 = vrot.slane %v2544_v33, 1  ;;  %v3066_v16 = vrot.slane %v2919_v18, 2  ;;  %v6103_v52 = vpop.f32.mrf.mxu1  ;;  %v3876_v33 = vpop.permute.xlu2 %3875 }
 0x371   : > { %4091 = vst.msk [vmem:[%s5599_s9 + $0x68] sm:$0xf] %vm4064_vm8, %v4042_v4  ;;  %v3611_v55 = vadd.f32 %v5989_v40, %v3559_v31  ;;  %v2323_v2 = vrot.slane %v6103_v52, 1 }
 0x372   : > { %v2691_v38 = vsel %vm2259_vm7, %v2688_v63, %v2690_v37  ;;  %v3298_v54 = vpop.f32.mrf.mxu0  ;;  %v3067_v50 = vsel %vm3008_vm6, %v3064_v56, %v3066_v16 }
 0x373   : > { %v3659_v12 = vmax.f32 %v3611_v55, 0.0  ;;  %v2808_v26 = vadd.f32 %v2691_v38, %v2433_v8  ;;  %v3444_v20 = vrot.slane %v3298_v54, 3  ;;  %v2324_v21 = vsel %vm2259_vm7, %v2321_v22, %v2323_v2 }
 0x375   : > { %v3995_v25 = vmul.f32 %v3866_v60, %v3659_v12  ;;  %v3184_v30 = vadd.f32 %v3067_v50, %v2808_v26  ;;  %v3445_v58 = vsel %vm3384_vm5, %v3442_v6, %v3444_v20  ;;  %v2436_v26 = vadd.f32 %v2324_v21, %v5304_v11 }
 0x377   : > { %v4043_v5 = vpack.c.bf16 %v3995_v25, %v3995_v25  ;;  %v3560_v19 = vadd.f32 %v3443_v10, %v3184_v30  ;;  %v2547_v1 = vpop.f32.mrf.mxu2  ;;  %v2922_v23 = vpop.f32.mrf.mxu3 }
 0x378   : > { %v2692_v43 = vrot.slane %v2547_v1, 1  ;;  %v3068_v47 = vrot.slane %v2922_v23, 2  ;;  %v6114_v61 = vpop.f32.mrf.mxu1 }
 0x379   : > { %4092 = vst.msk [vmem:[%s5599_s9 + $0x6c] sm:$0xf] %vm4064_vm8, %v4043_v5  ;;  %v3612_v41 = vadd.f32 %v5989_v40, %v3560_v19  ;;  %v2325_v50 = vrot.slane %v6114_v61, 1  ;;  %v3881_v19 = vpop.permute.xlu0 %3880 }
 0x37a   : > { %v2693_v15 = vsel %vm2259_vm7, %v2690_v37, %v2692_v43  ;;  %v3300_v9 = vpop.f32.mrf.mxu0  ;;  %v3069_v63 = vsel %vm3008_vm6, %v3066_v16, %v3068_v47 }
 0x37b   : > { %v3660_v53 = vmax.f32 %v3612_v41, 0.0  ;;  %v2809_v45 = vadd.f32 %v2693_v15, %v2434_v35  ;;  %v3446_v28 = vrot.slane %v3300_v9, 3  ;;  %v2326_v11 = vsel %vm2259_vm7, %v2323_v2, %v2325_v50 }
 0x37d   : > { %v3996_v56 = vmul.f32 %v3871_v51, %v3660_v53  ;;  %v3185_v24 = vadd.f32 %v3069_v63, %v2809_v45  ;;  %v3447_v8 = vsel %vm3384_vm5, %v3444_v20, %v3446_v28  ;;  %v2437_v53 = vadd.f32 %v2326_v11, %v5310_v59 }
 0x37f   : > { %v4044_v13 = vpack.c.bf16 %v3996_v56, %v3996_v56  ;;  %v3561_v62 = vadd.f32 %v3445_v58, %v3185_v24  ;;  %v2549_v49 = vpop.f32.mrf.mxu2  ;;  %v2924_v34 = vpop.f32.mrf.mxu3 }
 0x380   : > { %v2694_v44 = vrot.slane %v2549_v49, 1  ;;  %v3070_v17 = vrot.slane %v2924_v34, 2  ;;  %v6125_v27 = vpop.f32.mrf.mxu1 }
 0x381   : > { %4093 = vst.msk [vmem:[%s5599_s9 + $0x70] sm:$0xf] %vm4064_vm8, %v4044_v13  ;;  %v3613_v57 = vadd.f32 %v5989_v40, %v3561_v62  ;;  %v2327_v51 = vrot.slane %v6125_v27, 1  ;;  %v3886_v13 = vpop.permute.xlu1 %3885  ;;  %v3896_v11 = vpop.permute.xlu0 %3895 }
 0x382   : > { %v2695_v42 = vsel %vm2259_vm7, %v2692_v43, %v2694_v44  ;;  %v3303_v48 = vpop.f32.mrf.mxu0  ;;  %v3071_v18 = vsel %vm3008_vm6, %v3068_v47, %v3070_v17 }
 0x383   : > { %v3661_v4 = vmax.f32 %v3613_v57, 0.0  ;;  %v2810_v31 = vadd.f32 %v2695_v42, %v2435_v46  ;;  %v3448_v25 = vrot.slane %v3303_v48, 3  ;;  %v2328_v59 = vsel %vm2259_vm7, %v2325_v50, %v2327_v51 }
 0x384   : > { %v2438_v48 = vadd.f32 %v2328_v59, %v5321_v36 }
 0x385   : > { %v3997_v37 = vmul.f32 %v3876_v33, %v3661_v4  ;;  %v3186_v16 = vadd.f32 %v3071_v18, %v2810_v31  ;;  %v3449_v47 = vsel %vm3384_vm5, %v3446_v28, %v3448_v25 }
 0x387   : > { %v4045_v55 = vpack.c.bf16 %v3997_v37, %v3997_v37  ;;  %v3562_v39 = vadd.f32 %v3447_v8, %v3186_v16  ;;  %v2552_v6 = vpop.f32.mrf.mxu2  ;;  %v2927_v52 = vpop.f32.mrf.mxu3 }
 0x388   : > { %v2696_v38 = vrot.slane %v2552_v6, 1  ;;  %v3072_v54 = vrot.slane %v2927_v52, 2  ;;  %v6136_v12 = vpop.f32.mrf.mxu1  ;;  %v3891_v8 = vpop.permute.xlu2 %3890 }
 0x389   : > { %4094 = vst.msk [vmem:[%s5599_s9 + $0x74] sm:$0xf] %vm4064_vm8, %v4045_v55  ;;  %v3614_v60 = vadd.f32 %v5989_v40, %v3562_v39  ;;  %v2329_v31 = vrot.slane %v6136_v12, 1 }
 0x38a   : > { %v2697_v30 = vsel %vm2259_vm7, %v2694_v44, %v2696_v38  ;;  %v3305_v29 = vpop.f32.mrf.mxu0  ;;  %v3073_v1 = vsel %vm3008_vm6, %v3070_v17, %v3072_v54 }
 0x38b   : > { %v3662_v10 = vmax.f32 %v3614_v60, 0.0  ;;  %v2811_v5 = vadd.f32 %v2697_v30, %v2436_v26  ;;  %v3450_v63 = vrot.slane %v3305_v29, 3  ;;  %v2330_v36 = vsel %vm2259_vm7, %v2327_v51, %v2329_v31 }
 0x38c   : > { %v2439_v30 = vadd.f32 %v2330_v36, %v5330_v7 }
 0x38d   : > { %v3998_v23 = vmul.f32 %v3881_v19, %v3662_v10  ;;  %v3187_v43 = vadd.f32 %v3073_v1, %v2811_v5  ;;  %v3451_v44 = vsel %vm3384_vm5, %v3448_v25, %v3450_v63 }
 0x38f   : > { %v4046_v35 = vpack.c.bf16 %v3998_v23, %v3998_v23  ;;  %v3563_v41 = vadd.f32 %v3449_v47, %v3187_v43  ;;  %v2554_v22 = vpop.f32.mrf.mxu2  ;;  %v2929_v61 = vpop.f32.mrf.mxu3 }
 0x390   : > { %v2698_v20 = vrot.slane %v2554_v22, 1  ;;  %v3074_v15 = vrot.slane %v2929_v61, 2  ;;  %v6147_v9 = vpop.f32.mrf.mxu1 }
 0x391   : > { %4095 = vst.msk [vmem:[%s5599_s9 + $0x78] sm:$0xf] %vm4064_vm8, %v4046_v35  ;;  %v3615_v45 = vadd.f32 %v5989_v40, %v3563_v41  ;;  %v2331_v10 = vrot.slane %v6147_v9, 1 }
 0x392   : > { %v2699_v56 = vsel %vm2259_vm7, %v2696_v38, %v2698_v20  ;;  %v3308_v24 = vpop.f32.mrf.mxu0  ;;  %v3075_v62 = vsel %vm3008_vm6, %v3072_v54, %v3074_v15 }
 0x393   : > { %v3663_v32 = vmax.f32 %v3615_v45, 0.0  ;;  %v2812_v58 = vadd.f32 %v2699_v56, %v2437_v53  ;;  %v3452_v33 = vrot.slane %v3308_v24, 3  ;;  %v2332_v7 = vsel %vm2259_vm7, %v2329_v31, %v2331_v10 }
 0x395   : > { %v3999_v49 = vmul.f32 %v3886_v13, %v3663_v32  ;;  %v3188_v34 = vadd.f32 %v3075_v62, %v2812_v58  ;;  %v3453_v52 = vsel %vm3384_vm5, %v3450_v63, %v3452_v33  ;;  %v2440_v63 = vadd.f32 %v2332_v7, %v5344_v3 }
 0x397   : > { %v4047_v17 = vpack.c.bf16 %v3999_v49, %v3999_v49  ;;  %v3564_v46 = vadd.f32 %v3451_v44, %v3188_v34  ;;  %v2557_v57 = vpop.f32.mrf.mxu2  ;;  %v2932_v27 = vpop.f32.mrf.mxu3 }
 0x398   : > { %v2700_v2 = vrot.slane %v2557_v57, 1  ;;  %v3076_v28 = vrot.slane %v2932_v27, 2  ;;  %v6158_v42 = vpop.f32.mrf.mxu1  ;;  %v3901_v34 = vpop.permute.xlu1 %3900 }
 0x399   : > { %4096 = vst.msk [vmem:[%s5599_s9 + $0x7c] sm:$0xf] %vm4064_vm8, %v4047_v17  ;;  %v3616_v4 = vadd.f32 %v5989_v40, %v3564_v46  ;;  %v2333_v24 = vrot.slane %v6158_v42, 1 }
 0x39a   : > { %v2701_v18 = vsel %vm2259_vm7, %v2698_v20, %v2700_v2  ;;  %v3310_v37 = vpop.f32.mrf.mxu0  ;;  %v3077_v55 = vsel %vm3008_vm6, %v3074_v15, %v3076_v28 }
 0x39b   : > { %v3664_v16 = vmax.f32 %v3616_v4, 0.0  ;;  %v2813_v21 = vadd.f32 %v2701_v18, %v2438_v48  ;;  %v3454_v5 = vrot.slane %v3310_v37, 3  ;;  %v2334_v3 = vsel %vm2259_vm7, %v2331_v10, %v2333_v24 }
 0x39c   : > { %v2441_v31 = vadd.f32 %v2334_v3, %v5353_v0 }
 0x39d   : > { %v4000_v39 = vmul.f32 %v3891_v8, %v3664_v16  ;;  %v3189_v6 = vadd.f32 %v3077_v55, %v2813_v21  ;;  %v3455_v22 = vsel %vm3384_vm5, %v3452_v33, %v3454_v5 }
 0x39f   : > { %v4048_v38 = vpack.c.bf16 %v4000_v39, %v4000_v39  ;;  %v3565_v54 = vadd.f32 %v3453_v52, %v3189_v6  ;;  %v2559_v26 = vpop.f32.mrf.mxu2  ;;  %v2934_v12 = vpop.f32.mrf.mxu3 }
 0x3a0   : > { %v2702_v60 = vrot.slane %v2559_v26, 1  ;;  %v3078_v50 = vrot.slane %v2934_v12, 2  ;;  %v6169_v25 = vpop.f32.mrf.mxu1  ;;  %v3906_v39 = vpop.permute.xlu2 %3905 }
 0x3a1   : > { %4097 = vst.msk [vmem:[%s5599_s9 + $0x80] sm:$0xf] %vm4064_vm8, %v4048_v38  ;;  %v3617_v29 = vadd.f32 %v5989_v40, %v3565_v54  ;;  %v2335_v18 = vrot.slane %v6169_v25, 1 }
 0x3a2   : > { %v2703_v19 = vsel %vm2259_vm7, %v2700_v2, %v2702_v60  ;;  %v3313_v1 = vpop.f32.mrf.mxu0  ;;  %v3079_v47 = vsel %vm3008_vm6, %v3076_v28, %v3078_v50 }
 0x3a3   : > { %v3665_v23 = vmax.f32 %v3617_v29, 0.0  ;;  %v2814_v43 = vadd.f32 %v2703_v19, %v2439_v30  ;;  %v3456_v32 = vrot.slane %v3313_v1, 3  ;;  %v2336_v0 = vsel %vm2259_vm7, %v2333_v24, %v2335_v18 }
 0x3a4   : > { %v2442_v29 = vadd.f32 %v2336_v0, %v5367_v14 }
 0x3a5   : > { %v4001_v35 = vmul.f32 %v3896_v11, %v3665_v23  ;;  %v3190_v41 = vadd.f32 %v3079_v47, %v2814_v43  ;;  %v3457_v46 = vsel %vm3384_vm5, %v3454_v5, %v3456_v32  ;;  %v3911_v47 = vpop.permute.xlu0 %3910 }
 0x3a7   : > { %v4049_v61 = vpack.c.bf16 %v4001_v35, %v4001_v35  ;;  %v3566_v20 = vadd.f32 %v3455_v22, %v3190_v41  ;;  %v2562_v15 = vpop.f32.mrf.mxu2  ;;  %v2937_v9 = vpop.f32.mrf.mxu3 }
 0x3a8   : > { %v2704_v53 = vrot.slane %v2562_v15, 1  ;;  %v3080_v45 = vrot.slane %v2937_v9, 2  ;;  %v6180_v51 = vpop.f32.mrf.mxu1 }
 0x3a9   : > { %4098 = vst.msk [vmem:[%s5599_s9 + $0x84] sm:$0xf] %vm4064_vm8, %v4049_v61  ;;  %v3618_v56 = vadd.f32 %v5989_v40, %v3566_v20  ;;  %v2337_v5 = vrot.slane %v6180_v51, 1 }
 0x3aa   : > { %v2705_v58 = vsel %vm2259_vm7, %v2702_v60, %v2704_v53  ;;  %v3315_v13 = vpop.f32.mrf.mxu0  ;;  %v3081_v59 = vsel %vm3008_vm6, %v3078_v50, %v3080_v45 }
 0x3ab   : > { %v3666_v62 = vmax.f32 %v3618_v56, 0.0  ;;  %v2815_v49 = vadd.f32 %v2705_v58, %v2440_v63  ;;  %v3458_v37 = vrot.slane %v3315_v13, 3  ;;  %v2338_v14 = vsel %vm2259_vm7, %v2335_v18, %v2337_v5  ;;  %v6427_v63 = vld [vmem:[#allocation14_spill] sm:$0xff] }
 0x3ac   : > { %v2443_v56 = vadd.f32 %v2338_v14, %v6427_v63 }
 0x3ad   : > { %v4002_v44 = vmul.f32 %v3901_v34, %v3666_v62  ;;  %v3191_v17 = vadd.f32 %v3081_v59, %v2815_v49  ;;  %v3459_v38 = vsel %vm3384_vm5, %v3456_v32, %v3458_v37  ;;  %v3916_v59 = vpop.permute.xlu1 %3915 }
 0x3af   : > { %v4050_v57 = vpack.c.bf16 %v4002_v44, %v4002_v44  ;;  %v3567_v27 = vadd.f32 %v3457_v46, %v3191_v17  ;;  %v2564_v2 = vpop.f32.mrf.mxu2  ;;  %v2939_v28 = vpop.f32.mrf.mxu3 }
 0x3b0   : > { %v2706_v42 = vrot.slane %v2564_v2, 1  ;;  %v3082_v48 = vrot.slane %v2939_v28, 2  ;;  %v6191_v4 = vpop.f32.mrf.mxu1 }
 0x3b1   : > { %4099 = vst.msk [vmem:[%s5599_s9 + $0x88] sm:$0xf] %vm4064_vm8, %v4050_v57  ;;  %v3619_v33 = vadd.f32 %v5989_v40, %v3567_v27  ;;  %v2339_v32 = vrot.slane %v6191_v4, 1 }
 0x3b2   : > { %v2707_v16 = vsel %vm2259_vm7, %v2704_v53, %v2706_v42  ;;  %v3318_v21 = vpop.f32.mrf.mxu0  ;;  %v3083_v6 = vsel %vm3008_vm6, %v3080_v45, %v3082_v48 }
 0x3b3   : > { %v3667_v8 = vmax.f32 %v3619_v33, 0.0  ;;  %v2816_v55 = vadd.f32 %v2707_v16, %v2441_v31  ;;  %v3460_v19 = vrot.slane %v3318_v21, 3  ;;  %v2340_v46 = vsel %vm2259_vm7, %v2337_v5, %v2339_v32  ;;  %v6428_v33 = vld [vmem:[#allocation15_spill] sm:$0xff]  ;;  %v6429_v5 = vld [vmem:[#allocation2_spill] sm:$0xff] }
 0x3b4   : > { %v2444_v18 = vadd.f32 %v2340_v46, %v6428_v33 }
 0x3b5   : > { %v4003_v36 = vmul.f32 %v3906_v39, %v3667_v8  ;;  %v3192_v52 = vadd.f32 %v3083_v6, %v2816_v55  ;;  %v3461_v22 = vsel %vm3384_vm5, %v3458_v37, %v3460_v19 }
 0x3b7   : > { %v4051_v54 = vpack.c.bf16 %v4003_v36, %v4003_v36  ;;  %v3568_v26 = vadd.f32 %v3459_v38, %v3192_v52  ;;  %v2567_v12 = vpop.f32.mrf.mxu2  ;;  %v2942_v60 = vpop.f32.mrf.mxu3 }
 0x3b8   : > { %v2708_v50 = vrot.slane %v2567_v12, 1  ;;  %v3084_v25 = vrot.slane %v2942_v60, 2  ;;  %v6202_v30 = vpop.f32.mrf.mxu1  ;;  %v3921_v36 = vpop.permute.xlu2 %3920 }
 0x3b9   : > { %4100 = vst.msk [vmem:[%s5599_s9 + $0x8c] sm:$0xf] %vm4064_vm8, %v4051_v54  ;;  %v3620_v10 = vadd.f32 %v5989_v40, %v3568_v26  ;;  %v2341_v16 = vrot.slane %v6202_v30, 1 }
 0x3ba   : > { %v2709_v1 = vsel %vm2259_vm7, %v2706_v42, %v2708_v50  ;;  %v3320_v23 = vpop.f32.mrf.mxu0  ;;  %v3085_v35 = vsel %vm3008_vm6, %v3082_v48, %v3084_v25 }
 0x3bb   : > { %v3668_v43 = vmax.f32 %v3620_v10, 0.0  ;;  %v2817_v11 = vadd.f32 %v2709_v1, %v2442_v29  ;;  %v3462_v58 = vrot.slane %v3320_v23, 3  ;;  %v2342_v54 = vsel %vm2259_vm7, %v2339_v32, %v2341_v16  ;;  %v6430_v32 = vld [vmem:[#allocation3_spill] sm:$0xff] }
 0x3bd   : > { %v4004_v41 = vmul.f32 %v3911_v47, %v3668_v43  ;;  %v3193_v7 = vadd.f32 %v3085_v35, %v2817_v11  ;;  %v3463_v57 = vsel %vm3384_vm5, %v3460_v19, %v3462_v58  ;;  %v2445_v19 = vadd.f32 %v2342_v54, %v6429_v5 }
 0x3bf   : > { %v4052_v61 = vpack.c.bf16 %v4004_v41, %v4004_v41  ;;  %v3569_v20 = vadd.f32 %v3461_v22, %v3193_v7  ;;  %v2569_v15 = vpop.f32.mrf.mxu2  ;;  %v2944_v9 = vpop.f32.mrf.mxu3 }
 0x3c0   : > { %v2710_v53 = vrot.slane %v2569_v15, 1  ;;  %v3086_v45 = vrot.slane %v2944_v9, 2  ;;  %v6213_v51 = vpop.f32.mrf.mxu1  ;;  %v3926_v7 = vpop.permute.xlu0 %3925 }
 0x3c1   : > { %4101 = vst.msk [vmem:[%s5599_s9 + $0x90] sm:$0xf] %vm4064_vm8, %v4052_v61  ;;  %v3621_v24 = vadd.f32 %v5989_v40, %v3569_v20  ;;  %v2343_v23 = vrot.slane %v6213_v51, 1 }
 0x3c2   : > { %v2711_v13 = vsel %vm2259_vm7, %v2708_v50, %v2710_v53  ;;  %v3323_v62 = vpop.f32.mrf.mxu0  ;;  %v3087_v44 = vsel %vm3008_vm6, %v3084_v25, %v3086_v45 }
 0x3c3   : > { %v3669_v49 = vmax.f32 %v3621_v24, 0.0  ;;  %v2818_v34 = vadd.f32 %v2711_v13, %v2443_v56  ;;  %v3464_v21 = vrot.slane %v3323_v62, 3  ;;  %v2344_v20 = vsel %vm2259_vm7, %v2341_v16, %v2343_v23  ;;  %v6431_v16 = vld [vmem:[#allocation4_spill] sm:$0xff] }
 0x3c5   : > { %v4005_v17 = vmul.f32 %v3916_v59, %v3669_v49  ;;  %v3194_v3 = vadd.f32 %v3087_v44, %v2818_v34  ;;  %v3465_v26 = vsel %vm3384_vm5, %v3462_v58, %v3464_v21  ;;  %v2446_v58 = vadd.f32 %v2344_v20, %v6430_v32 }
 0x3c7   : > { %v4053_v27 = vpack.c.bf16 %v4005_v17, %v4005_v17  ;;  %v3570_v2 = vadd.f32 %v3463_v57, %v3194_v3  ;;  %v2572_v28 = vpop.f32.mrf.mxu2  ;;  %v2947_v42 = vpop.f32.mrf.mxu3 }
 0x3c8   : > { %v2712_v48 = vrot.slane %v2572_v28, 1  ;;  %v3088_v4 = vrot.slane %v2947_v42, 2  ;;  %v6224_v31 = vpop.f32.mrf.mxu1  ;;  %v3931_v3 = vpop.permute.xlu1 %3930 }
 0x3c9   : > { %4102 = vst.msk [vmem:[%s5599_s9 + $0x94] sm:$0xf] %vm4064_vm8, %v4053_v27  ;;  %v3622_v37 = vadd.f32 %v5989_v40, %v3570_v2  ;;  %v2345_v62 = vrot.slane %v6224_v31, 1 }
 0x3ca   : > { %v2713_v8 = vsel %vm2259_vm7, %v2710_v53, %v2712_v48  ;;  %v3325_v55 = vpop.f32.mrf.mxu0  ;;  %v3089_v52 = vsel %vm3008_vm6, %v3086_v45, %v3088_v4 }
 0x3cb   : > { %v3670_v39 = vmax.f32 %v3622_v37, 0.0  ;;  %v2819_v6 = vadd.f32 %v2713_v8, %v2444_v18  ;;  %v3466_v43 = vrot.slane %v3325_v55, 3  ;;  %v2346_v2 = vsel %vm2259_vm7, %v2343_v23, %v2345_v62 }
 0x3cd   : > { %v4006_v0 = vmul.f32 %v3921_v36, %v3670_v39  ;;  %v3195_v38 = vadd.f32 %v3089_v52, %v2819_v6  ;;  %v3467_v15 = vsel %vm3384_vm5, %v3464_v21, %v3466_v43  ;;  %v2447_v21 = vadd.f32 %v2346_v2, %v6431_v16  ;;  %v3936_v36 = vpop.permute.xlu2 %3935 }
 0x3cf   : > { %v4054_v12 = vpack.c.bf16 %v4006_v0, %v4006_v0  ;;  %v3571_v60 = vadd.f32 %v3465_v26, %v3195_v38  ;;  %v2574_v50 = vpop.f32.mrf.mxu2  ;;  %v2949_v25 = vpop.f32.mrf.mxu3 }
 0x3d0   : > { %v2714_v30 = vrot.slane %v2574_v50, 1  ;;  %v3090_v29 = vrot.slane %v2949_v25, 2  ;;  %v6235_v10 = vpop.f32.mrf.mxu1 }
 0x3d1   : > { %4103 = vst.msk [vmem:[%s5599_s9 + $0x98] sm:$0xf] %vm4064_vm8, %v4054_v12  ;;  %v3623_v1 = vadd.f32 %v5989_v40, %v3571_v60  ;;  %v2347_v8 = vrot.slane %v6235_v10, 1  ;;  %v6432_v10 = vld [vmem:[#allocation5_spill] sm:$0xff] }
 0x3d2   : > { %v2715_v11 = vsel %vm2259_vm7, %v2712_v48, %v2714_v30  ;;  %v3328_v47 = vpop.f32.mrf.mxu0  ;;  %v3091_v14 = vsel %vm3008_vm6, %v3088_v4, %v3090_v29 }
 0x3d3   : > { %v3671_v35 = vmax.f32 %v3623_v1, 0.0  ;;  %v2820_v41 = vadd.f32 %v2715_v11, %v2445_v19  ;;  %v3468_v49 = vrot.slane %v3328_v47, 3  ;;  %v2348_v26 = vsel %vm2259_vm7, %v2345_v62, %v2347_v8  ;;  %v6278_v11 = vld [vmem:[%s6335_s2] ss:$0 sm:$0xff] }
 0x3d4   : > { %v2448_v5 = vadd.f32 %v2348_v26, %v6432_v10 }
 0x3d5   : > { %v4007_v22 = vmul.f32 %v3926_v7, %v3671_v35  ;;  %v3196_v61 = vadd.f32 %v3091_v14, %v2820_v41  ;;  %v3469_v28 = vsel %vm3384_vm5, %v3466_v43, %v3468_v49 }
 0x3d7   : > { %v4055_v9 = vpack.c.bf16 %v4007_v22, %v4007_v22  ;;  %v3572_v53 = vadd.f32 %v3467_v15, %v3196_v61  ;;  %v2577_v45 = vpop.f32.mrf.mxu2  ;;  %v2952_v51 = vpop.f32.mrf.mxu3  ;;  %v6433_v15 = vld [vmem:[#allocation9_spill] sm:$0xff] }
 0x3d8   : > { %v2716_v63 = vrot.slane %v2577_v45, 1  ;;  %v3092_v56 = vrot.slane %v2952_v51, 2  ;;  %v6246_v24 = vpop.f32.mrf.mxu1  ;;  %v3941_v45 = vpop.permute.xlu0 %3940 }
 0x3d9   : > { %4104 = vst.msk [vmem:[%s5599_s9 + $0x9c] sm:$0xf] %vm4064_vm8, %v4055_v9  ;;  %v3624_v13 = vadd.f32 %v5989_v40, %v3572_v53  ;;  %v2349_v43 = vrot.slane %v6246_v24, 1  ;;  %v6434_v9 = vrot.slane %v6433_v15, 1  ;;  %v6436_v24 = vld [vmem:[#allocation12_spill] sm:$0xff] }
 0x3da   : > { %v2717_v34 = vsel %vm2259_vm7, %v2714_v30, %v2716_v63  ;;  %v6254_v59 = vpop.f32.mrf.mxu0  ;;  %v3093_v46 = vsel %vm3008_vm6, %v3090_v29, %v3092_v56 }
 0x3db   : > { %v3672_v44 = vmax.f32 %v3624_v13, 0.0  ;;  %v2821_v17 = vadd.f32 %v2717_v34, %v2446_v58  ;;  %v3470_v39 = vrot.slane %v6254_v59, 3  ;;  %v3951_v58 = vpop.permute.xlu2 %3950  ;;  %v3946_v13 = vpop.permute.xlu1 %3945  ;;  %v2350_v62 = vsel %vm2259_vm7, %v2347_v8, %v2349_v43 }
 0x3dd   : > { %v4008_v57 = vmul.f32 %v3931_v3, %v3672_v44  ;;  %v3197_v27 = vadd.f32 %v3093_v46, %v2821_v17  ;;  %v3471_v50 = vsel %vm3384_vm5, %v3468_v49, %v3470_v39  ;;  %v6437_v17 = vld [vmem:[#allocation18_spill] sm:$0xff]  ;;  %v6438_v46 = vld [vmem:[#allocation24_spill] sm:$0xff] }
 0x3df   : > { %v4056_v42 = vpack.c.bf16 %v4008_v57, %v4008_v57  ;;  %v3573_v48 = vadd.f32 %v3469_v28, %v3197_v27  ;;  %v2579_v4 = vpop.f32.mrf.mxu2  ;;  %v2954_v31 = vpop.f32.mrf.mxu3 }
 0x3e0   : > { %v2718_v33 = vrot.slane %v2579_v4, 1  ;;  %v3094_v18 = vrot.slane %v2954_v31, 2  ;;  %v2206_v37 = vpop.f32.mrf.mxu1  ;;  %v6439_v4 = vld [vmem:[#allocation19_spill] sm:$0xff] }
 0x3e1   : > { %4105 = vst.msk [vmem:[%s5599_s9 + $0xa0] sm:$0xf] %vm4064_vm8, %v4056_v42  ;;  %v3625_v55 = vadd.f32 %v5989_v40, %v3573_v48  ;;  %v2351_v35 = vrot.slane %v2206_v37, 1 }
 0x3e2   : > { %v2719_v6 = vsel %vm2259_vm7, %v2716_v63, %v2718_v33  ;;  %v3095_v38 = vsel %vm3008_vm6, %v3092_v56, %v3094_v18  ;;  %v6267_v54 = vpop.f32.mrf.mxu0  ;;  %v6435_v63 = vld [vmem:[#allocation8_spill] sm:$0xff] }
 0x3e3   : > { %v3673_v52 = vmax.f32 %v3625_v55, 0.0  ;;  %v2822_v0 = vadd.f32 %v2719_v6, %v2447_v21  ;;  %v3472_v7 = vrot.slane %v6267_v54, 3  ;;  %v2352_v59 = vsel %vm2259_vm7, %v2349_v43, %v2351_v35  ;;  %v6441_v21 = vld [vmem:[#allocation6_spill] sm:$0xff]  ;;  %v6442_v55 = vld [vmem:[#allocation7_spill] sm:$0xff] }
 0x3e4   : > { %v2449_v8 = vadd.f32 %v2350_v62, %v6441_v21 }
 0x3e5   : > { %v4009_v12 = vmul.f32 %v3936_v36, %v3673_v52  ;;  %v3198_v60 = vadd.f32 %v3095_v38, %v2822_v0  ;;  %v3473_v44 = vsel %vm3384_vm5, %v3470_v39, %v3472_v7  ;;  %v2450_v39 = vadd.f32 %v2352_v59, %v6442_v55  ;;  %v6443_v52 = vld [vmem:[#allocation16_spill] sm:$0xff]  ;;  %v6444_v38 = vld [vmem:[#allocation22_spill] sm:$0xff]  ;;  %v3956_v59 = vpop.permute.xlu0 %3955 }
 0x3e7   : > { %v4057_v25 = vpack.c.bf16 %v4009_v12, %v4009_v12  ;;  %v3574_v40 = vadd.f32 %v3471_v50, %v3198_v60  ;;  %v2582_v30 = vpop.f32.mrf.mxu2  ;;  %v2957_v29 = vpop.f32.mrf.mxu3  ;;  %v6445_v12 = vld [vmem:[#allocation17_spill] sm:$0xff] }
 0x3e8   : > { %v2720_v19 = vrot.slane %v2582_v30, 1  ;;  %v3096_v1 = vrot.slane %v2957_v29, 2  ;;  %v2208_v23 = vpop.f32.mrf.mxu1  ;;  %v6446_v60 = vrot.slane %v6445_v12, 1 }
 0x3e9   : > { %4106 = vst.msk [vmem:[%s5599_s9 + $0xa4] sm:$0xf] %vm4064_vm8, %v4057_v25  ;;  %v3626_v47 = vadd.f32 %v6278_v11, %v3574_v40  ;;  %v2353_v41 = vrot.slane %v2208_v23, 1  ;;  %v6447_v23 = vld [vmem:[#allocation11_spill] sm:$0xff] }
 0x3ea   : > { %v2721_v14 = vsel %vm2259_vm7, %v2718_v33, %v2720_v19  ;;  %v3097_v51 = vsel %vm3008_vm6, %v3094_v18, %v3096_v1  ;;  %v3335_v27 = vpop.f32.mrf.mxu0  ;;  %v6440_v33 = vld [vmem:[#allocation25_spill] sm:$0xff]  ;;  %v6448_v43 = vrot.slane %v6447_v23, 2 }
 0x3eb   : > { %v3674_v22 = vmax.f32 %v3626_v47, 0.0  ;;  %v2823_v61 = vadd.f32 %v2721_v14, %v2448_v5  ;;  %v2354_v20 = vsel %vm2259_vm7, %v2351_v35, %v2353_v41  ;;  %v2404_v53 = vsel %vm2259_vm7, %v2353_v41, %v6434_v9 }
 0x3ec   : > { %v2451_v56 = vadd.f32 %v2354_v20, %v6435_v63  ;;  %v2452_v32 = vadd.f32 %v2404_v53, %v6436_v24  ;;  %v3474_v36 = vrot.slane %v3335_v27, 3  ;;  %v6449_v20 = vld [vmem:[#allocation10_spill] sm:$0xff]  ;;  %v3966_v53 = vpop.permute.xlu2 %3965 }
 0x3ed   : > { %v4010_v49 = vmul.f32 %v3941_v45, %v3674_v22  ;;  %v3199_v34 = vadd.f32 %v3097_v51, %v2823_v61  ;;  %v6450_v15 = vrot.slane %v6449_v20, 3 }
 0x3ee   : > { %v2826_v3 = vadd.f32 %v6437_v17, %v2451_v56  ;;  %v2827_v57 = vadd.f32 %v6438_v46, %v2452_v32  ;;  %v3475_v61 = vsel %vm3384_vm5, %v3472_v7, %v3474_v36 }
 0x3ef   : > { %v4058_v2 = vpack.c.bf16 %v4010_v49, %v4010_v49  ;;  %v3575_v28 = vadd.f32 %v3473_v44, %v3199_v34  ;;  %v2584_v42 = vpop.f32.mrf.mxu2  ;;  %v2959_v48 = vpop.f32.mrf.mxu3  ;;  %v3531_v9 = vsel %vm3384_vm5, %v3474_v36, %v6450_v15 }
 0x3f0   : > { %v3202_v31 = vadd.f32 %v6439_v4, %v2826_v3  ;;  %v3203_v18 = vadd.f32 %v6440_v33, %v2827_v57  ;;  %v2722_v37 = vrot.slane %v2584_v42, 1  ;;  %v3098_v16 = vrot.slane %v2959_v48, 2 }
 0x3f1   : > { %4107 = vst.msk [vmem:[%s5599_s9 + $0xa8] sm:$0xf] %vm4064_vm8, %v4058_v2  ;;  %v3627_v6 = vadd.f32 %v6278_v11, %v3575_v28 }
 0x3f2   : > { %v3578_v0 = vadd.f32 %v6443_v52, %v3202_v31  ;;  %v3579_v54 = vadd.f32 %v6444_v38, %v3203_v18  ;;  %v2723_v26 = vsel %vm2259_vm7, %v2720_v19, %v2722_v37  ;;  %v2779_v50 = vsel %vm2259_vm7, %v2722_v37, %v6446_v60 }
 0x3f3   : > { %v3675_v25 = vmax.f32 %v3627_v6, 0.0  ;;  %v2824_v40 = vadd.f32 %v2723_v26, %v2449_v8  ;;  %v2825_v30 = vadd.f32 %v2779_v50, %v2450_v39  ;;  %v3099_v5 = vsel %vm3008_vm6, %v3096_v1, %v3098_v16  ;;  %v3961_v1 = vpop.permute.xlu1 %3960 }
 0x3f4   : > { %v3630_v29 = vadd.f32 %v6278_v11, %v3578_v0  ;;  %v3631_v10 = vadd.f32 %v6278_v11, %v3579_v54  ;;  %v3155_v47 = vsel %vm3008_vm6, %v3098_v16, %v6448_v43 }
 0x3f5   : > { %v4011_v35 = vmul.f32 %v3946_v13, %v3675_v25  ;;  %v3200_v19 = vadd.f32 %v3099_v5, %v2824_v40  ;;  %v3201_v41 = vadd.f32 %v3155_v47, %v2825_v30 }
 0x3f6   : > { %v3678_v14 = vmax.f32 %v3630_v29, 0.0  ;;  %v3679_v22 = vmax.f32 %v3631_v10, 0.0 }
 0x3f7   : > { %v4059_v45 = vpack.c.bf16 %v4011_v35, %v4011_v35  ;;  %v3576_v51 = vadd.f32 %v3475_v61, %v3200_v19  ;;  %v3577_v63 = vadd.f32 %v3531_v9, %v3201_v41 }
 0x3f8   : > { %v4014_v56 = vmul.f32 %v3961_v1, %v3678_v14  ;;  %v4015_v24 = vmul.f32 %v3966_v53, %v3679_v22 }
 0x3f9   : > { %4108 = vst.msk [vmem:[%s5599_s9 + $0xac] sm:$0xf] %vm4064_vm8, %v4059_v45  ;;  %v3628_v32 = vadd.f32 %v6278_v11, %v3576_v51  ;;  %v3629_v7 = vadd.f32 %v6278_v11, %v3577_v63 }
 0x3fa   : > { %v4062_v13 = vpack.c.bf16 %v4014_v56, %v4014_v56  ;;  %v4063_v62 = vpack.c.bf16 %v4015_v24, %v4015_v24 }
 0x3fb   : > { %v3676_v49 = vmax.f32 %v3628_v32, 0.0  ;;  %v3677_v34 = vmax.f32 %v3629_v7, 0.0 }
 0x3fc   : > { %4111 = vst.msk [vmem:[%s5599_s9 + $0xb8] sm:$0xf] %vm4064_vm8, %v4062_v13 }
 0x3fd   : > { %4112 = vst.msk [vmem:[%s5599_s9 + $0xbc] sm:$0xf] %vm4064_vm8, %v4063_v62  ;;  %v4012_v44 = vmul.f32 %v3951_v58, %v3676_v49  ;;  %v4013_v17 = vmul.f32 %v3956_v59, %v3677_v34 }
 0x3ff   : > { %v4060_v3 = vpack.c.bf16 %v4012_v44, %v4012_v44  ;;  %v4061_v46 = vpack.c.bf16 %v4013_v17, %v4013_v17 }
 0x401   : > { %4109 = vst.msk [vmem:[%s5599_s9 + $0xb0] sm:$0xf] %vm4064_vm8, %v4060_v3 }
 0x402   : > { %4110 = vst.msk [vmem:[%s5599_s9 + $0xb4] sm:$0xf] %vm4064_vm8, %v4061_v46 }
 0x403 PF: > { %s14_s15 = sadd.s32 1, %s4576_s15  }
 0x404   : > { %p11_p4 = scmp.ge.s32.totalorder %s14_s15, 4  }
 0x406   :  { %13 = sbr.rel (!%p11_p4) target bundleno = 1 (0x1), region = 74 }

// kernel: hg_block.13
= control target key start
LH: loop header
LB: loop body
LE: loop exit
PB: predicated region body
PF: predicated region fallthrough
CT: control target
= control target key end

     0   :  { %s5429_s21 = smov 0   ;;  %s5431_s22 = smov 0   ;;  %s6316_s0 = inlined_call_operand.vmem [shape: bf16[2,384,16], index: 0, kind: input, shape index: {}]   ;;  %s6317_s1 = inlined_call_operand.vmem [shape: bf16[2,384,8], index: 1, kind: input, shape index: {}]   ;;  %s6318_s2 = inlined_call_operand.vmem [shape: bf16[2,384,8], index: 2, kind: input, shape index: {}]   ;;  %s6319_s3 = inlined_call_operand.vmem [shape: bf16[2,384,8], index: 3, kind: input, shape index: {}]   ;;  %s6320_s4 = inlined_call_operand.vmem [shape: bf16[2,384,8], index: 4, kind: input, shape index: {}]   ;;  %s6321_s5 = inlined_call_operand.vmem [shape: bf16[2,384,8], index: 5, kind: input, shape index: {}]   ;;  %s6322_s6 = inlined_call_operand.vmem [shape: bf16[2,384,8], index: 6, kind: input, shape index: {}]   ;;  %s6323_s7 = inlined_call_operand.vmem [shape: bf16[16,8], index: 7, kind: input, shape index: {}]   ;;  %s6324_s8 = inlined_call_operand.vmem [shape: bf16[6,8,8], index: 8, kind: input, shape index: {}]   ;;  %s6325_s9 = inlined_call_operand.vmem [shape: f32[1,8], index: 9, kind: input, shape index: {}]   ;;  %s6326_s10 = inlined_call_operand.vmem [shape: bf16[8,16], index: 10, kind: input, shape index: {}]   ;;  %s6327_s11 = inlined_call_operand.vmem [shape: f32[1,16], index: 11, kind: input, shape index: {}]   ;;  %s6328_s12 = inlined_call_operand.vmem [shape: f32[2,384,16], index: 12, kind: output, shape index: {}]  }
   0x1   :  { %s5433_s23 = smov 0  }
   0x2 LB: > { %s34_s24 = sadd.s32 1, %s5358_s22  ;;  %p4257_p0 = scmp.ge.s32.totalorder %s5362_s23, 1  ;;  %s5362_s23 = sphi %s5433_s23, %s22_s23   ;;  %s5358_s22 = sphi %s5431_s22, %s6354_s22   ;;  %s5354_s21 = sphi %s5429_s21, %s6353_s21  }
   0x3   : > { %p36_p1 = scmp.ge.s32.totalorder %s34_s24, 2  ;;  %p485_p2 = scmp.lt.s32.totalorder %s5362_s23, 3 }
   0x5   : > { %s6356_s24 = smov (%p36_p1, %s34_s24), 0  ;;  %p486_p3 = pnand %p4257_p0, %p485_p2 }
   0x7   : > { %489 = sbr.rel (%p486_p3) target bundleno = 1068 (0x42c), region = 68 }
   0xc   : > { %v768_v0 = vld [vmem:[%s6324_s8] sm:$0xf]  ;;  %vm962_vm0 = vcmask 1043456   ;;  %v4510_v2 = vld [vmem:[%s6324_s8 + $0x4] sm:$0xf]  ;;  %p590_p4 = scmp.lt.s32.totalorder %s5354_s21, 1 }
   0xd   : > { %v5165_v1 = vld [vmem:[%s6323_s7] sm:$0xff]  ;;  %v964_v3 = vsel %vm962_vm0, %v768_v0, 0  ;;  %v1666_v4 = vsel %vm962_vm0, %v4510_v2, 0  ;;  %v4631_v5 = vld [vmem:[%s6324_s8 + $0x8] sm:$0xf]  ;;  %vm889_vm1 = vcmask 64512  }
   0xe   : > { %973 = vmatpush.bf16.msra.mxu0 %v964_v3  ;;  %1301 = vmatpush.bf16.msra.mxu1 %v5165_v1  ;;  %v2088_v6 = vsel %vm962_vm0, %v4631_v5, 0  ;;  %v4994_v7 = vld [vmem:[%s6324_s8 + $0x14] sm:$0xf]  ;;  %v4752_v8 = vld [vmem:[%s6324_s8 + $0xc] sm:$0xf]  ;;  %s6358_s21 = smov (!%p590_p4, %s5354_s21), 1 }
   0xf   : > { %1675 = vmatpush.bf16.msra.mxu2 %v1666_v4  ;;  %2097 = vmatpush.bf16.msra.mxu3 %v2088_v6  ;;  %v3354_v9 = vsel %vm962_vm0, %v4994_v7, 0  ;;  %v2510_v10 = vsel %vm962_vm0, %v4752_v8, 0  ;;  %v4873_v11 = vld [vmem:[%s6324_s8 + $0x10] sm:$0xf]  ;;  %s5477_s25 = smul.u32 192, %s6358_s21  ;;  %vm1221_vm2 = vcmask 130048  }
  0x10   : > { %v2932_v12 = vsel %vm962_vm0, %v4873_v11, 0  ;;  %v3657_v45 = vld [vmem:[%s6326_s10] sm:$0xf]  ;;  %s5311_s27 = smul.u32 384, %s6358_s21 }
  0x11   : > { %s5483_s28 = scalar_lea.vmem %s6316_s0, %s5477_s25  ;;  %s5489_s13 = scalar_lea.vmem %s6317_s1, %s5477_s25  ;;  %v3735_v46 = vsel %vm962_vm0, %v3657_v45, 0 }
  0x12   : > { %2519 = vmatpush.bf16.msrb.mxu0 %v2510_v10  ;;  %2941 = vmatpush.bf16.msrb.mxu1 %v2932_v12  ;;  %v5166_v13 = vld [vmem:[%s5489_s13] sm:$0xff]  ;;  %s5497_s16 = scalar_lea.vmem %s6318_s2, %s5477_s25  ;;  %s5503_s19 = scalar_lea.vmem %s6319_s3, %s5477_s25  ;;  %v5167_v17 = vld [vmem:[%s5489_s13 + $0x8] sm:$0xff]  ;;  %v5168_v21 = vld [vmem:[%s5489_s13 + $0x10] sm:$0xff] }
  0x13   : > { %3363 = vmatpush.bf16.msrb.mxu2 %v3354_v9  ;;  %v5141_v14 = vld [vmem:[%s5483_s28] sm:$0xff]  ;;  %4362 = vmatmul.msk.bf16.vlgmr.msra.gmra.mxu0 %vm889_vm1, %v5166_v13  ;;  %v5142_v18 = vld [vmem:[%s5483_s28 + $0x8] sm:$0xff]  ;;  %v5143_v22 = vld [vmem:[%s5483_s28 + $0x10] sm:$0xff]  ;;  %s5771_s30 = scalar_lea.vmem %s6320_s4, %s5477_s25  ;;  %s5777_s15 = scalar_lea.vmem %s6321_s5, %s5477_s25 }
  0x14   : > { %v5190_v15 = vld [vmem:[%s5497_s16] sm:$0xff]  ;;  %4486 = vmatmul.msk.bf16.vlgmr.msra.gmra.mxu1 %vm1221_vm2, %v5141_v14  ;;  %v5191_v19 = vld [vmem:[%s5497_s16 + $0x8] sm:$0xff]  ;;  %v5192_v23 = vld [vmem:[%s5497_s16 + $0x10] sm:$0xff]  ;;  %3744 = vmatpush.bf16.msrb.mxu3 %v3735_v46  ;;  %s5783_s18 = scalar_lea.vmem %s6322_s6, %s5477_s25  ;;  %s6008_s14 = scalar_lea.vmem %s6328_s12, %s5311_s27 }
  0x15   : > { %v5214_v16 = vld [vmem:[%s5503_s19] sm:$0xff]  ;;  %4607 = vmatmul.msk.bf16.vlgmr.msra.gmra.mxu2 %vm889_vm1, %v5190_v15  ;;  %v5215_v20 = vld [vmem:[%s5503_s19 + $0x8] sm:$0xff]  ;;  %v5216_v24 = vld [vmem:[%s5503_s19 + $0x10] sm:$0xff] }
  0x16   : > { %4728 = vmatmul.msk.bf16.vlgmr.msra.gmra.mxu3 %vm889_vm1, %v5214_v16  ;;  %v5169_v25 = vld [vmem:[%s5489_s13 + $0x18] sm:$0xff]  ;;  %v5170_v29 = vld [vmem:[%s5489_s13 + $0x20] sm:$0xff]  ;;  %v5171_v33 = vld [vmem:[%s5489_s13 + $0x28] sm:$0xff] }
  0x17   : > { %v5144_v26 = vld [vmem:[%s5483_s28 + $0x18] sm:$0xff]  ;;  %v5145_v30 = vld [vmem:[%s5483_s28 + $0x20] sm:$0xff]  ;;  %v5146_v34 = vld [vmem:[%s5483_s28 + $0x28] sm:$0xff] }
  0x18   : > { %v5193_v27 = vld [vmem:[%s5497_s16 + $0x18] sm:$0xff]  ;;  %v5194_v31 = vld [vmem:[%s5497_s16 + $0x20] sm:$0xff]  ;;  %v5195_v35 = vld [vmem:[%s5497_s16 + $0x28] sm:$0xff] }
  0x19   : > { %v5217_v28 = vld [vmem:[%s5503_s19 + $0x18] sm:$0xff]  ;;  %v5218_v32 = vld [vmem:[%s5503_s19 + $0x20] sm:$0xff]  ;;  %v5219_v36 = vld [vmem:[%s5503_s19 + $0x28] sm:$0xff] }
  0x1a   : > { %v5172_v37 = vld [vmem:[%s5489_s13 + $0x30] sm:$0xff]  ;;  %v5173_v41 = vld [vmem:[%s5489_s13 + $0x38] sm:$0xff]  ;;  %v5174_v47 = vld [vmem:[%s5489_s13 + $0x40] sm:$0xff] }
  0x1b   : > { %v5147_v38 = vld [vmem:[%s5483_s28 + $0x30] sm:$0xff]  ;;  %v5148_v42 = vld [vmem:[%s5483_s28 + $0x38] sm:$0xff]  ;;  %v5149_v48 = vld [vmem:[%s5483_s28 + $0x40] sm:$0xff] }
  0x1c   : > { %v5196_v39 = vld [vmem:[%s5497_s16 + $0x30] sm:$0xff]  ;;  %v5197_v43 = vld [vmem:[%s5497_s16 + $0x38] sm:$0xff]  ;;  %v5198_v51 = vld [vmem:[%s5497_s16 + $0x40] sm:$0xff] }
  0x1d   : > { %v5220_v40 = vld [vmem:[%s5503_s19 + $0x30] sm:$0xff]  ;;  %v5221_v44 = vld [vmem:[%s5503_s19 + $0x38] sm:$0xff]  ;;  %v5222_v52 = vld [vmem:[%s5503_s19 + $0x40] sm:$0xff] }
  0x1e   : > { %v5175_v63 = vld [vmem:[%s5489_s13 + $0x48] sm:$0xff] }
  0x1f   : > { %v5150_v0 = vld [vmem:[%s5483_s28 + $0x48] sm:$0xff] }
  0x20   : > { %v5199_v4 = vld [vmem:[%s5497_s16 + $0x48] sm:$0xff] }
  0x21   : > { %v5223_v5 = vld [vmem:[%s5503_s19 + $0x48] sm:$0xff] }
  0x23   : > { %4363 = vmatmul.msk.bf16.gmra.mxu0 %vm889_vm1, %v5167_v17  ;;  %v5176_v17 = vld [vmem:[%s5489_s13 + $0x50] sm:$0xff] }
  0x24   : > { %4487 = vmatmul.msk.bf16.gmra.mxu1 %vm1221_vm2, %v5142_v18  ;;  %v5151_v18 = vld [vmem:[%s5483_s28 + $0x50] sm:$0xff] }
  0x25   : > { %4608 = vmatmul.msk.bf16.gmra.mxu2 %vm889_vm1, %v5191_v19 }
  0x26   : > { %4729 = vmatmul.msk.bf16.gmra.mxu3 %vm889_vm1, %v5215_v20 }
  0x33   : > { %4364 = vmatmul.msk.bf16.gmra.mxu0 %vm889_vm1, %v5168_v21 }
  0x34   : > { %4488 = vmatmul.msk.bf16.gmra.mxu1 %vm1221_vm2, %v5143_v22  ;;  %v5200_v22 = vld [vmem:[%s5497_s16 + $0x50] sm:$0xff] }
  0x35   : > { %4609 = vmatmul.msk.bf16.gmra.mxu2 %vm889_vm1, %v5192_v23  ;;  %v5224_v23 = vld [vmem:[%s5503_s19 + $0x50] sm:$0xff] }
  0x36   : > { %4730 = vmatmul.msk.bf16.gmra.mxu3 %vm889_vm1, %v5216_v24 }
  0x43   : > { %4365 = vmatmul.msk.bf16.gmra.mxu0 %vm889_vm1, %v5169_v25 }
  0x44   : > { %4489 = vmatmul.msk.bf16.gmra.mxu1 %vm1221_vm2, %v5144_v26 }
  0x45   : > { %4610 = vmatmul.msk.bf16.gmra.mxu2 %vm889_vm1, %v5193_v27 }
  0x46   : > { %4731 = vmatmul.msk.bf16.gmra.mxu3 %vm889_vm1, %v5217_v28 }
  0x53   : > { %4366 = vmatmul.msk.bf16.gmra.mxu0 %vm889_vm1, %v5170_v29 }
  0x54   : > { %4490 = vmatmul.msk.bf16.gmra.mxu1 %vm1221_vm2, %v5145_v30 }
  0x55   : > { %4611 = vmatmul.msk.bf16.gmra.mxu2 %vm889_vm1, %v5194_v31 }
  0x56   : > { %4732 = vmatmul.msk.bf16.gmra.mxu3 %vm889_vm1, %v5218_v32 }
  0x63   : > { %4367 = vmatmul.msk.bf16.gmra.mxu0 %vm889_vm1, %v5171_v33 }
  0x64   : > { %4491 = vmatmul.msk.bf16.gmra.mxu1 %vm1221_vm2, %v5146_v34 }
  0x65   : > { %4612 = vmatmul.msk.bf16.gmra.mxu2 %vm889_vm1, %v5195_v35  ;;  %v5177_v35 = vld [vmem:[%s5489_s13 + $0x58] sm:$0xff] }
  0x66   : > { %4733 = vmatmul.msk.bf16.gmra.mxu3 %vm889_vm1, %v5219_v36  ;;  %v5152_v36 = vld [vmem:[%s5483_s28 + $0x58] sm:$0xff] }
  0x73   : > { %4368 = vmatmul.msk.bf16.gmra.mxu0 %vm889_vm1, %v5172_v37 }
  0x74   : > { %4492 = vmatmul.msk.bf16.gmra.mxu1 %vm1221_vm2, %v5147_v38 }
  0x75   : > { %4613 = vmatmul.msk.bf16.gmra.mxu2 %vm889_vm1, %v5196_v39 }
  0x76   : > { %4734 = vmatmul.msk.bf16.gmra.mxu3 %vm889_vm1, %v5220_v40  ;;  %v5201_v40 = vld [vmem:[%s5497_s16 + $0x58] sm:$0xff] }
  0x83   : > { %4369 = vmatmul.msk.bf16.gmra.mxu0 %vm889_vm1, %v5173_v41  ;;  %v5225_v41 = vld [vmem:[%s5503_s19 + $0x58] sm:$0xff] }
  0x84   : > { %4493 = vmatmul.msk.bf16.gmra.mxu1 %vm1221_vm2, %v5148_v42 }
  0x85   : > { %4614 = vmatmul.msk.bf16.gmra.mxu2 %vm889_vm1, %v5197_v43 }
  0x86   : > { %4735 = vmatmul.msk.bf16.gmra.mxu3 %vm889_vm1, %v5221_v44 }
  0x90   : > { %v975_v49 = vpop.f32.mrf.mxu0 }
  0x91   : > { %v1303_v50 = vpop.f32.mrf.mxu1 }
  0x92   : > { %v1304_v53 = vadd.f32 %v1303_v50, %v975_v49 }
  0x93   : > { %4370 = vmatmul.msk.bf16.gmra.mxu0 %vm889_vm1, %v5174_v47 }
  0x94   : > { %4494 = vmatmul.msk.bf16.gmra.mxu1 %vm1221_vm2, %v5149_v48 }
  0x95   : > { %4615 = vmatmul.msk.bf16.gmra.mxu2 %vm889_vm1, %v5198_v51 }
  0x96   : > { %4736 = vmatmul.msk.bf16.gmra.mxu3 %vm889_vm1, %v5222_v52 }
  0x98   : > { %v1677_v54 = vpop.f32.mrf.mxu2  ;;  %v977_v57 = vpop.f32.mrf.mxu0 }
  0x99   : > { %v2099_v55 = vpop.f32.mrf.mxu3  ;;  %v1797_v56 = vadd.f32 %v1677_v54, %v1304_v53  ;;  %v1305_v58 = vpop.f32.mrf.mxu1  ;;  %v5178_v53 = vld [vmem:[%s5489_s13 + $0x60] sm:$0xff] }
  0x9a   : > { %v1306_v59 = vadd.f32 %v1305_v58, %v977_v57  ;;  %v5153_v54 = vld [vmem:[%s5483_s28 + $0x60] sm:$0xff] }
  0x9b   : > { %v5579_v60 = vadd.f32 %v2099_v55, %v1797_v56  ;;  %v5202_v58 = vld [vmem:[%s5497_s16 + $0x60] sm:$0xff] }
  0xa0   : > { %v1679_v61 = vpop.f32.mrf.mxu2  ;;  %v980_v2 = vpop.f32.mrf.mxu0 }
  0xa1   : > { %v2101_v62 = vpop.f32.mrf.mxu3  ;;  %v1798_v1 = vadd.f32 %v1679_v61, %v1306_v59  ;;  %v1308_v3 = vpop.f32.mrf.mxu1  ;;  %v5226_v59 = vld [vmem:[%s5503_s19 + $0x60] sm:$0xff] }
  0xa2   : > { %v1309_v6 = vadd.f32 %v1308_v3, %v980_v2 }
  0xa3   : > { %v5585_v7 = vadd.f32 %v2101_v62, %v1798_v1  ;;  %4371 = vmatmul.msk.bf16.gmra.mxu0 %vm889_vm1, %v5175_v63 }
  0xa4   : > { %4495 = vmatmul.msk.bf16.gmra.mxu1 %vm1221_vm2, %v5150_v0 }
  0xa5   : > { %4616 = vmatmul.msk.bf16.gmra.mxu2 %vm889_vm1, %v5199_v4 }
  0xa6   : > { %4737 = vmatmul.msk.bf16.gmra.mxu3 %vm889_vm1, %v5223_v5 }
  0xa8   : > { %v1682_v8 = vpop.f32.mrf.mxu2  ;;  %v982_v11 = vpop.f32.mrf.mxu0 }
  0xa9   : > { %v2104_v9 = vpop.f32.mrf.mxu3  ;;  %v1799_v10 = vadd.f32 %v1682_v8, %v1309_v6  ;;  %v1310_v12 = vpop.f32.mrf.mxu1 }
  0xaa   : > { %v1311_v13 = vadd.f32 %v1310_v12, %v982_v11 }
  0xab   : > { %v5591_v14 = vadd.f32 %v2104_v9, %v1799_v10  ;;  %v5179_v9 = vld [vmem:[%s5489_s13 + $0x68] sm:$0xff] }
  0xac   : > { %v5154_v10 = vld [vmem:[%s5483_s28 + $0x68] sm:$0xff] }
  0xb0   : > { %v1684_v15 = vpop.f32.mrf.mxu2  ;;  %v985_v20 = vpop.f32.mrf.mxu0 }
  0xb1   : > { %v2106_v16 = vpop.f32.mrf.mxu3  ;;  %v1800_v19 = vadd.f32 %v1684_v15, %v1311_v13  ;;  %v1313_v21 = vpop.f32.mrf.mxu1  ;;  %v5203_v15 = vld [vmem:[%s5497_s16 + $0x68] sm:$0xff] }
  0xb2   : > { %v1314_v24 = vadd.f32 %v1313_v21, %v985_v20 }
  0xb3   : > { %v5597_v25 = vadd.f32 %v2106_v16, %v1800_v19  ;;  %4372 = vmatmul.msk.bf16.gmra.mxu0 %vm889_vm1, %v5176_v17  ;;  %v5227_v16 = vld [vmem:[%s5503_s19 + $0x68] sm:$0xff] }
  0xb4   : > { %4496 = vmatmul.msk.bf16.gmra.mxu1 %vm1221_vm2, %v5151_v18 }
  0xb5   : > { %4617 = vmatmul.msk.bf16.gmra.mxu2 %vm889_vm1, %v5200_v22 }
  0xb6   : > { %4738 = vmatmul.msk.bf16.gmra.mxu3 %vm889_vm1, %v5224_v23 }
  0xb8   : > { %v1687_v26 = vpop.f32.mrf.mxu2  ;;  %v987_v29 = vpop.f32.mrf.mxu0 }
  0xb9   : > { %v2109_v27 = vpop.f32.mrf.mxu3  ;;  %v1801_v28 = vadd.f32 %v1687_v26, %v1314_v24  ;;  %v1315_v30 = vpop.f32.mrf.mxu1 }
  0xba   : > { %v1316_v31 = vadd.f32 %v1315_v30, %v987_v29  ;;  %v5180_v29 = vld [vmem:[%s5489_s13 + $0x70] sm:$0xff] }
  0xbb   : > { %v5603_v32 = vadd.f32 %v2109_v27, %v1801_v28  ;;  %v5155_v30 = vld [vmem:[%s5483_s28 + $0x70] sm:$0xff] }
  0xc0   : > { %v1689_v33 = vpop.f32.mrf.mxu2  ;;  %v990_v38 = vpop.f32.mrf.mxu0 }
  0xc1   : > { %v2111_v34 = vpop.f32.mrf.mxu3  ;;  %v1802_v37 = vadd.f32 %v1689_v33, %v1316_v31  ;;  %v1318_v39 = vpop.f32.mrf.mxu1 }
  0xc2   : > { %v1319_v42 = vadd.f32 %v1318_v39, %v990_v38 }
  0xc3   : > { %v5609_v43 = vadd.f32 %v2111_v34, %v1802_v37  ;;  %4373 = vmatmul.msk.bf16.gmra.mxu0 %vm889_vm1, %v5177_v35  ;;  %v5204_v35 = vld [vmem:[%s5497_s16 + $0x70] sm:$0xff] }
  0xc4   : > { %4497 = vmatmul.msk.bf16.gmra.mxu1 %vm1221_vm2, %v5152_v36  ;;  %v5228_v36 = vld [vmem:[%s5503_s19 + $0x70] sm:$0xff] }
  0xc5   : > { %4618 = vmatmul.msk.bf16.gmra.mxu2 %vm889_vm1, %v5201_v40 }
  0xc6   : > { %4739 = vmatmul.msk.bf16.gmra.mxu3 %vm889_vm1, %v5225_v41 }
  0xc8   : > { %v1692_v44 = vpop.f32.mrf.mxu2  ;;  %v992_v47 = vpop.f32.mrf.mxu0 }
  0xc9   : > { %v2114_v45 = vpop.f32.mrf.mxu3  ;;  %v1803_v46 = vadd.f32 %v1692_v44, %v1319_v42  ;;  %v1320_v48 = vpop.f32.mrf.mxu1 }
  0xca   : > { %v1321_v49 = vadd.f32 %v1320_v48, %v992_v47 }
  0xcb   : > { %v5615_v50 = vadd.f32 %v2114_v45, %v1803_v46 }
  0xd0   : > { %v1694_v51 = vpop.f32.mrf.mxu2  ;;  %v995_v56 = vpop.f32.mrf.mxu0 }
  0xd1   : > { %v2116_v52 = vpop.f32.mrf.mxu3  ;;  %v1804_v55 = vadd.f32 %v1694_v51, %v1321_v49  ;;  %v1323_v57 = vpop.f32.mrf.mxu1  ;;  %v5181_v49 = vld [vmem:[%s5489_s13 + $0x78] sm:$0xff] }
  0xd2   : > { %v1324_v61 = vadd.f32 %v1323_v57, %v995_v56  ;;  %v5156_v51 = vld [vmem:[%s5483_s28 + $0x78] sm:$0xff] }
  0xd3   : > { %v5621_v62 = vadd.f32 %v2116_v52, %v1804_v55  ;;  %4374 = vmatmul.msk.bf16.gmra.mxu0 %vm889_vm1, %v5178_v53  ;;  %v5205_v55 = vld [vmem:[%s5497_s16 + $0x78] sm:$0xff] }
  0xd4   : > { %4498 = vmatmul.msk.bf16.gmra.mxu1 %vm1221_vm2, %v5153_v54  ;;  %v5229_v56 = vld [vmem:[%s5503_s19 + $0x78] sm:$0xff] }
  0xd5   : > { %4619 = vmatmul.msk.bf16.gmra.mxu2 %vm889_vm1, %v5202_v58 }
  0xd6   : > { %4740 = vmatmul.msk.bf16.gmra.mxu3 %vm889_vm1, %v5226_v59 }
  0xd8   : > { %v1697_v63 = vpop.f32.mrf.mxu2  ;;  %v997_v2 = vpop.f32.mrf.mxu0 }
  0xd9   : > { %v2119_v0 = vpop.f32.mrf.mxu3  ;;  %v1805_v1 = vadd.f32 %v1697_v63, %v1324_v61  ;;  %v1325_v3 = vpop.f32.mrf.mxu1 }
  0xda   : > { %v1326_v4 = vadd.f32 %v1325_v3, %v997_v2 }
  0xdb   : > { %v5627_v5 = vadd.f32 %v2119_v0, %v1805_v1 }
  0xe0   : > { %v1699_v6 = vpop.f32.mrf.mxu2  ;;  %v1000_v12 = vpop.f32.mrf.mxu0 }
  0xe1   : > { %v2121_v8 = vpop.f32.mrf.mxu3  ;;  %v1806_v11 = vadd.f32 %v1699_v6, %v1326_v4  ;;  %v1328_v13 = vpop.f32.mrf.mxu1 }
  0xe2   : > { %v1329_v17 = vadd.f32 %v1328_v13, %v1000_v12  ;;  %v5206_v13 = vld [vmem:[%s5497_s16 + $0x80] sm:$0xff] }
  0xe3   : > { %v5633_v18 = vadd.f32 %v2121_v8, %v1806_v11  ;;  %4375 = vmatmul.msk.bf16.gmra.mxu0 %vm889_vm1, %v5179_v9  ;;  %v5182_v8 = vld [vmem:[%s5489_s13 + $0x80] sm:$0xff] }
  0xe4   : > { %4499 = vmatmul.msk.bf16.gmra.mxu1 %vm1221_vm2, %v5154_v10  ;;  %v5157_v9 = vld [vmem:[%s5483_s28 + $0x80] sm:$0xff] }
  0xe5   : > { %4620 = vmatmul.msk.bf16.gmra.mxu2 %vm889_vm1, %v5203_v15  ;;  %v5230_v15 = vld [vmem:[%s5503_s19 + $0x80] sm:$0xff] }
  0xe6   : > { %4741 = vmatmul.msk.bf16.gmra.mxu3 %vm889_vm1, %v5227_v16 }
  0xe8   : > { %v1702_v19 = vpop.f32.mrf.mxu2  ;;  %v1002_v22 = vpop.f32.mrf.mxu0 }
  0xe9   : > { %v2124_v20 = vpop.f32.mrf.mxu3  ;;  %v1807_v21 = vadd.f32 %v1702_v19, %v1329_v17  ;;  %v1330_v23 = vpop.f32.mrf.mxu1 }
  0xea   : > { %v1331_v24 = vadd.f32 %v1330_v23, %v1002_v22 }
  0xeb   : > { %v5639_v26 = vadd.f32 %v2124_v20, %v1807_v21 }
  0xf0   : > { %v1704_v27 = vpop.f32.mrf.mxu2  ;;  %v1005_v33 = vpop.f32.mrf.mxu0 }
  0xf1   : > { %v2126_v28 = vpop.f32.mrf.mxu3  ;;  %v1808_v31 = vadd.f32 %v1704_v27, %v1331_v24  ;;  %v1333_v34 = vpop.f32.mrf.mxu1 }
  0xf2   : > { %v1334_v37 = vadd.f32 %v1333_v34, %v1005_v33 }
  0xf3   : > { %v5645_v38 = vadd.f32 %v2126_v28, %v1808_v31  ;;  %4376 = vmatmul.msk.bf16.gmra.mxu0 %vm889_vm1, %v5180_v29  ;;  %v5158_v31 = vld [vmem:[%s5483_s28 + $0x88] sm:$0xff] }
  0xf4   : > { %4500 = vmatmul.msk.bf16.gmra.mxu1 %vm1221_vm2, %v5155_v30  ;;  %v5183_v30 = vld [vmem:[%s5489_s13 + $0x88] sm:$0xff] }
  0xf5   : > { %4621 = vmatmul.msk.bf16.gmra.mxu2 %vm889_vm1, %v5204_v35 }
  0xf6   : > { %4742 = vmatmul.msk.bf16.gmra.mxu3 %vm889_vm1, %v5228_v36  ;;  %v5207_v36 = vld [vmem:[%s5497_s16 + $0x88] sm:$0xff] }
  0xf8   : > { %v1707_v39 = vpop.f32.mrf.mxu2  ;;  %v1007_v42 = vpop.f32.mrf.mxu0 }
  0xf9   : > { %v2129_v40 = vpop.f32.mrf.mxu3  ;;  %v1809_v41 = vadd.f32 %v1707_v39, %v1334_v37  ;;  %v1335_v44 = vpop.f32.mrf.mxu1  ;;  %v5231_v37 = vld [vmem:[%s5503_s19 + $0x88] sm:$0xff] }
  0xfa   : > { %v1336_v45 = vadd.f32 %v1335_v44, %v1007_v42 }
  0xfb   : > { %v5651_v46 = vadd.f32 %v2129_v40, %v1809_v41 }
 0x100   : > { %v1709_v47 = vpop.f32.mrf.mxu2  ;;  %v1010_v53 = vpop.f32.mrf.mxu0 }
 0x101   : > { %v2131_v48 = vpop.f32.mrf.mxu3  ;;  %v1810_v52 = vadd.f32 %v1709_v47, %v1336_v45  ;;  %v1338_v54 = vpop.f32.mrf.mxu1 }
 0x102   : > { %v1339_v57 = vadd.f32 %v1338_v54, %v1010_v53  ;;  %v5184_v53 = vld [vmem:[%s5489_s13 + $0x90] sm:$0xff] }
 0x103   : > { %v5657_v58 = vadd.f32 %v2131_v48, %v1810_v52  ;;  %4377 = vmatmul.msk.bf16.gmra.mxu0 %vm889_vm1, %v5181_v49  ;;  %v5159_v54 = vld [vmem:[%s5483_s28 + $0x90] sm:$0xff] }
 0x104   : > { %4501 = vmatmul.msk.bf16.gmra.mxu1 %vm1221_vm2, %v5156_v51 }
 0x105   : > { %4622 = vmatmul.msk.bf16.gmra.mxu2 %vm889_vm1, %v5205_v55 }
 0x106   : > { %4743 = vmatmul.msk.bf16.gmra.mxu3 %vm889_vm1, %v5229_v56 }
 0x108   : > { %v1712_v59 = vpop.f32.mrf.mxu2  ;;  %v1012_v0 = vpop.f32.mrf.mxu0 }
 0x109   : > { %v2134_v61 = vpop.f32.mrf.mxu3  ;;  %v1811_v63 = vadd.f32 %v1712_v59, %v1339_v57  ;;  %v1340_v1 = vpop.f32.mrf.mxu1  ;;  %v5208_v59 = vld [vmem:[%s5497_s16 + $0x90] sm:$0xff] }
 0x10a   : > { %v1341_v2 = vadd.f32 %v1340_v1, %v1012_v0 }
 0x10b   : > { %v5663_v3 = vadd.f32 %v2134_v61, %v1811_v63  ;;  %v5232_v61 = vld [vmem:[%s5503_s19 + $0x90] sm:$0xff] }
 0x110   : > { %v1714_v4 = vpop.f32.mrf.mxu2  ;;  %v1015_v11 = vpop.f32.mrf.mxu0 }
 0x111   : > { %v2136_v6 = vpop.f32.mrf.mxu3  ;;  %v1812_v10 = vadd.f32 %v1714_v4, %v1341_v2  ;;  %v1343_v12 = vpop.f32.mrf.mxu1 }
 0x112   : > { %v1344_v16 = vadd.f32 %v1343_v12, %v1015_v11 }
 0x113   : > { %v5669_v17 = vadd.f32 %v2136_v6, %v1812_v10  ;;  %4378 = vmatmul.msk.bf16.gmra.mxu0 %vm889_vm1, %v5182_v8 }
 0x114   : > { %4502 = vmatmul.msk.bf16.gmra.mxu1 %vm1221_vm2, %v5157_v9 }
 0x115   : > { %4623 = vmatmul.msk.bf16.gmra.mxu2 %vm889_vm1, %v5206_v13  ;;  %v5185_v13 = vld [vmem:[%s5489_s13 + $0x98] sm:$0xff] }
 0x116   : > { %4744 = vmatmul.msk.bf16.gmra.mxu3 %vm889_vm1, %v5230_v15  ;;  %v5160_v15 = vld [vmem:[%s5483_s28 + $0x98] sm:$0xff] }
 0x118   : > { %v1717_v19 = vpop.f32.mrf.mxu2  ;;  %v1017_v22 = vpop.f32.mrf.mxu0 }
 0x119   : > { %v2139_v20 = vpop.f32.mrf.mxu3  ;;  %v1813_v21 = vadd.f32 %v1717_v19, %v1344_v16  ;;  %v1345_v23 = vpop.f32.mrf.mxu1 }
 0x11a   : > { %v1346_v24 = vadd.f32 %v1345_v23, %v1017_v22  ;;  %v5233_v22 = vld [vmem:[%s5503_s19 + $0x98] sm:$0xff] }
 0x11b   : > { %v5675_v27 = vadd.f32 %v2139_v20, %v1813_v21  ;;  %v5209_v21 = vld [vmem:[%s5497_s16 + $0x98] sm:$0xff] }
 0x120   : > { %v1719_v28 = vpop.f32.mrf.mxu2  ;;  %v1020_v34 = vpop.f32.mrf.mxu0 }
 0x121   : > { %v2141_v29 = vpop.f32.mrf.mxu3  ;;  %v1814_v33 = vadd.f32 %v1719_v28, %v1346_v24  ;;  %v1348_v35 = vpop.f32.mrf.mxu1 }
 0x122   : > { %v1349_v39 = vadd.f32 %v1348_v35, %v1020_v34 }
 0x123   : > { %v5681_v40 = vadd.f32 %v2141_v29, %v1814_v33  ;;  %4379 = vmatmul.msk.bf16.gmra.mxu0 %vm889_vm1, %v5183_v30 }
 0x124   : > { %4503 = vmatmul.msk.bf16.gmra.mxu1 %vm1221_vm2, %v5158_v31 }
 0x125   : > { %4624 = vmatmul.msk.bf16.gmra.mxu2 %vm889_vm1, %v5207_v36 }
 0x126   : > { %4745 = vmatmul.msk.bf16.gmra.mxu3 %vm889_vm1, %v5231_v37 }
 0x128   : > { %v1722_v41 = vpop.f32.mrf.mxu2  ;;  %v1022_v45 = vpop.f32.mrf.mxu0 }
 0x129   : > { %v2144_v42 = vpop.f32.mrf.mxu3  ;;  %v1815_v44 = vadd.f32 %v1722_v41, %v1349_v39  ;;  %v1350_v47 = vpop.f32.mrf.mxu1  ;;  %v5186_v39 = vld [vmem:[%s5489_s13 + $0xa0] sm:$0xff] }
 0x12a   : > { %v1351_v48 = vadd.f32 %v1350_v47, %v1022_v45  ;;  %v5161_v41 = vld [vmem:[%s5483_s28 + $0xa0] sm:$0xff] }
 0x12b   : > { %v5687_v49 = vadd.f32 %v2144_v42, %v1815_v44  ;;  %v5210_v47 = vld [vmem:[%s5497_s16 + $0xa0] sm:$0xff] }
 0x130   : > { %v1724_v51 = vpop.f32.mrf.mxu2  ;;  %v1025_v56 = vpop.f32.mrf.mxu0 }
 0x131   : > { %v2146_v52 = vpop.f32.mrf.mxu3  ;;  %v1816_v55 = vadd.f32 %v1724_v51, %v1351_v48  ;;  %v1353_v57 = vpop.f32.mrf.mxu1  ;;  %v5234_v48 = vld [vmem:[%s5503_s19 + $0xa0] sm:$0xff] }
 0x132   : > { %v1354_v63 = vadd.f32 %v1353_v57, %v1025_v56 }
 0x133   : > { %v5693_v0 = vadd.f32 %v2146_v52, %v1816_v55  ;;  %4380 = vmatmul.msk.bf16.gmra.mxu0 %vm889_vm1, %v5184_v53 }
 0x134   : > { %4504 = vmatmul.msk.bf16.gmra.mxu1 %vm1221_vm2, %v5159_v54 }
 0x135   : > { %4625 = vmatmul.msk.bf16.gmra.mxu2 %vm889_vm1, %v5208_v59 }
 0x136   : > { %4746 = vmatmul.msk.bf16.gmra.mxu3 %vm889_vm1, %v5232_v61 }
 0x138   : > { %v1727_v1 = vpop.f32.mrf.mxu2  ;;  %v1027_v6 = vpop.f32.mrf.mxu0 }
 0x139   : > { %v2149_v2 = vpop.f32.mrf.mxu3  ;;  %v1817_v4 = vadd.f32 %v1727_v1, %v1354_v63  ;;  %v1355_v8 = vpop.f32.mrf.mxu1 }
 0x13a   : > { %v1356_v9 = vadd.f32 %v1355_v8, %v1027_v6 }
 0x13b   : > { %v5699_v10 = vadd.f32 %v2149_v2, %v1817_v4  ;;  %v5187_v2 = vld [vmem:[%s5489_s13 + $0xa8] sm:$0xff] }
 0x13c   : > { %v5162_v4 = vld [vmem:[%s5483_s28 + $0xa8] sm:$0xff] }
 0x140   : > { %v1729_v11 = vpop.f32.mrf.mxu2  ;;  %v1030_v19 = vpop.f32.mrf.mxu0 }
 0x141   : > { %v2151_v12 = vpop.f32.mrf.mxu3  ;;  %v1818_v16 = vadd.f32 %v1729_v11, %v1356_v9  ;;  %v1358_v20 = vpop.f32.mrf.mxu1  ;;  %v5211_v11 = vld [vmem:[%s5497_s16 + $0xa8] sm:$0xff] }
 0x142   : > { %v1359_v23 = vadd.f32 %v1358_v20, %v1030_v19 }
 0x143   : > { %v5705_v24 = vadd.f32 %v2151_v12, %v1818_v16  ;;  %4381 = vmatmul.msk.bf16.gmra.mxu0 %vm889_vm1, %v5185_v13  ;;  %v5235_v12 = vld [vmem:[%s5503_s19 + $0xa8] sm:$0xff] }
 0x144   : > { %4505 = vmatmul.msk.bf16.gmra.mxu1 %vm1221_vm2, %v5160_v15 }
 0x145   : > { %4626 = vmatmul.msk.bf16.gmra.mxu2 %vm889_vm1, %v5209_v21 }
 0x146   : > { %4747 = vmatmul.msk.bf16.gmra.mxu3 %vm889_vm1, %v5233_v22 }
 0x148   : > { %v1732_v28 = vpop.f32.mrf.mxu2  ;;  %v1032_v31 = vpop.f32.mrf.mxu0 }
 0x149   : > { %v2154_v29 = vpop.f32.mrf.mxu3  ;;  %v1819_v30 = vadd.f32 %v1732_v28, %v1359_v23  ;;  %v1360_v33 = vpop.f32.mrf.mxu1 }
 0x14a   : > { %v1361_v34 = vadd.f32 %v1360_v33, %v1032_v31  ;;  %v5163_v31 = vld [vmem:[%s5483_s28 + $0xb0] sm:$0xff] }
 0x14b   : > { %v5711_v35 = vadd.f32 %v2154_v29, %v1819_v30  ;;  %v5188_v30 = vld [vmem:[%s5489_s13 + $0xb0] sm:$0xff] }
 0x150   : > { %v1734_v36 = vpop.f32.mrf.mxu2  ;;  %v1035_v44 = vpop.f32.mrf.mxu0 }
 0x151   : > { %v2156_v37 = vpop.f32.mrf.mxu3  ;;  %v1820_v42 = vadd.f32 %v1734_v36, %v1361_v34  ;;  %v1363_v45 = vpop.f32.mrf.mxu1 }
 0x152   : > { %v1364_v51 = vadd.f32 %v1363_v45, %v1035_v44 }
 0x153   : > { %v5717_v52 = vadd.f32 %v2156_v37, %v1820_v42  ;;  %4382 = vmatmul.msk.bf16.gmra.mxu0 %vm889_vm1, %v5186_v39  ;;  %v5212_v37 = vld [vmem:[%s5497_s16 + $0xb0] sm:$0xff] }
 0x154   : > { %4506 = vmatmul.msk.bf16.gmra.mxu1 %vm1221_vm2, %v5161_v41  ;;  %v5236_v39 = vld [vmem:[%s5503_s19 + $0xb0] sm:$0xff] }
 0x155   : > { %4627 = vmatmul.msk.bf16.gmra.mxu2 %vm889_vm1, %v5210_v47 }
 0x156   : > { %4748 = vmatmul.msk.bf16.gmra.mxu3 %vm889_vm1, %v5234_v48 }
 0x158   : > { %v1737_v53 = vpop.f32.mrf.mxu2  ;;  %v1037_v56 = vpop.f32.mrf.mxu0 }
 0x159   : > { %v2159_v54 = vpop.f32.mrf.mxu3  ;;  %v1821_v55 = vadd.f32 %v1737_v53, %v1364_v51  ;;  %v1365_v57 = vpop.f32.mrf.mxu1 }
 0x15a   : > { %v1366_v59 = vadd.f32 %v1365_v57, %v1037_v56  ;;  %v5189_v56 = vld [vmem:[%s5489_s13 + $0xb8] sm:$0xff] }
 0x15b   : > { %v5723_v61 = vadd.f32 %v2159_v54, %v1821_v55  ;;  %v5164_v57 = vld [vmem:[%s5483_s28 + $0xb8] sm:$0xff] }
 0x160   : > { %v1739_v63 = vpop.f32.mrf.mxu2  ;;  %v1040_v8 = vpop.f32.mrf.mxu0 }
 0x161   : > { %v5725_v1 = vpop.f32.mrf.mxu3  ;;  %v5729_v6 = vadd.f32 %v1739_v63, %v1366_v59  ;;  %v1368_v9 = vpop.f32.mrf.mxu1 }
 0x162   : > { %v1369_v13 = vadd.f32 %v1368_v9, %v1040_v8  ;;  %v5237_v8 = vld [vmem:[%s5503_s19 + $0xb8] sm:$0xff] }
 0x163   : > { %4383 = vmatmul.msk.bf16.gmra.mxu0 %vm889_vm1, %v5187_v2 }
 0x164   : > { %4507 = vmatmul.msk.bf16.gmra.mxu1 %vm1221_vm2, %v5162_v4  ;;  %v5213_v4 = vld [vmem:[%s5497_s16 + $0xb8] sm:$0xff] }
 0x165   : > { %4628 = vmatmul.msk.bf16.gmra.mxu2 %vm889_vm1, %v5211_v11 }
 0x166   : > { %4749 = vmatmul.msk.bf16.gmra.mxu3 %vm889_vm1, %v5235_v12 }
 0x168   : > { %v1742_v15 = vpop.f32.mrf.mxu2  ;;  %v1042_v20 = vpop.f32.mrf.mxu0 }
 0x169   : > { %v2164_v16 = vpop.f32.mrf.mxu3  ;;  %v1823_v19 = vadd.f32 %v1742_v15, %v1369_v13  ;;  %v1370_v21 = vpop.f32.mrf.mxu1 }
 0x16a   : > { %v1371_v22 = vadd.f32 %v1370_v21, %v1042_v20 }
 0x16b   : > { %v5737_v23 = vadd.f32 %v2164_v16, %v1823_v19 }
 0x170   : > { %v1744_v28 = vpop.f32.mrf.mxu2  ;;  %v1045_v34 = vpop.f32.mrf.mxu0 }
 0x171   : > { %v5739_v29 = vpop.f32.mrf.mxu3  ;;  %v5743_v33 = vadd.f32 %v1744_v28, %v1371_v22  ;;  %v1373_v36 = vpop.f32.mrf.mxu1  ;;  %v5238_v28 = vld [vmem:[%s5771_s30] sm:$0xff] }
 0x172   : > { %v1374_v41 = vadd.f32 %v1373_v36, %v1045_v34 }
 0x173   : > { %4384 = vmatmul.msk.bf16.gmra.mxu0 %vm889_vm1, %v5188_v30  ;;  %v5262_v30 = vld [vmem:[%s5777_s15] sm:$0xff] }
 0x174   : > { %4508 = vmatmul.msk.bf16.gmra.mxu1 %vm1221_vm2, %v5163_v31 }
 0x175   : > { %4629 = vmatmul.msk.bf16.gmra.mxu2 %vm889_vm1, %v5212_v37  ;;  %v5286_v37 = vld [vmem:[%s5783_s18] sm:$0xff] }
 0x176   : > { %4750 = vmatmul.msk.bf16.gmra.mxu3 %vm889_vm1, %v5236_v39 }
 0x178   : > { %v1747_v42 = vpop.f32.mrf.mxu2  ;;  %v1047_v47 = vpop.f32.mrf.mxu0 }
 0x179   : > { %v2169_v44 = vpop.f32.mrf.mxu3  ;;  %v1825_v45 = vadd.f32 %v1747_v42, %v1374_v41  ;;  %v1375_v48 = vpop.f32.mrf.mxu1 }
 0x17a   : > { %v1376_v51 = vadd.f32 %v1375_v48, %v1047_v47 }
 0x17b   : > { %v5751_v53 = vadd.f32 %v2169_v44, %v1825_v45 }
 0x180   : > { %v1749_v54 = vpop.f32.mrf.mxu2  ;;  %v1050_v63 = vpop.f32.mrf.mxu0 }
 0x181   : > { %v5753_v55 = vpop.f32.mrf.mxu3  ;;  %v5757_v59 = vadd.f32 %v1749_v54, %v1376_v51  ;;  %v1378_v2 = vpop.f32.mrf.mxu1 }
 0x182   : > { %v1379_v9 = vadd.f32 %v1378_v2, %v1050_v63  ;;  %v5263_v63 = vld [vmem:[%s5777_s15 + $0x8] sm:$0xff] }
 0x183   : > { %4385 = vmatmul.msk.bf16.gmra.mxu0 %vm889_vm1, %v5189_v56 }
 0x184   : > { %4509 = vmatmul.msk.bf16.gmra.mxu1 %vm1221_vm2, %v5164_v57  ;;  %v5239_v57 = vld [vmem:[%s5771_s30 + $0x8] sm:$0xff] }
 0x185   : > { %4630 = vmatmul.msk.bf16.gmra.mxu2 %vm889_vm1, %v5213_v4 }
 0x186   : > { %4751 = vmatmul.msk.bf16.gmra.mxu3 %vm889_vm1, %v5237_v8 }
 0x188   : > { %v1752_v11 = vpop.f32.mrf.mxu2  ;;  %v1052_v15 = vpop.f32.mrf.mxu0 }
 0x189   : > { %v2174_v12 = vpop.f32.mrf.mxu3  ;;  %v1827_v13 = vadd.f32 %v1752_v11, %v1379_v9  ;;  %v1380_v16 = vpop.f32.mrf.mxu1  ;;  %v5287_v9 = vld [vmem:[%s5783_s18 + $0x8] sm:$0xff] }
 0x18a   : > { %v1381_v19 = vadd.f32 %v1380_v16, %v1052_v15 }
 0x18b   : > { %v5765_v20 = vadd.f32 %v2174_v12, %v1827_v13 }
 0x190   : > { %v1754_v21 = vpop.f32.mrf.mxu2  ;;  %v1055_v34 = vpop.f32.mrf.mxu0 }
 0x191   : > { %v5785_v22 = vpop.f32.mrf.mxu3  ;;  %v5789_v31 = vadd.f32 %v1754_v21, %v1381_v19  ;;  %v1383_v36 = vpop.f32.mrf.mxu1 }
 0x192   : > { %v1384_v39 = vadd.f32 %v1383_v36, %v1055_v34  ;;  %v5240_v36 = vld [vmem:[%s5771_s30 + $0x10] sm:$0xff] }
 0x193   : > { %4849 = vmatmul.msk.bf16.vlgmr.msrb.gmra.mxu0 %vm889_vm1, %v5238_v28 }
 0x194   : > { %4970 = vmatmul.msk.bf16.vlgmr.msrb.gmra.mxu1 %vm889_vm1, %v5262_v30 }
 0x195   : > { %5091 = vmatmul.msk.bf16.vlgmr.msrb.gmra.mxu2 %vm889_vm1, %v5286_v37  ;;  %v5264_v37 = vld [vmem:[%s5777_s15 + $0x10] sm:$0xff] }
 0x198   : > { %v1757_v41 = vpop.f32.mrf.mxu2  ;;  %v1057_v45 = vpop.f32.mrf.mxu0 }
 0x199   : > { %v2179_v42 = vpop.f32.mrf.mxu3  ;;  %v1829_v44 = vadd.f32 %v1757_v41, %v1384_v39  ;;  %v1385_v47 = vpop.f32.mrf.mxu1 }
 0x19a   : > { %v1386_v48 = vadd.f32 %v1385_v47, %v1057_v45 }
 0x19b   : > { %v5795_v51 = vadd.f32 %v2179_v42, %v1829_v44  ;;  %v5288_v44 = vld [vmem:[%s5783_s18 + $0x10] sm:$0xff] }
 0x1a0   : > { %v1759_v54 = vpop.f32.mrf.mxu2  ;;  %v1060_v4 = vpop.f32.mrf.mxu0 }
 0x1a1   : > { %v5797_v56 = vpop.f32.mrf.mxu3  ;;  %v5801_v2 = vadd.f32 %v1759_v54, %v1386_v48  ;;  %v1388_v8 = vpop.f32.mrf.mxu1 }
 0x1a2   : > { %v1389_v11 = vadd.f32 %v1388_v8, %v1060_v4 }
 0x1a3   : > { %4850 = vmatmul.msk.bf16.gmra.mxu0 %vm889_vm1, %v5239_v57 }
 0x1a4   : > { %4971 = vmatmul.msk.bf16.gmra.mxu1 %vm889_vm1, %v5263_v63 }
 0x1a5   : > { %5092 = vmatmul.msk.bf16.gmra.mxu2 %vm889_vm1, %v5287_v9 }
 0x1a8   : > { %v1762_v12 = vpop.f32.mrf.mxu2  ;;  %v1062_v16 = vpop.f32.mrf.mxu0 }
 0x1a9   : > { %v2184_v13 = vpop.f32.mrf.mxu3  ;;  %v1831_v15 = vadd.f32 %v1762_v12, %v1389_v11  ;;  %v1390_v19 = vpop.f32.mrf.mxu1  ;;  %v5241_v12 = vld [vmem:[%s5771_s30 + $0x18] sm:$0xff] }
 0x1aa   : > { %v1391_v21 = vadd.f32 %v1390_v19, %v1062_v16 }
 0x1ab   : > { %v5807_v28 = vadd.f32 %v2184_v13, %v1831_v15  ;;  %v5265_v13 = vld [vmem:[%s5777_s15 + $0x18] sm:$0xff] }
 0x1b0   : > { %v1764_v30 = vpop.f32.mrf.mxu2  ;;  %v1065_v41 = vpop.f32.mrf.mxu0 }
 0x1b1   : > { %v5809_v34 = vpop.f32.mrf.mxu3  ;;  %v5813_v39 = vadd.f32 %v1764_v30, %v1391_v21  ;;  %v1393_v42 = vpop.f32.mrf.mxu1  ;;  %v5289_v21 = vld [vmem:[%s5783_s18 + $0x18] sm:$0xff] }
 0x1b2   : > { %v1394_v45 = vadd.f32 %v1393_v42, %v1065_v41 }
 0x1b3   : > { %4851 = vmatmul.msk.bf16.gmra.mxu0 %vm889_vm1, %v5240_v36 }
 0x1b4   : > { %4972 = vmatmul.msk.bf16.gmra.mxu1 %vm889_vm1, %v5264_v37 }
 0x1b5   : > { %5093 = vmatmul.msk.bf16.gmra.mxu2 %vm889_vm1, %v5288_v44 }
 0x1b8   : > { %v1767_v47 = vpop.f32.mrf.mxu2  ;;  %v1067_v57 = vpop.f32.mrf.mxu0 }
 0x1b9   : > { %v2189_v48 = vpop.f32.mrf.mxu3  ;;  %v1833_v54 = vadd.f32 %v1767_v47, %v1394_v45  ;;  %v1395_v63 = vpop.f32.mrf.mxu1 }
 0x1ba   : > { %v1396_v4 = vadd.f32 %v1395_v63, %v1067_v57  ;;  %v5242_v57 = vld [vmem:[%s5771_s30 + $0x20] sm:$0xff] }
 0x1bb   : > { %v5819_v8 = vadd.f32 %v2189_v48, %v1833_v54  ;;  %v5266_v63 = vld [vmem:[%s5777_s15 + $0x20] sm:$0xff] }
 0x1c0   : > { %v1769_v9 = vpop.f32.mrf.mxu2  ;;  %v1070_v16 = vpop.f32.mrf.mxu0 }
 0x1c1   : > { %v5821_v11 = vpop.f32.mrf.mxu3  ;;  %v5825_v15 = vadd.f32 %v1769_v9, %v1396_v4  ;;  %v1398_v19 = vpop.f32.mrf.mxu1 }
 0x1c2   : > { %v1399_v30 = vadd.f32 %v1398_v19, %v1070_v16 }
 0x1c3   : > { %4852 = vmatmul.msk.bf16.gmra.mxu0 %vm889_vm1, %v5241_v12 }
 0x1c4   : > { %4973 = vmatmul.msk.bf16.gmra.mxu1 %vm889_vm1, %v5265_v13  ;;  %v5290_v13 = vld [vmem:[%s5783_s18 + $0x20] sm:$0xff] }
 0x1c5   : > { %5094 = vmatmul.msk.bf16.gmra.mxu2 %vm889_vm1, %v5289_v21 }
 0x1c8   : > { %v1772_v36 = vpop.f32.mrf.mxu2  ;;  %v1072_v42 = vpop.f32.mrf.mxu0 }
 0x1c9   : > { %v2194_v37 = vpop.f32.mrf.mxu3  ;;  %v1835_v41 = vadd.f32 %v1772_v36, %v1399_v30  ;;  %v1400_v44 = vpop.f32.mrf.mxu1 }
 0x1ca   : > { %v1401_v45 = vadd.f32 %v1400_v44, %v1072_v42 }
 0x1cb   : > { %v5831_v47 = vadd.f32 %v2194_v37, %v1835_v41 }
 0x1d0   : > { %v1774_v48 = vpop.f32.mrf.mxu2  ;;  %v1075_v9 = vpop.f32.mrf.mxu0 }
 0x1d1   : > { %v5833_v54 = vpop.f32.mrf.mxu3  ;;  %v5837_v4 = vadd.f32 %v1774_v48, %v1401_v45  ;;  %v1403_v12 = vpop.f32.mrf.mxu1  ;;  %v5243_v48 = vld [vmem:[%s5771_s30 + $0x28] sm:$0xff] }
 0x1d2   : > { %6329 = vst [vmem:[#allocation2_spill] sm:$0xff] %v5833_v54  ;;  %v1404_v16 = vadd.f32 %v1403_v12, %v1075_v9  ;;  %v5267_v9 = vld [vmem:[%s5777_s15 + $0x28] sm:$0xff] }
 0x1d3   : > { %4853 = vmatmul.msk.bf16.gmra.mxu0 %vm889_vm1, %v5242_v57 }
 0x1d4   : > { %4974 = vmatmul.msk.bf16.gmra.mxu1 %vm889_vm1, %v5266_v63 }
 0x1d5   : > { %5095 = vmatmul.msk.bf16.gmra.mxu2 %vm889_vm1, %v5290_v13  ;;  %v5291_v13 = vld [vmem:[%s5783_s18 + $0x28] sm:$0xff] }
 0x1d8   : > { %v1777_v19 = vpop.f32.mrf.mxu2  ;;  %v1077_v36 = vpop.f32.mrf.mxu0 }
 0x1d9   : > { %v2199_v21 = vpop.f32.mrf.mxu3  ;;  %v1837_v30 = vadd.f32 %v1777_v19, %v1404_v16  ;;  %v1405_v37 = vpop.f32.mrf.mxu1 }
 0x1da   : > { %v1406_v41 = vadd.f32 %v1405_v37, %v1077_v36 }
 0x1db   : > { %v5843_v42 = vadd.f32 %v2199_v21, %v1837_v30 }
 0x1dd   : > { %6330 = vst [vmem:[#allocation3_spill] sm:$0xff] %v5843_v42 }
 0x1e0   : > { %v1779_v44 = vpop.f32.mrf.mxu2  ;;  %v1080_v57 = vpop.f32.mrf.mxu0 }
 0x1e1   : > { %v5845_v45 = vpop.f32.mrf.mxu3  ;;  %v5849_v12 = vadd.f32 %v1779_v44, %v1406_v41  ;;  %v1408_v63 = vpop.f32.mrf.mxu1 }
 0x1e2   : > { %6331 = vst [vmem:[#allocation4_spill] sm:$0xff] %v5845_v45  ;;  %v1409_v54 = vadd.f32 %v1408_v63, %v1080_v57  ;;  %v5268_v57 = vld [vmem:[%s5777_s15 + $0x30] sm:$0xff] }
 0x1e3   : > { %6332 = vst [vmem:[#allocation5_spill] sm:$0xff] %v5849_v12  ;;  %4854 = vmatmul.msk.bf16.gmra.mxu0 %vm889_vm1, %v5243_v48  ;;  %v5244_v12 = vld [vmem:[%s5771_s30 + $0x30] sm:$0xff] }
 0x1e4   : > { %4975 = vmatmul.msk.bf16.gmra.mxu1 %vm889_vm1, %v5267_v9 }
 0x1e5   : > { %5096 = vmatmul.msk.bf16.gmra.mxu2 %vm889_vm1, %v5291_v13  ;;  %v5292_v13 = vld [vmem:[%s5783_s18 + $0x30] sm:$0xff] }
 0x1e8   : > { %v1782_v16 = vpop.f32.mrf.mxu2  ;;  %v1082_v30 = vpop.f32.mrf.mxu0 }
 0x1e9   : > { %v2204_v19 = vpop.f32.mrf.mxu3  ;;  %v1839_v21 = vadd.f32 %v1782_v16, %v1409_v54  ;;  %v1410_v36 = vpop.f32.mrf.mxu1 }
 0x1ea   : > { %v1411_v37 = vadd.f32 %v1410_v36, %v1082_v30 }
 0x1eb   : > { %v5855_v41 = vadd.f32 %v2204_v19, %v1839_v21 }
 0x1ed   : > { %6333 = vst [vmem:[#allocation6_spill] sm:$0xff] %v5855_v41 }
 0x1f0   : > { %v1784_v44 = vpop.f32.mrf.mxu2  ;;  %v1085_v48 = vpop.f32.mrf.mxu0 }
 0x1f1   : > { %v5857_v45 = vpop.f32.mrf.mxu3  ;;  %v5861_v63 = vadd.f32 %v1784_v44, %v1411_v37  ;;  %v1413_v9 = vpop.f32.mrf.mxu1 }
 0x1f2   : > { %6334 = vst [vmem:[#allocation7_spill] sm:$0xff] %v5857_v45  ;;  %v1414_v42 = vadd.f32 %v1413_v9, %v1085_v48  ;;  %v5269_v48 = vld [vmem:[%s5777_s15 + $0x38] sm:$0xff] }
 0x1f3   : > { %6335 = vst [vmem:[#allocation8_spill] sm:$0xff] %v5861_v63  ;;  %4855 = vmatmul.msk.bf16.gmra.mxu0 %vm889_vm1, %v5244_v12  ;;  %v5245_v63 = vld [vmem:[%s5771_s30 + $0x38] sm:$0xff] }
 0x1f4   : > { %4976 = vmatmul.msk.bf16.gmra.mxu1 %vm889_vm1, %v5268_v57 }
 0x1f5   : > { %5097 = vmatmul.msk.bf16.gmra.mxu2 %vm889_vm1, %v5292_v13  ;;  %v5293_v13 = vld [vmem:[%s5783_s18 + $0x38] sm:$0xff] }
 0x1f8   : > { %v1787_v54 = vpop.f32.mrf.mxu2  ;;  %v1087_v21 = vpop.f32.mrf.mxu0 }
 0x1f9   : > { %v2209_v16 = vpop.f32.mrf.mxu3  ;;  %v1841_v19 = vadd.f32 %v1787_v54, %v1414_v42  ;;  %v1415_v30 = vpop.f32.mrf.mxu1 }
 0x1fa   : > { %v1416_v36 = vadd.f32 %v1415_v30, %v1087_v21 }
 0x1fb   : > { %v5867_v37 = vadd.f32 %v2209_v16, %v1841_v19 }
 0x1fd   : > { %6336 = vst [vmem:[#allocation9_spill] sm:$0xff] %v5867_v37 }
 0x200   : > { %v1789_v44 = vpop.f32.mrf.mxu2  ;;  %v1090_v12 = vpop.f32.mrf.mxu0 }
 0x201   : > { %v5869_v45 = vpop.f32.mrf.mxu3  ;;  %v5873_v9 = vadd.f32 %v1789_v44, %v1416_v36  ;;  %v1418_v57 = vpop.f32.mrf.mxu1 }
 0x202   : > { %6337 = vst [vmem:[#allocation10_spill] sm:$0xff] %v5869_v45  ;;  %v1419_v41 = vadd.f32 %v1418_v57, %v1090_v12  ;;  %v5246_v45 = vld [vmem:[%s5771_s30 + $0x40] sm:$0xff] }
 0x203   : > { %6338 = vst [vmem:[#allocation11_spill] sm:$0xff] %v5873_v9  ;;  %4856 = vmatmul.msk.bf16.gmra.mxu0 %vm889_vm1, %v5245_v63  ;;  %v5270_v9 = vld [vmem:[%s5777_s15 + $0x40] sm:$0xff] }
 0x204   : > { %4977 = vmatmul.msk.bf16.gmra.mxu1 %vm889_vm1, %v5269_v48  ;;  %v5294_v48 = vld [vmem:[%s5783_s18 + $0x40] sm:$0xff] }
 0x205   : > { %5098 = vmatmul.msk.bf16.gmra.mxu2 %vm889_vm1, %v5293_v13 }
 0x208   : > { %v1792_v42 = vpop.f32.mrf.mxu2  ;;  %v1092_v19 = vpop.f32.mrf.mxu0 }
 0x209   : > { %v2214_v54 = vpop.f32.mrf.mxu3  ;;  %v1843_v16 = vadd.f32 %v1792_v42, %v1419_v41  ;;  %v1420_v21 = vpop.f32.mrf.mxu1 }
 0x20a   : > { %v1421_v30 = vadd.f32 %v1420_v21, %v1092_v19  ;;  %v5894_v21 = vld [vmem:[%s6325_s9] ss:$0 sm:$0xff] }
 0x20b   : > { %v5879_v36 = vadd.f32 %v2214_v54, %v1843_v16 }
 0x20d   : > { %6339 = vst [vmem:[#allocation12_spill] sm:$0xff] %v5879_v36  ;;  %v5295_v36 = vld [vmem:[%s5783_s18 + $0x48] sm:$0xff] }
 0x210   : > { %v1794_v44 = vpop.f32.mrf.mxu2  ;;  %v2521_v12 = vpop.f32.mrf.mxu0 }
 0x211   : > { %v5883_v37 = vadd.f32 %v1794_v44, %v1421_v30  ;;  %v2943_v63 = vpop.f32.mrf.mxu1  ;;  %v2641_v41 = vadd.f32 %v2521_v12, %v5579_v60  ;;  %v5271_v44 = vld [vmem:[%s5777_s15 + $0x48] sm:$0xff] }
 0x213   : > { %6340 = vst [vmem:[#allocation13_spill] sm:$0xff] %v5883_v37  ;;  %4857 = vmatmul.msk.bf16.gmra.mxu0 %vm889_vm1, %v5246_v45  ;;  %v3063_v54 = vadd.f32 %v2943_v63, %v2641_v41 }
 0x214   : > { %4978 = vmatmul.msk.bf16.gmra.mxu1 %vm889_vm1, %v5270_v9  ;;  %v5247_v9 = vld [vmem:[%s5771_s30 + $0x48] sm:$0xff] }
 0x215   : > { %5099 = vmatmul.msk.bf16.gmra.mxu2 %vm889_vm1, %v5294_v48 }
 0x218   : > { %v3365_v57 = vpop.f32.mrf.mxu2  ;;  %v2523_v13 = vpop.f32.mrf.mxu0 }
 0x219   : > { %v2945_v42 = vpop.f32.mrf.mxu1  ;;  %v2642_v16 = vadd.f32 %v2523_v13, %v5585_v7  ;;  %v3485_v19 = vadd.f32 %v3365_v57, %v3063_v54 }
 0x21b   : > { %v3064_v45 = vadd.f32 %v2945_v42, %v2642_v16  ;;  %v3537_v48 = vadd.f32 %v5894_v21, %v3485_v19 }
 0x21d   : > { %v3585_v7 = vmax.f32 %v3537_v48, 0.0  ;;  %v5272_v48 = vld [vmem:[%s5777_s15 + $0x50] sm:$0xff] }
 0x220   : > { %v3367_v30 = vpop.f32.mrf.mxu2  ;;  %v2526_v12 = vpop.f32.mrf.mxu0 }
 0x221   : > { %v3486_v60 = vadd.f32 %v3367_v30, %v3064_v45  ;;  %v2948_v37 = vpop.f32.mrf.mxu1  ;;  %v2643_v13 = vadd.f32 %v2526_v12, %v5591_v14  ;;  %v5296_v14 = vld [vmem:[%s5783_s18 + $0x50] sm:$0xff] }
 0x223   : > { %v3538_v63 = vadd.f32 %v5894_v21, %v3486_v60  ;;  %4858 = vmatmul.msk.bf16.gmra.mxu0 %vm889_vm1, %v5247_v9  ;;  %v3065_v19 = vadd.f32 %v2948_v37, %v2643_v13  ;;  %v5248_v60 = vld [vmem:[%s5771_s30 + $0x50] sm:$0xff] }
 0x224   : > { %4979 = vmatmul.msk.bf16.gmra.mxu1 %vm889_vm1, %v5271_v44 }
 0x225   : > { %v3586_v41 = vmax.f32 %v3538_v63, 0.0  ;;  %5100 = vmatmul.msk.bf16.gmra.mxu2 %vm889_vm1, %v5295_v36 }
 0x227   : > { %v3633_v57 = vpack.c.bf16 %v3586_v41, %v3585_v7 }
 0x228   : > { %v3370_v42 = vpop.f32.mrf.mxu2  ;;  %v2528_v54 = vpop.f32.mrf.mxu0 }
 0x229   : > { %5115 = vmatmul.msk.bf16.vlgmr.msrb.gmra.mxu3 %vm889_vm1, %v3633_v57  ;;  %v2950_v16 = vpop.f32.mrf.mxu1  ;;  %v2644_v45 = vadd.f32 %v2528_v54, %v5597_v25  ;;  %v3487_v30 = vadd.f32 %v3370_v42, %v3065_v19 }
 0x22b   : > { %v3066_v9 = vadd.f32 %v2950_v16, %v2644_v45  ;;  %v3539_v63 = vadd.f32 %v5894_v21, %v3487_v30 }
 0x22d   : > { %v3587_v25 = vmax.f32 %v3539_v63, 0.0 }
 0x230   : > { %v3372_v44 = vpop.f32.mrf.mxu2  ;;  %v2531_v7 = vpop.f32.mrf.mxu0 }
 0x231   : > { %v3488_v36 = vadd.f32 %v3372_v44, %v3066_v9  ;;  %v2953_v41 = vpop.f32.mrf.mxu1  ;;  %v2645_v13 = vadd.f32 %v2531_v7, %v5603_v32  ;;  %v5297_v32 = vld [vmem:[%s5783_s18 + $0x58] sm:$0xff] }
 0x233   : > { %v3540_v12 = vadd.f32 %v5894_v21, %v3488_v36  ;;  %4859 = vmatmul.msk.bf16.gmra.mxu0 %vm889_vm1, %v5248_v60  ;;  %v3067_v19 = vadd.f32 %v2953_v41, %v2645_v13  ;;  %v5249_v60 = vld [vmem:[%s5771_s30 + $0x58] sm:$0xff] }
 0x234   : > { %4980 = vmatmul.msk.bf16.gmra.mxu1 %vm889_vm1, %v5272_v48  ;;  %v5273_v48 = vld [vmem:[%s5777_s15 + $0x58] sm:$0xff] }
 0x235   : > { %v3588_v37 = vmax.f32 %v3540_v12, 0.0  ;;  %5101 = vmatmul.msk.bf16.gmra.mxu2 %vm889_vm1, %v5296_v14 }
 0x237   : > { %v3634_v57 = vpack.c.bf16 %v3588_v37, %v3587_v25 }
 0x238   : > { %v3375_v42 = vpop.f32.mrf.mxu2  ;;  %v2533_v54 = vpop.f32.mrf.mxu0 }
 0x239   : > { %5116 = vmatmul.msk.bf16.gmra.mxu3 %vm889_vm1, %v3634_v57  ;;  %v2955_v16 = vpop.f32.mrf.mxu1  ;;  %v2646_v45 = vadd.f32 %v2533_v54, %v5609_v43  ;;  %v3489_v30 = vadd.f32 %v3375_v42, %v3067_v19 }
 0x23b   : > { %v3068_v9 = vadd.f32 %v2955_v16, %v2646_v45  ;;  %v3541_v63 = vadd.f32 %v5894_v21, %v3489_v30 }
 0x23d   : > { %v3589_v43 = vmax.f32 %v3541_v63, 0.0 }
 0x240   : > { %v3377_v44 = vpop.f32.mrf.mxu2  ;;  %v2536_v14 = vpop.f32.mrf.mxu0 }
 0x241   : > { %v3490_v36 = vadd.f32 %v3377_v44, %v3068_v9  ;;  %v2958_v12 = vpop.f32.mrf.mxu1  ;;  %v2647_v37 = vadd.f32 %v2536_v14, %v5615_v50  ;;  %v5250_v9 = vld [vmem:[%s5771_s30 + $0x60] sm:$0xff] }
 0x242   : > { %v5274_v44 = vld [vmem:[%s5777_s15 + $0x60] sm:$0xff] }
 0x243   : > { %v3542_v7 = vadd.f32 %v5894_v21, %v3490_v36  ;;  %4860 = vmatmul.msk.bf16.gmra.mxu0 %vm889_vm1, %v5249_v60  ;;  %v3069_v54 = vadd.f32 %v2958_v12, %v2647_v37  ;;  %v5298_v50 = vld [vmem:[%s5783_s18 + $0x60] sm:$0xff] }
 0x244   : > { %4981 = vmatmul.msk.bf16.gmra.mxu1 %vm889_vm1, %v5273_v48 }
 0x245   : > { %v3590_v41 = vmax.f32 %v3542_v7, 0.0  ;;  %5102 = vmatmul.msk.bf16.gmra.mxu2 %vm889_vm1, %v5297_v32 }
 0x247   : > { %v3635_v25 = vpack.c.bf16 %v3590_v41, %v3589_v43 }
 0x248   : > { %v3380_v57 = vpop.f32.mrf.mxu2  ;;  %v2538_v13 = vpop.f32.mrf.mxu0 }
 0x249   : > { %5117 = vmatmul.msk.bf16.gmra.mxu3 %vm889_vm1, %v3635_v25  ;;  %v2960_v42 = vpop.f32.mrf.mxu1  ;;  %v2648_v16 = vadd.f32 %v2538_v13, %v5621_v62  ;;  %v3491_v19 = vadd.f32 %v3380_v57, %v3069_v54 }
 0x24b   : > { %v3070_v45 = vadd.f32 %v2960_v42, %v2648_v16  ;;  %v3543_v60 = vadd.f32 %v5894_v21, %v3491_v19  ;;  %v5251_v16 = vld [vmem:[%s5771_s30 + $0x68] sm:$0xff] }
 0x24c   : > { %v5275_v19 = vld [vmem:[%s5777_s15 + $0x68] sm:$0xff] }
 0x24d   : > { %v3591_v62 = vmax.f32 %v3543_v60, 0.0 }
 0x250   : > { %v3382_v30 = vpop.f32.mrf.mxu2  ;;  %v2541_v63 = vpop.f32.mrf.mxu0 }
 0x251   : > { %v3492_v48 = vadd.f32 %v3382_v30, %v3070_v45  ;;  %v2963_v36 = vpop.f32.mrf.mxu1  ;;  %v2649_v7 = vadd.f32 %v2541_v63, %v5627_v5  ;;  %v5299_v5 = vld [vmem:[%s5783_s18 + $0x68] sm:$0xff] }
 0x253   : > { %v3544_v14 = vadd.f32 %v5894_v21, %v3492_v48  ;;  %4861 = vmatmul.msk.bf16.gmra.mxu0 %vm889_vm1, %v5250_v9  ;;  %v3071_v37 = vadd.f32 %v2963_v36, %v2649_v7 }
 0x254   : > { %4982 = vmatmul.msk.bf16.gmra.mxu1 %vm889_vm1, %v5274_v44 }
 0x255   : > { %v3592_v12 = vmax.f32 %v3544_v14, 0.0  ;;  %5103 = vmatmul.msk.bf16.gmra.mxu2 %vm889_vm1, %v5298_v50 }
 0x257   : > { %v3636_v32 = vpack.c.bf16 %v3592_v12, %v3591_v62 }
 0x258   : > { %v3385_v43 = vpop.f32.mrf.mxu2  ;;  %v2543_v41 = vpop.f32.mrf.mxu0 }
 0x259   : > { %5118 = vmatmul.msk.bf16.gmra.mxu3 %vm889_vm1, %v3636_v32  ;;  %v2965_v25 = vpop.f32.mrf.mxu1  ;;  %v2650_v57 = vadd.f32 %v2543_v41, %v5633_v18  ;;  %v3493_v13 = vadd.f32 %v3385_v43, %v3071_v37  ;;  %v5276_v37 = vld [vmem:[%s5777_s15 + $0x70] sm:$0xff] }
 0x25b   : > { %v3072_v42 = vadd.f32 %v2965_v25, %v2650_v57  ;;  %v3545_v45 = vadd.f32 %v5894_v21, %v3493_v13  ;;  %v5252_v25 = vld [vmem:[%s5771_s30 + $0x70] sm:$0xff] }
 0x25d   : > { %v3593_v18 = vmax.f32 %v3545_v45, 0.0 }
 0x260   : > { %v3387_v54 = vpop.f32.mrf.mxu2  ;;  %v2546_v9 = vpop.f32.mrf.mxu0 }
 0x261   : > { %v3494_v30 = vadd.f32 %v3387_v54, %v3072_v42  ;;  %v2968_v44 = vpop.f32.mrf.mxu1  ;;  %v2651_v36 = vadd.f32 %v2546_v9, %v5639_v26  ;;  %v5300_v26 = vld [vmem:[%s5783_s18 + $0x70] sm:$0xff] }
 0x263   : > { %v3546_v60 = vadd.f32 %v5894_v21, %v3494_v30  ;;  %4862 = vmatmul.msk.bf16.gmra.mxu0 %vm889_vm1, %v5251_v16  ;;  %v3073_v12 = vadd.f32 %v2968_v44, %v2651_v36 }
 0x264   : > { %4983 = vmatmul.msk.bf16.gmra.mxu1 %vm889_vm1, %v5275_v19 }
 0x265   : > { %v3594_v48 = vmax.f32 %v3546_v60, 0.0  ;;  %5104 = vmatmul.msk.bf16.gmra.mxu2 %vm889_vm1, %v5299_v5 }
 0x267   : > { %v3637_v63 = vpack.c.bf16 %v3594_v48, %v3593_v18 }
 0x268   : > { %v3390_v50 = vpop.f32.mrf.mxu2  ;;  %v2548_v14 = vpop.f32.mrf.mxu0 }
 0x269   : > { %5119 = vmatmul.msk.bf16.gmra.mxu3 %vm889_vm1, %v3637_v63  ;;  %v2970_v62 = vpop.f32.mrf.mxu1  ;;  %v2652_v32 = vadd.f32 %v2548_v14, %v5645_v38  ;;  %v3495_v7 = vadd.f32 %v3390_v50, %v3073_v12  ;;  %v5253_v50 = vld [vmem:[%s5771_s30 + $0x78] sm:$0xff] }
 0x26a   : > { %v5277_v14 = vld [vmem:[%s5777_s15 + $0x78] sm:$0xff] }
 0x26b   : > { %v3074_v43 = vadd.f32 %v2970_v62, %v2652_v32  ;;  %v3547_v57 = vadd.f32 %v5894_v21, %v3495_v7 }
 0x26d   : > { %v3595_v38 = vmax.f32 %v3547_v57, 0.0 }
 0x270   : > { %v3392_v41 = vpop.f32.mrf.mxu2  ;;  %v2551_v42 = vpop.f32.mrf.mxu0 }
 0x271   : > { %v3496_v13 = vadd.f32 %v3392_v41, %v3074_v43  ;;  %v2973_v54 = vpop.f32.mrf.mxu1  ;;  %v2653_v30 = vadd.f32 %v2551_v42, %v5651_v46  ;;  %v5301_v46 = vld [vmem:[%s5783_s18 + $0x78] sm:$0xff] }
 0x273   : > { %v3548_v16 = vadd.f32 %v5894_v21, %v3496_v13  ;;  %4863 = vmatmul.msk.bf16.gmra.mxu0 %vm889_vm1, %v5252_v25  ;;  %v3075_v60 = vadd.f32 %v2973_v54, %v2653_v30  ;;  %v5278_v30 = vld [vmem:[%s5777_s15 + $0x80] sm:$0xff] }
 0x274   : > { %4984 = vmatmul.msk.bf16.gmra.mxu1 %vm889_vm1, %v5276_v37 }
 0x275   : > { %v3596_v19 = vmax.f32 %v3548_v16, 0.0  ;;  %5105 = vmatmul.msk.bf16.gmra.mxu2 %vm889_vm1, %v5300_v26 }
 0x277   : > { %v3638_v45 = vpack.c.bf16 %v3596_v19, %v3595_v38 }
 0x278   : > { %v3395_v9 = vpop.f32.mrf.mxu2  ;;  %v2553_v44 = vpop.f32.mrf.mxu0 }
 0x279   : > { %5120 = vmatmul.msk.bf16.gmra.mxu3 %vm889_vm1, %v3638_v45  ;;  %v2975_v5 = vpop.f32.mrf.mxu1  ;;  %v2654_v18 = vadd.f32 %v2553_v44, %v5657_v58  ;;  %v3497_v48 = vadd.f32 %v3395_v9, %v3075_v60  ;;  %v5254_v45 = vld [vmem:[%s5771_s30 + $0x80] sm:$0xff] }
 0x27b   : > { %v3076_v63 = vadd.f32 %v2975_v5, %v2654_v18  ;;  %v3549_v62 = vadd.f32 %v5894_v21, %v3497_v48 }
 0x27d   : > { %v3597_v58 = vmax.f32 %v3549_v62, 0.0 }
 0x280   : > { %v3397_v36 = vpop.f32.mrf.mxu2  ;;  %v2556_v32 = vpop.f32.mrf.mxu0 }
 0x281   : > { %v3498_v12 = vadd.f32 %v3397_v36, %v3076_v63  ;;  %v2978_v7 = vpop.f32.mrf.mxu1  ;;  %v2655_v37 = vadd.f32 %v2556_v32, %v5663_v3  ;;  %v5302_v3 = vld [vmem:[%s5783_s18 + $0x80] sm:$0xff] }
 0x283   : > { %v3550_v43 = vadd.f32 %v5894_v21, %v3498_v12  ;;  %4864 = vmatmul.msk.bf16.gmra.mxu0 %vm889_vm1, %v5253_v50  ;;  %v3077_v54 = vadd.f32 %v2978_v7, %v2655_v37 }
 0x284   : > { %4985 = vmatmul.msk.bf16.gmra.mxu1 %vm889_vm1, %v5277_v14 }
 0x285   : > { %v3598_v41 = vmax.f32 %v3550_v43, 0.0  ;;  %5106 = vmatmul.msk.bf16.gmra.mxu2 %vm889_vm1, %v5301_v46 }
 0x287   : > { %v3639_v25 = vpack.c.bf16 %v3598_v41, %v3597_v58  ;;  %v5255_v58 = vld [vmem:[%s5771_s30 + $0x88] sm:$0xff] }
 0x288   : > { %v3400_v57 = vpop.f32.mrf.mxu2  ;;  %v2558_v13 = vpop.f32.mrf.mxu0  ;;  %v5279_v41 = vld [vmem:[%s5777_s15 + $0x88] sm:$0xff] }
 0x289   : > { %5121 = vmatmul.msk.bf16.gmra.mxu3 %vm889_vm1, %v3639_v25  ;;  %v2980_v42 = vpop.f32.mrf.mxu1  ;;  %v2656_v26 = vadd.f32 %v2558_v13, %v5669_v17  ;;  %v3499_v16 = vadd.f32 %v3400_v57, %v3077_v54  ;;  %v5989_v54 = vpop.f32.mrf.mxu3 }
 0x28b   : > { %v3078_v38 = vadd.f32 %v2980_v42, %v2656_v26  ;;  %v3551_v9 = vadd.f32 %v5894_v21, %v3499_v16 }
 0x28d   : > { %v3599_v17 = vmax.f32 %v3551_v9, 0.0  ;;  %v5999_v9 = vld [vmem:[%s6327_s11] ss:$0 sm:$0xff] }
 0x290   : > { %v3402_v19 = vpop.f32.mrf.mxu2  ;;  %v2561_v5 = vpop.f32.mrf.mxu0 }
 0x291   : > { %v3500_v44 = vadd.f32 %v3402_v19, %v3078_v38  ;;  %v2983_v60 = vpop.f32.mrf.mxu1  ;;  %v2657_v36 = vadd.f32 %v2561_v5, %v5675_v27  ;;  %v5303_v27 = vld [vmem:[%s5783_s18 + $0x88] sm:$0xff] }
 0x293   : > { %v3552_v18 = vadd.f32 %v5894_v21, %v3500_v44  ;;  %4865 = vmatmul.msk.bf16.gmra.mxu0 %vm889_vm1, %v5254_v45  ;;  %v3079_v12 = vadd.f32 %v2983_v60, %v2657_v36  ;;  %v670_v44 = vld [vmem:[%s5483_s28] sm:$0xff]  }
 0x294   : > { %4986 = vmatmul.msk.bf16.gmra.mxu1 %vm889_vm1, %v5278_v30 }
 0x295   : > { %v3600_v48 = vmax.f32 %v3552_v18, 0.0  ;;  %5107 = vmatmul.msk.bf16.gmra.mxu2 %vm889_vm1, %v5302_v3 }
 0x297   : > { %v3640_v63 = vpack.c.bf16 %v3600_v48, %v3599_v17  ;;  %v3914_v17 = vunpack.c.l.bf16 %v670_v44 }
 0x298   : > { %v3405_v50 = vpop.f32.mrf.mxu2  ;;  %v2563_v14 = vpop.f32.mrf.mxu0 }
 0x299   : > { %5122 = vmatmul.msk.bf16.gmra.mxu3 %vm889_vm1, %v3640_v63  ;;  %v2985_v62 = vpop.f32.mrf.mxu1  ;;  %v2658_v32 = vadd.f32 %v2563_v14, %v5681_v40  ;;  %v3501_v7 = vadd.f32 %v3405_v50, %v3079_v12  ;;  %v5256_v50 = vld [vmem:[%s5771_s30 + $0x90] sm:$0xff] }
 0x29a   : > { %v5280_v14 = vld [vmem:[%s5777_s15 + $0x90] sm:$0xff] }
 0x29b   : > { %v3080_v46 = vadd.f32 %v2985_v62, %v2658_v32  ;;  %v3553_v25 = vadd.f32 %v5894_v21, %v3501_v7 }
 0x29d   : > { %v3601_v40 = vmax.f32 %v3553_v25, 0.0 }
 0x2a0   : > { %v3407_v43 = vpop.f32.mrf.mxu2  ;;  %v2566_v57 = vpop.f32.mrf.mxu0 }
 0x2a1   : > { %v3502_v37 = vadd.f32 %v3407_v43, %v3080_v46  ;;  %v2988_v13 = vpop.f32.mrf.mxu1  ;;  %v2659_v38 = vadd.f32 %v2566_v57, %v5687_v49  ;;  %v5304_v46 = vld [vmem:[%s5783_s18 + $0x90] sm:$0xff]  ;;  %v3915_v57 = vunpack.c.h.bf16 %v670_v44 }
 0x2a3   : > { %v3554_v42 = vadd.f32 %v5894_v21, %v3502_v37  ;;  %4866 = vmatmul.msk.bf16.gmra.mxu0 %vm889_vm1, %v5255_v58  ;;  %v3081_v5 = vadd.f32 %v2988_v13, %v2659_v38 }
 0x2a4   : > { %4987 = vmatmul.msk.bf16.gmra.mxu1 %vm889_vm1, %v5279_v41 }
 0x2a5   : > { %v3602_v26 = vmax.f32 %v3554_v42, 0.0  ;;  %5108 = vmatmul.msk.bf16.gmra.mxu2 %vm889_vm1, %v5303_v27 }
 0x2a7   : > { %v3641_v16 = vpack.c.bf16 %v3602_v26, %v3601_v40 }
 0x2a8   : > { %v3410_v19 = vpop.f32.mrf.mxu2  ;;  %v2568_v45 = vpop.f32.mrf.mxu0 }
 0x2a9   : > { %5123 = vmatmul.msk.bf16.gmra.mxu3 %vm889_vm1, %v3641_v16  ;;  %v2990_v30 = vpop.f32.mrf.mxu1  ;;  %v2660_v60 = vadd.f32 %v2568_v45, %v5693_v0  ;;  %v3503_v49 = vadd.f32 %v3410_v19, %v3081_v5  ;;  %v672_v19 = vld [vmem:[%s5483_s28 + $0x8] sm:$0xff]  }
 0x2ab   : > { %v3082_v48 = vadd.f32 %v2990_v30, %v2660_v60  ;;  %v3555_v0 = vadd.f32 %v5894_v21, %v3503_v49  ;;  %v3916_v60 = vunpack.c.l.bf16 %v672_v19 }
 0x2ac   : > { %v3746_v3 = vpop.f32.mrf.mxu3 }
 0x2ad   : > { %v3747_v18 = vadd.f32 %v5999_v9, %v3746_v3  ;;  %v3603_v41 = vmax.f32 %v3555_v0, 0.0 }
 0x2af   : > { %v3866_v63 = vmax.f32 %v3747_v18, 0.0 }
 0x2b0   : > { %v3412_v36 = vpop.f32.mrf.mxu2  ;;  %v2571_v32 = vpop.f32.mrf.mxu0 }
 0x2b1   : > { %v3962_v62 = vadd.f32 %v3914_v17, %v3866_v63  ;;  %v3504_v12 = vadd.f32 %v3412_v36, %v3082_v48  ;;  %v2993_v7 = vpop.f32.mrf.mxu1  ;;  %v2661_v27 = vadd.f32 %v2571_v32, %v5699_v10  ;;  %v5257_v17 = vld [vmem:[%s5771_s30 + $0x98] sm:$0xff] }
 0x2b2   : > { %v5281_v48 = vld [vmem:[%s5777_s15 + $0x98] sm:$0xff] }
 0x2b3   : > { %4010 = vst.msk [vmem:[%s6008_s14] sm:$0xff] %vm1221_vm2, %v3962_v62  ;;  %v3556_v43 = vadd.f32 %v5894_v21, %v3504_v12  ;;  %4867 = vmatmul.msk.bf16.gmra.mxu0 %vm889_vm1, %v5256_v50  ;;  %v3083_v45 = vadd.f32 %v2993_v7, %v2661_v27  ;;  %v5305_v62 = vld [vmem:[%s5783_s18 + $0x98] sm:$0xff] }
 0x2b4   : > { %v3748_v58 = vpop.f32.mrf.mxu3  ;;  %4988 = vmatmul.msk.bf16.gmra.mxu1 %vm889_vm1, %v5280_v14 }
 0x2b5   : > { %v3604_v25 = vmax.f32 %v3556_v43, 0.0  ;;  %v3749_v37 = vadd.f32 %v5999_v9, %v3748_v58  ;;  %5109 = vmatmul.msk.bf16.gmra.mxu2 %vm889_vm1, %v5304_v46  ;;  %v3917_v43 = vunpack.c.h.bf16 %v672_v19 }
 0x2b7   : > { %v3642_v13 = vpack.c.bf16 %v3604_v25, %v3603_v41  ;;  %v3867_v42 = vmax.f32 %v3749_v37, 0.0 }
 0x2b8   : > { %v3415_v40 = vpop.f32.mrf.mxu2  ;;  %v2573_v16 = vpop.f32.mrf.mxu0 }
 0x2b9   : > { %v3963_v26 = vadd.f32 %v3915_v57, %v3867_v42  ;;  %5124 = vmatmul.msk.bf16.gmra.mxu3 %vm889_vm1, %v3642_v13  ;;  %v2995_v38 = vpop.f32.mrf.mxu1  ;;  %v2662_v30 = vadd.f32 %v2573_v16, %v5705_v24  ;;  %v3505_v5 = vadd.f32 %v3415_v40, %v3083_v45  ;;  %v674_v42 = vld [vmem:[%s5483_s28 + $0x10] sm:$0xff]  }
 0x2ba   : > { %v3918_v19 = vunpack.c.l.bf16 %v674_v42 }
 0x2bb   : > { %4011 = vst.msk [vmem:[%s6008_s14 + $0x8] sm:$0xff] %vm1221_vm2, %v3963_v26  ;;  %v3084_v3 = vadd.f32 %v2995_v38, %v2662_v30  ;;  %v3557_v63 = vadd.f32 %v5894_v21, %v3505_v5  ;;  %v5258_v5 = vld [vmem:[%s5771_s30 + $0xa0] sm:$0xff] }
 0x2bc   : > { %v3751_v44 = vpop.f32.mrf.mxu3 }
 0x2bd   : > { %v3752_v10 = vadd.f32 %v5999_v9, %v3751_v44  ;;  %v3605_v32 = vmax.f32 %v3557_v63, 0.0 }
 0x2bf   : > { %v3868_v49 = vmax.f32 %v3752_v10, 0.0  ;;  %v5282_v10 = vld [vmem:[%s5777_s15 + $0xa0] sm:$0xff] }
 0x2c0   : > { %v3417_v18 = vpop.f32.mrf.mxu2  ;;  %v2576_v14 = vpop.f32.mrf.mxu0 }
 0x2c1   : > { %v3964_v36 = vadd.f32 %v3916_v60, %v3868_v49  ;;  %v3506_v50 = vadd.f32 %v3417_v18, %v3084_v3  ;;  %v2998_v0 = vpop.f32.mrf.mxu1  ;;  %v2663_v41 = vadd.f32 %v2576_v14, %v5711_v35 }
 0x2c3   : > { %4012 = vst.msk [vmem:[%s6008_s14 + $0x10] sm:$0xff] %vm1221_vm2, %v3964_v36  ;;  %v3558_v24 = vadd.f32 %v5894_v21, %v3506_v50  ;;  %4868 = vmatmul.msk.bf16.gmra.mxu0 %vm889_vm1, %v5257_v17  ;;  %v3085_v40 = vadd.f32 %v2998_v0, %v2663_v41  ;;  %v3919_v0 = vunpack.c.h.bf16 %v674_v42  ;;  %v676_v41 = vld [vmem:[%s5483_s28 + $0x18] sm:$0xff]  }
 0x2c4   : > { %v3753_v12 = vpop.f32.mrf.mxu3  ;;  %4989 = vmatmul.msk.bf16.gmra.mxu1 %vm889_vm1, %v5281_v48  ;;  %v5306_v48 = vld [vmem:[%s5783_s18 + $0xa0] sm:$0xff] }
 0x2c5   : > { %v3606_v7 = vmax.f32 %v3558_v24, 0.0  ;;  %v3754_v46 = vadd.f32 %v5999_v9, %v3753_v12  ;;  %5110 = vmatmul.msk.bf16.gmra.mxu2 %vm889_vm1, %v5305_v62 }
 0x2c7   : > { %v3643_v58 = vpack.c.bf16 %v3606_v7, %v3605_v32  ;;  %v3869_v25 = vmax.f32 %v3754_v46, 0.0  ;;  %v2244_v7 = vadd.f32 %v5725_v1, %v5729_v6 }
 0x2c8   : > { %v3420_v37 = vpop.f32.mrf.mxu2  ;;  %v2578_v13 = vpop.f32.mrf.mxu0 }
 0x2c9   : > { %v3965_v57 = vadd.f32 %v3917_v43, %v3869_v25  ;;  %5125 = vmatmul.msk.bf16.gmra.mxu3 %vm889_vm1, %v3643_v58  ;;  %v3000_v27 = vpop.f32.mrf.mxu1  ;;  %v2664_v26 = vadd.f32 %v2578_v13, %v5717_v52  ;;  %v3507_v38 = vadd.f32 %v3420_v37, %v3085_v40  ;;  %v5259_v40 = vld [vmem:[%s5771_s30 + $0xa8] sm:$0xff] }
 0x2cb   : > { %4013 = vst.msk [vmem:[%s6008_s14 + $0x18] sm:$0xff] %vm1221_vm2, %v3965_v57  ;;  %v3086_v45 = vadd.f32 %v3000_v27, %v2664_v26  ;;  %v3559_v60 = vadd.f32 %v5894_v21, %v3507_v38  ;;  %v3920_v27 = vunpack.c.l.bf16 %v676_v41  ;;  %v5283_v26 = vld [vmem:[%s5777_s15 + $0xa8] sm:$0xff] }
 0x2cc   : > { %v3756_v16 = vpop.f32.mrf.mxu3 }
 0x2cd   : > { %v3757_v35 = vadd.f32 %v5999_v9, %v3756_v16  ;;  %v3607_v36 = vmax.f32 %v3559_v60, 0.0 }
 0x2cf   : > { %v3870_v30 = vmax.f32 %v3757_v35, 0.0 }
 0x2d0   : > { %v3422_v44 = vpop.f32.mrf.mxu2  ;;  %v2581_v18 = vpop.f32.mrf.mxu0 }
 0x2d1   : > { %v3966_v3 = vadd.f32 %v3918_v19, %v3870_v30  ;;  %v3508_v49 = vadd.f32 %v3422_v44, %v3086_v45  ;;  %v3003_v17 = vpop.f32.mrf.mxu1  ;;  %v2665_v24 = vadd.f32 %v2581_v18, %v5723_v61  ;;  %v5307_v30 = vld [vmem:[%s5783_s18 + $0xa8] sm:$0xff] }
 0x2d3   : > { %4014 = vst.msk [vmem:[%s6008_s14 + $0x20] sm:$0xff] %vm1221_vm2, %v3966_v3  ;;  %v3560_v52 = vadd.f32 %v5894_v21, %v3508_v49  ;;  %4869 = vmatmul.msk.bf16.gmra.mxu0 %vm889_vm1, %v5258_v5  ;;  %v3087_v25 = vadd.f32 %v3003_v17, %v2665_v24  ;;  %v3921_v49 = vunpack.c.h.bf16 %v676_v41 }
 0x2d4   : > { %v3758_v63 = vpop.f32.mrf.mxu3  ;;  %4990 = vmatmul.msk.bf16.gmra.mxu1 %vm889_vm1, %v5282_v10 }
 0x2d5   : > { %v3608_v50 = vmax.f32 %v3560_v52, 0.0  ;;  %v3759_v14 = vadd.f32 %v5999_v9, %v3758_v63  ;;  %5111 = vmatmul.msk.bf16.gmra.mxu2 %vm889_vm1, %v5306_v48  ;;  %v2246_v63 = vadd.f32 %v5739_v29, %v5743_v33 }
 0x2d7   : > { %v3644_v62 = vpack.c.bf16 %v3608_v50, %v3607_v36  ;;  %v3871_v12 = vmax.f32 %v3759_v14, 0.0 }
 0x2d8   : > { %v3425_v32 = vpop.f32.mrf.mxu2  ;;  %v2583_v43 = vpop.f32.mrf.mxu0 }
 0x2d9   : > { %v3967_v46 = vadd.f32 %v3919_v0, %v3871_v12  ;;  %5126 = vmatmul.msk.bf16.gmra.mxu3 %vm889_vm1, %v3644_v62  ;;  %v3005_v58 = vpop.f32.mrf.mxu1  ;;  %v2666_v37 = vadd.f32 %v2583_v43, %v2244_v7  ;;  %v3509_v57 = vadd.f32 %v3425_v32, %v3087_v25  ;;  %v678_v0 = vld [vmem:[%s5483_s28 + $0x20] sm:$0xff]   ;;  %v5260_v43 = vld [vmem:[%s5771_s30 + $0xb0] sm:$0xff] }
 0x2da   : > { %v3922_v7 = vunpack.c.l.bf16 %v678_v0 }
 0x2db   : > { %4015 = vst.msk [vmem:[%s6008_s14 + $0x28] sm:$0xff] %vm1221_vm2, %v3967_v46  ;;  %v3088_v1 = vadd.f32 %v3005_v58, %v2666_v37  ;;  %v3561_v16 = vadd.f32 %v5894_v21, %v3509_v57  ;;  %v5284_v58 = vld [vmem:[%s5777_s15 + $0xb0] sm:$0xff] }
 0x2dc   : > { %v3761_v61 = vpop.f32.mrf.mxu3 }
 0x2dd   : > { %v3762_v13 = vadd.f32 %v5999_v9, %v3761_v61  ;;  %v3609_v10 = vmax.f32 %v3561_v16, 0.0 }
 0x2df   : > { %v3872_v6 = vmax.f32 %v3762_v13, 0.0  ;;  %v5308_v13 = vld [vmem:[%s5783_s18 + $0xb0] sm:$0xff] }
 0x2e0   : > { %v3427_v42 = vpop.f32.mrf.mxu2  ;;  %v2586_v19 = vpop.f32.mrf.mxu0 }
 0x2e1   : > { %v3968_v38 = vadd.f32 %v3920_v27, %v3872_v6  ;;  %v3510_v35 = vadd.f32 %v3427_v42, %v3088_v1  ;;  %v3008_v45 = vpop.f32.mrf.mxu1  ;;  %v2667_v17 = vadd.f32 %v2586_v19, %v5737_v23 }
 0x2e3   : > { %4016 = vst.msk [vmem:[%s6008_s14 + $0x30] sm:$0xff] %vm1221_vm2, %v3968_v38  ;;  %v3562_v44 = vadd.f32 %v5894_v21, %v3510_v35  ;;  %4870 = vmatmul.msk.bf16.gmra.mxu0 %vm889_vm1, %v5259_v40  ;;  %v3089_v62 = vadd.f32 %v3008_v45, %v2667_v17  ;;  %v2248_v45 = vadd.f32 %v5753_v55, %v5757_v59 }
 0x2e4   : > { %v3763_v5 = vpop.f32.mrf.mxu3  ;;  %4991 = vmatmul.msk.bf16.gmra.mxu1 %vm889_vm1, %v5283_v26  ;;  %v3923_v26 = vunpack.c.h.bf16 %v678_v0 }
 0x2e5   : > { %v3610_v60 = vmax.f32 %v3562_v44, 0.0  ;;  %v3764_v3 = vadd.f32 %v5999_v9, %v3763_v5  ;;  %5112 = vmatmul.msk.bf16.gmra.mxu2 %vm889_vm1, %v5307_v30 }
 0x2e7   : > { %v3645_v18 = vpack.c.bf16 %v3610_v60, %v3609_v10  ;;  %v3873_v48 = vmax.f32 %v3764_v3, 0.0  ;;  %v680_v10 = vld [vmem:[%s5483_s28 + $0x28] sm:$0xff]  }
 0x2e8   : > { %v3430_v52 = vpop.f32.mrf.mxu2  ;;  %v2588_v50 = vpop.f32.mrf.mxu0  ;;  %v3924_v17 = vunpack.c.l.bf16 %v680_v10 }
 0x2e9   : > { %v3969_v36 = vadd.f32 %v3921_v49, %v3873_v48  ;;  %5127 = vmatmul.msk.bf16.gmra.mxu3 %vm889_vm1, %v3645_v18  ;;  %v3010_v14 = vpop.f32.mrf.mxu1  ;;  %v2668_v24 = vadd.f32 %v2588_v50, %v2246_v63  ;;  %v3511_v12 = vadd.f32 %v3430_v52, %v3089_v62  ;;  %v5261_v52 = vld [vmem:[%s5771_s30 + $0xb8] sm:$0xff] }
 0x2ea   : > { %v5285_v63 = vld [vmem:[%s5777_s15 + $0xb8] sm:$0xff] }
 0x2eb   : > { %4017 = vst.msk [vmem:[%s6008_s14 + $0x38] sm:$0xff] %vm1221_vm2, %v3969_v36  ;;  %v3090_v29 = vadd.f32 %v3010_v14, %v2668_v24  ;;  %v3563_v41 = vadd.f32 %v5894_v21, %v3511_v12  ;;  %v5309_v24 = vld [vmem:[%s5783_s18 + $0xb8] sm:$0xff] }
 0x2ec   : > { %v3766_v23 = vpop.f32.mrf.mxu3 }
 0x2ed   : > { %v3767_v32 = vadd.f32 %v5999_v9, %v3766_v23  ;;  %v3611_v6 = vmax.f32 %v3563_v41, 0.0 }
 0x2ef   : > { %v3874_v33 = vmax.f32 %v3767_v32, 0.0 }
 0x2f0   : > { %v3432_v46 = vpop.f32.mrf.mxu2  ;;  %v2591_v61 = vpop.f32.mrf.mxu0 }
 0x2f1   : > { %v3970_v25 = vadd.f32 %v3922_v7, %v3874_v33  ;;  %v3512_v37 = vadd.f32 %v3432_v46, %v3090_v29  ;;  %v3013_v57 = vpop.f32.mrf.mxu1  ;;  %v2669_v38 = vadd.f32 %v2591_v61, %v5751_v53  ;;  %v3925_v33 = vunpack.c.h.bf16 %v680_v10 }
 0x2f3   : > { %4018 = vst.msk [vmem:[%s6008_s14 + $0x40] sm:$0xff] %vm1221_vm2, %v3970_v25  ;;  %v3564_v27 = vadd.f32 %v5894_v21, %v3512_v37  ;;  %4871 = vmatmul.msk.bf16.gmra.mxu0 %vm889_vm1, %v5260_v43  ;;  %v3091_v60 = vadd.f32 %v3013_v57, %v2669_v38  ;;  %v2250_v25 = vadd.f32 %v5785_v22, %v5789_v31 }
 0x2f4   : > { %v3768_v1 = vpop.f32.mrf.mxu3  ;;  %4992 = vmatmul.msk.bf16.gmra.mxu1 %vm889_vm1, %v5284_v58 }
 0x2f5   : > { %v3612_v42 = vmax.f32 %v3564_v27, 0.0  ;;  %v3769_v40 = vadd.f32 %v5999_v9, %v3768_v1  ;;  %5113 = vmatmul.msk.bf16.gmra.mxu2 %vm889_vm1, %v5308_v13  ;;  %v682_v13 = vld [vmem:[%s5483_s28 + $0x30] sm:$0xff]  }
 0x2f7   : > { %v3646_v16 = vpack.c.bf16 %v3612_v42, %v3611_v6  ;;  %v3875_v35 = vmax.f32 %v3769_v40, 0.0  ;;  %v3926_v40 = vunpack.c.l.bf16 %v682_v13 }
 0x2f8   : > { %v3435_v19 = vpop.f32.mrf.mxu2  ;;  %v2593_v44 = vpop.f32.mrf.mxu0 }
 0x2f9   : > { %v3971_v30 = vadd.f32 %v3923_v26, %v3875_v35  ;;  %5128 = vmatmul.msk.bf16.gmra.mxu3 %vm889_vm1, %v3646_v16  ;;  %v3015_v5 = vpop.f32.mrf.mxu1  ;;  %v2670_v3 = vadd.f32 %v2593_v44, %v2248_v45  ;;  %v3513_v49 = vadd.f32 %v3435_v19, %v3091_v60 }
 0x2fb   : > { %4019 = vst.msk [vmem:[%s6008_s14 + $0x48] sm:$0xff] %vm1221_vm2, %v3971_v30  ;;  %v3092_v55 = vadd.f32 %v3015_v5, %v2670_v3  ;;  %v3565_v36 = vadd.f32 %v5894_v21, %v3513_v49  ;;  %v3927_v3 = vunpack.c.h.bf16 %v682_v13 }
 0x2fc   : > { %v3771_v53 = vpop.f32.mrf.mxu3 }
 0x2fd   : > { %v3772_v18 = vadd.f32 %v5999_v9, %v3771_v53  ;;  %v3613_v32 = vmax.f32 %v3565_v36, 0.0 }
 0x2ff   : > { %v3876_v59 = vmax.f32 %v3772_v18, 0.0 }
 0x300   : > { %v3437_v48 = vpop.f32.mrf.mxu2  ;;  %v2596_v0 = vpop.f32.mrf.mxu0 }
 0x301   : > { %v3972_v50 = vadd.f32 %v3924_v17, %v3876_v59  ;;  %v3514_v14 = vadd.f32 %v3437_v48, %v3092_v55  ;;  %v3018_v62 = vpop.f32.mrf.mxu1  ;;  %v2671_v43 = vadd.f32 %v2596_v0, %v5765_v20  ;;  %v2252_v55 = vadd.f32 %v5797_v56, %v5801_v2 }
 0x303   : > { %4020 = vst.msk [vmem:[%s6008_s14 + $0x50] sm:$0xff] %vm1221_vm2, %v3972_v50  ;;  %v3566_v23 = vadd.f32 %v5894_v21, %v3514_v14  ;;  %4872 = vmatmul.msk.bf16.gmra.mxu0 %vm889_vm1, %v5261_v52  ;;  %v3093_v27 = vadd.f32 %v3018_v62, %v2671_v43 }
 0x304   : > { %v3773_v12 = vpop.f32.mrf.mxu3  ;;  %4993 = vmatmul.msk.bf16.gmra.mxu1 %vm889_vm1, %v5285_v63  ;;  %v684_v63 = vld [vmem:[%s5483_s28 + $0x38] sm:$0xff]  }
 0x305   : > { %v3614_v7 = vmax.f32 %v3566_v23, 0.0  ;;  %v3774_v29 = vadd.f32 %v5999_v9, %v3773_v12  ;;  %5114 = vmatmul.msk.bf16.gmra.mxu2 %vm889_vm1, %v5309_v24  ;;  %v3928_v62 = vunpack.c.l.bf16 %v684_v63 }
 0x307   : > { %v3647_v46 = vpack.c.bf16 %v3614_v7, %v3613_v32  ;;  %v3877_v58 = vmax.f32 %v3774_v29, 0.0 }
 0x308   : > { %v3440_v41 = vpop.f32.mrf.mxu2  ;;  %v2598_v61 = vpop.f32.mrf.mxu0 }
 0x309   : > { %v3973_v37 = vadd.f32 %v3925_v33, %v3877_v58  ;;  %5129 = vmatmul.msk.bf16.gmra.mxu3 %vm889_vm1, %v3647_v46  ;;  %v3020_v57 = vpop.f32.mrf.mxu1  ;;  %v2672_v1 = vadd.f32 %v2598_v61, %v2250_v25  ;;  %v3515_v42 = vadd.f32 %v3440_v41, %v3093_v27  ;;  %v3929_v25 = vunpack.c.h.bf16 %v684_v63 }
 0x30a   : > { %v2254_v27 = vadd.f32 %v5809_v34, %v5813_v39  ;;  %v6151_v34 = vld [vmem:[%s6325_s9] ss:$0 sm:$0xff] }
 0x30b   : > { %4021 = vst.msk [vmem:[%s6008_s14 + $0x58] sm:$0xff] %vm1221_vm2, %v3973_v37  ;;  %v3094_v26 = vadd.f32 %v3020_v57, %v2672_v1  ;;  %v3567_v22 = vadd.f32 %v5894_v21, %v3515_v42  ;;  %v686_v42 = vld [vmem:[%s5483_s28 + $0x40] sm:$0xff]  }
 0x30c   : > { %v3776_v6 = vpop.f32.mrf.mxu3 }
 0x30d   : > { %v3777_v20 = vadd.f32 %v5999_v9, %v3776_v6  ;;  %v3615_v5 = vmax.f32 %v3567_v22, 0.0 }
 0x30f   : > { %v3878_v16 = vmax.f32 %v3777_v20, 0.0 }
 0x310   : > { %v3442_v38 = vpop.f32.mrf.mxu2  ;;  %v2601_v19 = vpop.f32.mrf.mxu0 }
 0x311   : > { %v3974_v31 = vadd.f32 %v3926_v40, %v3878_v16  ;;  %v3516_v35 = vadd.f32 %v3442_v38, %v3094_v26  ;;  %v3023_v45 = vpop.f32.mrf.mxu1  ;;  %v2673_v49 = vadd.f32 %v2601_v19, %v5795_v51  ;;  %v3930_v38 = vunpack.c.l.bf16 %v686_v42 }
 0x313   : > { %4022 = vst.msk [vmem:[%s6008_s14 + $0x60] sm:$0xff] %vm1221_vm2, %v3974_v31  ;;  %v3568_v30 = vadd.f32 %v5894_v21, %v3516_v35  ;;  %v3095_v36 = vadd.f32 %v3023_v45, %v2673_v49  ;;  %v3931_v49 = vunpack.c.h.bf16 %v686_v42  ;;  %v690_v42 = vld [vmem:[%s5483_s28 + $0x50] sm:$0xff]  }
 0x314   : > { %v3778_v44 = vpop.f32.mrf.mxu3 }
 0x315   : > { %v3616_v10 = vmax.f32 %v3568_v30, 0.0  ;;  %v3779_v60 = vadd.f32 %v5999_v9, %v3778_v44 }
 0x317   : > { %v3648_v53 = vpack.c.bf16 %v3616_v10, %v3615_v5  ;;  %v3879_v18 = vmax.f32 %v3779_v60, 0.0 }
 0x318   : > { %v3445_v17 = vpop.f32.mrf.mxu2  ;;  %v2603_v48 = vpop.f32.mrf.mxu0 }
 0x319   : > { %v3975_v59 = vadd.f32 %v3927_v3, %v3879_v18  ;;  %5130 = vmatmul.msk.bf16.gmra.mxu3 %vm889_vm1, %v3648_v53  ;;  %v3025_v52 = vpop.f32.mrf.mxu1  ;;  %v2674_v50 = vadd.f32 %v2603_v48, %v2252_v55  ;;  %v3517_v0 = vadd.f32 %v3445_v17, %v3095_v36  ;;  %v2256_v48 = vadd.f32 %v5821_v11, %v5825_v15 }
 0x31b   : > { %4023 = vst.msk [vmem:[%s6008_s14 + $0x68] sm:$0xff] %vm1221_vm2, %v3975_v59  ;;  %v3096_v24 = vadd.f32 %v3025_v52, %v2674_v50  ;;  %v3569_v56 = vadd.f32 %v5894_v21, %v3517_v0  ;;  %v688_v50 = vld [vmem:[%s5483_s28 + $0x48] sm:$0xff]  }
 0x31c   : > { %v3781_v14 = vpop.f32.mrf.mxu3 }
 0x31d   : > { %v3782_v51 = vadd.f32 %v5999_v9, %v3781_v14  ;;  %v3617_v43 = vmax.f32 %v3569_v56, 0.0 }
 0x31f   : > { %v3880_v23 = vmax.f32 %v3782_v51, 0.0 }
 0x320   : > { %v3447_v12 = vpop.f32.mrf.mxu2  ;;  %v2606_v7 = vpop.f32.mrf.mxu0 }
 0x321   : > { %v3976_v2 = vadd.f32 %v3928_v62, %v3880_v23  ;;  %v3518_v32 = vadd.f32 %v3447_v12, %v3096_v24  ;;  %v3028_v29 = vpop.f32.mrf.mxu1  ;;  %v2675_v61 = vadd.f32 %v2606_v7, %v5807_v28  ;;  %v3932_v24 = vunpack.c.l.bf16 %v688_v50 }
 0x323   : > { %4024 = vst.msk [vmem:[%s6008_s14 + $0x70] sm:$0xff] %vm1221_vm2, %v3976_v2  ;;  %v3570_v33 = vadd.f32 %v5894_v21, %v3518_v32  ;;  %v3097_v20 = vadd.f32 %v3028_v29, %v2675_v61 }
 0x324   : > { %v3783_v46 = vpop.f32.mrf.mxu3 }
 0x325   : > { %v3618_v58 = vmax.f32 %v3570_v33, 0.0  ;;  %v3784_v41 = vadd.f32 %v5999_v9, %v3783_v46 }
 0x327   : > { %v3649_v37 = vpack.c.bf16 %v3618_v58, %v3617_v43  ;;  %v3881_v57 = vmax.f32 %v3784_v41, 0.0  ;;  %v3933_v41 = vunpack.c.h.bf16 %v688_v50 }
 0x328   : > { %v3450_v13 = vpop.f32.mrf.mxu2  ;;  %v2608_v6 = vpop.f32.mrf.mxu0 }
 0x329   : > { %v3977_v1 = vadd.f32 %v3929_v25, %v3881_v57  ;;  %5131 = vmatmul.msk.bf16.gmra.mxu3 %vm889_vm1, %v3649_v37  ;;  %v3030_v21 = vpop.f32.mrf.mxu1  ;;  %v2676_v40 = vadd.f32 %v2608_v6, %v2254_v27  ;;  %v3519_v16 = vadd.f32 %v3450_v13, %v3097_v20  ;;  %v6341_v13 = vld [vmem:[#allocation2_spill] sm:$0xff] }
 0x32a   : > { %v2258_v27 = vadd.f32 %v6341_v13, %v5837_v4 }
 0x32b   : > { %4025 = vst.msk [vmem:[%s6008_s14 + $0x78] sm:$0xff] %vm1221_vm2, %v3977_v1  ;;  %v3098_v22 = vadd.f32 %v3030_v21, %v2676_v40  ;;  %v3571_v39 = vadd.f32 %v6151_v34, %v3519_v16 }
 0x32c   : > { %v3786_v26 = vpop.f32.mrf.mxu3 }
 0x32d   : > { %v3787_v28 = vadd.f32 %v5999_v9, %v3786_v26  ;;  %v3619_v60 = vmax.f32 %v3571_v39, 0.0 }
 0x32f   : > { %v3882_v31 = vmax.f32 %v3787_v28, 0.0  ;;  %v3934_v28 = vunpack.c.l.bf16 %v690_v42 }
 0x330   : > { %v3452_v35 = vpop.f32.mrf.mxu2  ;;  %v2611_v30 = vpop.f32.mrf.mxu0 }
 0x331   : > { %v3978_v19 = vadd.f32 %v3930_v38, %v3882_v31  ;;  %v3520_v45 = vadd.f32 %v3452_v35, %v3098_v22  ;;  %v3033_v44 = vpop.f32.mrf.mxu1  ;;  %v2677_v17 = vadd.f32 %v2611_v30, %v5819_v8 }
 0x333   : > { %4026 = vst.msk [vmem:[%s6008_s14 + $0x80] sm:$0xff] %vm1221_vm2, %v3978_v19  ;;  %v3572_v5 = vadd.f32 %v6151_v34, %v3520_v45  ;;  %v3099_v14 = vadd.f32 %v3033_v44, %v2677_v17 }
 0x334   : > { %v3788_v10 = vpop.f32.mrf.mxu3 }
 0x335   : > { %v3620_v3 = vmax.f32 %v3572_v5, 0.0  ;;  %v3789_v53 = vadd.f32 %v5999_v9, %v3788_v10 }
 0x337   : > { %v3650_v18 = vpack.c.bf16 %v3620_v3, %v3619_v60  ;;  %v3883_v55 = vmax.f32 %v3789_v53, 0.0  ;;  %v3935_v3 = vunpack.c.h.bf16 %v690_v42 }
 0x338   : > { %v3455_v59 = vpop.f32.mrf.mxu2  ;;  %v2613_v63 = vpop.f32.mrf.mxu0 }
 0x339   : > { %v3979_v52 = vadd.f32 %v3931_v49, %v3883_v55  ;;  %5132 = vmatmul.msk.bf16.gmra.mxu3 %vm889_vm1, %v3650_v18  ;;  %v3035_v36 = vpop.f32.mrf.mxu1  ;;  %v2678_v0 = vadd.f32 %v2613_v63, %v2256_v48  ;;  %v3521_v62 = vadd.f32 %v3455_v59, %v3099_v14  ;;  %v6342_v49 = vld [vmem:[#allocation3_spill] sm:$0xff]  ;;  %v6343_v59 = vld [vmem:[#allocation5_spill] sm:$0xff]  ;;  %v6344_v48 = vld [vmem:[#allocation4_spill] sm:$0xff] }
 0x33a   : > { %v692_v14 = vld [vmem:[%s5483_s28 + $0x58] sm:$0xff]  }
 0x33b   : > { %4027 = vst.msk [vmem:[%s6008_s14 + $0x88] sm:$0xff] %vm1221_vm2, %v3979_v52  ;;  %v3100_v23 = vadd.f32 %v3035_v36, %v2678_v0  ;;  %v3573_v11 = vadd.f32 %v6151_v34, %v3521_v62  ;;  %v2260_v52 = vadd.f32 %v6344_v48, %v6343_v59 }
 0x33c   : > { %v3791_v51 = vpop.f32.mrf.mxu3 }
 0x33d   : > { %v3792_v8 = vadd.f32 %v5999_v9, %v3791_v51  ;;  %v3621_v46 = vmax.f32 %v3573_v11, 0.0 }
 0x33f   : > { %v3884_v12 = vmax.f32 %v3792_v8, 0.0 }
 0x340   : > { %v3457_v56 = vpop.f32.mrf.mxu2  ;;  %v2616_v32 = vpop.f32.mrf.mxu0 }
 0x341   : > { %v3980_v15 = vadd.f32 %v3932_v24, %v3884_v12  ;;  %v3522_v2 = vadd.f32 %v3457_v56, %v3100_v23  ;;  %v3038_v7 = vpop.f32.mrf.mxu1  ;;  %v2679_v37 = vadd.f32 %v2616_v32, %v5831_v47  ;;  %v3936_v23 = vunpack.c.l.bf16 %v692_v14 }
 0x343   : > { %4028 = vst.msk [vmem:[%s6008_s14 + $0x90] sm:$0xff] %vm1221_vm2, %v3980_v15  ;;  %v3574_v29 = vadd.f32 %v6151_v34, %v3522_v2  ;;  %v3101_v20 = vadd.f32 %v3038_v7, %v2679_v37 }
 0x344   : > { %v3793_v33 = vpop.f32.mrf.mxu3 }
 0x345   : > { %v3622_v43 = vmax.f32 %v3574_v29, 0.0  ;;  %v3794_v58 = vadd.f32 %v5999_v9, %v3793_v33 }
 0x347   : > { %v3651_v25 = vpack.c.bf16 %v3622_v43, %v3621_v46  ;;  %v3885_v61 = vmax.f32 %v3794_v58, 0.0 }
 0x348   : > { %v3460_v57 = vpop.f32.mrf.mxu2  ;;  %v2618_v6 = vpop.f32.mrf.mxu0 }
 0x349   : > { %v3981_v1 = vadd.f32 %v3933_v41, %v3885_v61  ;;  %5133 = vmatmul.msk.bf16.gmra.mxu3 %vm889_vm1, %v3651_v25  ;;  %v3040_v21 = vpop.f32.mrf.mxu1  ;;  %v2680_v40 = vadd.f32 %v2618_v6, %v2258_v27  ;;  %v3523_v16 = vadd.f32 %v3460_v57, %v3101_v20  ;;  %v3937_v25 = vunpack.c.h.bf16 %v692_v14  ;;  %v6345_v61 = vld [vmem:[#allocation6_spill] sm:$0xff]  ;;  %v6347_v6 = vld [vmem:[#allocation7_spill] sm:$0xff] }
 0x34b   : > { %4029 = vst.msk [vmem:[%s6008_s14 + $0x98] sm:$0xff] %vm1221_vm2, %v3981_v1  ;;  %v3102_v38 = vadd.f32 %v3040_v21, %v2680_v40  ;;  %v3575_v4 = vadd.f32 %v6151_v34, %v3523_v16  ;;  %v6346_v1 = vld [vmem:[#allocation8_spill] sm:$0xff] }
 0x34c   : > { %v3796_v26 = vpop.f32.mrf.mxu3  ;;  %v2262_v21 = vadd.f32 %v6347_v6, %v6346_v1 }
 0x34d   : > { %v3797_v47 = vadd.f32 %v5999_v9, %v3796_v26  ;;  %v3623_v5 = vmax.f32 %v3575_v4, 0.0  ;;  %v694_v26 = vld [vmem:[%s5483_s28 + $0x60] sm:$0xff]  }
 0x34f   : > { %v3886_v22 = vmax.f32 %v3797_v47, 0.0 }
 0x350   : > { %v3462_v31 = vpop.f32.mrf.mxu2  ;;  %v2621_v19 = vpop.f32.mrf.mxu0 }
 0x351   : > { %v3982_v35 = vadd.f32 %v3934_v28, %v3886_v22  ;;  %v3524_v39 = vadd.f32 %v3462_v31, %v3102_v38  ;;  %v3043_v45 = vpop.f32.mrf.mxu1  ;;  %v2681_v18 = vadd.f32 %v2621_v19, %v6342_v49  ;;  %v3938_v31 = vunpack.c.l.bf16 %v694_v26 }
 0x353   : > { %4030 = vst.msk [vmem:[%s6008_s14 + $0xa0] sm:$0xff] %vm1221_vm2, %v3982_v35  ;;  %v3576_v30 = vadd.f32 %v6151_v34, %v3524_v39  ;;  %v3103_v0 = vadd.f32 %v3043_v45, %v2681_v18  ;;  %v3939_v18 = vunpack.c.h.bf16 %v694_v26 }
 0x354   : > { %v3798_v44 = vpop.f32.mrf.mxu3 }
 0x355   : > { %v3624_v10 = vmax.f32 %v3576_v30, 0.0  ;;  %v3799_v60 = vadd.f32 %v5999_v9, %v3798_v44 }
 0x357   : > { %v3652_v53 = vpack.c.bf16 %v3624_v10, %v3623_v5  ;;  %v3887_v17 = vmax.f32 %v3799_v60, 0.0 }
 0x358   : > { %v3465_v55 = vpop.f32.mrf.mxu2  ;;  %v2623_v36 = vpop.f32.mrf.mxu0 }
 0x359   : > { %v3983_v63 = vadd.f32 %v3935_v3, %v3887_v17  ;;  %5134 = vmatmul.msk.bf16.gmra.mxu3 %vm889_vm1, %v3652_v53  ;;  %v3045_v50 = vpop.f32.mrf.mxu1  ;;  %v2682_v51 = vadd.f32 %v2623_v36, %v2260_v52  ;;  %v3525_v8 = vadd.f32 %v3465_v55, %v3103_v0  ;;  %v6348_v55 = vld [vmem:[#allocation9_spill] sm:$0xff]  ;;  %v6350_v36 = vld [vmem:[#allocation10_spill] sm:$0xff] }
 0x35b   : > { %4031 = vst.msk [vmem:[%s6008_s14 + $0xa8] sm:$0xff] %vm1221_vm2, %v3983_v63  ;;  %v3104_v12 = vadd.f32 %v3045_v50, %v2682_v51  ;;  %v3577_v15 = vadd.f32 %v6151_v34, %v3525_v8  ;;  %v6349_v63 = vld [vmem:[#allocation11_spill] sm:$0xff] }
 0x35c   : > { %v3801_v62 = vpop.f32.mrf.mxu3  ;;  %v2264_v50 = vadd.f32 %v6350_v36, %v6349_v63 }
 0x35d   : > { %v3802_v24 = vadd.f32 %v5999_v9, %v3801_v62  ;;  %v3625_v43 = vmax.f32 %v3577_v15, 0.0  ;;  %v696_v62 = vld [vmem:[%s5483_s28 + $0x68] sm:$0xff]  }
 0x35f   : > { %v3888_v56 = vmax.f32 %v3802_v24, 0.0 }
 0x360   : > { %v3467_v11 = vpop.f32.mrf.mxu2  ;;  %v2626_v7 = vpop.f32.mrf.mxu0 }
 0x361   : > { %v3984_v2 = vadd.f32 %v3936_v23, %v3888_v56  ;;  %v3526_v32 = vadd.f32 %v3467_v11, %v3104_v12  ;;  %v3048_v29 = vpop.f32.mrf.mxu1  ;;  %v2683_v57 = vadd.f32 %v2626_v7, %v6345_v61  ;;  %v3940_v11 = vunpack.c.l.bf16 %v696_v62 }
 0x363   : > { %4032 = vst.msk [vmem:[%s6008_s14 + $0xb0] sm:$0xff] %vm1221_vm2, %v3984_v2  ;;  %v3578_v33 = vadd.f32 %v6151_v34, %v3526_v32  ;;  %v3105_v16 = vadd.f32 %v3048_v29, %v2683_v57  ;;  %v3941_v57 = vunpack.c.h.bf16 %v696_v62 }
 0x364   : > { %v3803_v46 = vpop.f32.mrf.mxu3 }
 0x365   : > { %v3626_v58 = vmax.f32 %v3578_v33, 0.0  ;;  %v3804_v41 = vadd.f32 %v5999_v9, %v3803_v46 }
 0x367   : > { %v3653_v37 = vpack.c.bf16 %v3626_v58, %v3625_v43  ;;  %v3889_v13 = vmax.f32 %v3804_v41, 0.0 }
 0x368   : > { %v3470_v27 = vpop.f32.mrf.mxu2  ;;  %v2628_v20 = vpop.f32.mrf.mxu0 }
 0x369   : > { %v3985_v42 = vadd.f32 %v3937_v25, %v3889_v13  ;;  %5135 = vmatmul.msk.bf16.gmra.mxu3 %vm889_vm1, %v3653_v37  ;;  %v3050_v40 = vpop.f32.mrf.mxu1  ;;  %v2684_v47 = vadd.f32 %v2628_v20, %v2262_v21  ;;  %v3527_v38 = vadd.f32 %v3470_v27, %v3105_v16  ;;  %v6351_v27 = vld [vmem:[#allocation12_spill] sm:$0xff] }
 0x36a   : > { %v698_v16 = vld [vmem:[%s5483_s28 + $0x70] sm:$0xff]  }
 0x36b   : > { %4033 = vst.msk [vmem:[%s6008_s14 + $0xb8] sm:$0xff] %vm1221_vm2, %v3985_v42  ;;  %v3106_v4 = vadd.f32 %v3050_v40, %v2684_v47  ;;  %v3579_v19 = vadd.f32 %v6151_v34, %v3527_v38  ;;  %v6352_v42 = vld [vmem:[#allocation13_spill] sm:$0xff] }
 0x36c   : > { %v3806_v28 = vpop.f32.mrf.mxu3  ;;  %v2266_v20 = vadd.f32 %v5989_v54, %v6352_v42 }
 0x36d   : > { %v3807_v22 = vadd.f32 %v5999_v9, %v3806_v28  ;;  %v3627_v3 = vmax.f32 %v3579_v19, 0.0 }
 0x36f   : > { %v3890_v35 = vmax.f32 %v3807_v22, 0.0 }
 0x370   : > { %v3472_v39 = vpop.f32.mrf.mxu2  ;;  %v2631_v44 = vpop.f32.mrf.mxu0 }
 0x371   : > { %v3986_v45 = vadd.f32 %v3938_v31, %v3890_v35  ;;  %v3528_v30 = vadd.f32 %v3472_v39, %v3106_v4  ;;  %v3053_v5 = vpop.f32.mrf.mxu1  ;;  %v2685_v59 = vadd.f32 %v2631_v44, %v6348_v55  ;;  %v3942_v4 = vunpack.c.l.bf16 %v698_v16 }
 0x373   : > { %4034 = vst.msk [vmem:[%s6008_s14 + $0xc0] sm:$0xff] %vm1221_vm2, %v3986_v45  ;;  %v3580_v10 = vadd.f32 %v6151_v34, %v3528_v30  ;;  %v3107_v8 = vadd.f32 %v3053_v5, %v2685_v59  ;;  %v700_v59 = vld [vmem:[%s5483_s28 + $0x78] sm:$0xff]  }
 0x374   : > { %v3808_v60 = vpop.f32.mrf.mxu3 }
 0x375   : > { %v3628_v53 = vmax.f32 %v3580_v10, 0.0  ;;  %v3809_v49 = vadd.f32 %v5999_v9, %v3808_v60 }
 0x377   : > { %v3654_v17 = vpack.c.bf16 %v3628_v53, %v3627_v3  ;;  %v3891_v48 = vmax.f32 %v3809_v49, 0.0  ;;  %v3943_v49 = vunpack.c.h.bf16 %v698_v16 }
 0x378   : > { %v3475_v52 = vpop.f32.mrf.mxu2  ;;  %v2633_v0 = vpop.f32.mrf.mxu0 }
 0x379   : > { %v3987_v14 = vadd.f32 %v3939_v18, %v3891_v48  ;;  %5136 = vmatmul.msk.bf16.gmra.mxu3 %vm889_vm1, %v3654_v17  ;;  %v3055_v51 = vpop.f32.mrf.mxu1  ;;  %v2686_v24 = vadd.f32 %v2633_v0, %v2264_v50  ;;  %v3529_v12 = vadd.f32 %v3475_v52, %v3107_v8  ;;  %v3945_v0 = vunpack.c.h.bf16 %v700_v59  ;;  %v702_v8 = vld [vmem:[%s5483_s28 + $0x80] sm:$0xff]  }
 0x37b   : > { %4035 = vst.msk [vmem:[%s6008_s14 + $0xc8] sm:$0xff] %vm1221_vm2, %v3987_v14  ;;  %v3108_v15 = vadd.f32 %v3055_v51, %v2686_v24  ;;  %v3581_v7 = vadd.f32 %v6151_v34, %v3529_v12  ;;  %v3946_v12 = vunpack.c.l.bf16 %v702_v8 }
 0x37c   : > { %v3811_v23 = vpop.f32.mrf.mxu3 }
 0x37d   : > { %v3812_v56 = vadd.f32 %v5999_v9, %v3811_v23  ;;  %v3629_v25 = vmax.f32 %v3581_v7, 0.0 }
 0x37f   : > { %v3892_v2 = vmax.f32 %v3812_v56, 0.0 }
 0x380   : > { %v3477_v32 = vpop.f32.mrf.mxu2  ;;  %v2636_v46 = vpop.f32.mrf.mxu0 }
 0x381   : > { %v3988_v29 = vadd.f32 %v3940_v11, %v3892_v2  ;;  %v3530_v33 = vadd.f32 %v3477_v32, %v3108_v15  ;;  %v3058_v58 = vpop.f32.mrf.mxu1  ;;  %v2687_v1 = vadd.f32 %v2636_v46, %v6351_v27  ;;  %v3947_v32 = vunpack.c.h.bf16 %v702_v8 }
 0x383   : > { %4036 = vst.msk [vmem:[%s6008_s14 + $0xd0] sm:$0xff] %vm1221_vm2, %v3988_v29  ;;  %v3582_v43 = vadd.f32 %v6151_v34, %v3530_v33  ;;  %v3109_v47 = vadd.f32 %v3058_v58, %v2687_v1  ;;  %v704_v33 = vld [vmem:[%s5483_s28 + $0x88] sm:$0xff]   ;;  %v706_v1 = vld [vmem:[%s5483_s28 + $0x90] sm:$0xff]  }
 0x384   : > { %v3813_v41 = vpop.f32.mrf.mxu3  ;;  %v3948_v58 = vunpack.c.l.bf16 %v704_v33  ;;  %v3950_v42 = vunpack.c.l.bf16 %v706_v1 }
 0x385   : > { %v3630_v37 = vmax.f32 %v3582_v43, 0.0  ;;  %v3814_v61 = vadd.f32 %v5999_v9, %v3813_v41 }
 0x387   : > { %v3655_v13 = vpack.c.bf16 %v3630_v37, %v3629_v25  ;;  %v3893_v6 = vmax.f32 %v3814_v61, 0.0 }
 0x388   : > { %v3480_v21 = vpop.f32.mrf.mxu2  ;;  %v2638_v26 = vpop.f32.mrf.mxu0 }
 0x389   : > { %v3989_v40 = vadd.f32 %v3941_v57, %v3893_v6  ;;  %5137 = vmatmul.msk.bf16.gmra.mxu3 %vm889_vm1, %v3655_v13  ;;  %v2688_v28 = vadd.f32 %v2638_v26, %v2266_v20  ;;  %v3531_v22 = vadd.f32 %v3480_v21, %v3109_v47  ;;  %v3060_v35 = vpop.f32.mrf.mxu1  ;;  %v3949_v57 = vunpack.c.h.bf16 %v704_v33 }
 0x38a   : > { %v3951_v47 = vunpack.c.h.bf16 %v706_v1 }
 0x38b   : > { %4037 = vst.msk [vmem:[%s6008_s14 + $0xd8] sm:$0xff] %vm1221_vm2, %v3989_v40  ;;  %v3110_v39 = vadd.f32 %v3060_v35, %v2688_v28  ;;  %v3583_v45 = vadd.f32 %v6151_v34, %v3531_v22  ;;  %v708_v22 = vld [vmem:[%s5483_s28 + $0x98] sm:$0xff]  }
 0x38c   : > { %v3816_v38 = vpop.f32.mrf.mxu3  ;;  %v3952_v35 = vunpack.c.l.bf16 %v708_v22 }
 0x38d   : > { %v3817_v31 = vadd.f32 %v5999_v9, %v3816_v38  ;;  %v3631_v60 = vmax.f32 %v3583_v45, 0.0 }
 0x38f   : > { %v3894_v19 = vmax.f32 %v3817_v31, 0.0 }
 0x390   : > { %v3482_v54 = vpop.f32.mrf.mxu2 }
 0x391   : > { %v3990_v30 = vadd.f32 %v3942_v4, %v3894_v19  ;;  %v3532_v44 = vadd.f32 %v3482_v54, %v3110_v39 }
 0x393   : > { %4038 = vst.msk [vmem:[%s6008_s14 + $0xe0] sm:$0xff] %vm1221_vm2, %v3990_v30  ;;  %v3584_v5 = vadd.f32 %v6151_v34, %v3532_v44  ;;  %v6243_v34 = vld [vmem:[%s6327_s11] ss:$0 sm:$0xff]  ;;  %v3953_v30 = vunpack.c.h.bf16 %v708_v22 }
 0x394   : > { %v3818_v10 = vpop.f32.mrf.mxu3 }
 0x395   : > { %v3632_v3 = vmax.f32 %v3584_v5, 0.0  ;;  %v3819_v53 = vadd.f32 %v5999_v9, %v3818_v10  ;;  %v3944_v9 = vunpack.c.l.bf16 %v700_v59  ;;  %v710_v10 = vld [vmem:[%s5483_s28 + $0xa0] sm:$0xff]  }
 0x396   : > { %v3955_v59 = vunpack.c.h.bf16 %v710_v10 }
 0x397   : > { %v3656_v18 = vpack.c.bf16 %v3632_v3, %v3631_v60  ;;  %v3895_v17 = vmax.f32 %v3819_v53, 0.0  ;;  %v3954_v53 = vunpack.c.l.bf16 %v710_v10 }
 0x399   : > { %v3991_v55 = vadd.f32 %v3943_v49, %v3895_v17  ;;  %5138 = vmatmul.msk.bf16.gmra.mxu3 %vm889_vm1, %v3656_v18 }
 0x39b   : > { %4039 = vst.msk [vmem:[%s6008_s14 + $0xe8] sm:$0xff] %vm1221_vm2, %v3991_v55 }
 0x39c   : > { %v3821_v48 = vpop.f32.mrf.mxu3 }
 0x39d   : > { %v3822_v52 = vadd.f32 %v6243_v34, %v3821_v48 }
 0x39f   : > { %v3896_v63 = vmax.f32 %v3822_v52, 0.0 }
 0x3a1   : > { %v3992_v36 = vadd.f32 %v3944_v9, %v3896_v63  ;;  %v712_v9 = vld [vmem:[%s5483_s28 + $0xa8] sm:$0xff]  }
 0x3a2   : > { %v3957_v8 = vunpack.c.h.bf16 %v712_v9 }
 0x3a3   : > { %4040 = vst.msk [vmem:[%s6008_s14 + $0xf0] sm:$0xff] %vm1221_vm2, %v3992_v36 }
 0x3a4   : > { %v3823_v50 = vpop.f32.mrf.mxu3 }
 0x3a5   : > { %v3824_v14 = vadd.f32 %v6243_v34, %v3823_v50  ;;  %v3956_v50 = vunpack.c.l.bf16 %v712_v9 }
 0x3a7   : > { %v3897_v51 = vmax.f32 %v3824_v14, 0.0 }
 0x3a9   : > { %v3993_v62 = vadd.f32 %v3945_v0, %v3897_v51 }
 0x3ab   : > { %4041 = vst.msk [vmem:[%s6008_s14 + $0xf8] sm:$0xff] %vm1221_vm2, %v3993_v62 }
 0x3ac   : > { %v3826_v24 = vpop.f32.mrf.mxu3 }
 0x3ad   : > { %v3827_v23 = vadd.f32 %v6243_v34, %v3826_v24 }
 0x3af   : > { %v3898_v56 = vmax.f32 %v3827_v23, 0.0 }
 0x3b1   : > { %v3994_v11 = vadd.f32 %v3946_v12, %v3898_v56  ;;  %v714_v12 = vld [vmem:[%s5483_s28 + $0xb0] sm:$0xff]  }
 0x3b2   : > { %v3959_v33 = vunpack.c.h.bf16 %v714_v12 }
 0x3b3   : > { %4042 = vst.msk [vmem:[%s6008_s14 + $0x100] sm:$0xff] %vm1221_vm2, %v3994_v11 }
 0x3b4   : > { %v3828_v15 = vpop.f32.mrf.mxu3 }
 0x3b5   : > { %v3829_v2 = vadd.f32 %v6243_v34, %v3828_v15  ;;  %v3958_v15 = vunpack.c.l.bf16 %v714_v12 }
 0x3b7   : > { %v3899_v7 = vmax.f32 %v3829_v2, 0.0 }
 0x3b9   : > { %v3995_v29 = vadd.f32 %v3947_v32, %v3899_v7 }
 0x3bb   : > { %4043 = vst.msk [vmem:[%s6008_s14 + $0x108] sm:$0xff] %vm1221_vm2, %v3995_v29 }
 0x3bc   : > { %v3831_v46 = vpop.f32.mrf.mxu3 }
 0x3bd   : > { %v3832_v43 = vadd.f32 %v6243_v34, %v3831_v46 }
 0x3bf   : > { %v3900_v41 = vmax.f32 %v3832_v43, 0.0 }
 0x3c1   : > { %v3996_v25 = vadd.f32 %v3948_v58, %v3900_v41  ;;  %v716_v58 = vld [vmem:[%s5483_s28 + $0xb8] sm:$0xff]  }
 0x3c2   : > { %v3961_v1 = vunpack.c.h.bf16 %v716_v58 }
 0x3c3   : > { %4044 = vst.msk [vmem:[%s6008_s14 + $0x110] sm:$0xff] %vm1221_vm2, %v3996_v25 }
 0x3c4   : > { %v3833_v37 = vpop.f32.mrf.mxu3 }
 0x3c5   : > { %v3834_v61 = vadd.f32 %v6243_v34, %v3833_v37  ;;  %v3960_v37 = vunpack.c.l.bf16 %v716_v58 }
 0x3c7   : > { %v3901_v13 = vmax.f32 %v3834_v61, 0.0 }
 0x3c9   : > { %v3997_v27 = vadd.f32 %v3949_v57, %v3901_v13 }
 0x3cb   : > { %4045 = vst.msk [vmem:[%s6008_s14 + $0x118] sm:$0xff] %vm1221_vm2, %v3997_v27 }
 0x3cc   : > { %v3836_v6 = vpop.f32.mrf.mxu3 }
 0x3cd   : > { %v3837_v21 = vadd.f32 %v6243_v34, %v3836_v6 }
 0x3cf   : > { %v3902_v20 = vmax.f32 %v3837_v21, 0.0 }
 0x3d1   : > { %v3998_v40 = vadd.f32 %v3950_v42, %v3902_v20 }
 0x3d3   : > { %4046 = vst.msk [vmem:[%s6008_s14 + $0x120] sm:$0xff] %vm1221_vm2, %v3998_v40 }
 0x3d4   : > { %v3838_v26 = vpop.f32.mrf.mxu3 }
 0x3d5   : > { %v3839_v16 = vadd.f32 %v6243_v34, %v3838_v26 }
 0x3d7   : > { %v3903_v28 = vmax.f32 %v3839_v16, 0.0 }
 0x3d9   : > { %v3999_v38 = vadd.f32 %v3951_v47, %v3903_v28 }
 0x3db   : > { %4047 = vst.msk [vmem:[%s6008_s14 + $0x128] sm:$0xff] %vm1221_vm2, %v3999_v38 }
 0x3dc   : > { %v3841_v31 = vpop.f32.mrf.mxu3 }
 0x3dd   : > { %v3842_v4 = vadd.f32 %v6243_v34, %v3841_v31 }
 0x3df   : > { %v3904_v39 = vmax.f32 %v3842_v4, 0.0 }
 0x3e1   : > { %v4000_v19 = vadd.f32 %v3952_v35, %v3904_v39 }
 0x3e3   : > { %4048 = vst.msk [vmem:[%s6008_s14 + $0x130] sm:$0xff] %vm1221_vm2, %v4000_v19 }
 0x3e4   : > { %v3843_v54 = vpop.f32.mrf.mxu3 }
 0x3e5   : > { %v3844_v45 = vadd.f32 %v6243_v34, %v3843_v54 }
 0x3e7   : > { %v3905_v44 = vmax.f32 %v3844_v45, 0.0 }
 0x3e9   : > { %v4001_v5 = vadd.f32 %v3953_v30, %v3905_v44 }
 0x3eb   : > { %4049 = vst.msk [vmem:[%s6008_s14 + $0x138] sm:$0xff] %vm1221_vm2, %v4001_v5 }
 0x3ec   : > { %v3846_v60 = vpop.f32.mrf.mxu3 }
 0x3ed   : > { %v3847_v3 = vadd.f32 %v6243_v34, %v3846_v60 }
 0x3ef   : > { %v3906_v49 = vmax.f32 %v3847_v3, 0.0 }
 0x3f1   : > { %v4002_v18 = vadd.f32 %v3954_v53, %v3906_v49 }
 0x3f3   : > { %4050 = vst.msk [vmem:[%s6008_s14 + $0x140] sm:$0xff] %vm1221_vm2, %v4002_v18 }
 0x3f4   : > { %v3848_v17 = vpop.f32.mrf.mxu3 }
 0x3f5   : > { %v3849_v55 = vadd.f32 %v6243_v34, %v3848_v17 }
 0x3f7   : > { %v3907_v48 = vmax.f32 %v3849_v55, 0.0 }
 0x3f9   : > { %v4003_v52 = vadd.f32 %v3955_v59, %v3907_v48 }
 0x3fb   : > { %4051 = vst.msk [vmem:[%s6008_s14 + $0x148] sm:$0xff] %vm1221_vm2, %v4003_v52 }
 0x3fc   : > { %v3851_v63 = vpop.f32.mrf.mxu3 }
 0x3fd   : > { %v3852_v36 = vadd.f32 %v6243_v34, %v3851_v63 }
 0x3ff   : > { %v3908_v14 = vmax.f32 %v3852_v36, 0.0 }
 0x401   : > { %v4004_v0 = vadd.f32 %v3956_v50, %v3908_v14 }
 0x403   : > { %4052 = vst.msk [vmem:[%s6008_s14 + $0x150] sm:$0xff] %vm1221_vm2, %v4004_v0 }
 0x404   : > { %v3853_v51 = vpop.f32.mrf.mxu3 }
 0x405   : > { %v3854_v62 = vadd.f32 %v6243_v34, %v3853_v51 }
 0x407   : > { %v3909_v24 = vmax.f32 %v3854_v62, 0.0 }
 0x409   : > { %v4005_v23 = vadd.f32 %v3957_v8, %v3909_v24 }
 0x40b   : > { %4053 = vst.msk [vmem:[%s6008_s14 + $0x158] sm:$0xff] %vm1221_vm2, %v4005_v23 }
 0x40c   : > { %v3856_v56 = vpop.f32.mrf.mxu3 }
 0x40d   : > { %v3857_v11 = vadd.f32 %v6243_v34, %v3856_v56 }
 0x40f   : > { %v3910_v2 = vmax.f32 %v3857_v11, 0.0 }
 0x411   : > { %v4006_v32 = vadd.f32 %v3958_v15, %v3910_v2 }
 0x413   : > { %4054 = vst.msk [vmem:[%s6008_s14 + $0x160] sm:$0xff] %vm1221_vm2, %v4006_v32 }
 0x414   : > { %v3858_v7 = vpop.f32.mrf.mxu3 }
 0x415   : > { %v3859_v29 = vadd.f32 %v6243_v34, %v3858_v7 }
 0x417   : > { %v3911_v46 = vmax.f32 %v3859_v29, 0.0 }
 0x419   : > { %v4007_v43 = vadd.f32 %v3959_v33, %v3911_v46 }
 0x41b   : > { %4055 = vst.msk [vmem:[%s6008_s14 + $0x168] sm:$0xff] %vm1221_vm2, %v4007_v43 }
 0x41c   : > { %v3861_v41 = vpop.f32.mrf.mxu3 }
 0x41d   : > { %v3862_v25 = vadd.f32 %v6243_v34, %v3861_v41 }
 0x41f   : > { %v3912_v61 = vmax.f32 %v3862_v25, 0.0 }
 0x421   : > { %v4008_v57 = vadd.f32 %v3960_v37, %v3912_v61 }
 0x423   : > { %4056 = vst.msk [vmem:[%s6008_s14 + $0x170] sm:$0xff] %vm1221_vm2, %v4008_v57 }
 0x424   : > { %v3863_v13 = vpop.f32.mrf.mxu3 }
 0x425   : > { %v3864_v27 = vadd.f32 %v6243_v34, %v3863_v13 }
 0x427   : > { %v3913_v6 = vmax.f32 %v3864_v27, 0.0 }
 0x429   : > { %v4009_v21 = vadd.f32 %v3961_v1, %v3913_v6 }
 0x42b   : > { %4057 = vst.msk [vmem:[%s6008_s14 + $0x178] sm:$0xff] %vm1221_vm2, %v4009_v21 }
 0x42c PF: > { %s22_s23 = sadd.s32 1, %s5362_s23   ;;  %s6353_s21 = smov %s5358_s22 }
 0x42d   : > { %p19_p5 = scmp.ge.s32.totalorder %s22_s23, 4   ;;  %s6354_s22 = smov %s6356_s24 }
 0x42f   :  { %21 = sbr.rel (!%p19_p5) target bundleno = 2 (0x2), region = 121 }

</bundles_post_ra>
